<compile_context>
chip_gen: v6e
topology: v6e:2x2x1
jax: 0.10.0
libtpu: 0.0.40
codegen_flags: <defaults>
</compile_context>

<pallas_src>
import functools

import numpy as np
import jax
import jax.numpy as jnp
from jax.experimental import pallas as pl
from jax.experimental.pallas import tpu as pltpu


_LANE = 128
_VMEM_LIMIT = None


def _vmem_limit_bytes():
    cap = 64 * 1024 * 1024                       # conservative fallback (v7x-sized)
    try:
        info = pltpu.get_tpu_info()
        cap = int(getattr(info, "vmem_capacity_bytes", cap))
    except Exception:
        pass
    # ~100 MiB on 128 MiB parts (v5e/v6e), ~54 MiB on 64 MiB parts (v7x)
    return min(int(cap * 0.85), 100 * 1024 * 1024)


def _compiler_params(n_grid_axes):
    global _VMEM_LIMIT
    if _VMEM_LIMIT is None:
        _VMEM_LIMIT = _vmem_limit_bytes()
    return pltpu.CompilerParams(
        dimension_semantics=("parallel",) * n_grid_axes,
        vmem_limit_bytes=_VMEM_LIMIT)


def _const_spec(shape, index_map):
    """BlockSpec for grid-invariant operands (weights / biases): single-buffer
    them so large weight stacks are not pointlessly double-buffered."""
    try:
        return pl.BlockSpec(shape, index_map, pipeline_mode=pl.Buffered(1))
    except Exception:                             # older API without pipeline_mode
        return pl.BlockSpec(shape, index_map)


def _pick_tile(n, cap, unit=1):
    """Largest divisor of n that is <= cap and a multiple of `unit` (else n)."""
    if n <= cap:
        return n
    for t in range(cap, 0, -1):
        if n % t == 0 and t % unit == 0:
            return t
    return n


# ----------------------------------------------------------------------------
# Convolution (stride 1, optional dilation): per-tap MXU accumulation
# ----------------------------------------------------------------------------
def _conv_kernel(x_ref, w_ref, b_ref, o_ref, *, kh, kw, dil, tile_h, relu):
    """x_ref: [1, Hp, Wp, Cin] bf16 (whole padded image, resident per batch)
       w_ref: [KH*KW, Cin, Cout] bf16      b_ref: [1, Cout] f32
       o_ref: [1, TILE_H, Wo, Cout]        (output rows are grid-tiled)"""
    _, th, wo, cout = o_ref.shape
    cin = x_ref.shape[-1]
    t = pl.program_id(1)
    row0 = pl.multiple_of(t * tile_h, tile_h)
    acc = jnp.zeros((th * wo, cout), jnp.float32)
    # per-tap accumulation: no KH*KW*Cin im2col copy is ever built in VMEM.
    for i in range(kh):
        rows = x_ref[0, pl.ds(row0 + i * dil, th), :, :]           # [th, Wp, Cin]
        for j in range(kw):
            tap = rows[:, j * dil:j * dil + wo, :].reshape(th * wo, cin)
            acc = acc + jnp.dot(tap, w_ref[i * kw + j],
                                preferred_element_type=jnp.float32)
    acc = acc + b_ref[...]                                         # f32 epilogue
    if relu:
        acc = jnp.maximum(acc, 0.0)
    o_ref[...] = acc.reshape(1, th, wo, cout).astype(o_ref.dtype)


def conv2d(x, w, b, *, dilation=1, padding=0, relu=True,
           out_dtype=jnp.bfloat16, lane_pad=_LANE, keep_pad=False,
           tile_h_cap=64):
    """x: [B,H,W,Cin] NHWC; w: [KH,KW,Cin,Cout]; b: [Cout].  Stride 1.

    bf16 activations/weights, f32 accumulation.  Cout is padded to a multiple
    of `lane_pad` for unmasked lane-dense stores; the pad is sliced off unless
    `keep_pad=True` (at production widths >=128 no padding occurs)."""
    B, H, W, Cin = x.shape
    KH, KW, Cin_w, Cout = w.shape
    assert Cin_w == Cin
    if KH == 1 and KW == 1:
        assert padding == 0, "1x1 conv path assumes no spatial padding"
    Cout_l = Cout
    if lane_pad and Cout % lane_pad != 0:
        extra = lane_pad - Cout % lane_pad
        w = jnp.pad(w, ((0, 0), (0, 0), (0, 0), (0, extra)))
        b = jnp.pad(b, ((0, extra),))
        Cout += extra
    # TODO(synk): zero-pad inside the kernel (VMEM scratch + haloed H-tile DMA)
    # so the padded activation never round-trips HBM; with padding<=1 here the
    # jnp.pad inflation is negligible.
    xp = jnp.pad(x.astype(jnp.bfloat16),
                 ((0, 0), (padding, padding), (padding, padding), (0, 0)))
    Hp, Wp = H + 2 * padding, W + 2 * padding
    Ho = Hp - dilation * (KH - 1)
    Wo = Wp - dilation * (KW - 1)
    tile_h = _pick_tile(Ho, tile_h_cap)
    nH = Ho // tile_h
    w2 = w.reshape(KH * KW, Cin, Cout).astype(jnp.bfloat16)
    b2 = b.reshape(1, Cout).astype(jnp.float32)
    kern = functools.partial(_conv_kernel, kh=KH, kw=KW, dil=dilation,
                             tile_h=tile_h, relu=relu)
    out = pl.pallas_call(
        kern,
        out_shape=jax.ShapeDtypeStruct((B, Ho, Wo, Cout), out_dtype),
        grid=(B, nH),
        in_specs=[
            pl.BlockSpec((1, Hp, Wp, Cin), lambda bi, ti: (bi, 0, 0, 0)),
            _const_spec((KH * KW, Cin, Cout), lambda bi, ti: (0, 0, 0)),
            _const_spec((1, Cout), lambda bi, ti: (0, 0)),
        ],
        out_specs=pl.BlockSpec((1, tile_h, Wo, Cout),
                               lambda bi, ti: (bi, ti, 0, 0)),
        compiler_params=_compiler_params(2),
    )(xp, w2, b2)
    if not keep_pad and Cout_l != Cout:
        out = out[..., :Cout_l]
    return out


# ----------------------------------------------------------------------------
# Fused ASPP: all branches + image pooling + 1x1 projection in one pallas_call
# ----------------------------------------------------------------------------
def _aspp_kernel(x_ref, w1_ref, b1_ref, w3_ref, b3_ref, wp_ref, bp_ref,
                 wj_ref, bj_ref, o_ref, xpad_ref, *, dils, pad):
    """x_ref : [1, H, W, Cin] bf16 (UNPADDED -- padding is built in VMEM)
       w1    : [Cin, S]          b1 : [1, S]        (rate==1 branch, 1x1)
       w3    : [n3, 9, Cin, S]   b3 : [n3, S]       (dilated 3x3 branches)
       wp    : [Cin, S]          bp : [1, S]        (image-pooling branch)
       wj    : [nb+1, S, Sout]   bj : [1, Sout]     (per-branch projection)
       o_ref : [1, H, W, Sout]   xpad_ref: [H+2p, W+2p, Cin] bf16 scratch"""
    _, h, w, sout = o_ref.shape
    cin = x_ref.shape[-1]
    n3 = len(dils)
    s = w1_ref.shape[-1]

    # zero-padded copy of xf built once in VMEM (no pad-inflated HBM DMA)
    xpad_ref[...] = jnp.zeros_like(xpad_ref)
    xpad_ref[pad:pad + h, pad:pad + w, :] = x_ref[0]
    xflat = x_ref[0].reshape(h * w, cin)                       # bf16 [h*w, Cin]

    # image-pooling branch folded into the projection bias (no h*w broadcast)
    mean = jnp.mean(xflat.astype(jnp.float32), axis=0, keepdims=True)
    gp = jnp.dot(mean.astype(jnp.bfloat16), wp_ref[...],
                 preferred_element_type=jnp.float32)
    gp = jnp.maximum(gp + bp_ref[...], 0.0)                    # [1, S]
    proj_bias = bj_ref[...] + jnp.dot(gp.astype(jnp.bfloat16), wj_ref[n3 + 1],
                                      preferred_element_type=jnp.float32)

    # rate==1 branch (1x1 conv) -> projected immediately (no concat built)
    f = jnp.dot(xflat, w1_ref[...], preferred_element_type=jnp.float32)
    f = jnp.maximum(f + b1_ref[...], 0.0)
    out = jnp.dot(f.astype(jnp.bfloat16), wj_ref[0],
                  preferred_element_type=jnp.float32)

    # dilated 3x3 branches: per-tap MXU accumulation over the padded VMEM copy
    for bi, d in enumerate(dils):
        acc = jnp.zeros((h * w, s), jnp.float32)
        for idx in range(9):
            i, j = idx // 3, idx % 3
            oi = pad + (i - 1) * d
            oj = pad + (j - 1) * d
            tap = xpad_ref[oi:oi + h, oj:oj + w, :].reshape(h * w, cin)
            acc = acc + jnp.dot(tap, w3_ref[bi, idx],
                                preferred_element_type=jnp.float32)
        f = jnp.maximum(acc + b3_ref[bi:bi + 1, :], 0.0)
        out = out + jnp.dot(f.astype(jnp.bfloat16), wj_ref[bi + 1],
                            preferred_element_type=jnp.float32)

    out = jnp.maximum(out + proj_bias, 0.0)
    o_ref[...] = out.reshape(1, h, w, sout).astype(o_ref.dtype)


def aspp_fused(xf, ap, rates, *, lane_pad=_LANE):
    """One pallas_call for the whole ASPP stage (xf is DMA'd once, unpadded)."""
    B, H, W, Cin = xf.shape
    assert rates[0] == 1, "standard ASPP config expects the rate==1 branch first"
    S = ap['wj'].shape[-1]
    dils = tuple(int(r) for r in rates[1:])
    n3 = len(dils)
    nb = len(rates)
    pad = max(dils) if dils else 0
    Hp, Wp = H + 2 * pad, W + 2 * pad

    wj, bj = ap['wj'], ap['bj']
    Sout = S
    if lane_pad and S % lane_pad != 0:                 # lane-dense output store
        Sout = S + (lane_pad - S % lane_pad)
        wj = jnp.pad(wj, ((0, 0), (0, 0), (0, Sout - S)))
        bj = jnp.pad(bj, ((0, 0), (0, Sout - S)))

    kern = functools.partial(_aspp_kernel, dils=dils, pad=pad)
    out = pl.pallas_call(
        kern,
        out_shape=jax.ShapeDtypeStruct((B, H, W, Sout), jnp.bfloat16),
        grid=(B,),
        in_specs=[
            pl.BlockSpec((1, H, W, Cin), lambda bi: (bi, 0, 0, 0)),
            _const_spec((Cin, S), lambda bi: (0, 0)),
            _const_spec((1, S), lambda bi: (0, 0)),
            _const_spec((n3, 9, Cin, S), lambda bi: (0, 0, 0, 0)),
            _const_spec((n3, S), lambda bi: (0, 0)),
            _const_spec((Cin, S), lambda bi: (0, 0)),
            _const_spec((1, S), lambda bi: (0, 0)),
            _const_spec((nb + 1, S, Sout), lambda bi: (0, 0, 0)),
            _const_spec((1, Sout), lambda bi: (0, 0)),
        ],
        out_specs=pl.BlockSpec((1, H, W, Sout), lambda bi: (bi, 0, 0, 0)),
        scratch_shapes=[pltpu.VMEM((Hp, Wp, Cin), jnp.bfloat16)],
        compiler_params=_compiler_params(1),
    )(xf.astype(jnp.bfloat16),
      ap['w1'].astype(jnp.bfloat16), ap['b1'].astype(jnp.float32),
      ap['w3'].astype(jnp.bfloat16), ap['b3'].astype(jnp.float32),
      ap['wp'].astype(jnp.bfloat16), ap['bp'].astype(jnp.float32),
      wj.astype(jnp.bfloat16), bj.astype(jnp.float32))
    return out if Sout == S else out[..., :S]


# ----------------------------------------------------------------------------
# Fused separable align_corners=True bilinear resize, tiled (B, C-tile, H-tile)
# ----------------------------------------------------------------------------
def _resize_kernel(mh_ref, mw_ref, x_ref, o_ref):
    """mh: [THO, Hin] f32   mw: [Wout, Win] f32
       x : [1, Hin, Win, TC]          o: [1, THO, Wout, TC]"""
    _, tho, wout, tc = o_ref.shape
    _, hin, win, _ = x_ref.shape
    xm = x_ref[0].astype(jnp.float32).reshape(hin, win * tc)
    yh = jnp.dot(mh_ref[...], xm, preferred_element_type=jnp.float32)
    yh = yh.reshape(tho, win, tc)                                 # H done
    mwb = jnp.broadcast_to(mw_ref[...], (tho, wout, win))
    yw = jnp.einsum('tvw,twc->tvc', mwb, yh,
                    preferred_element_type=jnp.float32)           # W done
    o_ref[...] = yw.reshape(1, tho, wout, tc).astype(o_ref.dtype)


def _interp_matrix(n_out, n_in):
    """1-D align_corners=True bilinear interpolation matrix [n_out, n_in] (f32)."""
    m = np.zeros((n_out, n_in), np.float32)
    if n_out == 1 or n_in == 1:
        src = np.zeros((n_out,), np.float32)
    else:
        src = np.arange(n_out, dtype=np.float32) * (n_in - 1) / (n_out - 1)
    i0 = np.clip(np.floor(src).astype(np.int32), 0, n_in - 1)
    i1 = np.minimum(i0 + 1, n_in - 1)
    w1 = src - i0.astype(np.float32)
    w0 = 1.0 - w1
    for o in range(n_out):
        m[o, i0[o]] += w0[o]
        m[o, i1[o]] += w1[o]
    return jnp.asarray(m)


def bilinear_resize(x, out_hw, *, tile_ho_cap=64):
    """F.interpolate(mode='bilinear', align_corners=True): both separable
    matmuls fused in one pallas_call; the intermediate never touches HBM."""
    B, Hin, Win, C = x.shape
    Hout, Wout = out_hw
    if (Hout, Wout) == (Hin, Win):
        return x
    mh = _interp_matrix(Hout, Hin)                # f32 for row-sum==1 fidelity
    mw = _interp_matrix(Wout, Win)
    tc = _LANE if C % _LANE == 0 else C           # lane-aligned channel tiles
    tho = _pick_tile(Hout, tile_ho_cap, unit=8)   # output-row tiles
    nC, nHo = C // tc, Hout // tho
    return pl.pallas_call(
        _resize_kernel,
        out_shape=jax.ShapeDtypeStruct((B, Hout, Wout, C), x.dtype),
        grid=(B, nC, nHo),                        # x block stays resident over h
        in_specs=[
            pl.BlockSpec((tho, Hin), lambda b, c, h: (h, 0)),
            _const_spec((Wout, Win), lambda b, c, h: (0, 0)),
            pl.BlockSpec((1, Hin, Win, tc), lambda b, c, h: (b, 0, 0, c)),
        ],
        out_specs=pl.BlockSpec((1, tho, Wout, tc), lambda b, c, h: (b, h, 0, c)),
        compiler_params=_compiler_params(3),
    )(mh, mw, x)


# ----------------------------------------------------------------------------
# Glue / parameters
# ----------------------------------------------------------------------------
def _space_to_depth(x, f):
    B, H, W, C = x.shape
    x = x.reshape(B, H // f, f, W // f, f, C)
    x = x.transpose(0, 1, 3, 2, 4, 5)
    return x.reshape(B, H // f, W // f, f * f * C)


def _conv_bn_params(key, kh, kw, cin, cout, eps=1e-5):
    """Conv weight + eval-mode BatchNorm folded into (w, bias)."""
    ks = jax.random.split(key, 5)
    w = jax.random.normal(ks[0], (kh, kw, cin, cout), jnp.float32) / np.sqrt(kh * kw * cin)
    gamma = 1.0 + 0.1 * jax.random.normal(ks[1], (cout,), jnp.float32)
    beta = 0.1 * jax.random.normal(ks[2], (cout,), jnp.float32)
    mean = 0.1 * jax.random.normal(ks[3], (cout,), jnp.float32)
    var = 1.0 + 0.1 * jnp.abs(jax.random.normal(ks[4], (cout,), jnp.float32))
    scale = gamma / jnp.sqrt(var + eps)
    return w * scale, beta - mean * scale


def init_params(key, inch, class_num, *, aspp_inch, quater_outch, last_ch, rates):
    assert rates[0] == 1, "standard ASPP config expects rates[0] == 1"
    stagech = aspp_inch // 8                       # ASPPoutch = ASPPinch // 8
    nb = len(rates)
    keys = iter(jax.random.split(key, 16))
    p = {}
    # stand-in backbone (stride-4 and stride-16 feature extractors)
    p['bb0'] = _conv_bn_params(next(keys), 3, 3, inch * 16, quater_outch)
    p['bb1'] = _conv_bn_params(next(keys), 3, 3, quater_outch * 16, aspp_inch)
    # fused-ASPP parameters (packed in kernel layout; branch order = rates + pool)
    w1 = b1 = None
    w3l, b3l = [], []
    for r in rates:
        k = next(keys)
        if r == 1:
            wr, br = _conv_bn_params(k, 1, 1, aspp_inch, stagech)
            w1, b1 = wr.reshape(aspp_inch, stagech), br.reshape(1, stagech)
        else:
            wr, br = _conv_bn_params(k, 3, 3, aspp_inch, stagech)
            w3l.append(wr.reshape(9, aspp_inch, stagech))
            b3l.append(br)
    wp, bp = _conv_bn_params(next(keys), 1, 1, aspp_inch, stagech)
    wj, bj = _conv_bn_params(next(keys), 1, 1, stagech * (nb + 1), stagech)
    # NOTE: at production widths stagech>=256 is already lane-aligned; only the
    # final projection output is lane-padded (inside aspp_fused).
    p['aspp'] = dict(
        w1=w1, b1=b1,
        w3=jnp.stack(w3l), b3=jnp.stack(b3l),
        wp=wp.reshape(aspp_inch, stagech), bp=bp.reshape(1, stagech),
        wj=wj.reshape(nb + 1, stagech, stagech),
        bj=bj.reshape(1, stagech))
    # decoder
    p['conv0'] = _conv_bn_params(next(keys), 1, 1, quater_outch, stagech)   # Conv1x1_bn_relu
    p['last1'] = _conv_bn_params(next(keys), 3, 3, stagech * 2, last_ch)    # Conv3x3_bn_relu
    p['last2'] = _conv_bn_params(next(keys), 3, 3, last_ch, last_ch)        # Conv3x3_bn_relu
    kcw, kcb = jax.random.split(next(keys))
    p['cls_w'] = jax.random.normal(kcw, (1, 1, last_ch, class_num), jnp.float32) / np.sqrt(last_ch)
    p['cls_b'] = 0.1 * jax.random.normal(kcb, (class_num,), jnp.float32)
    return p


# ----------------------------------------------------------------------------
# Forward pass (mirrors deeplab3plus.forward)
# ----------------------------------------------------------------------------
def deeplab3plus_forward(x_nchw, params, *, rates):
    x = jnp.transpose(x_nchw, (0, 2, 3, 1)).astype(jnp.float32)   # NCHW -> NHWC
    B, H, W, _ = x.shape
    class_num = params['cls_w'].shape[-1]

    # ---- backbone: x0 (stride 4, quaterOutch), xf (stride 16, ASPPinch) ----
    # TODO(synk): the full Xception backbone is not defined in the module
    # snippet; replaced by space-to-depth + Conv3x3-BN-ReLU stride-4/16 stand-ins.
    x0 = conv2d(_space_to_depth(x, 4), *params['bb0'], padding=1)
    xf = conv2d(_space_to_depth(x0, 4), *params['bb1'], padding=1)

    # ---- ASPP: one fused kernel (branches + image pool + projection) ----
    aspp_out = aspp_fused(xf, params['aspp'], rates)

    # ---- decoder ----
    low = conv2d(x0, *params['conv0'])                                  # conv0
    up = bilinear_resize(aspp_out, (x0.shape[1], x0.shape[2]))          # to inter_size
    y = jnp.concatenate([up, low], axis=-1)                             # cat([x, x0], C)
    y = conv2d(y, *params['last1'], padding=1)
    y = conv2d(y, *params['last2'], padding=1)
    # classifier at stride-4 resolution (same order as the PyTorch module);
    # its 128-padded channels are kept so the full-resolution resize runs
    # lane-dense, then sliced to class_num at the very end.
    y = conv2d(y, params['cls_w'], params['cls_b'], relu=False,
               out_dtype=jnp.float32, keep_pad=True)                    # nn.Conv2d(...,1)
    y = bilinear_resize(y, (H, W))                                      # to x_size
    y = y[..., :class_num]
    return jnp.transpose(y, (0, 3, 1, 2))                               # NHWC -> NCHW


# ----------------------------------------------------------------------------
if __name__ == "__main__":
    key = jax.random.PRNGKey(0)
    kx, kp = jax.random.split(key)

    # small, deterministic config (channel widths scaled down from 2048/256/128)
    B, INCH, H, W = 2, 3, 32, 32
    CLASS_NUM = 5
    ASPP_INCH = 64       # scaled stand-in for 2048
    QUATER_OUTCH = 16    # scaled stand-in for 128 (Xception low-level feats)
    LAST_CH = 32         # scaled stand-in for 256
    RATES = (1, 6, 12, 18)

    x = jax.random.normal(kx, (B, INCH, H, W), jnp.float32)
    params = init_params(kp, INCH, CLASS_NUM, aspp_inch=ASPP_INCH,
                         quater_outch=QUATER_OUTCH, last_ch=LAST_CH, rates=RATES)

    fwd = jax.jit(functools.partial(deeplab3plus_forward, rates=RATES))
    out = jax.block_until_ready(fwd(x, params))
    assert out.shape == (B, CLASS_NUM, H, W), out.shape
    assert out.dtype == jnp.float32
    assert bool(jnp.all(jnp.isfinite(out)))
    print("KERNEL_OK")
</pallas_src>

<mosaic_0001>
module attributes {stable_mosaic.version = 11 : i64} {
  func.func @_conv_kernel(%arg0: i32, %arg1: i32, %arg2: memref<1x10x10x48xbf16, #tpu.memory_space<vmem>>, %arg3: memref<9x48x128xbf16, #tpu.memory_space<vmem>>, %arg4: memref<1x128xf32, #tpu.memory_space<vmem>>, %arg5: memref<1x8x8x128xbf16, #tpu.memory_space<vmem>>) attributes {dimension_semantics = [#tpu.dimension_semantics<parallel>, #tpu.dimension_semantics<parallel>], iteration_bounds = array<i64: 2, 1>, scalar_prefetch = 0 : i64, scratch_operands = 0 : i64, tpu.core_type = #tpu.core_type<tc>, window_params = [{transform_indices = @transform_0, window_bounds = array<i64: 1, 10, 10, 48>}, {pipeline_mode = #tpu.pipeline_mode<synchronous>, transform_indices = @transform_1, window_bounds = array<i64: 9, 48, 128>}, {pipeline_mode = #tpu.pipeline_mode<synchronous>, transform_indices = @transform_2, window_bounds = array<i64: 1, 128>}, {transform_indices = @transform_3, window_bounds = array<i64: 1, 8, 8, 128>}]} {
    %c8_i32 = arith.constant 8 : i32
    %0 = arith.muli %arg1, %c8_i32 : i32
    %1 = tpu.assume_multiple %0, 8 : i32
    %cst = arith.constant 0.000000e+00 : f32
    %2 = vector.broadcast %cst : f32 to vector<64x128xf32>
    %c0_i32 = arith.constant 0 : i32
    %3 = arith.addi %1, %c0_i32 : i32
    %c0 = arith.constant 0 : index
    %4 = arith.index_cast %3 : i32 to index
    %c0_0 = arith.constant 0 : index
    %c0_1 = arith.constant 0 : index
    %5 = vector.load %arg2[%c0, %4, %c0_0, %c0_1] : memref<1x10x10x48xbf16, #tpu.memory_space<vmem>>, vector<1x8x10x48xbf16>
    %6 = vector.shape_cast %5 : vector<1x8x10x48xbf16> to vector<8x10x48xbf16>
    %7 = vector.extract_strided_slice %6 {offsets = [0, 0, 0], sizes = [8, 8, 48], strides = [1, 1, 1]} : vector<8x10x48xbf16> to vector<8x8x48xbf16>
    %8 = vector.shape_cast %7 : vector<8x8x48xbf16> to vector<64x48xbf16>
    %c0_2 = arith.constant 0 : index
    %c0_3 = arith.constant 0 : index
    %c0_4 = arith.constant 0 : index
    %9 = vector.load %arg3[%c0_2, %c0_3, %c0_4] : memref<9x48x128xbf16, #tpu.memory_space<vmem>>, vector<1x48x128xbf16>
    %10 = vector.shape_cast %9 : vector<1x48x128xbf16> to vector<48x128xbf16>
    %cst_5 = arith.constant dense<0.000000e+00> : vector<64x128xf32>
    %11 = tpu.matmul %8, %10, %cst_5 {dimension_numbers = #tpu.dot_dimension_numbers<[1], [0], [0], [1], [0, 0, 1, 1], [], []>} : vector<64x48xbf16>, vector<48x128xbf16>, vector<64x128xf32> -> vector<64x128xf32>
    %12 = arith.addf %2, %11 : vector<64x128xf32>
    %13 = vector.extract_strided_slice %6 {offsets = [0, 1, 0], sizes = [8, 8, 48], strides = [1, 1, 1]} : vector<8x10x48xbf16> to vector<8x8x48xbf16>
    %14 = vector.shape_cast %13 : vector<8x8x48xbf16> to vector<64x48xbf16>
    %c1 = arith.constant 1 : index
    %c0_6 = arith.constant 0 : index
    %c0_7 = arith.constant 0 : index
    %15 = vector.load %arg3[%c1, %c0_6, %c0_7] : memref<9x48x128xbf16, #tpu.memory_space<vmem>>, vector<1x48x128xbf16>
    %16 = vector.shape_cast %15 : vector<1x48x128xbf16> to vector<48x128xbf16>
    %cst_8 = arith.constant dense<0.000000e+00> : vector<64x128xf32>
    %17 = tpu.matmul %14, %16, %cst_8 {dimension_numbers = #tpu.dot_dimension_numbers<[1], [0], [0], [1], [0, 0, 1, 1], [], []>} : vector<64x48xbf16>, vector<48x128xbf16>, vector<64x128xf32> -> vector<64x128xf32>
    %18 = arith.addf %12, %17 : vector<64x128xf32>
    %19 = vector.extract_strided_slice %6 {offsets = [0, 2, 0], sizes = [8, 8, 48], strides = [1, 1, 1]} : vector<8x10x48xbf16> to vector<8x8x48xbf16>
    %20 = vector.shape_cast %19 : vector<8x8x48xbf16> to vector<64x48xbf16>
    %c2 = arith.constant 2 : index
    %c0_9 = arith.constant 0 : index
    %c0_10 = arith.constant 0 : index
    %21 = vector.load %arg3[%c2, %c0_9, %c0_10] : memref<9x48x128xbf16, #tpu.memory_space<vmem>>, vector<1x48x128xbf16>
    %22 = vector.shape_cast %21 : vector<1x48x128xbf16> to vector<48x128xbf16>
    %cst_11 = arith.constant dense<0.000000e+00> : vector<64x128xf32>
    %23 = tpu.matmul %20, %22, %cst_11 {dimension_numbers = #tpu.dot_dimension_numbers<[1], [0], [0], [1], [0, 0, 1, 1], [], []>} : vector<64x48xbf16>, vector<48x128xbf16>, vector<64x128xf32> -> vector<64x128xf32>
    %24 = arith.addf %18, %23 : vector<64x128xf32>
    %c1_i32 = arith.constant 1 : i32
    %25 = arith.addi %1, %c1_i32 : i32
    %c0_12 = arith.constant 0 : index
    %26 = arith.index_cast %25 : i32 to index
    %c0_13 = arith.constant 0 : index
    %c0_14 = arith.constant 0 : index
    %27 = vector.load %arg2[%c0_12, %26, %c0_13, %c0_14] : memref<1x10x10x48xbf16, #tpu.memory_space<vmem>>, vector<1x8x10x48xbf16>
    %28 = vector.shape_cast %27 : vector<1x8x10x48xbf16> to vector<8x10x48xbf16>
    %29 = vector.extract_strided_slice %28 {offsets = [0, 0, 0], sizes = [8, 8, 48], strides = [1, 1, 1]} : vector<8x10x48xbf16> to vector<8x8x48xbf16>
    %30 = vector.shape_cast %29 : vector<8x8x48xbf16> to vector<64x48xbf16>
    %c3 = arith.constant 3 : index
    %c0_15 = arith.constant 0 : index
    %c0_16 = arith.constant 0 : index
    %31 = vector.load %arg3[%c3, %c0_15, %c0_16] : memref<9x48x128xbf16, #tpu.memory_space<vmem>>, vector<1x48x128xbf16>
    %32 = vector.shape_cast %31 : vector<1x48x128xbf16> to vector<48x128xbf16>
    %cst_17 = arith.constant dense<0.000000e+00> : vector<64x128xf32>
    %33 = tpu.matmul %30, %32, %cst_17 {dimension_numbers = #tpu.dot_dimension_numbers<[1], [0], [0], [1], [0, 0, 1, 1], [], []>} : vector<64x48xbf16>, vector<48x128xbf16>, vector<64x128xf32> -> vector<64x128xf32>
    %34 = arith.addf %24, %33 : vector<64x128xf32>
    %35 = vector.extract_strided_slice %28 {offsets = [0, 1, 0], sizes = [8, 8, 48], strides = [1, 1, 1]} : vector<8x10x48xbf16> to vector<8x8x48xbf16>
    %36 = vector.shape_cast %35 : vector<8x8x48xbf16> to vector<64x48xbf16>
    %c4 = arith.constant 4 : index
    %c0_18 = arith.constant 0 : index
    %c0_19 = arith.constant 0 : index
    %37 = vector.load %arg3[%c4, %c0_18, %c0_19] : memref<9x48x128xbf16, #tpu.memory_space<vmem>>, vector<1x48x128xbf16>
    %38 = vector.shape_cast %37 : vector<1x48x128xbf16> to vector<48x128xbf16>
    %cst_20 = arith.constant dense<0.000000e+00> : vector<64x128xf32>
    %39 = tpu.matmul %36, %38, %cst_20 {dimension_numbers = #tpu.dot_dimension_numbers<[1], [0], [0], [1], [0, 0, 1, 1], [], []>} : vector<64x48xbf16>, vector<48x128xbf16>, vector<64x128xf32> -> vector<64x128xf32>
    %40 = arith.addf %34, %39 : vector<64x128xf32>
    %41 = vector.extract_strided_slice %28 {offsets = [0, 2, 0], sizes = [8, 8, 48], strides = [1, 1, 1]} : vector<8x10x48xbf16> to vector<8x8x48xbf16>
    %42 = vector.shape_cast %41 : vector<8x8x48xbf16> to vector<64x48xbf16>
    %c5 = arith.constant 5 : index
    %c0_21 = arith.constant 0 : index
    %c0_22 = arith.constant 0 : index
    %43 = vector.load %arg3[%c5, %c0_21, %c0_22] : memref<9x48x128xbf16, #tpu.memory_space<vmem>>, vector<1x48x128xbf16>
    %44 = vector.shape_cast %43 : vector<1x48x128xbf16> to vector<48x128xbf16>
    %cst_23 = arith.constant dense<0.000000e+00> : vector<64x128xf32>
    %45 = tpu.matmul %42, %44, %cst_23 {dimension_numbers = #tpu.dot_dimension_numbers<[1], [0], [0], [1], [0, 0, 1, 1], [], []>} : vector<64x48xbf16>, vector<48x128xbf16>, vector<64x128xf32> -> vector<64x128xf32>
    %46 = arith.addf %40, %45 : vector<64x128xf32>
    %c2_i32 = arith.constant 2 : i32
    %47 = arith.addi %1, %c2_i32 : i32
    %c0_24 = arith.constant 0 : index
    %48 = arith.index_cast %47 : i32 to index
    %c0_25 = arith.constant 0 : index
    %c0_26 = arith.constant 0 : index
    %49 = vector.load %arg2[%c0_24, %48, %c0_25, %c0_26] : memref<1x10x10x48xbf16, #tpu.memory_space<vmem>>, vector<1x8x10x48xbf16>
    %50 = vector.shape_cast %49 : vector<1x8x10x48xbf16> to vector<8x10x48xbf16>
    %51 = vector.extract_strided_slice %50 {offsets = [0, 0, 0], sizes = [8, 8, 48], strides = [1, 1, 1]} : vector<8x10x48xbf16> to vector<8x8x48xbf16>
    %52 = vector.shape_cast %51 : vector<8x8x48xbf16> to vector<64x48xbf16>
    %c6 = arith.constant 6 : index
    %c0_27 = arith.constant 0 : index
    %c0_28 = arith.constant 0 : index
    %53 = vector.load %arg3[%c6, %c0_27, %c0_28] : memref<9x48x128xbf16, #tpu.memory_space<vmem>>, vector<1x48x128xbf16>
    %54 = vector.shape_cast %53 : vector<1x48x128xbf16> to vector<48x128xbf16>
    %cst_29 = arith.constant dense<0.000000e+00> : vector<64x128xf32>
    %55 = tpu.matmul %52, %54, %cst_29 {dimension_numbers = #tpu.dot_dimension_numbers<[1], [0], [0], [1], [0, 0, 1, 1], [], []>} : vector<64x48xbf16>, vector<48x128xbf16>, vector<64x128xf32> -> vector<64x128xf32>
    %56 = arith.addf %46, %55 : vector<64x128xf32>
    %57 = vector.extract_strided_slice %50 {offsets = [0, 1, 0], sizes = [8, 8, 48], strides = [1, 1, 1]} : vector<8x10x48xbf16> to vector<8x8x48xbf16>
    %58 = vector.shape_cast %57 : vector<8x8x48xbf16> to vector<64x48xbf16>
    %c7 = arith.constant 7 : index
    %c0_30 = arith.constant 0 : index
    %c0_31 = arith.constant 0 : index
    %59 = vector.load %arg3[%c7, %c0_30, %c0_31] : memref<9x48x128xbf16, #tpu.memory_space<vmem>>, vector<1x48x128xbf16>
    %60 = vector.shape_cast %59 : vector<1x48x128xbf16> to vector<48x128xbf16>
    %cst_32 = arith.constant dense<0.000000e+00> : vector<64x128xf32>
    %61 = tpu.matmul %58, %60, %cst_32 {dimension_numbers = #tpu.dot_dimension_numbers<[1], [0], [0], [1], [0, 0, 1, 1], [], []>} : vector<64x48xbf16>, vector<48x128xbf16>, vector<64x128xf32> -> vector<64x128xf32>
    %62 = arith.addf %56, %61 : vector<64x128xf32>
    %63 = vector.extract_strided_slice %50 {offsets = [0, 2, 0], sizes = [8, 8, 48], strides = [1, 1, 1]} : vector<8x10x48xbf16> to vector<8x8x48xbf16>
    %64 = vector.shape_cast %63 : vector<8x8x48xbf16> to vector<64x48xbf16>
    %c8 = arith.constant 8 : index
    %c0_33 = arith.constant 0 : index
    %c0_34 = arith.constant 0 : index
    %65 = vector.load %arg3[%c8, %c0_33, %c0_34] : memref<9x48x128xbf16, #tpu.memory_space<vmem>>, vector<1x48x128xbf16>
    %66 = vector.shape_cast %65 : vector<1x48x128xbf16> to vector<48x128xbf16>
    %cst_35 = arith.constant dense<0.000000e+00> : vector<64x128xf32>
    %67 = tpu.matmul %64, %66, %cst_35 {dimension_numbers = #tpu.dot_dimension_numbers<[1], [0], [0], [1], [0, 0, 1, 1], [], []>} : vector<64x48xbf16>, vector<48x128xbf16>, vector<64x128xf32> -> vector<64x128xf32>
    %68 = arith.addf %62, %67 : vector<64x128xf32>
    %c0_36 = arith.constant 0 : index
    %c0_37 = arith.constant 0 : index
    %69 = vector.load %arg4[%c0_36, %c0_37] : memref<1x128xf32, #tpu.memory_space<vmem>>, vector<1x128xf32>
    %70 = vector.broadcast %69 : vector<1x128xf32> to vector<64x128xf32>
    %71 = arith.addf %68, %70 : vector<64x128xf32>
    %cst_38 = arith.constant 0.000000e+00 : f32
    %72 = vector.broadcast %cst_38 : f32 to vector<64x128xf32>
    %73 = arith.maximumf %71, %72 : vector<64x128xf32>
    %74 = vector.shape_cast %73 : vector<64x128xf32> to vector<1x8x8x128xf32>
    %75 = arith.truncf %74 : vector<1x8x8x128xf32> to vector<1x8x8x128xbf16>
    %c0_39 = arith.constant 0 : index
    %c0_40 = arith.constant 0 : index
    %c0_41 = arith.constant 0 : index
    %c0_42 = arith.constant 0 : index
    %76 = vector.load %arg5[%c0_39, %c0_40, %c0_41, %c0_42] : memref<1x8x8x128xbf16, #tpu.memory_space<vmem>>, vector<1x8x8x128xbf16>
    tpu.vector_store %arg5[%c0_39, %c0_40, %c0_41, %c0_42], %75 {strides = array<i32>} : memref<1x8x8x128xbf16, #tpu.memory_space<vmem>>, vector<1x8x8x128xbf16>,
    return
  }
  func.func @transform_0(%arg0: i32, %arg1: i32) -> (i32, i32, i32, i32) {
    %c0_i32 = arith.constant 0 : i32
    %c0_i32_0 = arith.constant 0 : i32
    %c0_i32_1 = arith.constant 0 : i32
    %c0_i32_2 = arith.constant 0 : i32
    return %arg0, %c0_i32, %c0_i32_0, %c0_i32_1 : i32, i32, i32, i32
  }
  func.func @transform_1(%arg0: i32, %arg1: i32) -> (i32, i32, i32) {
    %c0_i32 = arith.constant 0 : i32
    %c0_i32_0 = arith.constant 0 : i32
    %c0_i32_1 = arith.constant 0 : i32
    %c0_i32_2 = arith.constant 0 : i32
    return %c0_i32, %c0_i32_0, %c0_i32_1 : i32, i32, i32
  }
  func.func @transform_2(%arg0: i32, %arg1: i32) -> (i32, i32) {
    %c0_i32 = arith.constant 0 : i32
    %c0_i32_0 = arith.constant 0 : i32
    %c0_i32_1 = arith.constant 0 : i32
    return %c0_i32, %c0_i32_0 : i32, i32
  }
  func.func @transform_3(%arg0: i32, %arg1: i32) -> (i32, i32, i32, i32) {
    %c0_i32 = arith.constant 0 : i32
    %c0_i32_0 = arith.constant 0 : i32
    %c0_i32_1 = arith.constant 0 : i32
    return %arg0, %arg1, %c0_i32, %c0_i32_0 : i32, i32, i32, i32
  }
}

module attributes {stable_mosaic.version = 11 : i64} {
  func.func @_conv_kernel(%arg0: i32, %arg1: i32, %arg2: memref<1x8x8x16xbf16, #tpu.memory_space<vmem>>, %arg3: memref<1x16x128xbf16, #tpu.memory_space<vmem>>, %arg4: memref<1x128xf32, #tpu.memory_space<vmem>>, %arg5: memref<1x8x8x128xbf16, #tpu.memory_space<vmem>>) attributes {dimension_semantics = [#tpu.dimension_semantics<parallel>, #tpu.dimension_semantics<parallel>], iteration_bounds = array<i64: 2, 1>, scalar_prefetch = 0 : i64, scratch_operands = 0 : i64, tpu.core_type = #tpu.core_type<tc>, window_params = [{transform_indices = @transform_0, window_bounds = array<i64: 1, 8, 8, 16>}, {pipeline_mode = #tpu.pipeline_mode<synchronous>, transform_indices = @transform_1, window_bounds = array<i64: 1, 16, 128>}, {pipeline_mode = #tpu.pipeline_mode<synchronous>, transform_indices = @transform_2, window_bounds = array<i64: 1, 128>}, {transform_indices = @transform_3, window_bounds = array<i64: 1, 8, 8, 128>}]} {
    %c8_i32 = arith.constant 8 : i32
    %0 = arith.muli %arg1, %c8_i32 : i32
    %1 = tpu.assume_multiple %0, 8 : i32
    %cst = arith.constant 0.000000e+00 : f32
    %2 = vector.broadcast %cst : f32 to vector<64x128xf32>
    %c0_i32 = arith.constant 0 : i32
    %3 = arith.addi %1, %c0_i32 : i32
    %c0 = arith.constant 0 : index
    %4 = arith.index_cast %3 : i32 to index
    %c0_0 = arith.constant 0 : index
    %c0_1 = arith.constant 0 : index
    %5 = vector.load %arg2[%c0, %4, %c0_0, %c0_1] : memref<1x8x8x16xbf16, #tpu.memory_space<vmem>>, vector<1x8x8x16xbf16>
    %6 = vector.shape_cast %5 : vector<1x8x8x16xbf16> to vector<8x8x16xbf16>
    %7 = vector.shape_cast %6 : vector<8x8x16xbf16> to vector<64x16xbf16>
    %c0_2 = arith.constant 0 : index
    %c0_3 = arith.constant 0 : index
    %c0_4 = arith.constant 0 : index
    %8 = vector.load %arg3[%c0_2, %c0_3, %c0_4] : memref<1x16x128xbf16, #tpu.memory_space<vmem>>, vector<1x16x128xbf16>
    %9 = vector.shape_cast %8 : vector<1x16x128xbf16> to vector<16x128xbf16>
    %cst_5 = arith.constant dense<0.000000e+00> : vector<64x128xf32>
    %10 = tpu.matmul %7, %9, %cst_5 {dimension_numbers = #tpu.dot_dimension_numbers<[1], [0], [0], [1], [0, 0, 1, 1], [], []>} : vector<64x16xbf16>, vector<16x128xbf16>, vector<64x128xf32> -> vector<64x128xf32>
    %11 = arith.addf %2, %10 : vector<64x128xf32>
    %c0_6 = arith.constant 0 : index
    %c0_7 = arith.constant 0 : index
    %12 = vector.load %arg4[%c0_6, %c0_7] : memref<1x128xf32, #tpu.memory_space<vmem>>, vector<1x128xf32>
    %13 = vector.broadcast %12 : vector<1x128xf32> to vector<64x128xf32>
    %14 = arith.addf %11, %13 : vector<64x128xf32>
    %cst_8 = arith.constant 0.000000e+00 : f32
    %15 = vector.broadcast %cst_8 : f32 to vector<64x128xf32>
    %16 = arith.maximumf %14, %15 : vector<64x128xf32>
    %17 = vector.shape_cast %16 : vector<64x128xf32> to vector<1x8x8x128xf32>
    %18 = arith.truncf %17 : vector<1x8x8x128xf32> to vector<1x8x8x128xbf16>
    %c0_9 = arith.constant 0 : index
    %c0_10 = arith.constant 0 : index
    %c0_11 = arith.constant 0 : index
    %c0_12 = arith.constant 0 : index
    %19 = vector.load %arg5[%c0_9, %c0_10, %c0_11, %c0_12] : memref<1x8x8x128xbf16, #tpu.memory_space<vmem>>, vector<1x8x8x128xbf16>
    tpu.vector_store %arg5[%c0_9, %c0_10, %c0_11, %c0_12], %18 {strides = array<i32>} : memref<1x8x8x128xbf16, #tpu.memory_space<vmem>>, vector<1x8x8x128xbf16>,
    return
  }
  func.func @transform_0(%arg0: i32, %arg1: i32) -> (i32, i32, i32, i32) {
    %c0_i32 = arith.constant 0 : i32
    %c0_i32_0 = arith.constant 0 : i32
    %c0_i32_1 = arith.constant 0 : i32
    %c0_i32_2 = arith.constant 0 : i32
    return %arg0, %c0_i32, %c0_i32_0, %c0_i32_1 : i32, i32, i32, i32
  }
  func.func @transform_1(%arg0: i32, %arg1: i32) -> (i32, i32, i32) {
    %c0_i32 = arith.constant 0 : i32
    %c0_i32_0 = arith.constant 0 : i32
    %c0_i32_1 = arith.constant 0 : i32
    %c0_i32_2 = arith.constant 0 : i32
    return %c0_i32, %c0_i32_0, %c0_i32_1 : i32, i32, i32
  }
  func.func @transform_2(%arg0: i32, %arg1: i32) -> (i32, i32) {
    %c0_i32 = arith.constant 0 : i32
    %c0_i32_0 = arith.constant 0 : i32
    %c0_i32_1 = arith.constant 0 : i32
    return %c0_i32, %c0_i32_0 : i32, i32
  }
  func.func @transform_3(%arg0: i32, %arg1: i32) -> (i32, i32, i32, i32) {
    %c0_i32 = arith.constant 0 : i32
    %c0_i32_0 = arith.constant 0 : i32
    %c0_i32_1 = arith.constant 0 : i32
    return %arg0, %arg1, %c0_i32, %c0_i32_0 : i32, i32, i32, i32
  }
}

module attributes {stable_mosaic.version = 11 : i64} {
  func.func @_conv_kernel(%arg0: i32, %arg1: i32, %arg2: memref<1x4x4x256xbf16, #tpu.memory_space<vmem>>, %arg3: memref<9x256x128xbf16, #tpu.memory_space<vmem>>, %arg4: memref<1x128xf32, #tpu.memory_space<vmem>>, %arg5: memref<1x2x2x128xbf16, #tpu.memory_space<vmem>>) attributes {dimension_semantics = [#tpu.dimension_semantics<parallel>, #tpu.dimension_semantics<parallel>], iteration_bounds = array<i64: 2, 1>, scalar_prefetch = 0 : i64, scratch_operands = 0 : i64, tpu.core_type = #tpu.core_type<tc>, window_params = [{transform_indices = @transform_0, window_bounds = array<i64: 1, 4, 4, 256>}, {pipeline_mode = #tpu.pipeline_mode<synchronous>, transform_indices = @transform_1, window_bounds = array<i64: 9, 256, 128>}, {pipeline_mode = #tpu.pipeline_mode<synchronous>, transform_indices = @transform_2, window_bounds = array<i64: 1, 128>}, {transform_indices = @transform_3, window_bounds = array<i64: 1, 2, 2, 128>}]} {
    %c2_i32 = arith.constant 2 : i32
    %0 = arith.muli %arg1, %c2_i32 : i32
    %1 = tpu.assume_multiple %0, 2 : i32
    %cst = arith.constant 0.000000e+00 : f32
    %2 = vector.broadcast %cst : f32 to vector<4x128xf32>
    %c0_i32 = arith.constant 0 : i32
    %3 = arith.addi %1, %c0_i32 : i32
    %c0 = arith.constant 0 : index
    %4 = arith.index_cast %3 : i32 to index
    %c0_0 = arith.constant 0 : index
    %c0_1 = arith.constant 0 : index
    %5 = vector.load %arg2[%c0, %4, %c0_0, %c0_1] : memref<1x4x4x256xbf16, #tpu.memory_space<vmem>>, vector<1x2x4x256xbf16>
    %6 = vector.shape_cast %5 : vector<1x2x4x256xbf16> to vector<2x4x256xbf16>
    %7 = vector.extract_strided_slice %6 {offsets = [0, 0, 0], sizes = [2, 2, 256], strides = [1, 1, 1]} : vector<2x4x256xbf16> to vector<2x2x256xbf16>
    %8 = vector.shape_cast %7 : vector<2x2x256xbf16> to vector<4x256xbf16>
    %c0_2 = arith.constant 0 : index
    %c0_3 = arith.constant 0 : index
    %c0_4 = arith.constant 0 : index
    %9 = vector.load %arg3[%c0_2, %c0_3, %c0_4] : memref<9x256x128xbf16, #tpu.memory_space<vmem>>, vector<1x256x128xbf16>
    %10 = vector.shape_cast %9 : vector<1x256x128xbf16> to vector<256x128xbf16>
    %cst_5 = arith.constant dense<0.000000e+00> : vector<4x128xf32>
    %11 = tpu.matmul %8, %10, %cst_5 {dimension_numbers = #tpu.dot_dimension_numbers<[1], [0], [0], [1], [0, 0, 1, 1], [], []>} : vector<4x256xbf16>, vector<256x128xbf16>, vector<4x128xf32> -> vector<4x128xf32>
    %12 = arith.addf %2, %11 : vector<4x128xf32>
    %13 = vector.extract_strided_slice %6 {offsets = [0, 1, 0], sizes = [2, 2, 256], strides = [1, 1, 1]} : vector<2x4x256xbf16> to vector<2x2x256xbf16>
    %14 = vector.shape_cast %13 : vector<2x2x256xbf16> to vector<4x256xbf16>
    %c1 = arith.constant 1 : index
    %c0_6 = arith.constant 0 : index
    %c0_7 = arith.constant 0 : index
    %15 = vector.load %arg3[%c1, %c0_6, %c0_7] : memref<9x256x128xbf16, #tpu.memory_space<vmem>>, vector<1x256x128xbf16>
    %16 = vector.shape_cast %15 : vector<1x256x128xbf16> to vector<256x128xbf16>
    %cst_8 = arith.constant dense<0.000000e+00> : vector<4x128xf32>
    %17 = tpu.matmul %14, %16, %cst_8 {dimension_numbers = #tpu.dot_dimension_numbers<[1], [0], [0], [1], [0, 0, 1, 1], [], []>} : vector<4x256xbf16>, vector<256x128xbf16>, vector<4x128xf32> -> vector<4x128xf32>
    %18 = arith.addf %12, %17 : vector<4x128xf32>
    %19 = vector.extract_strided_slice %6 {offsets = [0, 2, 0], sizes = [2, 2, 256], strides = [1, 1, 1]} : vector<2x4x256xbf16> to vector<2x2x256xbf16>
    %20 = vector.shape_cast %19 : vector<2x2x256xbf16> to vector<4x256xbf16>
    %c2 = arith.constant 2 : index
    %c0_9 = arith.constant 0 : index
    %c0_10 = arith.constant 0 : index
    %21 = vector.load %arg3[%c2, %c0_9, %c0_10] : memref<9x256x128xbf16, #tpu.memory_space<vmem>>, vector<1x256x128xbf16>
    %22 = vector.shape_cast %21 : vector<1x256x128xbf16> to vector<256x128xbf16>
    %cst_11 = arith.constant dense<0.000000e+00> : vector<4x128xf32>
    %23 = tpu.matmul %20, %22, %cst_11 {dimension_numbers = #tpu.dot_dimension_numbers<[1], [0], [0], [1], [0, 0, 1, 1], [], []>} : vector<4x256xbf16>, vector<256x128xbf16>, vector<4x128xf32> -> vector<4x128xf32>
    %24 = arith.addf %18, %23 : vector<4x128xf32>
    %c1_i32 = arith.constant 1 : i32
    %25 = arith.addi %1, %c1_i32 : i32
    %c0_12 = arith.constant 0 : index
    %26 = arith.index_cast %25 : i32 to index
    %c0_13 = arith.constant 0 : index
    %c0_14 = arith.constant 0 : index
    %27 = vector.load %arg2[%c0_12, %26, %c0_13, %c0_14] : memref<1x4x4x256xbf16, #tpu.memory_space<vmem>>, vector<1x2x4x256xbf16>
    %28 = vector.shape_cast %27 : vector<1x2x4x256xbf16> to vector<2x4x256xbf16>
    %29 = vector.extract_strided_slice %28 {offsets = [0, 0, 0], sizes = [2, 2, 256], strides = [1, 1, 1]} : vector<2x4x256xbf16> to vector<2x2x256xbf16>
    %30 = vector.shape_cast %29 : vector<2x2x256xbf16> to vector<4x256xbf16>
    %c3 = arith.constant 3 : index
    %c0_15 = arith.constant 0 : index
    %c0_16 = arith.constant 0 : index
    %31 = vector.load %arg3[%c3, %c0_15, %c0_16] : memref<9x256x128xbf16, #tpu.memory_space<vmem>>, vector<1x256x128xbf16>
    %32 = vector.shape_cast %31 : vector<1x256x128xbf16> to vector<256x128xbf16>
    %cst_17 = arith.constant dense<0.000000e+00> : vector<4x128xf32>
    %33 = tpu.matmul %30, %32, %cst_17 {dimension_numbers = #tpu.dot_dimension_numbers<[1], [0], [0], [1], [0, 0, 1, 1], [], []>} : vector<4x256xbf16>, vector<256x128xbf16>, vector<4x128xf32> -> vector<4x128xf32>
    %34 = arith.addf %24, %33 : vector<4x128xf32>
    %35 = vector.extract_strided_slice %28 {offsets = [0, 1, 0], sizes = [2, 2, 256], strides = [1, 1, 1]} : vector<2x4x256xbf16> to vector<2x2x256xbf16>
    %36 = vector.shape_cast %35 : vector<2x2x256xbf16> to vector<4x256xbf16>
    %c4 = arith.constant 4 : index
    %c0_18 = arith.constant 0 : index
    %c0_19 = arith.constant 0 : index
    %37 = vector.load %arg3[%c4, %c0_18, %c0_19] : memref<9x256x128xbf16, #tpu.memory_space<vmem>>, vector<1x256x128xbf16>
    %38 = vector.shape_cast %37 : vector<1x256x128xbf16> to vector<256x128xbf16>
    %cst_20 = arith.constant dense<0.000000e+00> : vector<4x128xf32>
    %39 = tpu.matmul %36, %38, %cst_20 {dimension_numbers = #tpu.dot_dimension_numbers<[1], [0], [0], [1], [0, 0, 1, 1], [], []>} : vector<4x256xbf16>, vector<256x128xbf16>, vector<4x128xf32> -> vector<4x128xf32>
    %40 = arith.addf %34, %39 : vector<4x128xf32>
    %41 = vector.extract_strided_slice %28 {offsets = [0, 2, 0], sizes = [2, 2, 256], strides = [1, 1, 1]} : vector<2x4x256xbf16> to vector<2x2x256xbf16>
    %42 = vector.shape_cast %41 : vector<2x2x256xbf16> to vector<4x256xbf16>
    %c5 = arith.constant 5 : index
    %c0_21 = arith.constant 0 : index
    %c0_22 = arith.constant 0 : index
    %43 = vector.load %arg3[%c5, %c0_21, %c0_22] : memref<9x256x128xbf16, #tpu.memory_space<vmem>>, vector<1x256x128xbf16>
    %44 = vector.shape_cast %43 : vector<1x256x128xbf16> to vector<256x128xbf16>
    %cst_23 = arith.constant dense<0.000000e+00> : vector<4x128xf32>
    %45 = tpu.matmul %42, %44, %cst_23 {dimension_numbers = #tpu.dot_dimension_numbers<[1], [0], [0], [1], [0, 0, 1, 1], [], []>} : vector<4x256xbf16>, vector<256x128xbf16>, vector<4x128xf32> -> vector<4x128xf32>
    %46 = arith.addf %40, %45 : vector<4x128xf32>
    %c2_i32_24 = arith.constant 2 : i32
    %47 = arith.addi %1, %c2_i32_24 : i32
    %c0_25 = arith.constant 0 : index
    %48 = arith.index_cast %47 : i32 to index
    %c0_26 = arith.constant 0 : index
    %c0_27 = arith.constant 0 : index
    %49 = vector.load %arg2[%c0_25, %48, %c0_26, %c0_27] : memref<1x4x4x256xbf16, #tpu.memory_space<vmem>>, vector<1x2x4x256xbf16>
    %50 = vector.shape_cast %49 : vector<1x2x4x256xbf16> to vector<2x4x256xbf16>
    %51 = vector.extract_strided_slice %50 {offsets = [0, 0, 0], sizes = [2, 2, 256], strides = [1, 1, 1]} : vector<2x4x256xbf16> to vector<2x2x256xbf16>
    %52 = vector.shape_cast %51 : vector<2x2x256xbf16> to vector<4x256xbf16>
    %c6 = arith.constant 6 : index
    %c0_28 = arith.constant 0 : index
    %c0_29 = arith.constant 0 : index
    %53 = vector.load %arg3[%c6, %c0_28, %c0_29] : memref<9x256x128xbf16, #tpu.memory_space<vmem>>, vector<1x256x128xbf16>
    %54 = vector.shape_cast %53 : vector<1x256x128xbf16> to vector<256x128xbf16>
    %cst_30 = arith.constant dense<0.000000e+00> : vector<4x128xf32>
    %55 = tpu.matmul %52, %54, %cst_30 {dimension_numbers = #tpu.dot_dimension_numbers<[1], [0], [0], [1], [0, 0, 1, 1], [], []>} : vector<4x256xbf16>, vector<256x128xbf16>, vector<4x128xf32> -> vector<4x128xf32>
    %56 = arith.addf %46, %55 : vector<4x128xf32>
    %57 = vector.extract_strided_slice %50 {offsets = [0, 1, 0], sizes = [2, 2, 256], strides = [1, 1, 1]} : vector<2x4x256xbf16> to vector<2x2x256xbf16>
    %58 = vector.shape_cast %57 : vector<2x2x256xbf16> to vector<4x256xbf16>
    %c7 = arith.constant 7 : index
    %c0_31 = arith.constant 0 : index
    %c0_32 = arith.constant 0 : index
    %59 = vector.load %arg3[%c7, %c0_31, %c0_32] : memref<9x256x128xbf16, #tpu.memory_space<vmem>>, vector<1x256x128xbf16>
    %60 = vector.shape_cast %59 : vector<1x256x128xbf16> to vector<256x128xbf16>
    %cst_33 = arith.constant dense<0.000000e+00> : vector<4x128xf32>
    %61 = tpu.matmul %58, %60, %cst_33 {dimension_numbers = #tpu.dot_dimension_numbers<[1], [0], [0], [1], [0, 0, 1, 1], [], []>} : vector<4x256xbf16>, vector<256x128xbf16>, vector<4x128xf32> -> vector<4x128xf32>
    %62 = arith.addf %56, %61 : vector<4x128xf32>
    %63 = vector.extract_strided_slice %50 {offsets = [0, 2, 0], sizes = [2, 2, 256], strides = [1, 1, 1]} : vector<2x4x256xbf16> to vector<2x2x256xbf16>
    %64 = vector.shape_cast %63 : vector<2x2x256xbf16> to vector<4x256xbf16>
    %c8 = arith.constant 8 : index
    %c0_34 = arith.constant 0 : index
    %c0_35 = arith.constant 0 : index
    %65 = vector.load %arg3[%c8, %c0_34, %c0_35] : memref<9x256x128xbf16, #tpu.memory_space<vmem>>, vector<1x256x128xbf16>
    %66 = vector.shape_cast %65 : vector<1x256x128xbf16> to vector<256x128xbf16>
    %cst_36 = arith.constant dense<0.000000e+00> : vector<4x128xf32>
    %67 = tpu.matmul %64, %66, %cst_36 {dimension_numbers = #tpu.dot_dimension_numbers<[1], [0], [0], [1], [0, 0, 1, 1], [], []>} : vector<4x256xbf16>, vector<256x128xbf16>, vector<4x128xf32> -> vector<4x128xf32>
    %68 = arith.addf %62, %67 : vector<4x128xf32>
    %c0_37 = arith.constant 0 : index
    %c0_38 = arith.constant 0 : index
    %69 = vector.load %arg4[%c0_37, %c0_38] : memref<1x128xf32, #tpu.memory_space<vmem>>, vector<1x128xf32>
    %70 = vector.broadcast %69 : vector<1x128xf32> to vector<4x128xf32>
    %71 = arith.addf %68, %70 : vector<4x128xf32>
    %cst_39 = arith.constant 0.000000e+00 : f32
    %72 = vector.broadcast %cst_39 : f32 to vector<4x128xf32>
    %73 = arith.maximumf %71, %72 : vector<4x128xf32>
    %74 = vector.shape_cast %73 : vector<4x128xf32> to vector<1x2x2x128xf32>
    %75 = arith.truncf %74 : vector<1x2x2x128xf32> to vector<1x2x2x128xbf16>
    %c0_40 = arith.constant 0 : index
    %c0_41 = arith.constant 0 : index
    %c0_42 = arith.constant 0 : index
    %c0_43 = arith.constant 0 : index
    %76 = vector.load %arg5[%c0_40, %c0_41, %c0_42, %c0_43] : memref<1x2x2x128xbf16, #tpu.memory_space<vmem>>, vector<1x2x2x128xbf16>
    tpu.vector_store %arg5[%c0_40, %c0_41, %c0_42, %c0_43], %75 {strides = array<i32>} : memref<1x2x2x128xbf16, #tpu.memory_space<vmem>>, vector<1x2x2x128xbf16>,
    return
  }
  func.func @transform_0(%arg0: i32, %arg1: i32) -> (i32, i32, i32, i32) {
    %c0_i32 = arith.constant 0 : i32
    %c0_i32_0 = arith.constant 0 : i32
    %c0_i32_1 = arith.constant 0 : i32
    %c0_i32_2 = arith.constant 0 : i32
    return %arg0, %c0_i32, %c0_i32_0, %c0_i32_1 : i32, i32, i32, i32
  }
  func.func @transform_1(%arg0: i32, %arg1: i32) -> (i32, i32, i32) {
    %c0_i32 = arith.constant 0 : i32
    %c0_i32_0 = arith.constant 0 : i32
    %c0_i32_1 = arith.constant 0 : i32
    %c0_i32_2 = arith.constant 0 : i32
    return %c0_i32, %c0_i32_0, %c0_i32_1 : i32, i32, i32
  }
  func.func @transform_2(%arg0: i32, %arg1: i32) -> (i32, i32) {
    %c0_i32 = arith.constant 0 : i32
    %c0_i32_0 = arith.constant 0 : i32
    %c0_i32_1 = arith.constant 0 : i32
    return %c0_i32, %c0_i32_0 : i32, i32
  }
  func.func @transform_3(%arg0: i32, %arg1: i32) -> (i32, i32, i32, i32) {
    %c0_i32 = arith.constant 0 : i32
    %c0_i32_0 = arith.constant 0 : i32
    %c0_i32_1 = arith.constant 0 : i32
    return %arg0, %arg1, %c0_i32, %c0_i32_0 : i32, i32, i32, i32
  }
}

module attributes {stable_mosaic.version = 11 : i64} {
  func.func @_aspp_kernel(%arg0: i32, %arg1: memref<1x2x2x64xbf16, #tpu.memory_space<vmem>>, %arg2: memref<64x8xbf16, #tpu.memory_space<vmem>>, %arg3: memref<1x8xf32, #tpu.memory_space<vmem>>, %arg4: memref<3x9x64x8xbf16, #tpu.memory_space<vmem>>, %arg5: memref<3x8xf32, #tpu.memory_space<vmem>>, %arg6: memref<64x8xbf16, #tpu.memory_space<vmem>>, %arg7: memref<1x8xf32, #tpu.memory_space<vmem>>, %arg8: memref<5x8x128xbf16, #tpu.memory_space<vmem>>, %arg9: memref<1x128xf32, #tpu.memory_space<vmem>>, %arg10: memref<1x2x2x128xbf16, #tpu.memory_space<vmem>>, %arg11: memref<38x38x64xbf16, #tpu.memory_space<vmem>>) attributes {dimension_semantics = [#tpu.dimension_semantics<parallel>], iteration_bounds = array<i64: 2>, scalar_prefetch = 0 : i64, scratch_operands = 1 : i64, tpu.core_type = #tpu.core_type<tc>, window_params = [{transform_indices = @transform_0, window_bounds = array<i64: 1, 2, 2, 64>}, {pipeline_mode = #tpu.pipeline_mode<synchronous>, transform_indices = @transform_1, window_bounds = array<i64: 64, 8>}, {pipeline_mode = #tpu.pipeline_mode<synchronous>, transform_indices = @transform_2, window_bounds = array<i64: 1, 8>}, {pipeline_mode = #tpu.pipeline_mode<synchronous>, transform_indices = @transform_3, window_bounds = array<i64: 3, 9, 64, 8>}, {pipeline_mode = #tpu.pipeline_mode<synchronous>, transform_indices = @transform_4, window_bounds = array<i64: 3, 8>}, {pipeline_mode = #tpu.pipeline_mode<synchronous>, transform_indices = @transform_5, window_bounds = array<i64: 64, 8>}, {pipeline_mode = #tpu.pipeline_mode<synchronous>, transform_indices = @transform_6, window_bounds = array<i64: 1, 8>}, {pipeline_mode = #tpu.pipeline_mode<synchronous>, transform_indices = @transform_7, window_bounds = array<i64: 5, 8, 128>}, {pipeline_mode = #tpu.pipeline_mode<synchronous>, transform_indices = @transform_8, window_bounds = array<i64: 1, 128>}, {transform_indices = @transform_9, window_bounds = array<i64: 1, 2, 2, 128>}]} {
    %cst = arith.constant 0.000000e+00 : bf16
    %0 = vector.broadcast %cst : bf16 to vector<38x38x64xbf16>
    %c0 = arith.constant 0 : index
    %c0_0 = arith.constant 0 : index
    %c0_1 = arith.constant 0 : index
    %1 = vector.load %arg11[%c0, %c0_0, %c0_1] : memref<38x38x64xbf16, #tpu.memory_space<vmem>>, vector<38x38x64xbf16>
    tpu.vector_store %arg11[%c0, %c0_0, %c0_1], %0 {strides = array<i32>} : memref<38x38x64xbf16, #tpu.memory_space<vmem>>, vector<38x38x64xbf16>,
    %c0_2 = arith.constant 0 : index
    %c0_3 = arith.constant 0 : index
    %c0_4 = arith.constant 0 : index
    %c0_5 = arith.constant 0 : index
    %2 = vector.load %arg1[%c0_2, %c0_3, %c0_4, %c0_5] : memref<1x2x2x64xbf16, #tpu.memory_space<vmem>>, vector<1x2x2x64xbf16>
    %3 = vector.shape_cast %2 : vector<1x2x2x64xbf16> to vector<2x2x64xbf16>
    %c18 = arith.constant 18 : index
    %c18_6 = arith.constant 18 : index
    %c0_7 = arith.constant 0 : index
    %4 = vector.load %arg11[%c18, %c18_6, %c0_7] : memref<38x38x64xbf16, #tpu.memory_space<vmem>>, vector<2x2x64xbf16>
    tpu.vector_store %arg11[%c18, %c18_6, %c0_7], %3 {strides = array<i32>} : memref<38x38x64xbf16, #tpu.memory_space<vmem>>, vector<2x2x64xbf16>,
    %c0_8 = arith.constant 0 : index
    %c0_9 = arith.constant 0 : index
    %c0_10 = arith.constant 0 : index
    %c0_11 = arith.constant 0 : index
    %5 = vector.load %arg1[%c0_8, %c0_9, %c0_10, %c0_11] : memref<1x2x2x64xbf16, #tpu.memory_space<vmem>>, vector<1x2x2x64xbf16>
    %6 = vector.shape_cast %5 : vector<1x2x2x64xbf16> to vector<2x2x64xbf16>
    %7 = vector.shape_cast %6 : vector<2x2x64xbf16> to vector<4x64xbf16>
    %8 = arith.extf %7 : vector<4x64xbf16> to vector<4x64xf32>
    %cst_12 = arith.constant dense<0.000000e+00> : vector<64xf32>
    %9 = vector.multi_reduction <add>, %8, %cst_12 [0] : vector<4x64xf32> to vector<64xf32>
    %10 = vector.shape_cast %9 : vector<64xf32> to vector<1x64xf32>
    %cst_13 = arith.constant 4.000000e+00 : f32
    %11 = vector.broadcast %cst_13 : f32 to vector<1x64xf32>
    %12 = arith.divf %10, %11 : vector<1x64xf32>
    %13 = arith.truncf %12 : vector<1x64xf32> to vector<1x64xbf16>
    %c0_14 = arith.constant 0 : index
    %c0_15 = arith.constant 0 : index
    %14 = vector.load %arg6[%c0_14, %c0_15] : memref<64x8xbf16, #tpu.memory_space<vmem>>, vector<64x8xbf16>
    %cst_16 = arith.constant dense<0.000000e+00> : vector<1x8xf32>
    %15 = tpu.matmul %13, %14, %cst_16 {dimension_numbers = #tpu.dot_dimension_numbers<[1], [0], [0], [1], [0, 0, 1, 1], [], []>} : vector<1x64xbf16>, vector<64x8xbf16>, vector<1x8xf32> -> vector<1x8xf32>
    %c0_17 = arith.constant 0 : index
    %c0_18 = arith.constant 0 : index
    %16 = vector.load %arg7[%c0_17, %c0_18] : memref<1x8xf32, #tpu.memory_space<vmem>>, vector<1x8xf32>
    %17 = arith.addf %15, %16 : vector<1x8xf32>
    %cst_19 = arith.constant 0.000000e+00 : f32
    %18 = vector.broadcast %cst_19 : f32 to vector<1x8xf32>
    %19 = arith.maximumf %17, %18 : vector<1x8xf32>
    %c0_20 = arith.constant 0 : index
    %c0_21 = arith.constant 0 : index
    %20 = vector.load %arg9[%c0_20, %c0_21] : memref<1x128xf32, #tpu.memory_space<vmem>>, vector<1x128xf32>
    %21 = arith.truncf %19 : vector<1x8xf32> to vector<1x8xbf16>
    %c4 = arith.constant 4 : index
    %c0_22 = arith.constant 0 : index
    %c0_23 = arith.constant 0 : index
    %22 = vector.load %arg8[%c4, %c0_22, %c0_23] : memref<5x8x128xbf16, #tpu.memory_space<vmem>>, vector<1x8x128xbf16>
    %23 = vector.shape_cast %22 : vector<1x8x128xbf16> to vector<8x128xbf16>
    %cst_24 = arith.constant dense<0.000000e+00> : vector<1x128xf32>
    %24 = tpu.matmul %21, %23, %cst_24 {dimension_numbers = #tpu.dot_dimension_numbers<[1], [0], [0], [1], [0, 0, 1, 1], [], []>} : vector<1x8xbf16>, vector<8x128xbf16>, vector<1x128xf32> -> vector<1x128xf32>
    %25 = arith.addf %20, %24 : vector<1x128xf32>
    %c0_25 = arith.constant 0 : index
    %c0_26 = arith.constant 0 : index
    %26 = vector.load %arg2[%c0_25, %c0_26] : memref<64x8xbf16, #tpu.memory_space<vmem>>, vector<64x8xbf16>
    %cst_27 = arith.constant dense<0.000000e+00> : vector<4x8xf32>
    %27 = tpu.matmul %7, %26, %cst_27 {dimension_numbers = #tpu.dot_dimension_numbers<[1], [0], [0], [1], [0, 0, 1, 1], [], []>} : vector<4x64xbf16>, vector<64x8xbf16>, vector<4x8xf32> -> vector<4x8xf32>
    %c0_28 = arith.constant 0 : index
    %c0_29 = arith.constant 0 : index
    %28 = vector.load %arg3[%c0_28, %c0_29] : memref<1x8xf32, #tpu.memory_space<vmem>>, vector<1x8xf32>
    %29 = vector.broadcast %28 : vector<1x8xf32> to vector<4x8xf32>
    %30 = arith.addf %27, %29 : vector<4x8xf32>
    %cst_30 = arith.constant 0.000000e+00 : f32
    %31 = vector.broadcast %cst_30 : f32 to vector<4x8xf32>
    %32 = arith.maximumf %30, %31 : vector<4x8xf32>
    %33 = arith.truncf %32 : vector<4x8xf32> to vector<4x8xbf16>
    %c0_31 = arith.constant 0 : index
    %c0_32 = arith.constant 0 : index
    %c0_33 = arith.constant 0 : index
    %34 = vector.load %arg8[%c0_31, %c0_32, %c0_33] : memref<5x8x128xbf16, #tpu.memory_space<vmem>>, vector<1x8x128xbf16>
    %35 = vector.shape_cast %34 : vector<1x8x128xbf16> to vector<8x128xbf16>
    %cst_34 = arith.constant dense<0.000000e+00> : vector<4x128xf32>
    %36 = tpu.matmul %33, %35, %cst_34 {dimension_numbers = #tpu.dot_dimension_numbers<[1], [0], [0], [1], [0, 0, 1, 1], [], []>} : vector<4x8xbf16>, vector<8x128xbf16>, vector<4x128xf32> -> vector<4x128xf32>
    %cst_35 = arith.constant 0.000000e+00 : f32
    %37 = vector.broadcast %cst_35 : f32 to vector<4x8xf32>
    %c12 = arith.constant 12 : index
    %c12_36 = arith.constant 12 : index
    %c0_37 = arith.constant 0 : index
    %38 = vector.load %arg11[%c12, %c12_36, %c0_37] : memref<38x38x64xbf16, #tpu.memory_space<vmem>>, vector<2x2x64xbf16>
    %39 = vector.shape_cast %38 : vector<2x2x64xbf16> to vector<4x64xbf16>
    %c0_38 = arith.constant 0 : index
    %c0_39 = arith.constant 0 : index
    %c0_40 = arith.constant 0 : index
    %c0_41 = arith.constant 0 : index
    %40 = vector.load %arg4[%c0_38, %c0_39, %c0_40, %c0_41] : memref<3x9x64x8xbf16, #tpu.memory_space<vmem>>, vector<1x1x64x8xbf16>
    %41 = vector.shape_cast %40 : vector<1x1x64x8xbf16> to vector<64x8xbf16>
    %cst_42 = arith.constant dense<0.000000e+00> : vector<4x8xf32>
    %42 = tpu.matmul %39, %41, %cst_42 {dimension_numbers = #tpu.dot_dimension_numbers<[1], [0], [0], [1], [0, 0, 1, 1], [], []>} : vector<4x64xbf16>, vector<64x8xbf16>, vector<4x8xf32> -> vector<4x8xf32>
    %43 = arith.addf %37, %42 : vector<4x8xf32>
    %c12_43 = arith.constant 12 : index
    %c18_44 = arith.constant 18 : index
    %c0_45 = arith.constant 0 : index
    %44 = vector.load %arg11[%c12_43, %c18_44, %c0_45] : memref<38x38x64xbf16, #tpu.memory_space<vmem>>, vector<2x2x64xbf16>
    %45 = vector.shape_cast %44 : vector<2x2x64xbf16> to vector<4x64xbf16>
    %c0_46 = arith.constant 0 : index
    %c1 = arith.constant 1 : index
    %c0_47 = arith.constant 0 : index
    %c0_48 = arith.constant 0 : index
    %46 = vector.load %arg4[%c0_46, %c1, %c0_47, %c0_48] : memref<3x9x64x8xbf16, #tpu.memory_space<vmem>>, vector<1x1x64x8xbf16>
    %47 = vector.shape_cast %46 : vector<1x1x64x8xbf16> to vector<64x8xbf16>
    %cst_49 = arith.constant dense<0.000000e+00> : vector<4x8xf32>
    %48 = tpu.matmul %45, %47, %cst_49 {dimension_numbers = #tpu.dot_dimension_numbers<[1], [0], [0], [1], [0, 0, 1, 1], [], []>} : vector<4x64xbf16>, vector<64x8xbf16>, vector<4x8xf32> -> vector<4x8xf32>
    %49 = arith.addf %43, %48 : vector<4x8xf32>
    %c12_50 = arith.constant 12 : index
    %c24 = arith.constant 24 : index
    %c0_51 = arith.constant 0 : index
    %50 = vector.load %arg11[%c12_50, %c24, %c0_51] : memref<38x38x64xbf16, #tpu.memory_space<vmem>>, vector<2x2x64xbf16>
    %51 = vector.shape_cast %50 : vector<2x2x64xbf16> to vector<4x64xbf16>
    %c0_52 = arith.constant 0 : index
    %c2 = arith.constant 2 : index
    %c0_53 = arith.constant 0 : index
    %c0_54 = arith.constant 0 : index
    %52 = vector.load %arg4[%c0_52, %c2, %c0_53, %c0_54] : memref<3x9x64x8xbf16, #tpu.memory_space<vmem>>, vector<1x1x64x8xbf16>
    %53 = vector.shape_cast %52 : vector<1x1x64x8xbf16> to vector<64x8xbf16>
    %cst_55 = arith.constant dense<0.000000e+00> : vector<4x8xf32>
    %54 = tpu.matmul %51, %53, %cst_55 {dimension_numbers = #tpu.dot_dimension_numbers<[1], [0], [0], [1], [0, 0, 1, 1], [], []>} : vector<4x64xbf16>, vector<64x8xbf16>, vector<4x8xf32> -> vector<4x8xf32>
    %55 = arith.addf %49, %54 : vector<4x8xf32>
    %c18_56 = arith.constant 18 : index
    %c12_57 = arith.constant 12 : index
    %c0_58 = arith.constant 0 : index
    %56 = vector.load %arg11[%c18_56, %c12_57, %c0_58] : memref<38x38x64xbf16, #tpu.memory_space<vmem>>, vector<2x2x64xbf16>
    %57 = vector.shape_cast %56 : vector<2x2x64xbf16> to vector<4x64xbf16>
    %c0_59 = arith.constant 0 : index
    %c3 = arith.constant 3 : index
    %c0_60 = arith.constant 0 : index
    %c0_61 = arith.constant 0 : index
    %58 = vector.load %arg4[%c0_59, %c3, %c0_60, %c0_61] : memref<3x9x64x8xbf16, #tpu.memory_space<vmem>>, vector<1x1x64x8xbf16>
    %59 = vector.shape_cast %58 : vector<1x1x64x8xbf16> to vector<64x8xbf16>
    %cst_62 = arith.constant dense<0.000000e+00> : vector<4x8xf32>
    %60 = tpu.matmul %57, %59, %cst_62 {dimension_numbers = #tpu.dot_dimension_numbers<[1], [0], [0], [1], [0, 0, 1, 1], [], []>} : vector<4x64xbf16>, vector<64x8xbf16>, vector<4x8xf32> -> vector<4x8xf32>
    %61 = arith.addf %55, %60 : vector<4x8xf32>
    %c18_63 = arith.constant 18 : index
    %c18_64 = arith.constant 18 : index
    %c0_65 = arith.constant 0 : index
    %62 = vector.load %arg11[%c18_63, %c18_64, %c0_65] : memref<38x38x64xbf16, #tpu.memory_space<vmem>>, vector<2x2x64xbf16>
    %63 = vector.shape_cast %62 : vector<2x2x64xbf16> to vector<4x64xbf16>
    %c0_66 = arith.constant 0 : index
    %c4_67 = arith.constant 4 : index
    %c0_68 = arith.constant 0 : index
    %c0_69 = arith.constant 0 : index
    %64 = vector.load %arg4[%c0_66, %c4_67, %c0_68, %c0_69] : memref<3x9x64x8xbf16, #tpu.memory_space<vmem>>, vector<1x1x64x8xbf16>
    %65 = vector.shape_cast %64 : vector<1x1x64x8xbf16> to vector<64x8xbf16>
    %cst_70 = arith.constant dense<0.000000e+00> : vector<4x8xf32>
    %66 = tpu.matmul %63, %65, %cst_70 {dimension_numbers = #tpu.dot_dimension_numbers<[1], [0], [0], [1], [0, 0, 1, 1], [], []>} : vector<4x64xbf16>, vector<64x8xbf16>, vector<4x8xf32> -> vector<4x8xf32>
    %67 = arith.addf %61, %66 : vector<4x8xf32>
    %c18_71 = arith.constant 18 : index
    %c24_72 = arith.constant 24 : index
    %c0_73 = arith.constant 0 : index
    %68 = vector.load %arg11[%c18_71, %c24_72, %c0_73] : memref<38x38x64xbf16, #tpu.memory_space<vmem>>, vector<2x2x64xbf16>
    %69 = vector.shape_cast %68 : vector<2x2x64xbf16> to vector<4x64xbf16>
    %c0_74 = arith.constant 0 : index
    %c5 = arith.constant 5 : index
    %c0_75 = arith.constant 0 : index
    %c0_76 = arith.constant 0 : index
    %70 = vector.load %arg4[%c0_74, %c5, %c0_75, %c0_76] : memref<3x9x64x8xbf16, #tpu.memory_space<vmem>>, vector<1x1x64x8xbf16>
    %71 = vector.shape_cast %70 : vector<1x1x64x8xbf16> to vector<64x8xbf16>
    %cst_77 = arith.constant dense<0.000000e+00> : vector<4x8xf32>
    %72 = tpu.matmul %69, %71, %cst_77 {dimension_numbers = #tpu.dot_dimension_numbers<[1], [0], [0], [1], [0, 0, 1, 1], [], []>} : vector<4x64xbf16>, vector<64x8xbf16>, vector<4x8xf32> -> vector<4x8xf32>
    %73 = arith.addf %67, %72 : vector<4x8xf32>
    %c24_78 = arith.constant 24 : index
    %c12_79 = arith.constant 12 : index
    %c0_80 = arith.constant 0 : index
    %74 = vector.load %arg11[%c24_78, %c12_79, %c0_80] : memref<38x38x64xbf16, #tpu.memory_space<vmem>>, vector<2x2x64xbf16>
    %75 = vector.shape_cast %74 : vector<2x2x64xbf16> to vector<4x64xbf16>
    %c0_81 = arith.constant 0 : index
    %c6 = arith.constant 6 : index
    %c0_82 = arith.constant 0 : index
    %c0_83 = arith.constant 0 : index
    %76 = vector.load %arg4[%c0_81, %c6, %c0_82, %c0_83] : memref<3x9x64x8xbf16, #tpu.memory_space<vmem>>, vector<1x1x64x8xbf16>
    %77 = vector.shape_cast %76 : vector<1x1x64x8xbf16> to vector<64x8xbf16>
    %cst_84 = arith.constant dense<0.000000e+00> : vector<4x8xf32>
    %78 = tpu.matmul %75, %77, %cst_84 {dimension_numbers = #tpu.dot_dimension_numbers<[1], [0], [0], [1], [0, 0, 1, 1], [], []>} : vector<4x64xbf16>, vector<64x8xbf16>, vector<4x8xf32> -> vector<4x8xf32>
    %79 = arith.addf %73, %78 : vector<4x8xf32>
    %c24_85 = arith.constant 24 : index
    %c18_86 = arith.constant 18 : index
    %c0_87 = arith.constant 0 : index
    %80 = vector.load %arg11[%c24_85, %c18_86, %c0_87] : memref<38x38x64xbf16, #tpu.memory_space<vmem>>, vector<2x2x64xbf16>
    %81 = vector.shape_cast %80 : vector<2x2x64xbf16> to vector<4x64xbf16>
    %c0_88 = arith.constant 0 : index
    %c7 = arith.constant 7 : index
    %c0_89 = arith.constant 0 : index
    %c0_90 = arith.constant 0 : index
    %82 = vector.load %arg4[%c0_88, %c7, %c0_89, %c0_90] : memref<3x9x64x8xbf16, #tpu.memory_space<vmem>>, vector<1x1x64x8xbf16>
    %83 = vector.shape_cast %82 : vector<1x1x64x8xbf16> to vector<64x8xbf16>
    %cst_91 = arith.constant dense<0.000000e+00> : vector<4x8xf32>
    %84 = tpu.matmul %81, %83, %cst_91 {dimension_numbers = #tpu.dot_dimension_numbers<[1], [0], [0], [1], [0, 0, 1, 1], [], []>} : vector<4x64xbf16>, vector<64x8xbf16>, vector<4x8xf32> -> vector<4x8xf32>
    %85 = arith.addf %79, %84 : vector<4x8xf32>
    %c24_92 = arith.constant 24 : index
    %c24_93 = arith.constant 24 : index
    %c0_94 = arith.constant 0 : index
    %86 = vector.load %arg11[%c24_92, %c24_93, %c0_94] : memref<38x38x64xbf16, #tpu.memory_space<vmem>>, vector<2x2x64xbf16>
    %87 = vector.shape_cast %86 : vector<2x2x64xbf16> to vector<4x64xbf16>
    %c0_95 = arith.constant 0 : index
    %c8 = arith.constant 8 : index
    %c0_96 = arith.constant 0 : index
    %c0_97 = arith.constant 0 : index
    %88 = vector.load %arg4[%c0_95, %c8, %c0_96, %c0_97] : memref<3x9x64x8xbf16, #tpu.memory_space<vmem>>, vector<1x1x64x8xbf16>
    %89 = vector.shape_cast %88 : vector<1x1x64x8xbf16> to vector<64x8xbf16>
    %cst_98 = arith.constant dense<0.000000e+00> : vector<4x8xf32>
    %90 = tpu.matmul %87, %89, %cst_98 {dimension_numbers = #tpu.dot_dimension_numbers<[1], [0], [0], [1], [0, 0, 1, 1], [], []>} : vector<4x64xbf16>, vector<64x8xbf16>, vector<4x8xf32> -> vector<4x8xf32>
    %91 = arith.addf %85, %90 : vector<4x8xf32>
    %c0_99 = arith.constant 0 : index
    %c0_100 = arith.constant 0 : index
    %92 = vector.load %arg5[%c0_99, %c0_100] : memref<3x8xf32, #tpu.memory_space<vmem>>, vector<1x8xf32>
    %93 = vector.broadcast %92 : vector<1x8xf32> to vector<4x8xf32>
    %94 = arith.addf %91, %93 : vector<4x8xf32>
    %cst_101 = arith.constant 0.000000e+00 : f32
    %95 = vector.broadcast %cst_101 : f32 to vector<4x8xf32>
    %96 = arith.maximumf %94, %95 : vector<4x8xf32>
    %97 = arith.truncf %96 : vector<4x8xf32> to vector<4x8xbf16>
    %c1_102 = arith.constant 1 : index
    %c0_103 = arith.constant 0 : index
    %c0_104 = arith.constant 0 : index
    %98 = vector.load %arg8[%c1_102, %c0_103, %c0_104] : memref<5x8x128xbf16, #tpu.memory_space<vmem>>, vector<1x8x128xbf16>
    %99 = vector.shape_cast %98 : vector<1x8x128xbf16> to vector<8x128xbf16>
    %cst_105 = arith.constant dense<0.000000e+00> : vector<4x128xf32>
    %100 = tpu.matmul %97, %99, %cst_105 {dimension_numbers = #tpu.dot_dimension_numbers<[1], [0], [0], [1], [0, 0, 1, 1], [], []>} : vector<4x8xbf16>, vector<8x128xbf16>, vector<4x128xf32> -> vector<4x128xf32>
    %101 = arith.addf %36, %100 : vector<4x128xf32>
    %cst_106 = arith.constant 0.000000e+00 : f32
    %102 = vector.broadcast %cst_106 : f32 to vector<4x8xf32>
    %c6_107 = arith.constant 6 : index
    %c6_108 = arith.constant 6 : index
    %c0_109 = arith.constant 0 : index
    %103 = vector.load %arg11[%c6_107, %c6_108, %c0_109] : memref<38x38x64xbf16, #tpu.memory_space<vmem>>, vector<2x2x64xbf16>
    %104 = vector.shape_cast %103 : vector<2x2x64xbf16> to vector<4x64xbf16>
    %c1_110 = arith.constant 1 : index
    %c0_111 = arith.constant 0 : index
    %c0_112 = arith.constant 0 : index
    %c0_113 = arith.constant 0 : index
    %105 = vector.load %arg4[%c1_110, %c0_111, %c0_112, %c0_113] : memref<3x9x64x8xbf16, #tpu.memory_space<vmem>>, vector<1x1x64x8xbf16>
    %106 = vector.shape_cast %105 : vector<1x1x64x8xbf16> to vector<64x8xbf16>
    %cst_114 = arith.constant dense<0.000000e+00> : vector<4x8xf32>
    %107 = tpu.matmul %104, %106, %cst_114 {dimension_numbers = #tpu.dot_dimension_numbers<[1], [0], [0], [1], [0, 0, 1, 1], [], []>} : vector<4x64xbf16>, vector<64x8xbf16>, vector<4x8xf32> -> vector<4x8xf32>
    %108 = arith.addf %102, %107 : vector<4x8xf32>
    %c6_115 = arith.constant 6 : index
    %c18_116 = arith.constant 18 : index
    %c0_117 = arith.constant 0 : index
    %109 = vector.load %arg11[%c6_115, %c18_116, %c0_117] : memref<38x38x64xbf16, #tpu.memory_space<vmem>>, vector<2x2x64xbf16>
    %110 = vector.shape_cast %109 : vector<2x2x64xbf16> to vector<4x64xbf16>
    %c1_118 = arith.constant 1 : index
    %c1_119 = arith.constant 1 : index
    %c0_120 = arith.constant 0 : index
    %c0_121 = arith.constant 0 : index
    %111 = vector.load %arg4[%c1_118, %c1_119, %c0_120, %c0_121] : memref<3x9x64x8xbf16, #tpu.memory_space<vmem>>, vector<1x1x64x8xbf16>
    %112 = vector.shape_cast %111 : vector<1x1x64x8xbf16> to vector<64x8xbf16>
    %cst_122 = arith.constant dense<0.000000e+00> : vector<4x8xf32>
    %113 = tpu.matmul %110, %112, %cst_122 {dimension_numbers = #tpu.dot_dimension_numbers<[1], [0], [0], [1], [0, 0, 1, 1], [], []>} : vector<4x64xbf16>, vector<64x8xbf16>, vector<4x8xf32> -> vector<4x8xf32>
    %114 = arith.addf %108, %113 : vector<4x8xf32>
    %c6_123 = arith.constant 6 : index
    %c30 = arith.constant 30 : index
    %c0_124 = arith.constant 0 : index
    %115 = vector.load %arg11[%c6_123, %c30, %c0_124] : memref<38x38x64xbf16, #tpu.memory_space<vmem>>, vector<2x2x64xbf16>
    %116 = vector.shape_cast %115 : vector<2x2x64xbf16> to vector<4x64xbf16>
    %c1_125 = arith.constant 1 : index
    %c2_126 = arith.constant 2 : index
    %c0_127 = arith.constant 0 : index
    %c0_128 = arith.constant 0 : index
    %117 = vector.load %arg4[%c1_125, %c2_126, %c0_127, %c0_128] : memref<3x9x64x8xbf16, #tpu.memory_space<vmem>>, vector<1x1x64x8xbf16>
    %118 = vector.shape_cast %117 : vector<1x1x64x8xbf16> to vector<64x8xbf16>
    %cst_129 = arith.constant dense<0.000000e+00> : vector<4x8xf32>
    %119 = tpu.matmul %116, %118, %cst_129 {dimension_numbers = #tpu.dot_dimension_numbers<[1], [0], [0], [1], [0, 0, 1, 1], [], []>} : vector<4x64xbf16>, vector<64x8xbf16>, vector<4x8xf32> -> vector<4x8xf32>
    %120 = arith.addf %114, %119 : vector<4x8xf32>
    %c18_130 = arith.constant 18 : index
    %c6_131 = arith.constant 6 : index
    %c0_132 = arith.constant 0 : index
    %121 = vector.load %arg11[%c18_130, %c6_131, %c0_132] : memref<38x38x64xbf16, #tpu.memory_space<vmem>>, vector<2x2x64xbf16>
    %122 = vector.shape_cast %121 : vector<2x2x64xbf16> to vector<4x64xbf16>
    %c1_133 = arith.constant 1 : index
    %c3_134 = arith.constant 3 : index
    %c0_135 = arith.constant 0 : index
    %c0_136 = arith.constant 0 : index
    %123 = vector.load %arg4[%c1_133, %c3_134, %c0_135, %c0_136] : memref<3x9x64x8xbf16, #tpu.memory_space<vmem>>, vector<1x1x64x8xbf16>
    %124 = vector.shape_cast %123 : vector<1x1x64x8xbf16> to vector<64x8xbf16>
    %cst_137 = arith.constant dense<0.000000e+00> : vector<4x8xf32>
    %125 = tpu.matmul %122, %124, %cst_137 {dimension_numbers = #tpu.dot_dimension_numbers<[1], [0], [0], [1], [0, 0, 1, 1], [], []>} : vector<4x64xbf16>, vector<64x8xbf16>, vector<4x8xf32> -> vector<4x8xf32>
    %126 = arith.addf %120, %125 : vector<4x8xf32>
    %c18_138 = arith.constant 18 : index
    %c18_139 = arith.constant 18 : index
    %c0_140 = arith.constant 0 : index
    %127 = vector.load %arg11[%c18_138, %c18_139, %c0_140] : memref<38x38x64xbf16, #tpu.memory_space<vmem>>, vector<2x2x64xbf16>
    %128 = vector.shape_cast %127 : vector<2x2x64xbf16> to vector<4x64xbf16>
    %c1_141 = arith.constant 1 : index
    %c4_142 = arith.constant 4 : index
    %c0_143 = arith.constant 0 : index
    %c0_144 = arith.constant 0 : index
    %129 = vector.load %arg4[%c1_141, %c4_142, %c0_143, %c0_144] : memref<3x9x64x8xbf16, #tpu.memory_space<vmem>>, vector<1x1x64x8xbf16>
    %130 = vector.shape_cast %129 : vector<1x1x64x8xbf16> to vector<64x8xbf16>
    %cst_145 = arith.constant dense<0.000000e+00> : vector<4x8xf32>
    %131 = tpu.matmul %128, %130, %cst_145 {dimension_numbers = #tpu.dot_dimension_numbers<[1], [0], [0], [1], [0, 0, 1, 1], [], []>} : vector<4x64xbf16>, vector<64x8xbf16>, vector<4x8xf32> -> vector<4x8xf32>
    %132 = arith.addf %126, %131 : vector<4x8xf32>
    %c18_146 = arith.constant 18 : index
    %c30_147 = arith.constant 30 : index
    %c0_148 = arith.constant 0 : index
    %133 = vector.load %arg11[%c18_146, %c30_147, %c0_148] : memref<38x38x64xbf16, #tpu.memory_space<vmem>>, vector<2x2x64xbf16>
    %134 = vector.shape_cast %133 : vector<2x2x64xbf16> to vector<4x64xbf16>
    %c1_149 = arith.constant 1 : index
    %c5_150 = arith.constant 5 : index
    %c0_151 = arith.constant 0 : index
    %c0_152 = arith.constant 0 : index
    %135 = vector.load %arg4[%c1_149, %c5_150, %c0_151, %c0_152] : memref<3x9x64x8xbf16, #tpu.memory_space<vmem>>, vector<1x1x64x8xbf16>
    %136 = vector.shape_cast %135 : vector<1x1x64x8xbf16> to vector<64x8xbf16>
    %cst_153 = arith.constant dense<0.000000e+00> : vector<4x8xf32>
    %137 = tpu.matmul %134, %136, %cst_153 {dimension_numbers = #tpu.dot_dimension_numbers<[1], [0], [0], [1], [0, 0, 1, 1], [], []>} : vector<4x64xbf16>, vector<64x8xbf16>, vector<4x8xf32> -> vector<4x8xf32>
    %138 = arith.addf %132, %137 : vector<4x8xf32>
    %c30_154 = arith.constant 30 : index
    %c6_155 = arith.constant 6 : index
    %c0_156 = arith.constant 0 : index
    %139 = vector.load %arg11[%c30_154, %c6_155, %c0_156] : memref<38x38x64xbf16, #tpu.memory_space<vmem>>, vector<2x2x64xbf16>
    %140 = vector.shape_cast %139 : vector<2x2x64xbf16> to vector<4x64xbf16>
    %c1_157 = arith.constant 1 : index
    %c6_158 = arith.constant 6 : index
    %c0_159 = arith.constant 0 : index
    %c0_160 = arith.constant 0 : index
    %141 = vector.load %arg4[%c1_157, %c6_158, %c0_159, %c0_160] : memref<3x9x64x8xbf16, #tpu.memory_space<vmem>>, vector<1x1x64x8xbf16>
    %142 = vector.shape_cast %141 : vector<1x1x64x8xbf16> to vector<64x8xbf16>
    %cst_161 = arith.constant dense<0.000000e+00> : vector<4x8xf32>
    %143 = tpu.matmul %140, %142, %cst_161 {dimension_numbers = #tpu.dot_dimension_numbers<[1], [0], [0], [1], [0, 0, 1, 1], [], []>} : vector<4x64xbf16>, vector<64x8xbf16>, vector<4x8xf32> -> vector<4x8xf32>
    %144 = arith.addf %138, %143 : vector<4x8xf32>
    %c30_162 = arith.constant 30 : index
    %c18_163 = arith.constant 18 : index
    %c0_164 = arith.constant 0 : index
    %145 = vector.load %arg11[%c30_162, %c18_163, %c0_164] : memref<38x38x64xbf16, #tpu.memory_space<vmem>>, vector<2x2x64xbf16>
    %146 = vector.shape_cast %145 : vector<2x2x64xbf16> to vector<4x64xbf16>
    %c1_165 = arith.constant 1 : index
    %c7_166 = arith.constant 7 : index
    %c0_167 = arith.constant 0 : index
    %c0_168 = arith.constant 0 : index
    %147 = vector.load %arg4[%c1_165, %c7_166, %c0_167, %c0_168] : memref<3x9x64x8xbf16, #tpu.memory_space<vmem>>, vector<1x1x64x8xbf16>
    %148 = vector.shape_cast %147 : vector<1x1x64x8xbf16> to vector<64x8xbf16>
    %cst_169 = arith.constant dense<0.000000e+00> : vector<4x8xf32>
    %149 = tpu.matmul %146, %148, %cst_169 {dimension_numbers = #tpu.dot_dimension_numbers<[1], [0], [0], [1], [0, 0, 1, 1], [], []>} : vector<4x64xbf16>, vector<64x8xbf16>, vector<4x8xf32> -> vector<4x8xf32>
    %150 = arith.addf %144, %149 : vector<4x8xf32>
    %c30_170 = arith.constant 30 : index
    %c30_171 = arith.constant 30 : index
    %c0_172 = arith.constant 0 : index
    %151 = vector.load %arg11[%c30_170, %c30_171, %c0_172] : memref<38x38x64xbf16, #tpu.memory_space<vmem>>, vector<2x2x64xbf16>
    %152 = vector.shape_cast %151 : vector<2x2x64xbf16> to vector<4x64xbf16>
    %c1_173 = arith.constant 1 : index
    %c8_174 = arith.constant 8 : index
    %c0_175 = arith.constant 0 : index
    %c0_176 = arith.constant 0 : index
    %153 = vector.load %arg4[%c1_173, %c8_174, %c0_175, %c0_176] : memref<3x9x64x8xbf16, #tpu.memory_space<vmem>>, vector<1x1x64x8xbf16>
    %154 = vector.shape_cast %153 : vector<1x1x64x8xbf16> to vector<64x8xbf16>
    %cst_177 = arith.constant dense<0.000000e+00> : vector<4x8xf32>
    %155 = tpu.matmul %152, %154, %cst_177 {dimension_numbers = #tpu.dot_dimension_numbers<[1], [0], [0], [1], [0, 0, 1, 1], [], []>} : vector<4x64xbf16>, vector<64x8xbf16>, vector<4x8xf32> -> vector<4x8xf32>
    %156 = arith.addf %150, %155 : vector<4x8xf32>
    %c1_178 = arith.constant 1 : index
    %c0_179 = arith.constant 0 : index
    %157 = vector.load %arg5[%c1_178, %c0_179] : memref<3x8xf32, #tpu.memory_space<vmem>>, vector<1x8xf32>
    %158 = vector.broadcast %157 : vector<1x8xf32> to vector<4x8xf32>
    %159 = arith.addf %156, %158 : vector<4x8xf32>
    %cst_180 = arith.constant 0.000000e+00 : f32
    %160 = vector.broadcast %cst_180 : f32 to vector<4x8xf32>
    %161 = arith.maximumf %159, %160 : vector<4x8xf32>
    %162 = arith.truncf %161 : vector<4x8xf32> to vector<4x8xbf16>
    %c2_181 = arith.constant 2 : index
    %c0_182 = arith.constant 0 : index
    %c0_183 = arith.constant 0 : index
    %163 = vector.load %arg8[%c2_181, %c0_182, %c0_183] : memref<5x8x128xbf16, #tpu.memory_space<vmem>>, vector<1x8x128xbf16>
    %164 = vector.shape_cast %163 : vector<1x8x128xbf16> to vector<8x128xbf16>
    %cst_184 = arith.constant dense<0.000000e+00> : vector<4x128xf32>
    %165 = tpu.matmul %162, %164, %cst_184 {dimension_numbers = #tpu.dot_dimension_numbers<[1], [0], [0], [1], [0, 0, 1, 1], [], []>} : vector<4x8xbf16>, vector<8x128xbf16>, vector<4x128xf32> -> vector<4x128xf32>
    %166 = arith.addf %101, %165 : vector<4x128xf32>
    %cst_185 = arith.constant 0.000000e+00 : f32
    %167 = vector.broadcast %cst_185 : f32 to vector<4x8xf32>
    %c0_186 = arith.constant 0 : index
    %c0_187 = arith.constant 0 : index
    %c0_188 = arith.constant 0 : index
    %168 = vector.load %arg11[%c0_186, %c0_187, %c0_188] : memref<38x38x64xbf16, #tpu.memory_space<vmem>>, vector<2x2x64xbf16>
    %169 = vector.shape_cast %168 : vector<2x2x64xbf16> to vector<4x64xbf16>
    %c2_189 = arith.constant 2 : index
    %c0_190 = arith.constant 0 : index
    %c0_191 = arith.constant 0 : index
    %c0_192 = arith.constant 0 : index
    %170 = vector.load %arg4[%c2_189, %c0_190, %c0_191, %c0_192] : memref<3x9x64x8xbf16, #tpu.memory_space<vmem>>, vector<1x1x64x8xbf16>
    %171 = vector.shape_cast %170 : vector<1x1x64x8xbf16> to vector<64x8xbf16>
    %cst_193 = arith.constant dense<0.000000e+00> : vector<4x8xf32>
    %172 = tpu.matmul %169, %171, %cst_193 {dimension_numbers = #tpu.dot_dimension_numbers<[1], [0], [0], [1], [0, 0, 1, 1], [], []>} : vector<4x64xbf16>, vector<64x8xbf16>, vector<4x8xf32> -> vector<4x8xf32>
    %173 = arith.addf %167, %172 : vector<4x8xf32>
    %c0_194 = arith.constant 0 : index
    %c18_195 = arith.constant 18 : index
    %c0_196 = arith.constant 0 : index
    %174 = vector.load %arg11[%c0_194, %c18_195, %c0_196] : memref<38x38x64xbf16, #tpu.memory_space<vmem>>, vector<2x2x64xbf16>
    %175 = vector.shape_cast %174 : vector<2x2x64xbf16> to vector<4x64xbf16>
    %c2_197 = arith.constant 2 : index
    %c1_198 = arith.constant 1 : index
    %c0_199 = arith.constant 0 : index
    %c0_200 = arith.constant 0 : index
    %176 = vector.load %arg4[%c2_197, %c1_198, %c0_199, %c0_200] : memref<3x9x64x8xbf16, #tpu.memory_space<vmem>>, vector<1x1x64x8xbf16>
    %177 = vector.shape_cast %176 : vector<1x1x64x8xbf16> to vector<64x8xbf16>
    %cst_201 = arith.constant dense<0.000000e+00> : vector<4x8xf32>
    %178 = tpu.matmul %175, %177, %cst_201 {dimension_numbers = #tpu.dot_dimension_numbers<[1], [0], [0], [1], [0, 0, 1, 1], [], []>} : vector<4x64xbf16>, vector<64x8xbf16>, vector<4x8xf32> -> vector<4x8xf32>
    %179 = arith.addf %173, %178 : vector<4x8xf32>
    %c0_202 = arith.constant 0 : index
    %c36 = arith.constant 36 : index
    %c0_203 = arith.constant 0 : index
    %180 = vector.load %arg11[%c0_202, %c36, %c0_203] : memref<38x38x64xbf16, #tpu.memory_space<vmem>>, vector<2x2x64xbf16>
    %181 = vector.shape_cast %180 : vector<2x2x64xbf16> to vector<4x64xbf16>
    %c2_204 = arith.constant 2 : index
    %c2_205 = arith.constant 2 : index
    %c0_206 = arith.constant 0 : index
    %c0_207 = arith.constant 0 : index
    %182 = vector.load %arg4[%c2_204, %c2_205, %c0_206, %c0_207] : memref<3x9x64x8xbf16, #tpu.memory_space<vmem>>, vector<1x1x64x8xbf16>
    %183 = vector.shape_cast %182 : vector<1x1x64x8xbf16> to vector<64x8xbf16>
    %cst_208 = arith.constant dense<0.000000e+00> : vector<4x8xf32>
    %184 = tpu.matmul %181, %183, %cst_208 {dimension_numbers = #tpu.dot_dimension_numbers<[1], [0], [0], [1], [0, 0, 1, 1], [], []>} : vector<4x64xbf16>, vector<64x8xbf16>, vector<4x8xf32> -> vector<4x8xf32>
    %185 = arith.addf %179, %184 : vector<4x8xf32>
    %c18_209 = arith.constant 18 : index
    %c0_210 = arith.constant 0 : index
    %c0_211 = arith.constant 0 : index
    %186 = vector.load %arg11[%c18_209, %c0_210, %c0_211] : memref<38x38x64xbf16, #tpu.memory_space<vmem>>, vector<2x2x64xbf16>
    %187 = vector.shape_cast %186 : vector<2x2x64xbf16> to vector<4x64xbf16>
    %c2_212 = arith.constant 2 : index
    %c3_213 = arith.constant 3 : index
    %c0_214 = arith.constant 0 : index
    %c0_215 = arith.constant 0 : index
    %188 = vector.load %arg4[%c2_212, %c3_213, %c0_214, %c0_215] : memref<3x9x64x8xbf16, #tpu.memory_space<vmem>>, vector<1x1x64x8xbf16>
    %189 = vector.shape_cast %188 : vector<1x1x64x8xbf16> to vector<64x8xbf16>
    %cst_216 = arith.constant dense<0.000000e+00> : vector<4x8xf32>
    %190 = tpu.matmul %187, %189, %cst_216 {dimension_numbers = #tpu.dot_dimension_numbers<[1], [0], [0], [1], [0, 0, 1, 1], [], []>} : vector<4x64xbf16>, vector<64x8xbf16>, vector<4x8xf32> -> vector<4x8xf32>
    %191 = arith.addf %185, %190 : vector<4x8xf32>
    %c18_217 = arith.constant 18 : index
    %c18_218 = arith.constant 18 : index
    %c0_219 = arith.constant 0 : index
    %192 = vector.load %arg11[%c18_217, %c18_218, %c0_219] : memref<38x38x64xbf16, #tpu.memory_space<vmem>>, vector<2x2x64xbf16>
    %193 = vector.shape_cast %192 : vector<2x2x64xbf16> to vector<4x64xbf16>
    %c2_220 = arith.constant 2 : index
    %c4_221 = arith.constant 4 : index
    %c0_222 = arith.constant 0 : index
    %c0_223 = arith.constant 0 : index
    %194 = vector.load %arg4[%c2_220, %c4_221, %c0_222, %c0_223] : memref<3x9x64x8xbf16, #tpu.memory_space<vmem>>, vector<1x1x64x8xbf16>
    %195 = vector.shape_cast %194 : vector<1x1x64x8xbf16> to vector<64x8xbf16>
    %cst_224 = arith.constant dense<0.000000e+00> : vector<4x8xf32>
    %196 = tpu.matmul %193, %195, %cst_224 {dimension_numbers = #tpu.dot_dimension_numbers<[1], [0], [0], [1], [0, 0, 1, 1], [], []>} : vector<4x64xbf16>, vector<64x8xbf16>, vector<4x8xf32> -> vector<4x8xf32>
    %197 = arith.addf %191, %196 : vector<4x8xf32>
    %c18_225 = arith.constant 18 : index
    %c36_226 = arith.constant 36 : index
    %c0_227 = arith.constant 0 : index
    %198 = vector.load %arg11[%c18_225, %c36_226, %c0_227] : memref<38x38x64xbf16, #tpu.memory_space<vmem>>, vector<2x2x64xbf16>
    %199 = vector.shape_cast %198 : vector<2x2x64xbf16> to vector<4x64xbf16>
    %c2_228 = arith.constant 2 : index
    %c5_229 = arith.constant 5 : index
    %c0_230 = arith.constant 0 : index
    %c0_231 = arith.constant 0 : index
    %200 = vector.load %arg4[%c2_228, %c5_229, %c0_230, %c0_231] : memref<3x9x64x8xbf16, #tpu.memory_space<vmem>>, vector<1x1x64x8xbf16>
    %201 = vector.shape_cast %200 : vector<1x1x64x8xbf16> to vector<64x8xbf16>
    %cst_232 = arith.constant dense<0.000000e+00> : vector<4x8xf32>
    %202 = tpu.matmul %199, %201, %cst_232 {dimension_numbers = #tpu.dot_dimension_numbers<[1], [0], [0], [1], [0, 0, 1, 1], [], []>} : vector<4x64xbf16>, vector<64x8xbf16>, vector<4x8xf32> -> vector<4x8xf32>
    %203 = arith.addf %197, %202 : vector<4x8xf32>
    %c36_233 = arith.constant 36 : index
    %c0_234 = arith.constant 0 : index
    %c0_235 = arith.constant 0 : index
    %204 = vector.load %arg11[%c36_233, %c0_234, %c0_235] : memref<38x38x64xbf16, #tpu.memory_space<vmem>>, vector<2x2x64xbf16>
    %205 = vector.shape_cast %204 : vector<2x2x64xbf16> to vector<4x64xbf16>
    %c2_236 = arith.constant 2 : index
    %c6_237 = arith.constant 6 : index
    %c0_238 = arith.constant 0 : index
    %c0_239 = arith.constant 0 : index
    %206 = vector.load %arg4[%c2_236, %c6_237, %c0_238, %c0_239] : memref<3x9x64x8xbf16, #tpu.memory_space<vmem>>, vector<1x1x64x8xbf16>
    %207 = vector.shape_cast %206 : vector<1x1x64x8xbf16> to vector<64x8xbf16>
    %cst_240 = arith.constant dense<0.000000e+00> : vector<4x8xf32>
    %208 = tpu.matmul %205, %207, %cst_240 {dimension_numbers = #tpu.dot_dimension_numbers<[1], [0], [0], [1], [0, 0, 1, 1], [], []>} : vector<4x64xbf16>, vector<64x8xbf16>, vector<4x8xf32> -> vector<4x8xf32>
    %209 = arith.addf %203, %208 : vector<4x8xf32>
    %c36_241 = arith.constant 36 : index
    %c18_242 = arith.constant 18 : index
    %c0_243 = arith.constant 0 : index
    %210 = vector.load %arg11[%c36_241, %c18_242, %c0_243] : memref<38x38x64xbf16, #tpu.memory_space<vmem>>, vector<2x2x64xbf16>
    %211 = vector.shape_cast %210 : vector<2x2x64xbf16> to vector<4x64xbf16>
    %c2_244 = arith.constant 2 : index
    %c7_245 = arith.constant 7 : index
    %c0_246 = arith.constant 0 : index
    %c0_247 = arith.constant 0 : index
    %212 = vector.load %arg4[%c2_244, %c7_245, %c0_246, %c0_247] : memref<3x9x64x8xbf16, #tpu.memory_space<vmem>>, vector<1x1x64x8xbf16>
    %213 = vector.shape_cast %212 : vector<1x1x64x8xbf16> to vector<64x8xbf16>
    %cst_248 = arith.constant dense<0.000000e+00> : vector<4x8xf32>
    %214 = tpu.matmul %211, %213, %cst_248 {dimension_numbers = #tpu.dot_dimension_numbers<[1], [0], [0], [1], [0, 0, 1, 1], [], []>} : vector<4x64xbf16>, vector<64x8xbf16>, vector<4x8xf32> -> vector<4x8xf32>
    %215 = arith.addf %209, %214 : vector<4x8xf32>
    %c36_249 = arith.constant 36 : index
    %c36_250 = arith.constant 36 : index
    %c0_251 = arith.constant 0 : index
    %216 = vector.load %arg11[%c36_249, %c36_250, %c0_251] : memref<38x38x64xbf16, #tpu.memory_space<vmem>>, vector<2x2x64xbf16>
    %217 = vector.shape_cast %216 : vector<2x2x64xbf16> to vector<4x64xbf16>
    %c2_252 = arith.constant 2 : index
    %c8_253 = arith.constant 8 : index
    %c0_254 = arith.constant 0 : index
    %c0_255 = arith.constant 0 : index
    %218 = vector.load %arg4[%c2_252, %c8_253, %c0_254, %c0_255] : memref<3x9x64x8xbf16, #tpu.memory_space<vmem>>, vector<1x1x64x8xbf16>
    %219 = vector.shape_cast %218 : vector<1x1x64x8xbf16> to vector<64x8xbf16>
    %cst_256 = arith.constant dense<0.000000e+00> : vector<4x8xf32>
    %220 = tpu.matmul %217, %219, %cst_256 {dimension_numbers = #tpu.dot_dimension_numbers<[1], [0], [0], [1], [0, 0, 1, 1], [], []>} : vector<4x64xbf16>, vector<64x8xbf16>, vector<4x8xf32> -> vector<4x8xf32>
    %221 = arith.addf %215, %220 : vector<4x8xf32>
    %c2_257 = arith.constant 2 : index
    %c0_258 = arith.constant 0 : index
    %222 = vector.load %arg5[%c2_257, %c0_258] : memref<3x8xf32, #tpu.memory_space<vmem>>, vector<1x8xf32>
    %223 = vector.broadcast %222 : vector<1x8xf32> to vector<4x8xf32>
    %224 = arith.addf %221, %223 : vector<4x8xf32>
    %cst_259 = arith.constant 0.000000e+00 : f32
    %225 = vector.broadcast %cst_259 : f32 to vector<4x8xf32>
    %226 = arith.maximumf %224, %225 : vector<4x8xf32>
    %227 = arith.truncf %226 : vector<4x8xf32> to vector<4x8xbf16>
    %c3_260 = arith.constant 3 : index
    %c0_261 = arith.constant 0 : index
    %c0_262 = arith.constant 0 : index
    %228 = vector.load %arg8[%c3_260, %c0_261, %c0_262] : memref<5x8x128xbf16, #tpu.memory_space<vmem>>, vector<1x8x128xbf16>
    %229 = vector.shape_cast %228 : vector<1x8x128xbf16> to vector<8x128xbf16>
    %cst_263 = arith.constant dense<0.000000e+00> : vector<4x128xf32>
    %230 = tpu.matmul %227, %229, %cst_263 {dimension_numbers = #tpu.dot_dimension_numbers<[1], [0], [0], [1], [0, 0, 1, 1], [], []>} : vector<4x8xbf16>, vector<8x128xbf16>, vector<4x128xf32> -> vector<4x128xf32>
    %231 = arith.addf %166, %230 : vector<4x128xf32>
    %232 = vector.broadcast %25 : vector<1x128xf32> to vector<4x128xf32>
    %233 = arith.addf %231, %232 : vector<4x128xf32>
    %cst_264 = arith.constant 0.000000e+00 : f32
    %234 = vector.broadcast %cst_264 : f32 to vector<4x128xf32>
    %235 = arith.maximumf %233, %234 : vector<4x128xf32>
    %236 = vector.shape_cast %235 : vector<4x128xf32> to vector<1x2x2x128xf32>
    %237 = arith.truncf %236 : vector<1x2x2x128xf32> to vector<1x2x2x128xbf16>
    %c0_265 = arith.constant 0 : index
    %c0_266 = arith.constant 0 : index
    %c0_267 = arith.constant 0 : index
    %c0_268 = arith.constant 0 : index
    %238 = vector.load %arg10[%c0_265, %c0_266, %c0_267, %c0_268] : memref<1x2x2x128xbf16, #tpu.memory_space<vmem>>, vector<1x2x2x128xbf16>
    tpu.vector_store %arg10[%c0_265, %c0_266, %c0_267, %c0_268], %237 {strides = array<i32>} : memref<1x2x2x128xbf16, #tpu.memory_space<vmem>>, vector<1x2x2x128xbf16>,
    return
  }
  func.func @transform_0(%arg0: i32) -> (i32, i32, i32, i32) {
    %c0_i32 = arith.constant 0 : i32
    %c0_i32_0 = arith.constant 0 : i32
    %c0_i32_1 = arith.constant 0 : i32
    %c0_i32_2 = arith.constant 0 : i32
    return %arg0, %c0_i32, %c0_i32_0, %c0_i32_1 : i32, i32, i32, i32
  }
  func.func @transform_1(%arg0: i32) -> (i32, i32) {
    %c0_i32 = arith.constant 0 : i32
    %c0_i32_0 = arith.constant 0 : i32
    %c0_i32_1 = arith.constant 0 : i32
    return %c0_i32, %c0_i32_0 : i32, i32
  }
  func.func @transform_2(%arg0: i32) -> (i32, i32) {
    %c0_i32 = arith.constant 0 : i32
    %c0_i32_0 = arith.constant 0 : i32
    %c0_i32_1 = arith.constant 0 : i32
    return %c0_i32, %c0_i32_0 : i32, i32
  }
  func.func @transform_3(%arg0: i32) -> (i32, i32, i32, i32) {
    %c0_i32 = arith.constant 0 : i32
    %c0_i32_0 = arith.constant 0 : i32
    %c0_i32_1 = arith.constant 0 : i32
    %c0_i32_2 = arith.constant 0 : i32
    %c0_i32_3 = arith.constant 0 : i32
    return %c0_i32, %c0_i32_0, %c0_i32_1, %c0_i32_2 : i32, i32, i32, i32
  }
  func.func @transform_4(%arg0: i32) -> (i32, i32) {
    %c0_i32 = arith.constant 0 : i32
    %c0_i32_0 = arith.constant 0 : i32
    %c0_i32_1 = arith.constant 0 : i32
    return %c0_i32, %c0_i32_0 : i32, i32
  }
  func.func @transform_5(%arg0: i32) -> (i32, i32) {
    %c0_i32 = arith.constant 0 : i32
    %c0_i32_0 = arith.constant 0 : i32
    %c0_i32_1 = arith.constant 0 : i32
    return %c0_i32, %c0_i32_0 : i32, i32
  }
  func.func @transform_6(%arg0: i32) -> (i32, i32) {
    %c0_i32 = arith.constant 0 : i32
    %c0_i32_0 = arith.constant 0 : i32
    %c0_i32_1 = arith.constant 0 : i32
    return %c0_i32, %c0_i32_0 : i32, i32
  }
  func.func @transform_7(%arg0: i32) -> (i32, i32, i32) {
    %c0_i32 = arith.constant 0 : i32
    %c0_i32_0 = arith.constant 0 : i32
    %c0_i32_1 = arith.constant 0 : i32
    %c0_i32_2 = arith.constant 0 : i32
    return %c0_i32, %c0_i32_0, %c0_i32_1 : i32, i32, i32
  }
  func.func @transform_8(%arg0: i32) -> (i32, i32) {
    %c0_i32 = arith.constant 0 : i32
    %c0_i32_0 = arith.constant 0 : i32
    %c0_i32_1 = arith.constant 0 : i32
    return %c0_i32, %c0_i32_0 : i32, i32
  }
  func.func @transform_9(%arg0: i32) -> (i32, i32, i32, i32) {
    %c0_i32 = arith.constant 0 : i32
    %c0_i32_0 = arith.constant 0 : i32
    %c0_i32_1 = arith.constant 0 : i32
    %c0_i32_2 = arith.constant 0 : i32
    return %arg0, %c0_i32, %c0_i32_0, %c0_i32_1 : i32, i32, i32, i32
  }
}

module attributes {stable_mosaic.version = 11 : i64} {
  func.func @_resize_kernel(%arg0: i32, %arg1: i32, %arg2: i32, %arg3: memref<8x2xf32, #tpu.memory_space<vmem>>, %arg4: memref<8x2xf32, #tpu.memory_space<vmem>>, %arg5: memref<1x2x2x8xbf16, #tpu.memory_space<vmem>>, %arg6: memref<1x8x8x8xbf16, #tpu.memory_space<vmem>>) attributes {dimension_semantics = [#tpu.dimension_semantics<parallel>, #tpu.dimension_semantics<parallel>, #tpu.dimension_semantics<parallel>], iteration_bounds = array<i64: 2, 1, 1>, scalar_prefetch = 0 : i64, scratch_operands = 0 : i64, tpu.core_type = #tpu.core_type<tc>, window_params = [{transform_indices = @transform_0, window_bounds = array<i64: 8, 2>}, {pipeline_mode = #tpu.pipeline_mode<synchronous>, transform_indices = @transform_1, window_bounds = array<i64: 8, 2>}, {transform_indices = @transform_2, window_bounds = array<i64: 1, 2, 2, 8>}, {transform_indices = @transform_3, window_bounds = array<i64: 1, 8, 8, 8>}]} {
    %c0 = arith.constant 0 : index
    %c0_0 = arith.constant 0 : index
    %c0_1 = arith.constant 0 : index
    %c0_2 = arith.constant 0 : index
    %0 = vector.load %arg5[%c0, %c0_0, %c0_1, %c0_2] : memref<1x2x2x8xbf16, #tpu.memory_space<vmem>>, vector<1x2x2x8xbf16>
    %1 = vector.shape_cast %0 : vector<1x2x2x8xbf16> to vector<2x2x8xbf16>
    %2 = arith.extf %1 : vector<2x2x8xbf16> to vector<2x2x8xf32>
    %3 = vector.shape_cast %2 : vector<2x2x8xf32> to vector<2x16xf32>
    %c0_3 = arith.constant 0 : index
    %c0_4 = arith.constant 0 : index
    %4 = vector.load %arg3[%c0_3, %c0_4] : memref<8x2xf32, #tpu.memory_space<vmem>>, vector<8x2xf32>
    %cst = arith.constant dense<0.000000e+00> : vector<8x16xf32>
    %5 = tpu.matmul %4, %3, %cst {dimension_numbers = #tpu.dot_dimension_numbers<[1], [0], [0], [1], [0, 0, 1, 1], [], []>} : vector<8x2xf32>, vector<2x16xf32>, vector<8x16xf32> -> vector<8x16xf32>
    %6 = vector.shape_cast %5 : vector<8x16xf32> to vector<8x2x8xf32>
    %c0_5 = arith.constant 0 : index
    %c0_6 = arith.constant 0 : index
    %7 = vector.load %arg4[%c0_5, %c0_6] : memref<8x2xf32, #tpu.memory_space<vmem>>, vector<8x2xf32>
    %8 = vector.shape_cast %7 : vector<8x2xf32> to vector<1x8x2xf32>
    %9 = vector.broadcast %8 : vector<1x8x2xf32> to vector<8x8x2xf32>
    "tpu.trace_start"() <{level = 10 : i32, message = "tvw,twc->tvc"}> : () -> ()
    %cst_7 = arith.constant dense<0.000000e+00> : vector<8x8x8xf32>
    %10 = tpu.matmul %9, %6, %cst_7 {dimension_numbers = #tpu.dot_dimension_numbers<[2], [1], [1], [2], [0, 0, 0, 1, 1, 2], [0], [0]>} : vector<8x8x2xf32>, vector<8x2x8xf32>, vector<8x8x8xf32> -> vector<8x8x8xf32>
    "tpu.trace_stop"() : () -> ()
    %11 = vector.shape_cast %10 : vector<8x8x8xf32> to vector<1x8x8x8xf32>
    %12 = arith.truncf %11 : vector<1x8x8x8xf32> to vector<1x8x8x8xbf16>
    %c0_8 = arith.constant 0 : index
    %c0_9 = arith.constant 0 : index
    %c0_10 = arith.constant 0 : index
    %c0_11 = arith.constant 0 : index
    %13 = vector.load %arg6[%c0_8, %c0_9, %c0_10, %c0_11] : memref<1x8x8x8xbf16, #tpu.memory_space<vmem>>, vector<1x8x8x8xbf16>
    tpu.vector_store %arg6[%c0_8, %c0_9, %c0_10, %c0_11], %12 {strides = array<i32>} : memref<1x8x8x8xbf16, #tpu.memory_space<vmem>>, vector<1x8x8x8xbf16>,
    return
  }
  func.func @transform_0(%arg0: i32, %arg1: i32, %arg2: i32) -> (i32, i32) {
    %c0_i32 = arith.constant 0 : i32
    %c0_i32_0 = arith.constant 0 : i32
    return %arg2, %c0_i32 : i32, i32
  }
  func.func @transform_1(%arg0: i32, %arg1: i32, %arg2: i32) -> (i32, i32) {
    %c0_i32 = arith.constant 0 : i32
    %c0_i32_0 = arith.constant 0 : i32
    %c0_i32_1 = arith.constant 0 : i32
    return %c0_i32, %c0_i32_0 : i32, i32
  }
  func.func @transform_2(%arg0: i32, %arg1: i32, %arg2: i32) -> (i32, i32, i32, i32) {
    %c0_i32 = arith.constant 0 : i32
    %c0_i32_0 = arith.constant 0 : i32
    %c0_i32_1 = arith.constant 0 : i32
    return %arg0, %c0_i32, %c0_i32_0, %arg1 : i32, i32, i32, i32
  }
  func.func @transform_3(%arg0: i32, %arg1: i32, %arg2: i32) -> (i32, i32, i32, i32) {
    %c0_i32 = arith.constant 0 : i32
    %c0_i32_0 = arith.constant 0 : i32
    return %arg0, %arg2, %c0_i32, %arg1 : i32, i32, i32, i32
  }
}

module attributes {stable_mosaic.version = 11 : i64} {
  func.func @_conv_kernel(%arg0: i32, %arg1: i32, %arg2: memref<1x10x10x16xbf16, #tpu.memory_space<vmem>>, %arg3: memref<9x16x128xbf16, #tpu.memory_space<vmem>>, %arg4: memref<1x128xf32, #tpu.memory_space<vmem>>, %arg5: memref<1x8x8x128xbf16, #tpu.memory_space<vmem>>) attributes {dimension_semantics = [#tpu.dimension_semantics<parallel>, #tpu.dimension_semantics<parallel>], iteration_bounds = array<i64: 2, 1>, scalar_prefetch = 0 : i64, scratch_operands = 0 : i64, tpu.core_type = #tpu.core_type<tc>, window_params = [{transform_indices = @transform_0, window_bounds = array<i64: 1, 10, 10, 16>}, {pipeline_mode = #tpu.pipeline_mode<synchronous>, transform_indices = @transform_1, window_bounds = array<i64: 9, 16, 128>}, {pipeline_mode = #tpu.pipeline_mode<synchronous>, transform_indices = @transform_2, window_bounds = array<i64: 1, 128>}, {transform_indices = @transform_3, window_bounds = array<i64: 1, 8, 8, 128>}]} {
    %c8_i32 = arith.constant 8 : i32
    %0 = arith.muli %arg1, %c8_i32 : i32
    %1 = tpu.assume_multiple %0, 8 : i32
    %cst = arith.constant 0.000000e+00 : f32
    %2 = vector.broadcast %cst : f32 to vector<64x128xf32>
    %c0_i32 = arith.constant 0 : i32
    %3 = arith.addi %1, %c0_i32 : i32
    %c0 = arith.constant 0 : index
    %4 = arith.index_cast %3 : i32 to index
    %c0_0 = arith.constant 0 : index
    %c0_1 = arith.constant 0 : index
    %5 = vector.load %arg2[%c0, %4, %c0_0, %c0_1] : memref<1x10x10x16xbf16, #tpu.memory_space<vmem>>, vector<1x8x10x16xbf16>
    %6 = vector.shape_cast %5 : vector<1x8x10x16xbf16> to vector<8x10x16xbf16>
    %7 = vector.extract_strided_slice %6 {offsets = [0, 0, 0], sizes = [8, 8, 16], strides = [1, 1, 1]} : vector<8x10x16xbf16> to vector<8x8x16xbf16>
    %8 = vector.shape_cast %7 : vector<8x8x16xbf16> to vector<64x16xbf16>
    %c0_2 = arith.constant 0 : index
    %c0_3 = arith.constant 0 : index
    %c0_4 = arith.constant 0 : index
    %9 = vector.load %arg3[%c0_2, %c0_3, %c0_4] : memref<9x16x128xbf16, #tpu.memory_space<vmem>>, vector<1x16x128xbf16>
    %10 = vector.shape_cast %9 : vector<1x16x128xbf16> to vector<16x128xbf16>
    %cst_5 = arith.constant dense<0.000000e+00> : vector<64x128xf32>
    %11 = tpu.matmul %8, %10, %cst_5 {dimension_numbers = #tpu.dot_dimension_numbers<[1], [0], [0], [1], [0, 0, 1, 1], [], []>} : vector<64x16xbf16>, vector<16x128xbf16>, vector<64x128xf32> -> vector<64x128xf32>
    %12 = arith.addf %2, %11 : vector<64x128xf32>
    %13 = vector.extract_strided_slice %6 {offsets = [0, 1, 0], sizes = [8, 8, 16], strides = [1, 1, 1]} : vector<8x10x16xbf16> to vector<8x8x16xbf16>
    %14 = vector.shape_cast %13 : vector<8x8x16xbf16> to vector<64x16xbf16>
    %c1 = arith.constant 1 : index
    %c0_6 = arith.constant 0 : index
    %c0_7 = arith.constant 0 : index
    %15 = vector.load %arg3[%c1, %c0_6, %c0_7] : memref<9x16x128xbf16, #tpu.memory_space<vmem>>, vector<1x16x128xbf16>
    %16 = vector.shape_cast %15 : vector<1x16x128xbf16> to vector<16x128xbf16>
    %cst_8 = arith.constant dense<0.000000e+00> : vector<64x128xf32>
    %17 = tpu.matmul %14, %16, %cst_8 {dimension_numbers = #tpu.dot_dimension_numbers<[1], [0], [0], [1], [0, 0, 1, 1], [], []>} : vector<64x16xbf16>, vector<16x128xbf16>, vector<64x128xf32> -> vector<64x128xf32>
    %18 = arith.addf %12, %17 : vector<64x128xf32>
    %19 = vector.extract_strided_slice %6 {offsets = [0, 2, 0], sizes = [8, 8, 16], strides = [1, 1, 1]} : vector<8x10x16xbf16> to vector<8x8x16xbf16>
    %20 = vector.shape_cast %19 : vector<8x8x16xbf16> to vector<64x16xbf16>
    %c2 = arith.constant 2 : index
    %c0_9 = arith.constant 0 : index
    %c0_10 = arith.constant 0 : index
    %21 = vector.load %arg3[%c2, %c0_9, %c0_10] : memref<9x16x128xbf16, #tpu.memory_space<vmem>>, vector<1x16x128xbf16>
    %22 = vector.shape_cast %21 : vector<1x16x128xbf16> to vector<16x128xbf16>
    %cst_11 = arith.constant dense<0.000000e+00> : vector<64x128xf32>
    %23 = tpu.matmul %20, %22, %cst_11 {dimension_numbers = #tpu.dot_dimension_numbers<[1], [0], [0], [1], [0, 0, 1, 1], [], []>} : vector<64x16xbf16>, vector<16x128xbf16>, vector<64x128xf32> -> vector<64x128xf32>
    %24 = arith.addf %18, %23 : vector<64x128xf32>
    %c1_i32 = arith.constant 1 : i32
    %25 = arith.addi %1, %c1_i32 : i32
    %c0_12 = arith.constant 0 : index
    %26 = arith.index_cast %25 : i32 to index
    %c0_13 = arith.constant 0 : index
    %c0_14 = arith.constant 0 : index
    %27 = vector.load %arg2[%c0_12, %26, %c0_13, %c0_14] : memref<1x10x10x16xbf16, #tpu.memory_space<vmem>>, vector<1x8x10x16xbf16>
    %28 = vector.shape_cast %27 : vector<1x8x10x16xbf16> to vector<8x10x16xbf16>
    %29 = vector.extract_strided_slice %28 {offsets = [0, 0, 0], sizes = [8, 8, 16], strides = [1, 1, 1]} : vector<8x10x16xbf16> to vector<8x8x16xbf16>
    %30 = vector.shape_cast %29 : vector<8x8x16xbf16> to vector<64x16xbf16>
    %c3 = arith.constant 3 : index
    %c0_15 = arith.constant 0 : index
    %c0_16 = arith.constant 0 : index
    %31 = vector.load %arg3[%c3, %c0_15, %c0_16] : memref<9x16x128xbf16, #tpu.memory_space<vmem>>, vector<1x16x128xbf16>
    %32 = vector.shape_cast %31 : vector<1x16x128xbf16> to vector<16x128xbf16>
    %cst_17 = arith.constant dense<0.000000e+00> : vector<64x128xf32>
    %33 = tpu.matmul %30, %32, %cst_17 {dimension_numbers = #tpu.dot_dimension_numbers<[1], [0], [0], [1], [0, 0, 1, 1], [], []>} : vector<64x16xbf16>, vector<16x128xbf16>, vector<64x128xf32> -> vector<64x128xf32>
    %34 = arith.addf %24, %33 : vector<64x128xf32>
    %35 = vector.extract_strided_slice %28 {offsets = [0, 1, 0], sizes = [8, 8, 16], strides = [1, 1, 1]} : vector<8x10x16xbf16> to vector<8x8x16xbf16>
    %36 = vector.shape_cast %35 : vector<8x8x16xbf16> to vector<64x16xbf16>
    %c4 = arith.constant 4 : index
    %c0_18 = arith.constant 0 : index
    %c0_19 = arith.constant 0 : index
    %37 = vector.load %arg3[%c4, %c0_18, %c0_19] : memref<9x16x128xbf16, #tpu.memory_space<vmem>>, vector<1x16x128xbf16>
    %38 = vector.shape_cast %37 : vector<1x16x128xbf16> to vector<16x128xbf16>
    %cst_20 = arith.constant dense<0.000000e+00> : vector<64x128xf32>
    %39 = tpu.matmul %36, %38, %cst_20 {dimension_numbers = #tpu.dot_dimension_numbers<[1], [0], [0], [1], [0, 0, 1, 1], [], []>} : vector<64x16xbf16>, vector<16x128xbf16>, vector<64x128xf32> -> vector<64x128xf32>
    %40 = arith.addf %34, %39 : vector<64x128xf32>
    %41 = vector.extract_strided_slice %28 {offsets = [0, 2, 0], sizes = [8, 8, 16], strides = [1, 1, 1]} : vector<8x10x16xbf16> to vector<8x8x16xbf16>
    %42 = vector.shape_cast %41 : vector<8x8x16xbf16> to vector<64x16xbf16>
    %c5 = arith.constant 5 : index
    %c0_21 = arith.constant 0 : index
    %c0_22 = arith.constant 0 : index
    %43 = vector.load %arg3[%c5, %c0_21, %c0_22] : memref<9x16x128xbf16, #tpu.memory_space<vmem>>, vector<1x16x128xbf16>
    %44 = vector.shape_cast %43 : vector<1x16x128xbf16> to vector<16x128xbf16>
    %cst_23 = arith.constant dense<0.000000e+00> : vector<64x128xf32>
    %45 = tpu.matmul %42, %44, %cst_23 {dimension_numbers = #tpu.dot_dimension_numbers<[1], [0], [0], [1], [0, 0, 1, 1], [], []>} : vector<64x16xbf16>, vector<16x128xbf16>, vector<64x128xf32> -> vector<64x128xf32>
    %46 = arith.addf %40, %45 : vector<64x128xf32>
    %c2_i32 = arith.constant 2 : i32
    %47 = arith.addi %1, %c2_i32 : i32
    %c0_24 = arith.constant 0 : index
    %48 = arith.index_cast %47 : i32 to index
    %c0_25 = arith.constant 0 : index
    %c0_26 = arith.constant 0 : index
    %49 = vector.load %arg2[%c0_24, %48, %c0_25, %c0_26] : memref<1x10x10x16xbf16, #tpu.memory_space<vmem>>, vector<1x8x10x16xbf16>
    %50 = vector.shape_cast %49 : vector<1x8x10x16xbf16> to vector<8x10x16xbf16>
    %51 = vector.extract_strided_slice %50 {offsets = [0, 0, 0], sizes = [8, 8, 16], strides = [1, 1, 1]} : vector<8x10x16xbf16> to vector<8x8x16xbf16>
    %52 = vector.shape_cast %51 : vector<8x8x16xbf16> to vector<64x16xbf16>
    %c6 = arith.constant 6 : index
    %c0_27 = arith.constant 0 : index
    %c0_28 = arith.constant 0 : index
    %53 = vector.load %arg3[%c6, %c0_27, %c0_28] : memref<9x16x128xbf16, #tpu.memory_space<vmem>>, vector<1x16x128xbf16>
    %54 = vector.shape_cast %53 : vector<1x16x128xbf16> to vector<16x128xbf16>
    %cst_29 = arith.constant dense<0.000000e+00> : vector<64x128xf32>
    %55 = tpu.matmul %52, %54, %cst_29 {dimension_numbers = #tpu.dot_dimension_numbers<[1], [0], [0], [1], [0, 0, 1, 1], [], []>} : vector<64x16xbf16>, vector<16x128xbf16>, vector<64x128xf32> -> vector<64x128xf32>
    %56 = arith.addf %46, %55 : vector<64x128xf32>
    %57 = vector.extract_strided_slice %50 {offsets = [0, 1, 0], sizes = [8, 8, 16], strides = [1, 1, 1]} : vector<8x10x16xbf16> to vector<8x8x16xbf16>
    %58 = vector.shape_cast %57 : vector<8x8x16xbf16> to vector<64x16xbf16>
    %c7 = arith.constant 7 : index
    %c0_30 = arith.constant 0 : index
    %c0_31 = arith.constant 0 : index
    %59 = vector.load %arg3[%c7, %c0_30, %c0_31] : memref<9x16x128xbf16, #tpu.memory_space<vmem>>, vector<1x16x128xbf16>
    %60 = vector.shape_cast %59 : vector<1x16x128xbf16> to vector<16x128xbf16>
    %cst_32 = arith.constant dense<0.000000e+00> : vector<64x128xf32>
    %61 = tpu.matmul %58, %60, %cst_32 {dimension_numbers = #tpu.dot_dimension_numbers<[1], [0], [0], [1], [0, 0, 1, 1], [], []>} : vector<64x16xbf16>, vector<16x128xbf16>, vector<64x128xf32> -> vector<64x128xf32>
    %62 = arith.addf %56, %61 : vector<64x128xf32>
    %63 = vector.extract_strided_slice %50 {offsets = [0, 2, 0], sizes = [8, 8, 16], strides = [1, 1, 1]} : vector<8x10x16xbf16> to vector<8x8x16xbf16>
    %64 = vector.shape_cast %63 : vector<8x8x16xbf16> to vector<64x16xbf16>
    %c8 = arith.constant 8 : index
    %c0_33 = arith.constant 0 : index
    %c0_34 = arith.constant 0 : index
    %65 = vector.load %arg3[%c8, %c0_33, %c0_34] : memref<9x16x128xbf16, #tpu.memory_space<vmem>>, vector<1x16x128xbf16>
    %66 = vector.shape_cast %65 : vector<1x16x128xbf16> to vector<16x128xbf16>
    %cst_35 = arith.constant dense<0.000000e+00> : vector<64x128xf32>
    %67 = tpu.matmul %64, %66, %cst_35 {dimension_numbers = #tpu.dot_dimension_numbers<[1], [0], [0], [1], [0, 0, 1, 1], [], []>} : vector<64x16xbf16>, vector<16x128xbf16>, vector<64x128xf32> -> vector<64x128xf32>
    %68 = arith.addf %62, %67 : vector<64x128xf32>
    %c0_36 = arith.constant 0 : index
    %c0_37 = arith.constant 0 : index
    %69 = vector.load %arg4[%c0_36, %c0_37] : memref<1x128xf32, #tpu.memory_space<vmem>>, vector<1x128xf32>
    %70 = vector.broadcast %69 : vector<1x128xf32> to vector<64x128xf32>
    %71 = arith.addf %68, %70 : vector<64x128xf32>
    %cst_38 = arith.constant 0.000000e+00 : f32
    %72 = vector.broadcast %cst_38 : f32 to vector<64x128xf32>
    %73 = arith.maximumf %71, %72 : vector<64x128xf32>
    %74 = vector.shape_cast %73 : vector<64x128xf32> to vector<1x8x8x128xf32>
    %75 = arith.truncf %74 : vector<1x8x8x128xf32> to vector<1x8x8x128xbf16>
    %c0_39 = arith.constant 0 : index
    %c0_40 = arith.constant 0 : index
    %c0_41 = arith.constant 0 : index
    %c0_42 = arith.constant 0 : index
    %76 = vector.load %arg5[%c0_39, %c0_40, %c0_41, %c0_42] : memref<1x8x8x128xbf16, #tpu.memory_space<vmem>>, vector<1x8x8x128xbf16>
    tpu.vector_store %arg5[%c0_39, %c0_40, %c0_41, %c0_42], %75 {strides = array<i32>} : memref<1x8x8x128xbf16, #tpu.memory_space<vmem>>, vector<1x8x8x128xbf16>,
    return
  }
  func.func @transform_0(%arg0: i32, %arg1: i32) -> (i32, i32, i32, i32) {
    %c0_i32 = arith.constant 0 : i32
    %c0_i32_0 = arith.constant 0 : i32
    %c0_i32_1 = arith.constant 0 : i32
    %c0_i32_2 = arith.constant 0 : i32
    return %arg0, %c0_i32, %c0_i32_0, %c0_i32_1 : i32, i32, i32, i32
  }
  func.func @transform_1(%arg0: i32, %arg1: i32) -> (i32, i32, i32) {
    %c0_i32 = arith.constant 0 : i32
    %c0_i32_0 = arith.constant 0 : i32
    %c0_i32_1 = arith.constant 0 : i32
    %c0_i32_2 = arith.constant 0 : i32
    return %c0_i32, %c0_i32_0, %c0_i32_1 : i32, i32, i32
  }
  func.func @transform_2(%arg0: i32, %arg1: i32) -> (i32, i32) {
    %c0_i32 = arith.constant 0 : i32
    %c0_i32_0 = arith.constant 0 : i32
    %c0_i32_1 = arith.constant 0 : i32
    return %c0_i32, %c0_i32_0 : i32, i32
  }
  func.func @transform_3(%arg0: i32, %arg1: i32) -> (i32, i32, i32, i32) {
    %c0_i32 = arith.constant 0 : i32
    %c0_i32_0 = arith.constant 0 : i32
    %c0_i32_1 = arith.constant 0 : i32
    return %arg0, %arg1, %c0_i32, %c0_i32_0 : i32, i32, i32, i32
  }
}

module attributes {stable_mosaic.version = 11 : i64} {
  func.func @_conv_kernel(%arg0: i32, %arg1: i32, %arg2: memref<1x10x10x32xbf16, #tpu.memory_space<vmem>>, %arg3: memref<9x32x128xbf16, #tpu.memory_space<vmem>>, %arg4: memref<1x128xf32, #tpu.memory_space<vmem>>, %arg5: memref<1x8x8x128xbf16, #tpu.memory_space<vmem>>) attributes {dimension_semantics = [#tpu.dimension_semantics<parallel>, #tpu.dimension_semantics<parallel>], iteration_bounds = array<i64: 2, 1>, scalar_prefetch = 0 : i64, scratch_operands = 0 : i64, tpu.core_type = #tpu.core_type<tc>, window_params = [{transform_indices = @transform_0, window_bounds = array<i64: 1, 10, 10, 32>}, {pipeline_mode = #tpu.pipeline_mode<synchronous>, transform_indices = @transform_1, window_bounds = array<i64: 9, 32, 128>}, {pipeline_mode = #tpu.pipeline_mode<synchronous>, transform_indices = @transform_2, window_bounds = array<i64: 1, 128>}, {transform_indices = @transform_3, window_bounds = array<i64: 1, 8, 8, 128>}]} {
    %c8_i32 = arith.constant 8 : i32
    %0 = arith.muli %arg1, %c8_i32 : i32
    %1 = tpu.assume_multiple %0, 8 : i32
    %cst = arith.constant 0.000000e+00 : f32
    %2 = vector.broadcast %cst : f32 to vector<64x128xf32>
    %c0_i32 = arith.constant 0 : i32
    %3 = arith.addi %1, %c0_i32 : i32
    %c0 = arith.constant 0 : index
    %4 = arith.index_cast %3 : i32 to index
    %c0_0 = arith.constant 0 : index
    %c0_1 = arith.constant 0 : index
    %5 = vector.load %arg2[%c0, %4, %c0_0, %c0_1] : memref<1x10x10x32xbf16, #tpu.memory_space<vmem>>, vector<1x8x10x32xbf16>
    %6 = vector.shape_cast %5 : vector<1x8x10x32xbf16> to vector<8x10x32xbf16>
    %7 = vector.extract_strided_slice %6 {offsets = [0, 0, 0], sizes = [8, 8, 32], strides = [1, 1, 1]} : vector<8x10x32xbf16> to vector<8x8x32xbf16>
    %8 = vector.shape_cast %7 : vector<8x8x32xbf16> to vector<64x32xbf16>
    %c0_2 = arith.constant 0 : index
    %c0_3 = arith.constant 0 : index
    %c0_4 = arith.constant 0 : index
    %9 = vector.load %arg3[%c0_2, %c0_3, %c0_4] : memref<9x32x128xbf16, #tpu.memory_space<vmem>>, vector<1x32x128xbf16>
    %10 = vector.shape_cast %9 : vector<1x32x128xbf16> to vector<32x128xbf16>
    %cst_5 = arith.constant dense<0.000000e+00> : vector<64x128xf32>
    %11 = tpu.matmul %8, %10, %cst_5 {dimension_numbers = #tpu.dot_dimension_numbers<[1], [0], [0], [1], [0, 0, 1, 1], [], []>} : vector<64x32xbf16>, vector<32x128xbf16>, vector<64x128xf32> -> vector<64x128xf32>
    %12 = arith.addf %2, %11 : vector<64x128xf32>
    %13 = vector.extract_strided_slice %6 {offsets = [0, 1, 0], sizes = [8, 8, 32], strides = [1, 1, 1]} : vector<8x10x32xbf16> to vector<8x8x32xbf16>
    %14 = vector.shape_cast %13 : vector<8x8x32xbf16> to vector<64x32xbf16>
    %c1 = arith.constant 1 : index
    %c0_6 = arith.constant 0 : index
    %c0_7 = arith.constant 0 : index
    %15 = vector.load %arg3[%c1, %c0_6, %c0_7] : memref<9x32x128xbf16, #tpu.memory_space<vmem>>, vector<1x32x128xbf16>
    %16 = vector.shape_cast %15 : vector<1x32x128xbf16> to vector<32x128xbf16>
    %cst_8 = arith.constant dense<0.000000e+00> : vector<64x128xf32>
    %17 = tpu.matmul %14, %16, %cst_8 {dimension_numbers = #tpu.dot_dimension_numbers<[1], [0], [0], [1], [0, 0, 1, 1], [], []>} : vector<64x32xbf16>, vector<32x128xbf16>, vector<64x128xf32> -> vector<64x128xf32>
    %18 = arith.addf %12, %17 : vector<64x128xf32>
    %19 = vector.extract_strided_slice %6 {offsets = [0, 2, 0], sizes = [8, 8, 32], strides = [1, 1, 1]} : vector<8x10x32xbf16> to vector<8x8x32xbf16>
    %20 = vector.shape_cast %19 : vector<8x8x32xbf16> to vector<64x32xbf16>
    %c2 = arith.constant 2 : index
    %c0_9 = arith.constant 0 : index
    %c0_10 = arith.constant 0 : index
    %21 = vector.load %arg3[%c2, %c0_9, %c0_10] : memref<9x32x128xbf16, #tpu.memory_space<vmem>>, vector<1x32x128xbf16>
    %22 = vector.shape_cast %21 : vector<1x32x128xbf16> to vector<32x128xbf16>
    %cst_11 = arith.constant dense<0.000000e+00> : vector<64x128xf32>
    %23 = tpu.matmul %20, %22, %cst_11 {dimension_numbers = #tpu.dot_dimension_numbers<[1], [0], [0], [1], [0, 0, 1, 1], [], []>} : vector<64x32xbf16>, vector<32x128xbf16>, vector<64x128xf32> -> vector<64x128xf32>
    %24 = arith.addf %18, %23 : vector<64x128xf32>
    %c1_i32 = arith.constant 1 : i32
    %25 = arith.addi %1, %c1_i32 : i32
    %c0_12 = arith.constant 0 : index
    %26 = arith.index_cast %25 : i32 to index
    %c0_13 = arith.constant 0 : index
    %c0_14 = arith.constant 0 : index
    %27 = vector.load %arg2[%c0_12, %26, %c0_13, %c0_14] : memref<1x10x10x32xbf16, #tpu.memory_space<vmem>>, vector<1x8x10x32xbf16>
    %28 = vector.shape_cast %27 : vector<1x8x10x32xbf16> to vector<8x10x32xbf16>
    %29 = vector.extract_strided_slice %28 {offsets = [0, 0, 0], sizes = [8, 8, 32], strides = [1, 1, 1]} : vector<8x10x32xbf16> to vector<8x8x32xbf16>
    %30 = vector.shape_cast %29 : vector<8x8x32xbf16> to vector<64x32xbf16>
    %c3 = arith.constant 3 : index
    %c0_15 = arith.constant 0 : index
    %c0_16 = arith.constant 0 : index
    %31 = vector.load %arg3[%c3, %c0_15, %c0_16] : memref<9x32x128xbf16, #tpu.memory_space<vmem>>, vector<1x32x128xbf16>
    %32 = vector.shape_cast %31 : vector<1x32x128xbf16> to vector<32x128xbf16>
    %cst_17 = arith.constant dense<0.000000e+00> : vector<64x128xf32>
    %33 = tpu.matmul %30, %32, %cst_17 {dimension_numbers = #tpu.dot_dimension_numbers<[1], [0], [0], [1], [0, 0, 1, 1], [], []>} : vector<64x32xbf16>, vector<32x128xbf16>, vector<64x128xf32> -> vector<64x128xf32>
    %34 = arith.addf %24, %33 : vector<64x128xf32>
    %35 = vector.extract_strided_slice %28 {offsets = [0, 1, 0], sizes = [8, 8, 32], strides = [1, 1, 1]} : vector<8x10x32xbf16> to vector<8x8x32xbf16>
    %36 = vector.shape_cast %35 : vector<8x8x32xbf16> to vector<64x32xbf16>
    %c4 = arith.constant 4 : index
    %c0_18 = arith.constant 0 : index
    %c0_19 = arith.constant 0 : index
    %37 = vector.load %arg3[%c4, %c0_18, %c0_19] : memref<9x32x128xbf16, #tpu.memory_space<vmem>>, vector<1x32x128xbf16>
    %38 = vector.shape_cast %37 : vector<1x32x128xbf16> to vector<32x128xbf16>
    %cst_20 = arith.constant dense<0.000000e+00> : vector<64x128xf32>
    %39 = tpu.matmul %36, %38, %cst_20 {dimension_numbers = #tpu.dot_dimension_numbers<[1], [0], [0], [1], [0, 0, 1, 1], [], []>} : vector<64x32xbf16>, vector<32x128xbf16>, vector<64x128xf32> -> vector<64x128xf32>
    %40 = arith.addf %34, %39 : vector<64x128xf32>
    %41 = vector.extract_strided_slice %28 {offsets = [0, 2, 0], sizes = [8, 8, 32], strides = [1, 1, 1]} : vector<8x10x32xbf16> to vector<8x8x32xbf16>
    %42 = vector.shape_cast %41 : vector<8x8x32xbf16> to vector<64x32xbf16>
    %c5 = arith.constant 5 : index
    %c0_21 = arith.constant 0 : index
    %c0_22 = arith.constant 0 : index
    %43 = vector.load %arg3[%c5, %c0_21, %c0_22] : memref<9x32x128xbf16, #tpu.memory_space<vmem>>, vector<1x32x128xbf16>
    %44 = vector.shape_cast %43 : vector<1x32x128xbf16> to vector<32x128xbf16>
    %cst_23 = arith.constant dense<0.000000e+00> : vector<64x128xf32>
    %45 = tpu.matmul %42, %44, %cst_23 {dimension_numbers = #tpu.dot_dimension_numbers<[1], [0], [0], [1], [0, 0, 1, 1], [], []>} : vector<64x32xbf16>, vector<32x128xbf16>, vector<64x128xf32> -> vector<64x128xf32>
    %46 = arith.addf %40, %45 : vector<64x128xf32>
    %c2_i32 = arith.constant 2 : i32
    %47 = arith.addi %1, %c2_i32 : i32
    %c0_24 = arith.constant 0 : index
    %48 = arith.index_cast %47 : i32 to index
    %c0_25 = arith.constant 0 : index
    %c0_26 = arith.constant 0 : index
    %49 = vector.load %arg2[%c0_24, %48, %c0_25, %c0_26] : memref<1x10x10x32xbf16, #tpu.memory_space<vmem>>, vector<1x8x10x32xbf16>
    %50 = vector.shape_cast %49 : vector<1x8x10x32xbf16> to vector<8x10x32xbf16>
    %51 = vector.extract_strided_slice %50 {offsets = [0, 0, 0], sizes = [8, 8, 32], strides = [1, 1, 1]} : vector<8x10x32xbf16> to vector<8x8x32xbf16>
    %52 = vector.shape_cast %51 : vector<8x8x32xbf16> to vector<64x32xbf16>
    %c6 = arith.constant 6 : index
    %c0_27 = arith.constant 0 : index
    %c0_28 = arith.constant 0 : index
    %53 = vector.load %arg3[%c6, %c0_27, %c0_28] : memref<9x32x128xbf16, #tpu.memory_space<vmem>>, vector<1x32x128xbf16>
    %54 = vector.shape_cast %53 : vector<1x32x128xbf16> to vector<32x128xbf16>
    %cst_29 = arith.constant dense<0.000000e+00> : vector<64x128xf32>
    %55 = tpu.matmul %52, %54, %cst_29 {dimension_numbers = #tpu.dot_dimension_numbers<[1], [0], [0], [1], [0, 0, 1, 1], [], []>} : vector<64x32xbf16>, vector<32x128xbf16>, vector<64x128xf32> -> vector<64x128xf32>
    %56 = arith.addf %46, %55 : vector<64x128xf32>
    %57 = vector.extract_strided_slice %50 {offsets = [0, 1, 0], sizes = [8, 8, 32], strides = [1, 1, 1]} : vector<8x10x32xbf16> to vector<8x8x32xbf16>
    %58 = vector.shape_cast %57 : vector<8x8x32xbf16> to vector<64x32xbf16>
    %c7 = arith.constant 7 : index
    %c0_30 = arith.constant 0 : index
    %c0_31 = arith.constant 0 : index
    %59 = vector.load %arg3[%c7, %c0_30, %c0_31] : memref<9x32x128xbf16, #tpu.memory_space<vmem>>, vector<1x32x128xbf16>
    %60 = vector.shape_cast %59 : vector<1x32x128xbf16> to vector<32x128xbf16>
    %cst_32 = arith.constant dense<0.000000e+00> : vector<64x128xf32>
    %61 = tpu.matmul %58, %60, %cst_32 {dimension_numbers = #tpu.dot_dimension_numbers<[1], [0], [0], [1], [0, 0, 1, 1], [], []>} : vector<64x32xbf16>, vector<32x128xbf16>, vector<64x128xf32> -> vector<64x128xf32>
    %62 = arith.addf %56, %61 : vector<64x128xf32>
    %63 = vector.extract_strided_slice %50 {offsets = [0, 2, 0], sizes = [8, 8, 32], strides = [1, 1, 1]} : vector<8x10x32xbf16> to vector<8x8x32xbf16>
    %64 = vector.shape_cast %63 : vector<8x8x32xbf16> to vector<64x32xbf16>
    %c8 = arith.constant 8 : index
    %c0_33 = arith.constant 0 : index
    %c0_34 = arith.constant 0 : index
    %65 = vector.load %arg3[%c8, %c0_33, %c0_34] : memref<9x32x128xbf16, #tpu.memory_space<vmem>>, vector<1x32x128xbf16>
    %66 = vector.shape_cast %65 : vector<1x32x128xbf16> to vector<32x128xbf16>
    %cst_35 = arith.constant dense<0.000000e+00> : vector<64x128xf32>
    %67 = tpu.matmul %64, %66, %cst_35 {dimension_numbers = #tpu.dot_dimension_numbers<[1], [0], [0], [1], [0, 0, 1, 1], [], []>} : vector<64x32xbf16>, vector<32x128xbf16>, vector<64x128xf32> -> vector<64x128xf32>
    %68 = arith.addf %62, %67 : vector<64x128xf32>
    %c0_36 = arith.constant 0 : index
    %c0_37 = arith.constant 0 : index
    %69 = vector.load %arg4[%c0_36, %c0_37] : memref<1x128xf32, #tpu.memory_space<vmem>>, vector<1x128xf32>
    %70 = vector.broadcast %69 : vector<1x128xf32> to vector<64x128xf32>
    %71 = arith.addf %68, %70 : vector<64x128xf32>
    %cst_38 = arith.constant 0.000000e+00 : f32
    %72 = vector.broadcast %cst_38 : f32 to vector<64x128xf32>
    %73 = arith.maximumf %71, %72 : vector<64x128xf32>
    %74 = vector.shape_cast %73 : vector<64x128xf32> to vector<1x8x8x128xf32>
    %75 = arith.truncf %74 : vector<1x8x8x128xf32> to vector<1x8x8x128xbf16>
    %c0_39 = arith.constant 0 : index
    %c0_40 = arith.constant 0 : index
    %c0_41 = arith.constant 0 : index
    %c0_42 = arith.constant 0 : index
    %76 = vector.load %arg5[%c0_39, %c0_40, %c0_41, %c0_42] : memref<1x8x8x128xbf16, #tpu.memory_space<vmem>>, vector<1x8x8x128xbf16>
    tpu.vector_store %arg5[%c0_39, %c0_40, %c0_41, %c0_42], %75 {strides = array<i32>} : memref<1x8x8x128xbf16, #tpu.memory_space<vmem>>, vector<1x8x8x128xbf16>,
    return
  }
  func.func @transform_0(%arg0: i32, %arg1: i32) -> (i32, i32, i32, i32) {
    %c0_i32 = arith.constant 0 : i32
    %c0_i32_0 = arith.constant 0 : i32
    %c0_i32_1 = arith.constant 0 : i32
    %c0_i32_2 = arith.constant 0 : i32
    return %arg0, %c0_i32, %c0_i32_0, %c0_i32_1 : i32, i32, i32, i32
  }
  func.func @transform_1(%arg0: i32, %arg1: i32) -> (i32, i32, i32) {
    %c0_i32 = arith.constant 0 : i32
    %c0_i32_0 = arith.constant 0 : i32
    %c0_i32_1 = arith.constant 0 : i32
    %c0_i32_2 = arith.constant 0 : i32
    return %c0_i32, %c0_i32_0, %c0_i32_1 : i32, i32, i32
  }
  func.func @transform_2(%arg0: i32, %arg1: i32) -> (i32, i32) {
    %c0_i32 = arith.constant 0 : i32
    %c0_i32_0 = arith.constant 0 : i32
    %c0_i32_1 = arith.constant 0 : i32
    return %c0_i32, %c0_i32_0 : i32, i32
  }
  func.func @transform_3(%arg0: i32, %arg1: i32) -> (i32, i32, i32, i32) {
    %c0_i32 = arith.constant 0 : i32
    %c0_i32_0 = arith.constant 0 : i32
    %c0_i32_1 = arith.constant 0 : i32
    return %arg0, %arg1, %c0_i32, %c0_i32_0 : i32, i32, i32, i32
  }
}

module attributes {stable_mosaic.version = 11 : i64} {
  func.func @_conv_kernel(%arg0: i32, %arg1: i32, %arg2: memref<1x8x8x32xbf16, #tpu.memory_space<vmem>>, %arg3: memref<1x32x128xbf16, #tpu.memory_space<vmem>>, %arg4: memref<1x128xf32, #tpu.memory_space<vmem>>, %arg5: memref<1x8x8x128xf32, #tpu.memory_space<vmem>>) attributes {dimension_semantics = [#tpu.dimension_semantics<parallel>, #tpu.dimension_semantics<parallel>], iteration_bounds = array<i64: 2, 1>, scalar_prefetch = 0 : i64, scratch_operands = 0 : i64, tpu.core_type = #tpu.core_type<tc>, window_params = [{transform_indices = @transform_0, window_bounds = array<i64: 1, 8, 8, 32>}, {pipeline_mode = #tpu.pipeline_mode<synchronous>, transform_indices = @transform_1, window_bounds = array<i64: 1, 32, 128>}, {pipeline_mode = #tpu.pipeline_mode<synchronous>, transform_indices = @transform_2, window_bounds = array<i64: 1, 128>}, {transform_indices = @transform_3, window_bounds = array<i64: 1, 8, 8, 128>}]} {
    %c8_i32 = arith.constant 8 : i32
    %0 = arith.muli %arg1, %c8_i32 : i32
    %1 = tpu.assume_multiple %0, 8 : i32
    %cst = arith.constant 0.000000e+00 : f32
    %2 = vector.broadcast %cst : f32 to vector<64x128xf32>
    %c0_i32 = arith.constant 0 : i32
    %3 = arith.addi %1, %c0_i32 : i32
    %c0 = arith.constant 0 : index
    %4 = arith.index_cast %3 : i32 to index
    %c0_0 = arith.constant 0 : index
    %c0_1 = arith.constant 0 : index
    %5 = vector.load %arg2[%c0, %4, %c0_0, %c0_1] : memref<1x8x8x32xbf16, #tpu.memory_space<vmem>>, vector<1x8x8x32xbf16>
    %6 = vector.shape_cast %5 : vector<1x8x8x32xbf16> to vector<8x8x32xbf16>
    %7 = vector.shape_cast %6 : vector<8x8x32xbf16> to vector<64x32xbf16>
    %c0_2 = arith.constant 0 : index
    %c0_3 = arith.constant 0 : index
    %c0_4 = arith.constant 0 : index
    %8 = vector.load %arg3[%c0_2, %c0_3, %c0_4] : memref<1x32x128xbf16, #tpu.memory_space<vmem>>, vector<1x32x128xbf16>
    %9 = vector.shape_cast %8 : vector<1x32x128xbf16> to vector<32x128xbf16>
    %cst_5 = arith.constant dense<0.000000e+00> : vector<64x128xf32>
    %10 = tpu.matmul %7, %9, %cst_5 {dimension_numbers = #tpu.dot_dimension_numbers<[1], [0], [0], [1], [0, 0, 1, 1], [], []>} : vector<64x32xbf16>, vector<32x128xbf16>, vector<64x128xf32> -> vector<64x128xf32>
    %11 = arith.addf %2, %10 : vector<64x128xf32>
    %c0_6 = arith.constant 0 : index
    %c0_7 = arith.constant 0 : index
    %12 = vector.load %arg4[%c0_6, %c0_7] : memref<1x128xf32, #tpu.memory_space<vmem>>, vector<1x128xf32>
    %13 = vector.broadcast %12 : vector<1x128xf32> to vector<64x128xf32>
    %14 = arith.addf %11, %13 : vector<64x128xf32>
    %15 = vector.shape_cast %14 : vector<64x128xf32> to vector<1x8x8x128xf32>
    %c0_8 = arith.constant 0 : index
    %c0_9 = arith.constant 0 : index
    %c0_10 = arith.constant 0 : index
    %c0_11 = arith.constant 0 : index
    %16 = vector.load %arg5[%c0_8, %c0_9, %c0_10, %c0_11] : memref<1x8x8x128xf32, #tpu.memory_space<vmem>>, vector<1x8x8x128xf32>
    tpu.vector_store %arg5[%c0_8, %c0_9, %c0_10, %c0_11], %15 {strides = array<i32>} : memref<1x8x8x128xf32, #tpu.memory_space<vmem>>, vector<1x8x8x128xf32>,
    return
  }
  func.func @transform_0(%arg0: i32, %arg1: i32) -> (i32, i32, i32, i32) {
    %c0_i32 = arith.constant 0 : i32
    %c0_i32_0 = arith.constant 0 : i32
    %c0_i32_1 = arith.constant 0 : i32
    %c0_i32_2 = arith.constant 0 : i32
    return %arg0, %c0_i32, %c0_i32_0, %c0_i32_1 : i32, i32, i32, i32
  }
  func.func @transform_1(%arg0: i32, %arg1: i32) -> (i32, i32, i32) {
    %c0_i32 = arith.constant 0 : i32
    %c0_i32_0 = arith.constant 0 : i32
    %c0_i32_1 = arith.constant 0 : i32
    %c0_i32_2 = arith.constant 0 : i32
    return %c0_i32, %c0_i32_0, %c0_i32_1 : i32, i32, i32
  }
  func.func @transform_2(%arg0: i32, %arg1: i32) -> (i32, i32) {
    %c0_i32 = arith.constant 0 : i32
    %c0_i32_0 = arith.constant 0 : i32
    %c0_i32_1 = arith.constant 0 : i32
    return %c0_i32, %c0_i32_0 : i32, i32
  }
  func.func @transform_3(%arg0: i32, %arg1: i32) -> (i32, i32, i32, i32) {
    %c0_i32 = arith.constant 0 : i32
    %c0_i32_0 = arith.constant 0 : i32
    %c0_i32_1 = arith.constant 0 : i32
    return %arg0, %arg1, %c0_i32, %c0_i32_0 : i32, i32, i32, i32
  }
}

module attributes {stable_mosaic.version = 11 : i64} {
  func.func @_resize_kernel(%arg0: i32, %arg1: i32, %arg2: i32, %arg3: memref<32x8xf32, #tpu.memory_space<vmem>>, %arg4: memref<32x8xf32, #tpu.memory_space<vmem>>, %arg5: memref<1x8x8x128xf32, #tpu.memory_space<vmem>>, %arg6: memref<1x32x32x128xf32, #tpu.memory_space<vmem>>) attributes {dimension_semantics = [#tpu.dimension_semantics<parallel>, #tpu.dimension_semantics<parallel>, #tpu.dimension_semantics<parallel>], iteration_bounds = array<i64: 2, 1, 1>, scalar_prefetch = 0 : i64, scratch_operands = 0 : i64, tpu.core_type = #tpu.core_type<tc>, window_params = [{transform_indices = @transform_0, window_bounds = array<i64: 32, 8>}, {pipeline_mode = #tpu.pipeline_mode<synchronous>, transform_indices = @transform_1, window_bounds = array<i64: 32, 8>}, {transform_indices = @transform_2, window_bounds = array<i64: 1, 8, 8, 128>}, {transform_indices = @transform_3, window_bounds = array<i64: 1, 32, 32, 128>}]} {
    %c0 = arith.constant 0 : index
    %c0_0 = arith.constant 0 : index
    %c0_1 = arith.constant 0 : index
    %c0_2 = arith.constant 0 : index
    %0 = vector.load %arg5[%c0, %c0_0, %c0_1, %c0_2] : memref<1x8x8x128xf32, #tpu.memory_space<vmem>>, vector<1x8x8x128xf32>
    %1 = vector.shape_cast %0 : vector<1x8x8x128xf32> to vector<8x8x128xf32>
    %2 = vector.shape_cast %1 : vector<8x8x128xf32> to vector<8x1024xf32>
    %c0_3 = arith.constant 0 : index
    %c0_4 = arith.constant 0 : index
    %3 = vector.load %arg3[%c0_3, %c0_4] : memref<32x8xf32, #tpu.memory_space<vmem>>, vector<32x8xf32>
    %cst = arith.constant dense<0.000000e+00> : vector<32x1024xf32>
    %4 = tpu.matmul %3, %2, %cst {dimension_numbers = #tpu.dot_dimension_numbers<[1], [0], [0], [1], [0, 0, 1, 1], [], []>} : vector<32x8xf32>, vector<8x1024xf32>, vector<32x1024xf32> -> vector<32x1024xf32>
    %5 = vector.shape_cast %4 : vector<32x1024xf32> to vector<32x8x128xf32>
    %c0_5 = arith.constant 0 : index
    %c0_6 = arith.constant 0 : index
    %6 = vector.load %arg4[%c0_5, %c0_6] : memref<32x8xf32, #tpu.memory_space<vmem>>, vector<32x8xf32>
    %7 = vector.shape_cast %6 : vector<32x8xf32> to vector<1x32x8xf32>
    %8 = vector.broadcast %7 : vector<1x32x8xf32> to vector<32x32x8xf32>
    "tpu.trace_start"() <{level = 10 : i32, message = "tvw,twc->tvc"}> : () -> ()
    %cst_7 = arith.constant dense<0.000000e+00> : vector<32x32x128xf32>
    %9 = tpu.matmul %8, %5, %cst_7 {dimension_numbers = #tpu.dot_dimension_numbers<[2], [1], [1], [2], [0, 0, 0, 1, 1, 2], [0], [0]>} : vector<32x32x8xf32>, vector<32x8x128xf32>, vector<32x32x128xf32> -> vector<32x32x128xf32>
    "tpu.trace_stop"() : () -> ()
    %10 = vector.shape_cast %9 : vector<32x32x128xf32> to vector<1x32x32x128xf32>
    %c0_8 = arith.constant 0 : index
    %c0_9 = arith.constant 0 : index
    %c0_10 = arith.constant 0 : index
    %c0_11 = arith.constant 0 : index
    %11 = vector.load %arg6[%c0_8, %c0_9, %c0_10, %c0_11] : memref<1x32x32x128xf32, #tpu.memory_space<vmem>>, vector<1x32x32x128xf32>
    tpu.vector_store %arg6[%c0_8, %c0_9, %c0_10, %c0_11], %10 {strides = array<i32>} : memref<1x32x32x128xf32, #tpu.memory_space<vmem>>, vector<1x32x32x128xf32>,
    return
  }
  func.func @transform_0(%arg0: i32, %arg1: i32, %arg2: i32) -> (i32, i32) {
    %c0_i32 = arith.constant 0 : i32
    %c0_i32_0 = arith.constant 0 : i32
    return %arg2, %c0_i32 : i32, i32
  }
  func.func @transform_1(%arg0: i32, %arg1: i32, %arg2: i32) -> (i32, i32) {
    %c0_i32 = arith.constant 0 : i32
    %c0_i32_0 = arith.constant 0 : i32
    %c0_i32_1 = arith.constant 0 : i32
    return %c0_i32, %c0_i32_0 : i32, i32
  }
  func.func @transform_2(%arg0: i32, %arg1: i32, %arg2: i32) -> (i32, i32, i32, i32) {
    %c0_i32 = arith.constant 0 : i32
    %c0_i32_0 = arith.constant 0 : i32
    %c0_i32_1 = arith.constant 0 : i32
    return %arg0, %c0_i32, %c0_i32_0, %arg1 : i32, i32, i32, i32
  }
  func.func @transform_3(%arg0: i32, %arg1: i32, %arg2: i32) -> (i32, i32, i32, i32) {
    %c0_i32 = arith.constant 0 : i32
    %c0_i32_0 = arith.constant 0 : i32
    return %arg0, %arg2, %c0_i32, %arg1 : i32, i32, i32, i32
  }
}

</mosaic_0001>

<bundles_post_ra>
// kernel: deeplab3plus_forward.12
= control target key start
LH: loop header
LB: loop body
LE: loop exit
PB: predicated region body
PF: predicated region fallthrough
CT: control target
= control target key end

     0   :  { %s562_s12 = smov 0   ;;  %s564_s13 = smov 0   ;;  %s608_s0 = inlined_call_operand.vmem [shape: bf16[2,8,8,16], index: 0, kind: input, shape index: {}]   ;;  %s609_s1 = inlined_call_operand.vmem [shape: bf16[1,16,128], index: 1, kind: input, shape index: {}]   ;;  %s610_s2 = inlined_call_operand.vmem [shape: f32[1,128], index: 2, kind: input, shape index: {}]   ;;  %s611_s3 = inlined_call_operand.vmem [shape: bf16[2,8,8,128], index: 3, kind: output, shape index: {}]  }
   0x1   :  { %s566_s14 = smov 0  }
   0x2 LB: > { %s25_s15 = sadd.s32 1, %s536_s13  ;;  %p430_p0 = scmp.ge.s32.totalorder %s540_s14, 1  ;;  %s540_s14 = sphi %s566_s14, %s13_s14   ;;  %s536_s13 = sphi %s564_s13, %s613_s13   ;;  %s532_s12 = sphi %s562_s12, %s612_s12  }
   0x3   : > { %p27_p1 = scmp.ge.s32.totalorder %s25_s15, 2  ;;  %p151_p2 = scmp.lt.s32.totalorder %s540_s14, 3 }
   0x5   : > { %s615_s15 = smov (%p27_p1, %s25_s15), 0  ;;  %p152_p3 = pnand %p430_p0, %p151_p2 }
   0x6   : > { %p179_p4 = scmp.lt.s32.totalorder (!%p152_p3), %s532_s12, 1 }
   0x7   : > { %155 = sbr.rel (%p152_p3) target bundleno = 223 (0xdf), region = 32 }
   0xc   : > { %v513_v0 = vld [vmem:[%s609_s1] sm:$0xff]   ;;  %s617_s12 = smov (!%p179_p4, %s532_s12), 1  ;;  %vm241_vm0 = vcmask 130048  }
   0xd   : > { %477 = vmatprep.subr.bf16.mxu0 %v513_v0  ;;  %487 = vmatprep.subr.bf16.mxu1 %v513_v0  ;;  %s447_s18 = sshll.u32 %s617_s12, 5  ;;  %v435_v6 = vld [vmem:[%s610_s2] ss:$0 sm:$0xff] }
   0xe   : > { %478 = vmatpush3.bf16.msra.mxu0 %v513_v0  ;;  %488 = vmatpush3.bf16.msra.mxu1 %v513_v0  ;;  %s183_s21 = scalar_lea.vmem %s608_s0, %s447_s18  ;;  %s192_s26 = scalar_lea.vmem %s611_s3, %s447_s18 }
   0xf   : > { %v514_v1 = vld [vmem:[%s183_s21] sm:$0xff]   ;;  %v515_v2 = vld [vmem:[%s183_s21 + $0x10] sm:$0xff]   ;;  %v516_v3 = vld [vmem:[%s183_s21 + $0x8] sm:$0xff]  }
  0x10   : > { %479 = vmatprep.mubr.msk.bf16.mxu0 %vm241_vm0, %v514_v1  ;;  %483 = vmatprep.mubr.msk.bf16.mxu1 %vm241_vm0, %v515_v2  ;;  %v517_v4 = vld [vmem:[%s183_s21 + $0x18] sm:$0xff]  }
  0x11   : > { %480 = vmatmul.mubr.msk.bf16.vlgmr.msra.gmra.mxu0 %vm241_vm0, %v516_v3  ;;  %484 = vmatmul.mubr.msk.bf16.vlgmr.msra.gmra.mxu1 %vm241_vm0, %v517_v4 }
  0xd1   : > { %v481_v5 = vpop.f32.mrf.mxu0  ;;  %v485_v7 = vpop.f32.mrf.mxu1 }
  0xd2   : > { %v297_v9 = vadd.f32 %v481_v5, %v435_v6  ;;  %v313_v11 = vadd.f32 %v485_v7, %v435_v6 }
  0xd3   : > { %v288_v8 = vpop.f32.mrf.mxu0  ;;  %v304_v10 = vpop.f32.mrf.mxu1 }
  0xd4   : > { %v289_v13 = vadd.f32 %v435_v6, %v288_v8  ;;  %v305_v16 = vadd.f32 %v435_v6, %v304_v10  ;;  %v321_v19 = vmax.f32 %v297_v9, 0.0  ;;  %v325_v23 = vmax.f32 %v313_v11, 0.0 }
  0xd5   : > { %v482_v12 = vpop.f32.mrf.mxu0  ;;  %v486_v15 = vpop.f32.mrf.mxu1 }
  0xd6   : > { %v300_v14 = vadd.f32 %v482_v12, %v435_v6  ;;  %v316_v17 = vadd.f32 %v486_v15, %v435_v6  ;;  %v319_v26 = vmax.f32 %v289_v13, 0.0  ;;  %v323_v29 = vmax.f32 %v305_v16, 0.0 }
  0xd7   : > { %v291_v18 = vpop.f32.mrf.mxu0  ;;  %v307_v22 = vpop.f32.mrf.mxu1 }
  0xd8   : > { %v322_v20 = vmax.f32 %v300_v14, 0.0  ;;  %v292_v21 = vadd.f32 %v435_v6, %v291_v18  ;;  %v326_v24 = vmax.f32 %v316_v17, 0.0  ;;  %v308_v25 = vadd.f32 %v435_v6, %v307_v22 }
  0xda   : > { %v457_v27 = vpack.c.bf16 %v322_v20, %v321_v19  ;;  %v320_v28 = vmax.f32 %v292_v21, 0.0  ;;  %v467_v30 = vpack.c.bf16 %v326_v24, %v325_v23  ;;  %v324_v31 = vmax.f32 %v308_v25, 0.0 }
  0xdc   : > { %469 = vst [vmem:[%s192_s26 + $0x8] sm:$0xff] %v457_v27   ;;  %v452_v32 = vpack.c.bf16 %v320_v28, %v319_v26  ;;  %471 = vst [vmem:[%s192_s26 + $0x18] sm:$0xff] %v467_v30   ;;  %v462_v33 = vpack.c.bf16 %v324_v31, %v323_v29 }
  0xde   : > { %453 = vst [vmem:[%s192_s26] sm:$0xff] %v452_v32   ;;  %470 = vst [vmem:[%s192_s26 + $0x10] sm:$0xff] %v462_v33  }
  0xdf PF: > { %s13_s14 = sadd.s32 1, %s540_s14   ;;  %s612_s12 = smov %s536_s13 }
  0xe0   : > { %p10_p5 = scmp.ge.s32.totalorder %s13_s14, 4   ;;  %s613_s13 = smov %s615_s15 }
  0xe2   :  { %12 = sbr.rel (!%p10_p5) target bundleno = 2 (0x2), region = 63 }

// kernel: deeplab3plus_forward.9
= control target key start
LH: loop header
LB: loop body
LE: loop exit
PB: predicated region body
PF: predicated region fallthrough
CT: control target
= control target key end

     0   :  { %s2494_s12 = smov 0   ;;  %s2496_s13 = smov 0   ;;  %s3119_s0 = inlined_call_operand.vmem [shape: bf16[2,10,10,48], index: 0, kind: input, shape index: {}]   ;;  %s3120_s1 = inlined_call_operand.vmem [shape: bf16[9,48,128], index: 1, kind: input, shape index: {}]   ;;  %s3121_s2 = inlined_call_operand.vmem [shape: f32[1,128], index: 2, kind: input, shape index: {}]   ;;  %s3122_s3 = inlined_call_operand.vmem [shape: bf16[2,8,8,128], index: 3, kind: output, shape index: {}]  }
   0x1   :  { %s2498_s14 = smov 0  }
   0x2 LB: > { %s25_s15 = sadd.s32 1, %s2468_s13  ;;  %p1957_p0 = scmp.ge.s32.totalorder %s2472_s14, 1  ;;  %s2472_s14 = sphi %s2498_s14, %s13_s14   ;;  %s2468_s13 = sphi %s2496_s13, %s3134_s13   ;;  %s2464_s12 = sphi %s2494_s12, %s3133_s12  }
   0x3   : > { %p27_p1 = scmp.ge.s32.totalorder %s25_s15, 2  ;;  %p151_p2 = scmp.lt.s32.totalorder %s2472_s14, 3 }
   0x5   : > { %s3136_s15 = smov (%p27_p1, %s25_s15), 0  ;;  %p152_p3 = pnand %p1957_p0, %p151_p2 }
   0x7   : > { %155 = sbr.rel (%p152_p3) target bundleno = 315 (0x13b), region = 32 }
   0xc   : > { %v2411_v0 = vld [vmem:[%s3120_s1 + $0x10] sm:$0xff]   ;;  %p179_p4 = scmp.lt.s32.totalorder %s2464_s12, 1  ;;  %v2412_v1 = vld [vmem:[%s3120_s1 + $0x28] sm:$0xff]   ;;  %v2414_v3 = vld [vmem:[%s3120_s1 + $0x20] sm:$0xff]   ;;  %vm373_vm0 = vcmask 392192   ;;  %vm574_vm3 = vcmask 1042432  }
   0xd   : > { %2268 = vmatprep.subr.bf16.mxu1 %v2411_v0  ;;  %v2413_v2 = vld [vmem:[%s3120_s1 + $0x8] sm:$0xff]   ;;  %2254 = vmatprep.subr.bf16.mxu0 %v2412_v1  ;;  %v2415_v4 = vld [vmem:[%s3120_s1] sm:$0xff]   ;;  %v2417_v5 = vld [vmem:[%s3120_s1 + $0x18] sm:$0xff]   ;;  %vm221_vm1 = vsmask.f32 3328  ;;  %vm575_vm4 = vcmask 1046532  }
   0xe   : > { %s3138_s12 = smov (!%p179_p4, %s2464_s12), 1  ;;  %2269 = vmatpush3.bf16.msra.mxu1 %v2411_v0  ;;  %2255 = vmatpush3.bf16.msra.mxu0 %v2412_v1  ;;  %vm222_vm2 = vsmask.f32 7440  ;;  %v2565_v19 = vld [vmem:[%s3120_s1 + $0x40] sm:$0xff]   ;;  %v2420_v25 = vld [vmem:[%s3120_s1 + $0x58] sm:$0xff]   ;;  %v2423_v44 = vld [vmem:[%s3120_s1 + $0x50] sm:$0xff]  }
   0xf   : > { %2270 = vmatprep.subr.bf16.mxu1 %v2413_v2  ;;  %s2386_s26 = smul.u32 80, %s3138_s12  ;;  %2256 = vmatprep.subr.bf16.mxu0 %v2414_v3  ;;  %vm2592_vm5 = vmor %vm221_vm1, %vm222_vm2  ;;  %s2167_s30 = sshll.u32 %s3138_s12, 5 }
  0x10   : > { %vm2643_vm6 = vmor %vm574_vm3, %vm575_vm4  ;;  %s192_s7 = scalar_lea.vmem %s3122_s3, %s2167_s30 }
  0x11   : > { %s2536_s4 = scalar_lea.vmem %s3119_s0, %s2386_s26 }
  0x12   : > { %2271 = vmatpush3.bf16.msra.mxu1 %v2413_v2  ;;  %v2539_v6 = vld [vmem:[%s2536_s4] sm:$0xf]  ;;  %v2542_v7 = vld [vmem:[%s2536_s4 + $0x8] sm:$0xf]  ;;  %v2545_v8 = vld [vmem:[%s2536_s4 + $0x10] sm:$0xf]  ;;  %2257 = vmatpush3.bf16.msra.mxu0 %v2414_v3 }
  0x13   : > { %2272 = vmatprep.subr.bf16.mxu1 %v2415_v4  ;;  %v225_v9 = vshrl.u32 %v2539_v6, 16  ;;  %v228_v10 = vshll.u32 %v2539_v6, 16  ;;  %v239_v11 = vshrl.u32 %v2542_v7, 16  ;;  %v242_v12 = vshll.u32 %v2542_v7, 16  ;;  %v2552_v13 = vld [vmem:[%s2536_s4 + $0x18] sm:$0xf]  ;;  %2258 = vmatprep.subr.bf16.mxu0 %v2417_v5 }
  0x14   : > { %v1978_v14 = vcombine.low %v2539_v6, %v2542_v7  ;;  %v1989_v15 = vrot.slane %v2539_v6, 9  ;;  %v1990_v16 = vrot.slane %v2542_v7, 9  ;;  %v253_v17 = vshrl.u32 %v2545_v8, 16  ;;  %v2560_v18 = vld [vmem:[%s2536_s4 + $0x4] sm:$0x1] }
  0x15   : > { %v256_v20 = vshll.u32 %v2545_v8, 16  ;;  %v267_v21 = vshrl.u32 %v2552_v13, 16  ;;  %v270_v22 = vshll.u32 %v2552_v13, 16  ;;  %v1979_v23 = vcombine.low %v2545_v8, %v2552_v13  ;;  %v2573_v24 = vld [vmem:[%s2536_s4 + $0xc] sm:$0x1] }
  0x16   : > { %2273 = vmatpush3.bf16.msra.mxu1 %v2415_v4  ;;  %2274 = vmatprep.mubr.msk.bf16.mxu1 %vm373_vm0, %v1978_v14  ;;  %v1991_v26 = vrot.slane %v2545_v8, 9  ;;  %v1992_v27 = vrot.slane %v2552_v13, 9  ;;  %v227_v28 = vrot.slane %v225_v9, 4  ;;  %v230_v29 = vrot.slane %v228_v10, 5  ;;  %v2587_v37 = vld [vmem:[%s2536_s4 + $0x14] sm:$0x1] }
  0x17   : > { %2259 = vmatpush3.bf16.msra.mxu0 %v2417_v5  ;;  %v234_v30 = vshll.u32 %v2560_v18, 16  ;;  %v241_v31 = vrot.slane %v239_v11, 4  ;;  %v244_v32 = vrot.slane %v242_v12, 5  ;;  %v248_v33 = vshll.u32 %v2573_v24, 16  ;;  %2296 = vmatprep.subr.bf16.mxu1 %v2420_v25  ;;  %v2597_v42 = vld [vmem:[%s2536_s4 + $0x1c] sm:$0x1] }
  0x18   : > { %v231_v34 = vor.u32 %v230_v29, %v227_v28  ;;  %v579_v35 = vrot.slane %v2560_v18, 5  ;;  %v583_v36 = vrot.slane %v2573_v24, 5  ;;  %2282 = vmatprep.subr.bf16.mxu0 %v2565_v19  ;;  %v255_v43 = vrot.slane %v253_v17, 4  ;;  %v2604_v49 = vld [vmem:[%s2536_s4 + $0x20] sm:$0xf]  ;;  %v2425_v12 = vld [vmem:[%s3120_s1 + $0x48] sm:$0xff]  }
  0x19   : > { %2275 = vmatmul.mubr.msk.bf16.vlgmr.msra.gmra.mxu1 %vm373_vm0, %v1979_v23  ;;  %v236_v39 = vrot.slane %v234_v30, 5  ;;  %v245_v40 = vor.u32 %v244_v32, %v241_v31  ;;  %v250_v41 = vrot.slane %v248_v33, 5  ;;  %v258_v46 = vrot.slane %v256_v20, 5  ;;  %v2609_v54 = vld [vmem:[%s2536_s4 + $0x28] sm:$0xf]  ;;  %v2424_v33 = vld [vmem:[%s3120_s1 + $0x38] sm:$0xff]  }
  0x1a   : > { %v232_v45 = vrot.slane %v231_v34, 4  ;;  %v262_v47 = vshll.u32 %v2587_v37, 16  ;;  %v269_v48 = vrot.slane %v267_v21, 4  ;;  %2297 = vmatpush3.bf16.msra.mxu1 %v2420_v25  ;;  %v272_v51 = vrot.slane %v270_v22, 5  ;;  %v2615_v59 = vld [vmem:[%s2536_s4 + $0x30] sm:$0xf] }
  0x1b   : > { %v246_v50 = vrot.slane %v245_v40, 4  ;;  %v276_v52 = vshll.u32 %v2597_v42, 16  ;;  %v587_v53 = vrot.slane %v2587_v37, 5  ;;  %2298 = vmatprep.subr.bf16.mxu1 %v2423_v44  ;;  %v259_v56 = vor.u32 %v258_v46, %v255_v43  ;;  %v2618_v60 = vld [vmem:[%s2536_s4 + $0x38] sm:$0xf] }
  0x1c   : > { %v237_v55 = vsel %vm2592_vm5, %v232_v45, %v236_v39  ;;  %v264_v57 = vrot.slane %v262_v47, 5  ;;  %v591_v58 = vrot.slane %v2597_v42, 5  ;;  %v273_v62 = vor.u32 %v272_v51, %v269_v48  ;;  %v2639_v22 = vld [vmem:[%s2536_s4 + $0x24] sm:$0x1]  ;;  %v2653_v29 = vld [vmem:[%s2536_s4 + $0x2c] sm:$0x1] }
  0x1d   : > { %v251_v61 = vsel %vm2592_vm5, %v246_v50, %v250_v41  ;;  %v278_v63 = vrot.slane %v276_v52, 5  ;;  %v281_v0 = vshrl.u32 %v2604_v49, 16  ;;  %v260_v2 = vrot.slane %v259_v56, 4  ;;  %v2665_v45 = vld [vmem:[%s2536_s4 + $0x3c] sm:$0x1] }
  0x1e   : > { %v1967_v1 = vcombine.low %v237_v55, %v251_v61  ;;  %v284_v3 = vshll.u32 %v2604_v49, 16  ;;  %v295_v4 = vshrl.u32 %v2609_v54, 16  ;;  %2299 = vmatpush3.bf16.msra.mxu1 %v2423_v44  ;;  %v274_v5 = vrot.slane %v273_v62, 4  ;;  %v2662_v44 = vld [vmem:[%s2536_s4 + $0x34] sm:$0x1]  ;;  %v2430_v55 = vld [vmem:[%s3120_s1 + $0x88] sm:$0xff]  }
  0x1f   : > { %v298_v9 = vshll.u32 %v2609_v54, 16  ;;  %v1980_v10 = vcombine.low %v2604_v49, %v2609_v54  ;;  %v309_v11 = vshrl.u32 %v2615_v59, 16  ;;  %v265_v14 = vsel %vm2592_vm5, %v260_v2, %v264_v57  ;;  %2300 = vmatprep.subr.bf16.mxu1 %v2425_v12  ;;  %v2691_v2 = vld [vmem:[%s2536_s4 + $0x10] sm:$0xf] }
  0x20   : > { %2260 = vmatprep.mubr.msk.bf16.mxu0 %vm373_vm0, %v1967_v1  ;;  %v312_v17 = vshll.u32 %v2615_v59, 16  ;;  %v323_v20 = vshrl.u32 %v2618_v60, 16  ;;  %v326_v21 = vshll.u32 %v2618_v60, 16  ;;  %v279_v25 = vsel %vm2592_vm5, %v274_v5, %v278_v63  ;;  %v2426_v63 = vld [vmem:[%s3120_s1 + $0x30] sm:$0xff]   ;;  %v2696_v5 = vld [vmem:[%s2536_s4 + $0x18] sm:$0xf] }
  0x21   : > { %2278 = vmatprep.mubr.msk.bf16.mxu1 %vm373_vm0, %v1980_v10  ;;  %v1981_v28 = vcombine.low %v2615_v59, %v2618_v60  ;;  %v283_v30 = vrot.slane %v281_v0, 4  ;;  %v286_v31 = vrot.slane %v284_v3, 5  ;;  %v1968_v32 = vcombine.low %v265_v14, %v279_v25  ;;  %v2686_v0 = vld [vmem:[%s2536_s4 + $0x8] sm:$0xf]  ;;  %v2703_v14 = vld [vmem:[%s2536_s4 + $0x20] sm:$0xf] }
  0x22   : > { %v290_v34 = vshll.u32 %v2639_v22, 16  ;;  %v297_v39 = vrot.slane %v295_v4, 4  ;;  %v300_v40 = vrot.slane %v298_v9, 5  ;;  %2301 = vmatpush3.bf16.msra.mxu1 %v2425_v12  ;;  %v304_v43 = vshll.u32 %v2653_v29, 16 }
  0x23   : > { %2279 = vmatmul.mubr.msk.bf16.gmra.mxu1 %vm373_vm0, %v1981_v28  ;;  %v287_v41 = vor.u32 %v286_v31, %v283_v30  ;;  %v311_v46 = vrot.slane %v309_v11, 4  ;;  %v2673_v47 = vsel %vm2643_vm6, %v1989_v15, %v579_v35  ;;  %2261 = vmatmul.mubr.msk.bf16.vlgmr.msra.gmra.mxu0 %vm373_vm0, %v1968_v32  ;;  %v314_v51 = vrot.slane %v312_v17, 5  ;;  %v2710_v28 = vld [vmem:[%s3120_s1 + $0x70] sm:$0xff]  }
  0x24   : > { %v292_v48 = vrot.slane %v290_v34, 5  ;;  %v301_v50 = vor.u32 %v300_v40, %v297_v39  ;;  %v318_v52 = vshll.u32 %v2662_v44, 16  ;;  %2283 = vmatpush3.bf16.msra.mxu0 %v2565_v19  ;;  %v306_v18 = vrot.slane %v304_v43, 5  ;;  %2324 = vmatprep.subr.bf16.mxu1 %v2430_v55  ;;  %v2433_v34 = vld [vmem:[%s3120_s1 + $0x80] sm:$0xff]  }
  0x25   : > { %v288_v6 = vrot.slane %v287_v41, 4  ;;  %v325_v15 = vrot.slane %v323_v20, 4  ;;  %v328_v35 = vrot.slane %v326_v21, 5  ;;  %2284 = vmatprep.subr.bf16.mxu0 %v2424_v33  ;;  %v315_v57 = vor.u32 %v314_v51, %v311_v46  ;;  %v2734_v46 = vld [vmem:[%s2536_s4 + $0x28] sm:$0xf] }
  0x26   : > { %v302_v56 = vrot.slane %v301_v50, 4  ;;  %v320_v61 = vrot.slane %v318_v52, 5  ;;  %v332_v62 = vshll.u32 %v2665_v45, 16  ;;  %v882_v3 = vshrl.u32 %v2686_v0, 16  ;;  %v2742_v52 = vld [vmem:[%s2536_s4 + $0x38] sm:$0xf] }
  0x27   : > { %v293_v19 = vsel %vm2592_vm5, %v288_v6, %v292_v48  ;;  %v329_v1 = vor.u32 %v328_v35, %v325_v15  ;;  %v885_v4 = vshll.u32 %v2686_v0, 16  ;;  %v316_v10 = vrot.slane %v315_v57, 4  ;;  %v2737_v48 = vld [vmem:[%s2536_s4 + $0x30] sm:$0xf]  ;;  %v2745_v6 = vld [vmem:[%s2536_s4 + $0x40] sm:$0xf] }
  0x28   : > { %v307_v9 = vsel %vm2592_vm5, %v302_v56, %v306_v18  ;;  %v334_v11 = vrot.slane %v332_v62, 5  ;;  %v2036_v12 = vcombine.low %v2686_v0, %v2691_v2  ;;  %2285 = vmatpush3.bf16.msra.mxu0 %v2424_v33  ;;  %v896_v21 = vshrl.u32 %v2691_v2, 16 }
  0x29   : > { %v1969_v17 = vcombine.low %v293_v19, %v307_v9  ;;  %v330_v20 = vrot.slane %v329_v1, 4  ;;  %v899_v25 = vshll.u32 %v2691_v2, 16  ;;  %v321_v30 = vsel %vm2592_vm5, %v316_v10, %v320_v61  ;;  %2286 = vmatprep.subr.bf16.mxu0 %v2426_v63  ;;  %v2019_v1 = vld [vmem:[%s2536_s4 + $0x1c] sm:$0x1]  ;;  %v2021_v9 = vld [vmem:[%s2536_s4 + $0x24] sm:$0x1] }
  0x2a   : > { %2302 = vmatprep.mubr.msk.bf16.mxu1 %vm373_vm0, %v2036_v12  ;;  %v2037_v31 = vcombine.low %v2696_v5, %v2703_v14  ;;  %v910_v32 = vshrl.u32 %v2696_v5, 16  ;;  %v913_v33 = vshll.u32 %v2696_v5, 16  ;;  %v924_v40 = vshrl.u32 %v2703_v14, 16 }
  0x2b   : > { %2264 = vmatprep.mubr.msk.bf16.mxu0 %vm373_vm0, %v1969_v17  ;;  %v335_v39 = vsel %vm2592_vm5, %v330_v20, %v334_v11  ;;  %v927_v41 = vshll.u32 %v2703_v14, 16  ;;  %v584_v43 = vsel %vm2643_vm6, %v1990_v16, %v583_v36  ;;  %v588_v7 = vsel %vm2643_vm6, %v1991_v26, %v587_v53  ;;  %v2438_v20 = vld [vmem:[%s3120_s1 + $0xb8] sm:$0xff]  }
  0x2c   : > { %v1970_v50 = vcombine.low %v321_v30, %v335_v39  ;;  %2303 = vmatmul.mubr.msk.bf16.vlgmr.msra.gmra.mxu1 %vm373_vm0, %v2037_v31  ;;  %v2003_v51 = vcombine.low %v2673_v47, %v584_v43  ;;  %2287 = vmatpush3.bf16.msra.mxu0 %v2426_v63  ;;  %v592_v16 = vsel %vm2643_vm6, %v1992_v27, %v591_v58  ;;  %v938_v36 = vshrl.u32 %v2734_v46, 16  ;;  %v2435_v27 = vld [vmem:[%s3120_s1 + $0x78] sm:$0xff]   ;;  %v2434_v63 = vld [vmem:[%s3120_s1 + $0x68] sm:$0xff]  }
  0x2d   : > { %2325 = vmatpush3.bf16.msra.mxu1 %v2430_v55  ;;  %v2038_v24 = vcombine.low %v2734_v46, %v2737_v48  ;;  %2310 = vmatprep.subr.bf16.mxu0 %v2710_v28  ;;  %v941_v8 = vshll.u32 %v2734_v46, 16  ;;  %v952_v26 = vshrl.u32 %v2737_v48, 16  ;;  %v955_v37 = vshll.u32 %v2737_v48, 16 }
  0x2e   : > { %2265 = vmatmul.mubr.msk.bf16.gmra.mxu0 %vm373_vm0, %v1970_v50  ;;  %v2039_v13 = vcombine.low %v2742_v52, %v2745_v6  ;;  %v966_v42 = vshrl.u32 %v2742_v52, 16  ;;  %v969_v53 = vshll.u32 %v2742_v52, 16  ;;  %v980_v58 = vshrl.u32 %v2745_v6, 16  ;;  %2326 = vmatprep.subr.bf16.mxu1 %v2433_v34 }
  0x2f   : > { %2288 = vmatprep.mubr.msk.bf16.mxu0 %vm373_vm0, %v2003_v51  ;;  %2306 = vmatprep.mubr.msk.bf16.mxu1 %vm373_vm0, %v2038_v24  ;;  %v1993_v47 = vrot.slane %v2604_v49, 9  ;;  %v595_v55 = vrot.slane %v2639_v22, 5  ;;  %v1994_v18 = vrot.slane %v2609_v54, 9  ;;  %v599_v15 = vrot.slane %v2653_v29, 5  ;;  %v2017_v29 = vld [vmem:[%s2536_s4 + $0x14] sm:$0x1] }
  0x30   : > { %v1995_v35 = vrot.slane %v2615_v59, 9  ;;  %v983_v56 = vshll.u32 %v2745_v6, 16  ;;  %v603_v57 = vrot.slane %v2662_v44, 5  ;;  %v1996_v61 = vrot.slane %v2618_v60, 9  ;;  %v2015_v59 = vld [vmem:[%s2536_s4 + $0xc] sm:$0x1] }
  0x31   : > { %2327 = vmatpush3.bf16.msra.mxu1 %v2433_v34  ;;  %v607_v49 = vrot.slane %v2665_v45, 5  ;;  %v2004_v62 = vcombine.low %v588_v7, %v592_v16  ;;  %v596_v22 = vsel %vm2643_vm6, %v1993_v47, %v595_v55  ;;  %v600_v54 = vsel %vm2643_vm6, %v1994_v18, %v599_v15  ;;  %v2838_v55 = vld [vmem:[%s2536_s4 + $0x2c] sm:$0x1] }
  0x32   : > { %2328 = vmatprep.subr.bf16.mxu1 %v2435_v27  ;;  %v2005_v19 = vcombine.low %v596_v22, %v600_v54  ;;  %v2797_v60 = vsel %vm2643_vm6, %v1995_v35, %v603_v57  ;;  %v2064_v45 = vrot.slane %v2686_v0, 9  ;;  %v1125_v11 = vrot.slane %v2015_v59, 5  ;;  %v2436_v0 = vld [vmem:[%s3120_s1 + $0x60] sm:$0xff]  }
  0x33   : > { %v2801_v44 = vsel %vm2643_vm6, %v1996_v61, %v607_v49  ;;  %v2065_v12 = vrot.slane %v2691_v2, 9  ;;  %v1129_v17 = vrot.slane %v2017_v29, 5  ;;  %v2066_v30 = vrot.slane %v2696_v5, 9  ;;  %v2846_v61 = vld [vmem:[%s2536_s4 + $0x34] sm:$0x1] }
  0x34   : > { %2307 = vmatmul.mubr.msk.bf16.gmra.mxu1 %vm373_vm0, %v2039_v13  ;;  %v2006_v10 = vcombine.low %v2797_v60, %v2801_v44  ;;  %v1133_v31 = vrot.slane %v2019_v1, 5  ;;  %v2067_v34 = vrot.slane %v2703_v14, 9  ;;  %v1137_v39 = vrot.slane %v2021_v9, 5 }
  0x35   : > { %2329 = vmatpush3.bf16.msra.mxu1 %v2435_v27  ;;  %v1126_v43 = vsel %vm2643_vm6, %v2064_v45, %v1125_v11  ;;  %v1130_v50 = vsel %vm2643_vm6, %v2065_v12, %v1129_v17  ;;  %v884_v51 = vrot.slane %v882_v3, 4  ;;  %v887_v7 = vrot.slane %v885_v4, 5  ;;  %v2441_v17 = vld [vmem:[%s3120_s1 + $0xa8] sm:$0xff]  }
  0x36   : > { %2289 = vmatmul.mubr.msk.bf16.vlgmr.msra.gmra.mxu0 %vm373_vm0, %v2004_v62  ;;  %2352 = vmatprep.subr.bf16.mxu1 %v2438_v20  ;;  %v2078_v16 = vcombine.low %v1126_v43, %v1130_v50  ;;  %v1134_v24 = vsel %vm2643_vm6, %v2066_v30, %v1133_v31  ;;  %v1138_v13 = vsel %vm2643_vm6, %v2067_v34, %v1137_v39  ;;  %v891_v27 = vshll.u32 %v2015_v59, 16  ;;  %v2439_v62 = vld [vmem:[%s3120_s1 + $0xb0] sm:$0xff]   ;;  %v2859_v59 = vld [vmem:[%s2536_s4 + $0x44] sm:$0x1] }
  0x37   : > { %2311 = vmatpush3.bf16.msra.mxu0 %v2710_v28  ;;  %2292 = vmatprep.mubr.msk.bf16.mxu0 %vm373_vm0, %v2005_v19  ;;  %v2079_v3 = vcombine.low %v1134_v24, %v1138_v13  ;;  %v888_v4 = vor.u32 %v887_v7, %v884_v51  ;;  %v898_v28 = vrot.slane %v896_v21, 4  ;;  %v901_v47 = vrot.slane %v899_v25, 5 }
  0x38   : > { %2312 = vmatprep.subr.bf16.mxu0 %v2434_v63  ;;  %2330 = vmatprep.mubr.msk.bf16.mxu1 %vm373_vm0, %v2078_v16  ;;  %v893_v18 = vrot.slane %v891_v27, 5  ;;  %v905_v15 = vshll.u32 %v2017_v29, 16  ;;  %v912_v35 = vrot.slane %v910_v32, 4  ;;  %v915_v57 = vrot.slane %v913_v33, 5  ;;  %v2856_v33 = vld [vmem:[%s2536_s4 + $0x3c] sm:$0x1] }
  0x39   : > { %v889_v21 = vrot.slane %v888_v4, 4  ;;  %v902_v49 = vor.u32 %v901_v47, %v898_v28  ;;  %v919_v2 = vshll.u32 %v2019_v1, 16  ;;  %v926_v25 = vrot.slane %v924_v40, 4  ;;  %v2908_v47 = vld [vmem:[%s2536_s4 + $0x10] sm:$0xf] }
  0x3a   : > { %v907_v22 = vrot.slane %v905_v15, 5  ;;  %v916_v54 = vor.u32 %v915_v57, %v912_v35  ;;  %v929_v32 = vrot.slane %v927_v41, 5  ;;  %v933_v5 = vshll.u32 %v2021_v9, 16 }
  0x3b   : > { %2313 = vmatpush3.bf16.msra.mxu0 %v2434_v63  ;;  %v894_v40 = vsel %vm2592_vm5, %v889_v21, %v893_v18  ;;  %v903_v29 = vrot.slane %v902_v49, 4  ;;  %v2437_v63 = vld [vmem:[%s3120_s1 + $0xa0] sm:$0xff]   ;;  %v921_v19 = vrot.slane %v919_v2, 5  ;;  %v2068_v14 = vrot.slane %v2734_v46, 9  ;;  %v2440_v46 = vld [vmem:[%s3120_s1 + $0x98] sm:$0xff]  }
  0x3c   : > { %2314 = vmatprep.subr.bf16.mxu0 %v2436_v0  ;;  %2331 = vmatmul.mubr.msk.bf16.vlgmr.msra.gmra.mxu1 %vm373_vm0, %v2079_v3  ;;  %v917_v41 = vrot.slane %v916_v54, 4  ;;  %v930_v60 = vor.u32 %v929_v32, %v926_v25  ;;  %v935_v44 = vrot.slane %v933_v5, 5  ;;  %v1141_v45 = vrot.slane %v2838_v55, 5  ;;  %v2942_v5 = vld [vmem:[%s2536_s4 + $0x1c] sm:$0x1] }
  0x3d   : > { %2353 = vmatpush3.bf16.msra.mxu1 %v2438_v20  ;;  %v908_v1 = vsel %vm2592_vm5, %v903_v29, %v907_v22  ;;  %v2069_v9 = vrot.slane %v2737_v48, 9  ;;  %v1145_v11 = vrot.slane %v2846_v61, 5  ;;  %v2070_v12 = vrot.slane %v2742_v52, 9  ;;  %v2924_v48 = vld [vmem:[%s2536_s4 + $0x18] sm:$0xf] }
  0x3e   : > { %2293 = vmatmul.mubr.msk.bf16.gmra.mxu0 %vm373_vm0, %v2006_v10  ;;  %2354 = vmatprep.subr.bf16.mxu1 %v2439_v62  ;;  %v2053_v20 = vcombine.low %v894_v40, %v908_v1  ;;  %v922_v30 = vsel %vm2592_vm5, %v917_v41, %v921_v19  ;;  %v931_v10 = vrot.slane %v930_v60, 4  ;;  %v1142_v31 = vsel %vm2643_vm6, %v2068_v14, %v1141_v45  ;;  %v2950_v19 = vld [vmem:[%s2536_s4 + $0x20] sm:$0xf]  ;;  %v2955_v45 = vld [vmem:[%s2536_s4 + $0x24] sm:$0x1] }
  0x3f   : > { %2315 = vmatpush3.bf16.msra.mxu0 %v2436_v0  ;;  %v1146_v34 = vsel %vm2643_vm6, %v2069_v9, %v1145_v11  ;;  %v1149_v39 = vrot.slane %v2856_v33, 5  ;;  %v2071_v43 = vrot.slane %v2745_v6, 9  ;;  %v1153_v50 = vrot.slane %v2859_v59, 5 }
  0x40   : > { %2338 = vmatprep.subr.bf16.mxu0 %v2437_v63  ;;  %2316 = vmatprep.mubr.msk.bf16.mxu0 %vm373_vm0, %v2053_v20  ;;  %v936_v51 = vsel %vm2592_vm5, %v931_v10, %v935_v44  ;;  %v2080_v7 = vcombine.low %v1142_v31, %v1146_v34  ;;  %v940_v16 = vrot.slane %v938_v36, 4  ;;  %v943_v24 = vrot.slane %v941_v8, 5  ;;  %v2966_v10 = vld [vmem:[%s2536_s4 + $0x2c] sm:$0x1] }
  0x41   : > { %2355 = vmatpush3.bf16.msra.mxu1 %v2439_v62  ;;  %v2054_v13 = vcombine.low %v922_v30, %v936_v51  ;;  %v1150_v27 = vsel %vm2643_vm6, %v2070_v12, %v1149_v39  ;;  %v1154_v0 = vsel %vm2643_vm6, %v2071_v43, %v1153_v50  ;;  %v947_v3 = vshll.u32 %v2838_v55, 16  ;;  %v2913_v55 = vld [vmem:[%s3120_s1 + $0xd0] sm:$0xff]  }
  0x42   : > { %2356 = vmatprep.subr.bf16.mxu1 %v2441_v17  ;;  %2334 = vmatprep.mubr.msk.bf16.mxu1 %vm373_vm0, %v2080_v7  ;;  %v2081_v4 = vcombine.low %v1150_v27, %v1154_v0  ;;  %v944_v36 = vor.u32 %v943_v24, %v940_v16  ;;  %v954_v8 = vrot.slane %v952_v26, 4  ;;  %v957_v28 = vrot.slane %v955_v37, 5  ;;  %v2921_v26 = vld [vmem:[%s2536_s4 + $0x14] sm:$0x1]  ;;  %v2972_v7 = vld [vmem:[%s2536_s4 + $0x30] sm:$0xf] }
  0x43   : > { %v949_v18 = vrot.slane %v947_v3, 5  ;;  %v961_v15 = vshll.u32 %v2846_v61, 16  ;;  %v968_v35 = vrot.slane %v966_v42, 4  ;;  %v971_v57 = vrot.slane %v969_v53, 5  ;;  %v2975_v16 = vld [vmem:[%s2536_s4 + $0x34] sm:$0x1] }
  0x44   : > { %2335 = vmatmul.mubr.msk.bf16.gmra.mxu1 %vm373_vm0, %v2081_v4  ;;  %v945_v37 = vrot.slane %v944_v36, 4  ;;  %v958_v21 = vor.u32 %v957_v28, %v954_v8  ;;  %v975_v49 = vshll.u32 %v2856_v33, 16  ;;  %v982_v2 = vrot.slane %v980_v58, 4 }
  0x45   : > { %v963_v61 = vrot.slane %v961_v15, 5  ;;  %v972_v42 = vor.u32 %v971_v57, %v968_v35  ;;  %v985_v52 = vrot.slane %v983_v56, 5  ;;  %v989_v53 = vshll.u32 %v2859_v59, 16  ;;  %2357 = vmatpush3.bf16.msra.mxu1 %v2441_v17  ;;  %v2442_v56 = vld [vmem:[%s3120_s1 + $0x90] sm:$0xff]   ;;  %v2960_v17 = vld [vmem:[%s2536_s4 + $0x28] sm:$0xf] }
  0x46   : > { %2317 = vmatmul.mubr.msk.bf16.vlgmr.msra.gmra.mxu0 %vm373_vm0, %v2054_v13  ;;  %v950_v25 = vsel %vm2592_vm5, %v945_v37, %v949_v18  ;;  %v959_v62 = vrot.slane %v958_v21, 4  ;;  %v977_v22 = vrot.slane %v975_v49, 5  ;;  %v1428_v58 = vshrl.u32 %v2908_v47, 16  ;;  %2380 = vmatprep.subr.bf16.mxu1 %v2913_v55  ;;  %v2986_v35 = vld [vmem:[%s2536_s4 + $0x38] sm:$0xf] }
  0x47   : > { %2339 = vmatpush3.bf16.msra.mxu0 %v2437_v63  ;;  %v973_v54 = vrot.slane %v972_v42, 4  ;;  %v986_v32 = vor.u32 %v985_v52, %v982_v2  ;;  %v991_v6 = vrot.slane %v989_v53, 5  ;;  %v1431_v33 = vshll.u32 %v2908_v47, 16 }
  0x48   : > { %2340 = vmatprep.subr.bf16.mxu0 %v2440_v46  ;;  %v964_v59 = vsel %vm2592_vm5, %v959_v62, %v963_v61  ;;  %v1430_v40 = vrot.slane %v1428_v58, 4  ;;  %v1437_v29 = vshll.u32 %v2921_v26, 16  ;;  %v1442_v63 = vshrl.u32 %v2924_v48, 16  ;;  %v2998_v62 = vld [vmem:[%s2536_s4 + $0x3c] sm:$0x1] }
  0x49   : > { %v2055_v14 = vcombine.low %v950_v25, %v964_v59  ;;  %v978_v41 = vsel %vm2592_vm5, %v973_v54, %v977_v22  ;;  %v987_v60 = vrot.slane %v986_v32, 4  ;;  %v1433_v44 = vrot.slane %v1431_v33, 5  ;;  %v3003_v54 = vld [vmem:[%s2536_s4 + $0x40] sm:$0xf]  ;;  %v3008_v59 = vld [vmem:[%s2536_s4 + $0x44] sm:$0x1] }
  0x4a   : > { %v1439_v1 = vrot.slane %v1437_v29, 5  ;;  %v1444_v9 = vrot.slane %v1442_v63, 4  ;;  %v1445_v11 = vshll.u32 %v2924_v48, 16  ;;  %v1451_v12 = vshll.u32 %v2942_v5, 16 }
  0x4b   : > { %2341 = vmatpush3.bf16.msra.mxu0 %v2440_v46  ;;  %2320 = vmatprep.mubr.msk.bf16.mxu0 %vm373_vm0, %v2055_v14  ;;  %v992_v20 = vsel %vm2592_vm5, %v987_v60, %v991_v6  ;;  %v1434_v30 = vor.u32 %v1433_v44, %v1430_v40  ;;  %v1456_v31 = vshrl.u32 %v2950_v19, 16  ;;  %v1459_v34 = vshll.u32 %v2950_v19, 16  ;;  %v3011_v40 = vld [vmem:[%s2536_s4 + $0x48] sm:$0xf] }
  0x4c   : > { %2342 = vmatprep.subr.bf16.mxu0 %v2442_v56  ;;  %v2056_v39 = vcombine.low %v978_v41, %v992_v20  ;;  %v1447_v43 = vrot.slane %v1445_v11, 5  ;;  %v1453_v50 = vrot.slane %v1451_v12, 5  ;;  %v1465_v51 = vshll.u32 %v2955_v45, 16  ;;  %v3021_v20 = vld [vmem:[%s2536_s4 + $0x4c] sm:$0x1] }
  0x4d   : > { %v1435_v24 = vrot.slane %v1434_v30, 4  ;;  %v1458_v13 = vrot.slane %v1456_v31, 4  ;;  %v1461_v27 = vrot.slane %v1459_v34, 5  ;;  %v1470_v0 = vshrl.u32 %v2960_v17, 16  ;;  %v2446_v34 = vld [vmem:[%s3120_s1 + $0xc8] sm:$0xff]  }
  0x4e   : > { %2321 = vmatmul.mubr.msk.bf16.gmra.mxu0 %vm373_vm0, %v2056_v39  ;;  %v1448_v3 = vor.u32 %v1447_v43, %v1444_v9  ;;  %v1467_v4 = vrot.slane %v1465_v51, 5  ;;  %v1473_v46 = vshll.u32 %v2960_v17, 16  ;;  %v1479_v36 = vshll.u32 %v2966_v10, 16 }
  0x4f   : > { %v1440_v8 = vsel %vm2592_vm5, %v1435_v24, %v1439_v1  ;;  %2343 = vmatpush3.bf16.msra.mxu0 %v2442_v56  ;;  %v1462_v28 = vor.u32 %v1461_v27, %v1458_v13  ;;  %v1472_v18 = vrot.slane %v1470_v0, 4  ;;  %v2111_v15 = vcombine.low %v2908_v47, %v2924_v48 }
  0x50   : > { %v1449_v57 = vrot.slane %v1448_v3, 4  ;;  %v1475_v37 = vrot.slane %v1473_v46, 5  ;;  %v1481_v21 = vrot.slane %v1479_v36, 5  ;;  %2366 = vmatprep.subr.bf16.mxu0 %v2913_v55  ;;  %v2112_v49 = vcombine.low %v2950_v19, %v2960_v17 }
  0x51   : > { %v1463_v2 = vrot.slane %v1462_v28, 4  ;;  %2344 = vmatprep.mubr.msk.bf16.mxu0 %vm373_vm0, %v2111_v15  ;;  %v1484_v61 = vshrl.u32 %v2972_v7, 16  ;;  %v1487_v42 = vshll.u32 %v2972_v7, 16  ;;  %v1493_v52 = vshll.u32 %v2975_v16, 16  ;;  %v2448_v28 = vld [vmem:[%s3120_s1 + $0xc0] sm:$0xff]  }
  0x52   : > { %v1454_v53 = vsel %vm2592_vm5, %v1449_v57, %v1453_v50  ;;  %v1476_v25 = vor.u32 %v1475_v37, %v1472_v18  ;;  %v1498_v22 = vshrl.u32 %v2986_v35, 16  ;;  %v1501_v58 = vshll.u32 %v2986_v35, 16 }
  0x53   : > { %v2128_v32 = vcombine.low %v1440_v8, %v1454_v53  ;;  %v1468_v6 = vsel %vm2592_vm5, %v1463_v2, %v1467_v4  ;;  %v1486_v56 = vrot.slane %v1484_v61, 4  ;;  %v1489_v33 = vrot.slane %v1487_v42, 5 }
  0x54   : > { %v1477_v29 = vrot.slane %v1476_v25, 4  ;;  %v1495_v63 = vrot.slane %v1493_v52, 5  ;;  %v1500_v14 = vrot.slane %v1498_v22, 4  ;;  %v1503_v41 = vrot.slane %v1501_v58, 5 }
  0x55   : > { %2358 = vmatprep.mubr.msk.bf16.mxu1 %vm373_vm0, %v2128_v32  ;;  %v1490_v60 = vor.u32 %v1489_v33, %v1486_v56  ;;  %v1507_v44 = vshll.u32 %v2998_v62, 16  ;;  %v1512_v1 = vshrl.u32 %v3003_v54, 16  ;;  %v1515_v9 = vshll.u32 %v3003_v54, 16 }
  0x56   : > { %v1482_v11 = vsel %vm2592_vm5, %v1477_v29, %v1481_v21  ;;  %2345 = vmatmul.mubr.msk.bf16.vlgmr.msra.gmra.mxu0 %vm373_vm0, %v2112_v49  ;;  %v1504_v12 = vor.u32 %v1503_v41, %v1500_v14  ;;  %v1521_v30 = vshll.u32 %v3008_v59, 16  ;;  %v1526_v31 = vshrl.u32 %v3011_v40, 16 }
  0x57   : > { %v2129_v39 = vcombine.low %v1468_v6, %v1482_v11  ;;  %2367 = vmatpush3.bf16.msra.mxu0 %v2913_v55  ;;  %v1491_v43 = vrot.slane %v1490_v60, 4  ;;  %v1509_v50 = vrot.slane %v1507_v44, 5  ;;  %v1514_v51 = vrot.slane %v1512_v1, 4 }
  0x58   : > { %v1505_v24 = vrot.slane %v1504_v12, 4  ;;  %v1517_v13 = vrot.slane %v1515_v9, 5  ;;  %2368 = vmatprep.subr.bf16.mxu0 %v2446_v34  ;;  %v1528_v0 = vrot.slane %v1526_v31, 4  ;;  %v1529_v3 = vshll.u32 %v3011_v40, 16 }
  0x59   : > { %2359 = vmatmul.mubr.msk.bf16.vlgmr.msra.gmra.mxu1 %vm373_vm0, %v2129_v39  ;;  %v1496_v27 = vsel %vm2592_vm5, %v1491_v43, %v1495_v63  ;;  %v1535_v4 = vshll.u32 %v3021_v20, 16  ;;  %v2113_v8 = vcombine.low %v2972_v7, %v2986_v35  ;;  %v1523_v15 = vrot.slane %v1521_v30, 5 }
  0x5a   : > { %2383 = vmatpush3.bf16.msra.mxu1 %v2913_v55  ;;  %v1510_v46 = vsel %vm2592_vm5, %v1505_v24, %v1509_v50  ;;  %v1518_v36 = vor.u32 %v1517_v13, %v1514_v51  ;;  %v1531_v57 = vrot.slane %v1529_v3, 5  ;;  %v2114_v37 = vcombine.low %v3003_v54, %v3011_v40 }
  0x5b   : > { %v2130_v18 = vcombine.low %v1496_v27, %v1510_v46  ;;  %2381 = vmatprep.subr.bf16.mxu1 %v2446_v34  ;;  %2369 = vmatpush3.bf16.msra.mxu0 %v2446_v34  ;;  %v2143_v21 = vrot.slane %v2972_v7, 9  ;;  %v1687_v49 = vrot.slane %v2975_v16, 5  ;;  %v2144_v2 = vrot.slane %v2986_v35, 9 }
  0x5c   : > { %v1519_v55 = vrot.slane %v1518_v36, 4  ;;  %2348 = vmatprep.mubr.msk.bf16.mxu0 %vm373_vm0, %v2113_v8  ;;  %2370 = vmatprep.subr.bf16.mxu0 %v2448_v28  ;;  %v1532_v61 = vor.u32 %v1531_v57, %v1528_v0  ;;  %v1537_v42 = vrot.slane %v1535_v4, 5  ;;  %v1695_v52 = vrot.slane %v3008_v59, 5 }
  0x5d   : > { %2362 = vmatprep.mubr.msk.bf16.mxu1 %vm373_vm0, %v2130_v18  ;;  %v1691_v53 = vrot.slane %v2998_v62, 5  ;;  %v1699_v25 = vrot.slane %v3021_v20, 5  ;;  %v1688_v7 = vsel %vm2643_vm6, %v2143_v21, %v1687_v49  ;;  %v2139_v16 = vrot.slane %v2908_v47, 9 }
  0x5e   : > { %2384 = vmatpush3.bf16.msra.mxu1 %v2446_v34  ;;  %2349 = vmatmul.mubr.msk.bf16.gmra.mxu0 %vm373_vm0, %v2114_v37  ;;  %v1671_v35 = vrot.slane %v2921_v26, 5  ;;  %v1524_v22 = vsel %vm2592_vm5, %v1519_v55, %v1523_v15  ;;  %v1533_v58 = vrot.slane %v1532_v61, 4  ;;  %v2145_v32 = vrot.slane %v3003_v54, 9 }
  0x5f   : > { %2382 = vmatprep.subr.bf16.mxu1 %v2448_v28  ;;  %v1692_v62 = vsel %vm2643_vm6, %v2144_v2, %v1691_v53  ;;  %2371 = vmatpush3.bf16.msra.mxu0 %v2448_v28  ;;  %v2146_v56 = vrot.slane %v3011_v40, 9  ;;  %v2140_v47 = vrot.slane %v2924_v48, 9  ;;  %v1675_v59 = vrot.slane %v2942_v5, 5 }
  0x60   : > { %v2155_v6 = vcombine.low %v1688_v7, %v1692_v62  ;;  %v1672_v33 = vsel %vm2643_vm6, %v2139_v16, %v1671_v35  ;;  %v1538_v26 = vsel %vm2592_vm5, %v1533_v58, %v1537_v42  ;;  %v2141_v29 = vrot.slane %v2950_v19, 9 }
  0x61   : > { %v1679_v63 = vrot.slane %v2955_v45, 5  ;;  %v2131_v14 = vcombine.low %v1524_v22, %v1538_v26  ;;  %v2142_v54 = vrot.slane %v2960_v17, 9  ;;  %v1683_v40 = vrot.slane %v2966_v10, 5 }
  0x62   : > { %2385 = vmatpush3.bf16.msra.mxu1 %v2448_v28  ;;  %v1676_v41 = vsel %vm2643_vm6, %v2140_v47, %v1675_v59  ;;  %v1696_v19 = vsel %vm2643_vm6, %v2145_v32, %v1695_v52  ;;  %v1700_v45 = vsel %vm2643_vm6, %v2146_v56, %v1699_v25 }
  0x63   : > { %v1680_v48 = vsel %vm2643_vm6, %v2141_v29, %v1679_v63  ;;  %2363 = vmatmul.mubr.msk.bf16.gmra.mxu1 %vm373_vm0, %v2131_v14  ;;  %v2153_v38 = vcombine.low %v1672_v33, %v1676_v41  ;;  %v1684_v5 = vsel %vm2643_vm6, %v2142_v54, %v1683_v40  ;;  %v2156_v10 = vcombine.low %v1696_v19, %v1700_v45 }
  0x64   : > { %2376 = vmatprep.mubr.msk.bf16.mxu1 %vm373_vm0, %v2155_v6  ;;  %v2154_v17 = vcombine.low %v1680_v48, %v1684_v5 }
  0x65   : > { %2372 = vmatprep.mubr.msk.bf16.mxu0 %vm373_vm0, %v2153_v38 }
  0x66   : > { %2373 = vmatmul.mubr.msk.bf16.vlgmr.msra.gmra.mxu0 %vm373_vm0, %v2154_v17 }
  0x6b   : > { %2377 = vmatmul.mubr.msk.bf16.vlgmr.msra.gmra.mxu1 %vm373_vm0, %v2156_v10 }
  0xd9   : > { %v2276_v60 = vpop.f32.mrf.mxu1 }
  0xdb   : > { %v535_v44 = vpop.f32.mrf.mxu1 }
  0xdd   : > { %v2277_v1 = vpop.f32.mrf.mxu1 }
  0xdf   : > { %v538_v9 = vpop.f32.mrf.mxu1 }
  0xe3   : > { %v2280_v11 = vpop.f32.mrf.mxu1  ;;  %v2262_v12 = vpop.f32.mrf.mxu0 }
  0xe4   : > { %v544_v56 = vadd.f32 %v2276_v60, %v2262_v12 }
  0xe5   : > { %v551_v20 = vpop.f32.mrf.mxu1  ;;  %v420_v30 = vpop.f32.mrf.mxu0 }
  0xe6   : > { %v536_v26 = vadd.f32 %v535_v44, %v420_v30 }
  0xe7   : > { %v2281_v31 = vpop.f32.mrf.mxu1  ;;  %v2263_v34 = vpop.f32.mrf.mxu0 }
  0xe8   : > { %v547_v14 = vadd.f32 %v2277_v1, %v2263_v34 }
  0xe9   : > { %v554_v23 = vpop.f32.mrf.mxu1  ;;  %v423_v39 = vpop.f32.mrf.mxu0 }
  0xea   : > { %v539_v5 = vadd.f32 %v538_v9, %v423_v39 }
  0xec   : > { %v2304_v43 = vpop.f32.mrf.mxu1 }
  0xee   : > { %v2266_v50 = vpop.f32.mrf.mxu0  ;;  %v842_v51 = vpop.f32.mrf.mxu1 }
  0xef   : > { %v560_v63 = vadd.f32 %v2280_v11, %v2266_v50 }
  0xf0   : > { %v436_v24 = vpop.f32.mrf.mxu0  ;;  %v2305_v13 = vpop.f32.mrf.mxu1 }
  0xf1   : > { %v552_v41 = vadd.f32 %v551_v20, %v436_v24 }
  0xf2   : > { %v2267_v27 = vpop.f32.mrf.mxu0  ;;  %v3088_v0 = vpop.f32.mrf.mxu1 }
  0xf3   : > { %v563_v10 = vadd.f32 %v2281_v31, %v2267_v27 }
  0xf4   : > { %v439_v3 = vpop.f32.mrf.mxu0  ;;  %v2308_v4 = vpop.f32.mrf.mxu1 }
  0xf5   : > { %v555_v30 = vadd.f32 %v554_v23, %v439_v3 }
  0xf6   : > { %v2290_v46 = vpop.f32.mrf.mxu0  ;;  %v858_v36 = vpop.f32.mrf.mxu1 }
  0xf7   : > { %v725_v59 = vadd.f32 %v2290_v46, %v544_v56 }
  0xf8   : > { %v692_v8 = vpop.f32.mrf.mxu0  ;;  %v2309_v28 = vpop.f32.mrf.mxu1 }
  0xf9   : > { %v723_v54 = vadd.f32 %v692_v8, %v536_v26  ;;  %v875_v45 = vadd.f32 %v2304_v43, %v725_v59 }
  0xfa   : > { %v2291_v18 = vpop.f32.mrf.mxu0  ;;  %v3090_v15 = vpop.f32.mrf.mxu1 }
  0xfb   : > { %v726_v19 = vadd.f32 %v2291_v18, %v547_v14 }
  0xfc   : > { %v695_v57 = vpop.f32.mrf.mxu0  ;;  %v2332_v37 = vpop.f32.mrf.mxu1 }
  0xfd   : > { %v724_v12 = vadd.f32 %v695_v57, %v539_v5  ;;  %v876_v50 = vadd.f32 %v2305_v13, %v726_v19 }
  0xfe   : > { %v2294_v55 = vpop.f32.mrf.mxu0  ;;  %v1238_v21 = vpop.f32.mrf.mxu1 }
  0xff   : > { %v729_v48 = vadd.f32 %v2294_v55, %v560_v63  ;;  %v874_v43 = vadd.f32 %v3088_v0, %v724_v12 }
 0x100   : > { %v708_v49 = vpop.f32.mrf.mxu0  ;;  %v3092_v61 = vpop.f32.mrf.mxu1 }
 0x101   : > { %3127 = vst [vmem:[#allocation2_spill] sm:$0xff] %v3092_v61  ;;  %v879_v11 = vadd.f32 %v2308_v4, %v729_v48 }
 0x102   : > { %v2295_v2 = vpop.f32.mrf.mxu0  ;;  %v3094_v53 = vpop.f32.mrf.mxu1 }
 0x103   : > { %3128 = vst [vmem:[#allocation3_spill] sm:$0xff] %v3094_v53  ;;  %v727_v53 = vadd.f32 %v708_v49, %v552_v41  ;;  %v730_v46 = vadd.f32 %v2295_v2, %v563_v10  ;;  %v2164_v41 = vld [vmem:[%s3121_s2] ss:$0 sm:$0xff] }
 0x104   : > { %v711_v42 = vpop.f32.mrf.mxu0  ;;  %v2336_v7 = vpop.f32.mrf.mxu1 }
 0x105   : > { %v728_v24 = vadd.f32 %v711_v42, %v555_v30  ;;  %v877_v9 = vadd.f32 %v858_v36, %v727_v53  ;;  %v880_v55 = vadd.f32 %v2309_v28, %v730_v46 }
 0x106   : > { %v2318_v52 = vpop.f32.mrf.mxu0  ;;  %v1254_v22 = vpop.f32.mrf.mxu1 }
 0x107   : > { %v1109_v61 = vadd.f32 %v2318_v52, %v875_v45  ;;  %v878_v2 = vadd.f32 %v3090_v15, %v728_v24 }
 0x108   : > { %v1076_v25 = vpop.f32.mrf.mxu0  ;;  %v2337_v32 = vpop.f32.mrf.mxu1 }
 0x109   : > { %v1271_v31 = vadd.f32 %v2332_v37, %v1109_v61 }
 0x10a   : > { %v2319_v16 = vpop.f32.mrf.mxu0  ;;  %v3096_v47 = vpop.f32.mrf.mxu1 }
 0x10b   : > { %3129 = vst [vmem:[#allocation4_spill] sm:$0xff] %v3096_v47  ;;  %v873_v47 = vadd.f32 %v842_v51, %v723_v54  ;;  %v1110_v39 = vadd.f32 %v2319_v16, %v876_v50 }
 0x10c   : > { %v1079_v35 = vpop.f32.mrf.mxu0 }
 0x10d   : > { %v1107_v34 = vadd.f32 %v1076_v25, %v873_v47  ;;  %v1108_v51 = vadd.f32 %v1079_v35, %v874_v43  ;;  %v3130_v25 = vld [vmem:[#allocation2_spill] sm:$0xff] }
 0x10e   : > { %v2322_v58 = vpop.f32.mrf.mxu0  ;;  %v1272_v36 = vadd.f32 %v3130_v25, %v1110_v39 }
 0x10f   : > { %v1113_v8 = vadd.f32 %v2322_v58, %v879_v11  ;;  %v1269_v23 = vadd.f32 %v1238_v21, %v1107_v34 }
 0x110   : > { %v1092_v62 = vpop.f32.mrf.mxu0 }
 0x111   : > { %v1111_v57 = vadd.f32 %v1092_v62, %v877_v9  ;;  %v1275_v13 = vadd.f32 %v2336_v7, %v1113_v8  ;;  %v3131_v62 = vld [vmem:[#allocation3_spill] sm:$0xff] }
 0x112   : > { %v2323_v6 = vpop.f32.mrf.mxu0  ;;  %v1270_v28 = vadd.f32 %v3131_v62, %v1108_v51  ;;  %v3132_v63 = vld [vmem:[#allocation4_spill] sm:$0xff] }
 0x113   : > { %v1114_v4 = vadd.f32 %v2323_v6, %v880_v55  ;;  %v1273_v37 = vadd.f32 %v1254_v22, %v1111_v57 }
 0x114   : > { %v1095_v33 = vpop.f32.mrf.mxu0 }
 0x115   : > { %v1112_v16 = vadd.f32 %v1095_v33, %v878_v2  ;;  %v1276_v21 = vadd.f32 %v2337_v32, %v1114_v4 }
 0x116   : > { %v2346_v29 = vpop.f32.mrf.mxu0 }
 0x117   : > { %v1421_v49 = vadd.f32 %v2346_v29, %v1271_v31  ;;  %v1274_v14 = vadd.f32 %v3132_v63, %v1112_v16 }
 0x118   : > { %v1388_v40 = vpop.f32.mrf.mxu0 }
 0x119   : > { %v2360_v38 = vpop.f32.mrf.mxu1  ;;  %v1419_v52 = vadd.f32 %v1388_v40, %v1269_v23 }
 0x11a   : > { %v2347_v17 = vpop.f32.mrf.mxu0  ;;  %v1655_v35 = vadd.f32 %v2360_v38, %v1421_v49 }
 0x11b   : > { %v1622_v60 = vpop.f32.mrf.mxu1  ;;  %v1422_v61 = vadd.f32 %v2347_v17, %v1272_v36 }
 0x11c   : > { %v1391_v44 = vpop.f32.mrf.mxu0  ;;  %v1653_v7 = vadd.f32 %v1622_v60, %v1419_v52 }
 0x11d   : > { %v2361_v1 = vpop.f32.mrf.mxu1  ;;  %v1420_v6 = vadd.f32 %v1391_v44, %v1270_v28 }
 0x11e   : > { %v2350_v20 = vpop.f32.mrf.mxu0  ;;  %v1656_v22 = vadd.f32 %v2361_v1, %v1422_v61 }
 0x11f   : > { %v1625_v27 = vpop.f32.mrf.mxu1  ;;  %v1425_v0 = vadd.f32 %v2350_v20, %v1275_v13 }
 0x120   : > { %v1404_v18 = vpop.f32.mrf.mxu0  ;;  %v1654_v17 = vadd.f32 %v1625_v27, %v1420_v6 }
 0x121   : > { %v1423_v56 = vadd.f32 %v1404_v18, %v1273_v37 }
 0x122   : > { %v2351_v3 = vpop.f32.mrf.mxu0 }
 0x123   : > { %v2364_v42 = vpop.f32.mrf.mxu1  ;;  %v1426_v29 = vadd.f32 %v2351_v3, %v1276_v21 }
 0x124   : > { %v1407_v53 = vpop.f32.mrf.mxu0  ;;  %v1659_v59 = vadd.f32 %v2364_v42, %v1425_v0 }
 0x125   : > { %v1638_v58 = vpop.f32.mrf.mxu1  ;;  %v1424_v32 = vadd.f32 %v1407_v53, %v1274_v14 }
 0x126   : > { %v2374_v47 = vpop.f32.mrf.mxu0  ;;  %v1657_v48 = vadd.f32 %v1638_v58, %v1423_v56 }
 0x127   : > { %v2365_v26 = vpop.f32.mrf.mxu1  ;;  %v1817_v15 = vadd.f32 %v2374_v47, %v1655_v35 }
 0x128   : > { %v1784_v54 = vpop.f32.mrf.mxu0  ;;  %v1660_v60 = vadd.f32 %v2365_v26, %v1426_v29 }
 0x129   : > { %v1641_v33 = vpop.f32.mrf.mxu1  ;;  %v1815_v40 = vadd.f32 %v1784_v54, %v1653_v7  ;;  %v1832_v19 = vadd.f32 %v2164_v41, %v1817_v15 }
 0x12a   : > { %v2375_v38 = vpop.f32.mrf.mxu0  ;;  %v1658_v34 = vadd.f32 %v1641_v33, %v1424_v32 }
 0x12b   : > { %v2378_v5 = vpop.f32.mrf.mxu1  ;;  %v1818_v45 = vadd.f32 %v2375_v38, %v1656_v22  ;;  %v1830_v30 = vadd.f32 %v2164_v41, %v1815_v40  ;;  %v1840_v20 = vmax.f32 %v1832_v19, 0.0 }
 0x12c   : > { %v1821_v10 = vadd.f32 %v2378_v5, %v1659_v59  ;;  %v1787_v12 = vpop.f32.mrf.mxu0 }
 0x12d   : > { %v1800_v44 = vpop.f32.mrf.mxu1  ;;  %v1833_v46 = vadd.f32 %v2164_v41, %v1818_v45  ;;  %v1816_v11 = vadd.f32 %v1787_v12, %v1654_v17  ;;  %v1838_v31 = vmax.f32 %v1830_v30, 0.0 }
 0x12e   : > { %v1819_v1 = vadd.f32 %v1800_v44, %v1657_v48  ;;  %v1836_v9 = vadd.f32 %v2164_v41, %v1821_v10 }
 0x12f   : > { %v2379_v50 = vpop.f32.mrf.mxu1  ;;  %v1841_v24 = vmax.f32 %v1833_v46, 0.0  ;;  %v1831_v8 = vadd.f32 %v2164_v41, %v1816_v11 }
 0x130   : > { %v1822_v39 = vadd.f32 %v2379_v50, %v1660_v60  ;;  %v1834_v57 = vadd.f32 %v2164_v41, %v1819_v1  ;;  %v1844_v23 = vmax.f32 %v1836_v9, 0.0 }
 0x131   : > { %v1803_v43 = vpop.f32.mrf.mxu1  ;;  %v2176_v18 = vpack.c.bf16 %v1841_v24, %v1840_v20  ;;  %v1839_v27 = vmax.f32 %v1831_v8, 0.0 }
 0x132   : > { %v1837_v55 = vadd.f32 %v2164_v41, %v1822_v39  ;;  %v1820_v51 = vadd.f32 %v1803_v43, %v1658_v34  ;;  %v1842_v2 = vmax.f32 %v1834_v57, 0.0 }
 0x133   : > { %2188 = vst [vmem:[%s192_s7 + $0x8] sm:$0xff] %v2176_v18   ;;  %v2171_v49 = vpack.c.bf16 %v1839_v27, %v1838_v31 }
 0x134   : > { %v1845_v3 = vmax.f32 %v1837_v55, 0.0  ;;  %v1835_v4 = vadd.f32 %v2164_v41, %v1820_v51 }
 0x135   : > { %2172 = vst [vmem:[%s192_s7] sm:$0xff] %v2171_v49  }
 0x136   : > { %v2186_v13 = vpack.c.bf16 %v1845_v3, %v1844_v23  ;;  %v1843_v52 = vmax.f32 %v1835_v4, 0.0 }
 0x138   : > { %2190 = vst [vmem:[%s192_s7 + $0x18] sm:$0xff] %v2186_v13   ;;  %v2181_v42 = vpack.c.bf16 %v1843_v52, %v1842_v2 }
 0x13a   : > { %2189 = vst [vmem:[%s192_s7 + $0x10] sm:$0xff] %v2181_v42  }
 0x13b PF: > { %s13_s14 = sadd.s32 1, %s2472_s14   ;;  %s3133_s12 = smov %s2468_s13 }
 0x13c   : > { %p10_p5 = scmp.ge.s32.totalorder %s13_s14, 4   ;;  %s3134_s13 = smov %s3136_s15 }
 0x13e   :  { %12 = sbr.rel (!%p10_p5) target bundleno = 2 (0x2), region = 73 }

// kernel: deeplab3plus_forward.10
= control target key start
LH: loop header
LB: loop body
LE: loop exit
PB: predicated region body
PF: predicated region fallthrough
CT: control target
= control target key end

     0   :  { %s3040_s12 = smov 0   ;;  %s3042_s13 = smov 0   ;;  %s3608_s0 = inlined_call_operand.vmem [shape: bf16[2,4,4,256], index: 0, kind: input, shape index: {}]   ;;  %s3609_s1 = inlined_call_operand.vmem [shape: bf16[9,256,128], index: 1, kind: input, shape index: {}]   ;;  %s3610_s2 = inlined_call_operand.vmem [shape: f32[1,128], index: 2, kind: input, shape index: {}]   ;;  %s3611_s3 = inlined_call_operand.vmem [shape: bf16[2,2,2,128], index: 3, kind: output, shape index: {}]  }
   0x1   :  { %s3044_s14 = smov 0  }
   0x2 LB: > { %s25_s15 = sadd.s32 1, %s3012_s13  ;;  %p2199_p0 = scmp.ge.s32.totalorder %s3016_s14, 1  ;;  %s3016_s14 = sphi %s3044_s14, %s13_s14   ;;  %s3012_s13 = sphi %s3042_s13, %s3615_s13   ;;  %s3008_s12 = sphi %s3040_s12, %s3614_s12  }
   0x3   : > { %p27_p1 = scmp.ge.s32.totalorder %s25_s15, 2  ;;  %p151_p2 = scmp.lt.s32.totalorder %s3016_s14, 3 }
   0x5   : > { %s3617_s15 = smov (%p27_p1, %s25_s15), 0  ;;  %p152_p3 = pnand %p2199_p0, %p151_p2 }
   0x6   : > { %p178_p4 = scmp.lt.s32.totalorder (!%p152_p3), %s3008_s12, 1 }
   0x7   : > { %155 = sbr.rel (%p152_p3) target bundleno = 384 (0x180), region = 32 }
   0xc   : > { %v2850_v0 = vld [vmem:[%s3609_s1 + $0xf8] sm:$0xff]   ;;  %v2854_v4 = vld [vmem:[%s3609_s1 + $0xf0] sm:$0xff]   ;;  %v2858_v8 = vld [vmem:[%s3609_s1 + $0xe8] sm:$0xff]   ;;  %s3619_s12 = smov (!%p178_p4, %s3008_s12), 1  ;;  %vm249_vm0 = vsmask.f32 256  ;;  %v319_v35 = vlaneseq }
   0xd   : > { %v2851_v1 = vld [vmem:[%s3609_s1 + $0x78] sm:$0xff]   ;;  %2626 = vmatprep.subr.bf16.mxu0 %v2850_v0  ;;  %v2855_v5 = vld [vmem:[%s3609_s1 + $0x70] sm:$0xff]   ;;  %v2859_v9 = vld [vmem:[%s3609_s1 + $0x68] sm:$0xff]   ;;  %s2625_s24 = sshll.u32 %s3619_s12, 4  ;;  %vm250_vm1 = vsmask.f32 1284 }
   0xe   : > { %v2852_v2 = vld [vmem:[%s3609_s1 + $0xb8] sm:$0xff]   ;;  %2648 = vmatprep.subr.bf16.mxu1 %v2851_v1  ;;  %v2856_v6 = vld [vmem:[%s3609_s1 + $0xb0] sm:$0xff]   ;;  %v2860_v10 = vld [vmem:[%s3609_s1 + $0xa8] sm:$0xff]   ;;  %s3158_s6 = scalar_lea.vmem %s3608_s0, %s2625_s24  ;;  %vm252_vm3 = vsmask.f32 2312  ;;  %v3176_v44 = vshrl.u32 %v319_v35, 7 }
   0xf   : > { %v2853_v3 = vld [vmem:[%s3609_s1 + $0x38] sm:$0xff]   ;;  %2627 = vmatpush3.bf16.msra.mxu0 %v2852_v2  ;;  %v2857_v7 = vld [vmem:[%s3609_s1 + $0x30] sm:$0xff]   ;;  %v2861_v11 = vld [vmem:[%s3609_s1 + $0x28] sm:$0xff]   ;;  %vm254_vm4 = vsmask.f32 3340  ;;  %s2202_s19 = sshll.u32 %s3619_s12, 1 }
  0x10   : > { %2649 = vmatpush3.bf16.msra.mxu1 %v2853_v3  ;;  %2628 = vmatprep.subr.bf16.mxu0 %v2854_v4  ;;  %v2862_v12 = vld [vmem:[%s3609_s1 + $0xe0] sm:$0xff]   ;;  %v2866_v16 = vld [vmem:[%s3609_s1 + $0xd8] sm:$0xff]   ;;  %v2870_v20 = vld [vmem:[%s3609_s1 + $0xd0] sm:$0xff]   ;;  %vm256_vm5 = vsmask.f32 4368  ;;  %s190_s22 = scalar_lea.vmem %s3611_s3, %s2202_s19 }
  0x11   : > { %2650 = vmatprep.subr.bf16.mxu1 %v2855_v5  ;;  %v2863_v13 = vld [vmem:[%s3609_s1 + $0x60] sm:$0xff]   ;;  %v2867_v17 = vld [vmem:[%s3609_s1 + $0x58] sm:$0xff]   ;;  %v2871_v21 = vld [vmem:[%s3609_s1 + $0x50] sm:$0xff]   ;;  %vm258_vm7 = vsmask.f32 5396 }
  0x12   : > { %v2864_v14 = vld [vmem:[%s3609_s1 + $0xa0] sm:$0xff]   ;;  %v2868_v18 = vld [vmem:[%s3609_s1 + $0x98] sm:$0xff]   ;;  %v2872_v22 = vld [vmem:[%s3609_s1 + $0x90] sm:$0xff]   ;;  %vm260_vm8 = vsmask.f32 6424 }
  0x13   : > { %2629 = vmatpush3.bf16.msra.mxu0 %v2856_v6  ;;  %v2865_v15 = vld [vmem:[%s3609_s1 + $0x20] sm:$0xff]   ;;  %v2869_v19 = vld [vmem:[%s3609_s1 + $0x18] sm:$0xff]   ;;  %v2873_v23 = vld [vmem:[%s3609_s1 + $0x10] sm:$0xff]   ;;  %vm262_vm9 = vsmask.f32 7452 }
  0x14   : > { %2651 = vmatpush3.bf16.msra.mxu1 %v2857_v7  ;;  %2630 = vmatprep.subr.bf16.mxu0 %v2858_v8  ;;  %v2874_v24 = vld [vmem:[%s3609_s1 + $0xc8] sm:$0xff]   ;;  %v2878_v28 = vld [vmem:[%s3609_s1 + $0xc0] sm:$0xff]   ;;  %vm251_vm2 = vmor %vm249_vm0, %vm250_vm1  ;;  %v3018_v42 = vmov 1966171168  }
  0x15   : > { %2652 = vmatprep.subr.bf16.mxu1 %v2859_v9  ;;  %v2875_v25 = vld [vmem:[%s3609_s1 + $0x48] sm:$0xff]   ;;  %v2879_v29 = vld [vmem:[%s3609_s1 + $0x40] sm:$0xff]   ;;  %vm253_vm6 = vmor %vm251_vm2, %vm252_vm3  ;;  %v317_v43 = vunpack.c.l.s4 %v3018_v42 }
  0x16   : > { %v2876_v26 = vld [vmem:[%s3609_s1 + $0x88] sm:$0xff]   ;;  %v2880_v30 = vld [vmem:[%s3609_s1 + $0x80] sm:$0xff]   ;;  %vm255_vm10 = vmor %vm253_vm6, %vm254_vm4 }
  0x17   : > { %2631 = vmatpush3.bf16.msra.mxu0 %v2860_v10  ;;  %v2877_v27 = vld [vmem:[%s3609_s1 + $0x8] sm:$0xff]   ;;  %v2881_v31 = vld [vmem:[%s3609_s1] sm:$0xff]   ;;  %vm257_vm11 = vmor %vm255_vm10, %vm256_vm5  ;;  %v318_v46 = vunpack.c.0.s8 %v317_v43 }
  0x18   : > { %2653 = vmatpush3.bf16.msra.mxu1 %v2861_v11  ;;  %2632 = vmatprep.subr.bf16.mxu0 %v2862_v12  ;;  %v2203_v32 = vld.sshfl [vmem:[%s3158_s6] sm:$0x33 pattern:$0x75316420]  ;;  %v2882_v41 = vld [vmem:[%s3609_s1 + $0x178] sm:$0xff]   ;;  %vm259_vm12 = vmor %vm257_vm11, %vm258_vm7 }
  0x19   : > { %2654 = vmatprep.subr.bf16.mxu1 %v2863_v13  ;;  %v3168_v33 = vld.sshfl [vmem:[%s3158_s6 + $0x4] sm:$0x33 pattern:$0x75316420]  ;;  %v247_v34 = vcombine.high %v2203_v32, %v2203_v32  ;;  %v265_v37 = vshrl.u32 %v2203_v32, 16  ;;  %vm261_vm13 = vmor %vm259_vm12, %vm260_vm8  ;;  %v2884_v48 = vld [vmem:[%s3609_s1 + $0x1f8] sm:$0xff]   ;;  %v3195_v53 = vsub.s32 %v318_v46, %v3176_v44 }
  0x1a   : > { %v248_v36 = vcombine.high %v3168_v33, %v3168_v33  ;;  %v274_v39 = vshrl.u32 %v3168_v33, 16  ;;  %vm3178_vm14 = vmor %vm261_vm13, %vm262_vm9  ;;  %v476_v47 = vcombine.low %v2203_v32, %v3168_v33  ;;  %v2303_v49 = vcombine.high %v2203_v32, %v3168_v33  ;;  %v2883_v59 = vld [vmem:[%s3609_s1 + $0x138] sm:$0xff]   ;;  %v2886_v2 = vld [vmem:[%s3609_s1 + $0x170] sm:$0xff]  }
  0x1b   : > { %2633 = vmatpush3.bf16.msra.mxu0 %v2864_v14  ;;  %v270_v38 = vshll.u32 %v247_v34, 16  ;;  %v2885_v62 = vld [vmem:[%s3609_s1 + $0x1b8] sm:$0xff]   ;;  %v2888_v3 = vld [vmem:[%s3609_s1 + $0x1f0] sm:$0xff]   ;;  %v2890_v7 = vld [vmem:[%s3609_s1 + $0x168] sm:$0xff]  }
  0x1c   : > { %2655 = vmatpush3.bf16.msra.mxu1 %v2865_v15  ;;  %2634 = vmatprep.subr.bf16.mxu0 %v2866_v16  ;;  %v279_v40 = vshll.u32 %v248_v36, 16  ;;  %v483_v55 = vrot.slane %v476_v47, %v3195_v53  ;;  %v3200_v56 = vrot.slane %v2303_v49, %v3195_v53  ;;  %v2887_v4 = vld [vmem:[%s3609_s1 + $0x130] sm:$0xff]   ;;  %v2892_v8 = vld [vmem:[%s3609_s1 + $0x1e8] sm:$0xff]   ;;  %v2894_v11 = vld [vmem:[%s3609_s1 + $0x160] sm:$0xff]  }
  0x1d   : > { %2656 = vmatprep.subr.bf16.mxu1 %v2867_v17  ;;  %v272_v50 = vsel %vm3178_vm14, %v265_v37, %v270_v38  ;;  %v2889_v6 = vld [vmem:[%s3609_s1 + $0x1b0] sm:$0xff]   ;;  %v2891_v9 = vld [vmem:[%s3609_s1 + $0x128] sm:$0xff]   ;;  %v2896_v12 = vld [vmem:[%s3609_s1 + $0x1e0] sm:$0xff]  }
  0x1e   : > { %v3191_v51 = vsel %vm3178_vm14, %v274_v39, %v279_v40  ;;  %v484_v58 = vcombine.high %v483_v55, %v483_v55  ;;  %v491_v61 = vrot.slane %v483_v55, %v3195_v53  ;;  %v678_v63 = vcombine.high %v3200_v56, %v3200_v56  ;;  %v2893_v10 = vld [vmem:[%s3609_s1 + $0x1a8] sm:$0xff]   ;;  %v2895_v13 = vld [vmem:[%s3609_s1 + $0x120] sm:$0xff]   ;;  %v2898_v15 = vld [vmem:[%s3609_s1 + $0x158] sm:$0xff]  }
  0x1f   : > { %2635 = vmatpush3.bf16.msra.mxu0 %v2868_v18  ;;  %v315_v52 = vcombine.low %v272_v50, %v3191_v51  ;;  %v2897_v14 = vld [vmem:[%s3609_s1 + $0x1a0] sm:$0xff]   ;;  %v2900_v16 = vld [vmem:[%s3609_s1 + $0x1d8] sm:$0xff]   ;;  %v685_v49 = vrot.slane %v3200_v56, %v3195_v53  ;;  %v2920_v55 = vld [vmem:[%s3609_s1 + $0x2f0] sm:$0xff]  }
  0x20   : > { %2657 = vmatpush3.bf16.msra.mxu1 %v2869_v19  ;;  %2636 = vmatprep.subr.bf16.mxu0 %v2870_v20  ;;  %v498_v1 = vrot.slane %v484_v58, %v3195_v53  ;;  %v692_v5 = vrot.slane %v678_v63, %v3195_v53  ;;  %v2899_v17 = vld [vmem:[%s3609_s1 + $0x118] sm:$0xff]   ;;  %v2902_v19 = vld [vmem:[%s3609_s1 + $0x150] sm:$0xff]   ;;  %v2912_v34 = vld [vmem:[%s3609_s1 + $0x1c0] sm:$0xff]  }
  0x21   : > { %2658 = vmatprep.subr.bf16.mxu1 %v2871_v21  ;;  %v322_v54 = vrot.slane %v315_v52, %v3195_v53  ;;  %v2901_v18 = vld [vmem:[%s3609_s1 + $0x198] sm:$0xff]   ;;  %v2904_v20 = vld [vmem:[%s3609_s1 + $0x1d0] sm:$0xff]   ;;  %v2911_v38 = vld [vmem:[%s3609_s1 + $0x100] sm:$0xff]  }
  0x22   : > { %629 = vmatprep.mubr.bf16.mxu1 %v498_v1  ;;  %v2903_v21 = vld [vmem:[%s3609_s1 + $0x110] sm:$0xff]   ;;  %v2915_v46 = vld [vmem:[%s3609_s1 + $0x238] sm:$0xff]   ;;  %v2923_v63 = vld [vmem:[%s3609_s1 + $0x228] sm:$0xff]  }
  0x23   : > { %2637 = vmatpush3.bf16.msra.mxu0 %v2872_v22  ;;  %v323_v57 = vcombine.high %v322_v54, %v322_v54  ;;  %v330_v60 = vrot.slane %v322_v54, %v3195_v53  ;;  %v2905_v22 = vld [vmem:[%s3609_s1 + $0x190] sm:$0xff]   ;;  %v2916_v47 = vld [vmem:[%s3609_s1 + $0x2f8] sm:$0xff]   ;;  %v2926_v1 = vld [vmem:[%s3609_s1 + $0x260] sm:$0xff]  }
  0x24   : > { %2659 = vmatpush3.bf16.msra.mxu1 %v2873_v23  ;;  %2638 = vmatprep.subr.bf16.mxu0 %v2874_v24  ;;  %v2906_v23 = vld [vmem:[%s3609_s1 + $0x148] sm:$0xff]   ;;  %v2918_v54 = vld [vmem:[%s3609_s1 + $0x270] sm:$0xff]  }
  0x25   : > { %2660 = vmatprep.subr.bf16.mxu1 %v2875_v25  ;;  %v337_v0 = vrot.slane %v323_v57, %v3195_v53  ;;  %v2908_v24 = vld [vmem:[%s3609_s1 + $0x1c8] sm:$0xff]   ;;  %v2919_v57 = vld [vmem:[%s3609_s1 + $0x230] sm:$0xff]  }
  0x26   : > { %v2907_v25 = vld [vmem:[%s3609_s1 + $0x108] sm:$0xff]  }
  0x27   : > { %2639 = vmatpush3.bf16.msra.mxu0 %v2876_v26  ;;  %468 = vmatprep.mubr.bf16.mxu0 %v337_v0  ;;  %v2909_v26 = vld [vmem:[%s3609_s1 + $0x188] sm:$0xff]  }
  0x28   : > { %2661 = vmatpush3.bf16.msra.mxu1 %v2877_v27  ;;  %2640 = vmatprep.subr.bf16.mxu0 %v2878_v28  ;;  %v3288_v27 = vld.sshfl [vmem:[%s3158_s6 + $0x8] sm:$0x33 pattern:$0x75316420]  ;;  %v2910_v28 = vld [vmem:[%s3609_s1 + $0x140] sm:$0xff]  }
  0x29   : > { %2662 = vmatprep.subr.bf16.mxu1 %v2879_v29  ;;  %v887_v29 = vcombine.low %v3168_v33, %v3288_v27  ;;  %v2454_v32 = vcombine.high %v3168_v33, %v3288_v27  ;;  %v2913_v33 = vld [vmem:[%s3609_s1 + $0x180] sm:$0xff]   ;;  %v2925_v0 = vld [vmem:[%s3609_s1 + $0x2a8] sm:$0xff]  }
  0x2b   : > { %2641 = vmatpush3.bf16.msra.mxu0 %v2880_v30  ;;  %v1050_v30 = vcombine.high %v3288_v27, %v3288_v27  ;;  %v894_v35 = vrot.slane %v887_v29, %v3195_v53  ;;  %v3305_v37 = vrot.slane %v2454_v32, %v3195_v53  ;;  %v2952_v29 = vld [vmem:[%s3609_s1 + $0x3f0] sm:$0xff]   ;;  %v2954_v32 = vld [vmem:[%s3609_s1 + $0x368] sm:$0xff]  }
  0x2c   : > { %2663 = vmatpush3.bf16.msra.mxu1 %v2881_v31  ;;  %2670 = vmatprep.subr.bf16.mxu0 %v2882_v41  ;;  %v1061_v31 = vshrl.u32 %v3288_v27, 16  ;;  %v2914_v41 = vld [vmem:[%s3609_s1 + $0x278] sm:$0xff]  }
  0x2d   : > { %2692 = vmatprep.subr.bf16.mxu1 %v2884_v48  ;;  %v1066_v36 = vshll.u32 %v1050_v30, 16  ;;  %v895_v39 = vcombine.high %v894_v35, %v894_v35  ;;  %v1305_v48 = vcombine.high %v3305_v37, %v3305_v37  ;;  %v902_v50 = vrot.slane %v894_v35, %v3195_v53  ;;  %v2951_v30 = vld [vmem:[%s3609_s1 + $0x330] sm:$0xff]   ;;  %v2955_v35 = vld [vmem:[%s3609_s1 + $0x328] sm:$0xff]  }
  0x2e   : > { %469 = vmatmul.mubr.bf16.vlgmr.msra.gmra.mxu0 %v330_v60 }
  0x2f   : > { %630 = vmatmul.mubr.bf16.vlgmr.msra.gmra.mxu1 %v491_v61  ;;  %2671 = vmatpush3.bf16.msra.mxu0 %v2883_v59  ;;  %v3315_v40 = vsel %vm3178_vm14, %v1061_v31, %v1066_v36  ;;  %v909_v43 = vrot.slane %v895_v39, %v3195_v53  ;;  %v1319_v58 = vrot.slane %v1305_v48, %v3195_v53  ;;  %v2921_v59 = vld [vmem:[%s3609_s1 + $0x2b0] sm:$0xff]   ;;  %v2922_v61 = vld [vmem:[%s3609_s1 + $0x268] sm:$0xff]   ;;  %v2961_v39 = vld [vmem:[%s3609_s1 + $0x3a0] sm:$0xff]  }
  0x30   : > { %2693 = vmatpush3.bf16.msra.mxu1 %v2885_v62  ;;  %2672 = vmatprep.subr.bf16.mxu0 %v2886_v2  ;;  %v1102_v42 = vcombine.low %v3191_v51, %v3315_v40  ;;  %v2917_v51 = vld [vmem:[%s3609_s1 + $0x2b8] sm:$0xff]   ;;  %v2924_v62 = vld [vmem:[%s3609_s1 + $0x2e8] sm:$0xff]   ;;  %v2928_v2 = vld [vmem:[%s3609_s1 + $0x2e0] sm:$0xff]  }
  0x31   : > { %2694 = vmatprep.subr.bf16.mxu1 %v2888_v3  ;;  %823 = vmatprep.mubr.bf16.mxu0 %v692_v5  ;;  %v2927_v3 = vld [vmem:[%s3609_s1 + $0x220] sm:$0xff]   ;;  %v2930_v5 = vld [vmem:[%s3609_s1 + $0x258] sm:$0xff]   ;;  %v2953_v31 = vld [vmem:[%s3609_s1 + $0x3b0] sm:$0xff]  }
  0x32   : > { %v3338_v52 = vrot.slane %v1102_v42, %v3195_v53  ;;  %1040 = vmatprep.mubr.bf16.mxu1 %v909_v43  ;;  %v2957_v36 = vld [vmem:[%s3609_s1 + $0x3a8] sm:$0xff]   ;;  %v2964_v42 = vld [vmem:[%s3609_s1 + $0x3d8] sm:$0xff]   ;;  %v2968_v48 = vld [vmem:[%s3609_s1 + $0x3d0] sm:$0xff]  }
  0x33   : > { %2673 = vmatpush3.bf16.msra.mxu0 %v2887_v4  ;;  %v2929_v4 = vld [vmem:[%s3609_s1 + $0x2a0] sm:$0xff]   ;;  %v2963_v43 = vld [vmem:[%s3609_s1 + $0x318] sm:$0xff]  }
  0x34   : > { %2695 = vmatpush3.bf16.msra.mxu1 %v2889_v6  ;;  %2674 = vmatprep.subr.bf16.mxu0 %v2890_v7  ;;  %v1110_v56 = vcombine.high %v3338_v52, %v3338_v52  ;;  %v2932_v6 = vld [vmem:[%s3609_s1 + $0x2d8] sm:$0xff]  }
  0x35   : > { %2696 = vmatprep.subr.bf16.mxu1 %v2892_v8  ;;  %v2931_v7 = vld [vmem:[%s3609_s1 + $0x218] sm:$0xff]  }
  0x36   : > { %v1124_v60 = vrot.slane %v1110_v56, %v3195_v53  ;;  %v2933_v8 = vld [vmem:[%s3609_s1 + $0x298] sm:$0xff]   ;;  %v2973_v56 = vld [vmem:[%s3609_s1 + $0x388] sm:$0xff]  }
  0x37   : > { %2675 = vmatpush3.bf16.msra.mxu0 %v2891_v9  ;;  %v2934_v9 = vld [vmem:[%s3609_s1 + $0x250] sm:$0xff]  }
  0x38   : > { %2697 = vmatpush3.bf16.msra.mxu1 %v2893_v10  ;;  %2676 = vmatprep.subr.bf16.mxu0 %v2894_v11  ;;  %v2936_v10 = vld [vmem:[%s3609_s1 + $0x2d0] sm:$0xff]  }
  0x39   : > { %2698 = vmatprep.subr.bf16.mxu1 %v2896_v12  ;;  %v2935_v11 = vld [vmem:[%s3609_s1 + $0x210] sm:$0xff]  }
  0x3a   : > { %v2937_v12 = vld [vmem:[%s3609_s1 + $0x290] sm:$0xff]  }
  0x3b   : > { %2677 = vmatpush3.bf16.msra.mxu0 %v2895_v13  ;;  %v2938_v13 = vld [vmem:[%s3609_s1 + $0x248] sm:$0xff]  }
  0x3c   : > { %2699 = vmatpush3.bf16.msra.mxu1 %v2897_v14  ;;  %2678 = vmatprep.subr.bf16.mxu0 %v2898_v15  ;;  %v2940_v14 = vld [vmem:[%s3609_s1 + $0x2c8] sm:$0xff]  }
  0x3d   : > { %2700 = vmatprep.subr.bf16.mxu1 %v2900_v16  ;;  %v2939_v15 = vld [vmem:[%s3609_s1 + $0x208] sm:$0xff]  }
  0x3e   : > { %v2941_v16 = vld [vmem:[%s3609_s1 + $0x288] sm:$0xff]  }
  0x3f   : > { %2679 = vmatpush3.bf16.msra.mxu0 %v2899_v17  ;;  %v2942_v17 = vld [vmem:[%s3609_s1 + $0x240] sm:$0xff]  }
  0x40   : > { %2701 = vmatpush3.bf16.msra.mxu1 %v2901_v18  ;;  %2680 = vmatprep.subr.bf16.mxu0 %v2902_v19  ;;  %v2944_v18 = vld [vmem:[%s3609_s1 + $0x2c0] sm:$0xff]  }
  0x41   : > { %2702 = vmatprep.subr.bf16.mxu1 %v2904_v20  ;;  %v2943_v19 = vld [vmem:[%s3609_s1 + $0x200] sm:$0xff]  }
  0x42   : > { %v2945_v20 = vld [vmem:[%s3609_s1 + $0x280] sm:$0xff]  }
  0x43   : > { %2681 = vmatpush3.bf16.msra.mxu0 %v2903_v21  ;;  %v2946_v21 = vld [vmem:[%s3609_s1 + $0x378] sm:$0xff]  }
  0x44   : > { %2703 = vmatpush3.bf16.msra.mxu1 %v2905_v22  ;;  %2682 = vmatprep.subr.bf16.mxu0 %v2906_v23  ;;  %v2948_v22 = vld [vmem:[%s3609_s1 + $0x3f8] sm:$0xff]  }
  0x45   : > { %2704 = vmatprep.subr.bf16.mxu1 %v2908_v24  ;;  %v2947_v23 = vld [vmem:[%s3609_s1 + $0x338] sm:$0xff]   ;;  %v1117_v24 = vrot.slane %v3338_v52, %v3195_v53  ;;  %v2972_v52 = vld [vmem:[%s3609_s1 + $0x3c8] sm:$0xff]  }
  0x47   : > { %2683 = vmatpush3.bf16.msra.mxu0 %v2907_v25  ;;  %v1312_v25 = vrot.slane %v3305_v37, %v3195_v53  ;;  %v2958_v37 = vld [vmem:[%s3609_s1 + $0x360] sm:$0xff]  }
  0x48   : > { %2705 = vmatpush3.bf16.msra.mxu1 %v2909_v26  ;;  %2684 = vmatprep.subr.bf16.mxu0 %v2910_v28  ;;  %v2949_v26 = vld [vmem:[%s3609_s1 + $0x3b8] sm:$0xff]   ;;  %v2950_v28 = vld [vmem:[%s3609_s1 + $0x370] sm:$0xff]  }
  0x49   : > { %2706 = vmatprep.subr.bf16.mxu1 %v2912_v34  ;;  %v2956_v34 = vld [vmem:[%s3609_s1 + $0x3e8] sm:$0xff]  }
  0x4b   : > { %2685 = vmatpush3.bf16.msra.mxu0 %v2911_v38  ;;  %v2960_v38 = vld [vmem:[%s3609_s1 + $0x3e0] sm:$0xff]  }
  0x4c   : > { %2707 = vmatpush3.bf16.msra.mxu1 %v2913_v33  ;;  %2714 = vmatprep.subr.bf16.mxu0 %v2914_v41  ;;  %v2959_v33 = vld [vmem:[%s3609_s1 + $0x320] sm:$0xff]   ;;  %v2962_v41 = vld [vmem:[%s3609_s1 + $0x358] sm:$0xff]  }
  0x4d   : > { %2736 = vmatprep.subr.bf16.mxu1 %v2916_v47  ;;  %v2966_v47 = vld [vmem:[%s3609_s1 + $0x350] sm:$0xff]  }
  0x4e   : > { %824 = vmatmul.mubr.bf16.vlgmr.msra.gmra.mxu0 %v685_v49  ;;  %v2967_v49 = vld [vmem:[%s3609_s1 + $0x310] sm:$0xff]  }
  0x4f   : > { %1041 = vmatmul.mubr.bf16.vlgmr.msra.gmra.mxu1 %v902_v50  ;;  %2715 = vmatpush3.bf16.msra.mxu0 %v2915_v46  ;;  %v2965_v46 = vld [vmem:[%s3609_s1 + $0x398] sm:$0xff]   ;;  %v2969_v50 = vld [vmem:[%s3609_s1 + $0x390] sm:$0xff]  }
  0x50   : > { %2737 = vmatpush3.bf16.msra.mxu1 %v2917_v51  ;;  %2716 = vmatprep.subr.bf16.mxu0 %v2918_v54  ;;  %v2970_v51 = vld [vmem:[%s3609_s1 + $0x348] sm:$0xff]  }
  0x51   : > { %2738 = vmatprep.subr.bf16.mxu1 %v2920_v55  ;;  %1255 = vmatprep.mubr.bf16.mxu0 %v1124_v60  ;;  %v2971_v54 = vld [vmem:[%s3609_s1 + $0x308] sm:$0xff]  }
  0x52   : > { %1450 = vmatprep.mubr.bf16.mxu1 %v1319_v58  ;;  %v2474_v55 = vld.sshfl [vmem:[%s3158_s6 + $0xc] sm:$0x33 pattern:$0x75316420] }
  0x53   : > { %2717 = vmatpush3.bf16.msra.mxu0 %v2919_v57  ;;  %v1514_v57 = vcombine.low %v3288_v27, %v2474_v55  ;;  %v1677_v58 = vcombine.high %v2474_v55, %v2474_v55  ;;  %v2605_v60 = vcombine.high %v3288_v27, %v2474_v55  ;;  %v2975_v27 = vld [vmem:[%s3609_s1 + $0x300] sm:$0xff]  }
  0x54   : > { %2739 = vmatpush3.bf16.msra.mxu1 %v2921_v59  ;;  %2718 = vmatprep.subr.bf16.mxu0 %v2922_v61  ;;  %v1688_v59 = vshrl.u32 %v2474_v55, 16  ;;  %v2974_v61 = vld [vmem:[%s3609_s1 + $0x340] sm:$0xff]  }
  0x55   : > { %2740 = vmatprep.subr.bf16.mxu1 %v2924_v62  ;;  %v2976_v62 = vld [vmem:[%s3609_s1 + $0x3c0] sm:$0xff]  }
  0x57   : > { %2719 = vmatpush3.bf16.msra.mxu0 %v2923_v63  ;;  %v1521_v63 = vrot.slane %v1514_v57, %v3195_v53 }
  0x58   : > { %2741 = vmatpush3.bf16.msra.mxu1 %v2925_v0  ;;  %2720 = vmatprep.subr.bf16.mxu0 %v2926_v1  ;;  %v1693_v0 = vshll.u32 %v1677_v58, 16  ;;  %v1931_v1 = vrot.slane %v2605_v60, %v3195_v53 }
  0x59   : > { %2742 = vmatprep.subr.bf16.mxu1 %v2928_v2  ;;  %v1522_v2 = vcombine.high %v1521_v63, %v1521_v63 }
  0x5a   : > { %v1932_v45 = vcombine.high %v1931_v1, %v1931_v1 }
  0x5b   : > { %2721 = vmatpush3.bf16.msra.mxu0 %v2927_v3  ;;  %v1695_v3 = vsel %vm3178_vm14, %v1688_v59, %v1693_v0 }
  0x5c   : > { %2743 = vmatpush3.bf16.msra.mxu1 %v2929_v4  ;;  %2722 = vmatprep.subr.bf16.mxu0 %v2930_v5  ;;  %v2977_v4 = vld [vmem:[%s3609_s1 + $0x380] sm:$0xff]   ;;  %v1729_v5 = vcombine.low %v3315_v40, %v1695_v3  ;;  %v2979_v40 = vld [vmem:[%s3609_s1 + $0x438] sm:$0xff]  }
  0x5d   : > { %2744 = vmatprep.subr.bf16.mxu1 %v2932_v6  ;;  %v1536_v6 = vrot.slane %v1522_v2, %v3195_v53 }
  0x5f   : > { %2723 = vmatpush3.bf16.msra.mxu0 %v2931_v7  ;;  %v2978_v7 = vld [vmem:[%s3609_s1 + $0x478] sm:$0xff]  }
  0x60   : > { %2745 = vmatpush3.bf16.msra.mxu1 %v2933_v8  ;;  %2724 = vmatprep.subr.bf16.mxu0 %v2934_v9  ;;  %v1736_v8 = vrot.slane %v1729_v5, %v3195_v53  ;;  %v1529_v9 = vrot.slane %v1521_v63, %v3195_v53 }
  0x61   : > { %2746 = vmatprep.subr.bf16.mxu1 %v2936_v10 }
  0x62   : > { %v1737_v10 = vcombine.high %v1736_v8, %v1736_v8 }
  0x63   : > { %2725 = vmatpush3.bf16.msra.mxu0 %v2935_v11  ;;  %v1744_v11 = vrot.slane %v1736_v8, %v3195_v53 }
  0x64   : > { %2747 = vmatpush3.bf16.msra.mxu1 %v2937_v12  ;;  %2726 = vmatprep.subr.bf16.mxu0 %v2938_v13  ;;  %v2980_v12 = vld [vmem:[%s3609_s1 + $0x470] sm:$0xff]   ;;  %v1751_v13 = vrot.slane %v1737_v10, %v3195_v53 }
  0x65   : > { %2748 = vmatprep.subr.bf16.mxu1 %v2940_v14  ;;  %v1946_v14 = vrot.slane %v1932_v45, %v3195_v53 }
  0x67   : > { %2727 = vmatpush3.bf16.msra.mxu0 %v2939_v15  ;;  %v2981_v15 = vld [vmem:[%s3609_s1 + $0x430] sm:$0xff]  }
  0x68   : > { %2749 = vmatpush3.bf16.msra.mxu1 %v2941_v16  ;;  %2728 = vmatprep.subr.bf16.mxu0 %v2942_v17  ;;  %v2982_v16 = vld [vmem:[%s3609_s1 + $0x468] sm:$0xff]  }
  0x69   : > { %2750 = vmatprep.subr.bf16.mxu1 %v2944_v18  ;;  %v2983_v17 = vld [vmem:[%s3609_s1 + $0x428] sm:$0xff]   ;;  %v2984_v18 = vld [vmem:[%s3609_s1 + $0x460] sm:$0xff]  }
  0x6b   : > { %2729 = vmatpush3.bf16.msra.mxu0 %v2943_v19  ;;  %v2985_v19 = vld [vmem:[%s3609_s1 + $0x420] sm:$0xff]  }
  0x6c   : > { %2751 = vmatpush3.bf16.msra.mxu1 %v2945_v20  ;;  %2758 = vmatprep.subr.bf16.mxu0 %v2946_v21  ;;  %v2986_v20 = vld [vmem:[%s3609_s1 + $0x458] sm:$0xff]  }
  0x6d   : > { %2780 = vmatprep.subr.bf16.mxu1 %v2948_v22  ;;  %v2987_v21 = vld [vmem:[%s3609_s1 + $0x418] sm:$0xff]   ;;  %v2988_v22 = vld [vmem:[%s3609_s1 + $0x450] sm:$0xff]  }
  0x6e   : > { %1256 = vmatmul.mubr.bf16.vlgmr.msra.gmra.mxu0 %v1117_v24  ;;  %v2990_v24 = vld [vmem:[%s3609_s1 + $0x448] sm:$0xff]  }
  0x6f   : > { %1451 = vmatmul.mubr.bf16.vlgmr.msra.gmra.mxu1 %v1312_v25  ;;  %2759 = vmatpush3.bf16.msra.mxu0 %v2947_v23  ;;  %v2989_v23 = vld [vmem:[%s3609_s1 + $0x410] sm:$0xff]   ;;  %v2991_v25 = vld [vmem:[%s3609_s1 + $0x408] sm:$0xff]  }
  0x70   : > { %2781 = vmatpush3.bf16.msra.mxu1 %v2949_v26  ;;  %2760 = vmatprep.subr.bf16.mxu0 %v2950_v28  ;;  %v2992_v26 = vld [vmem:[%s3609_s1 + $0x440] sm:$0xff]  }
  0x71   : > { %2782 = vmatprep.subr.bf16.mxu1 %v2952_v29  ;;  %1667 = vmatprep.mubr.bf16.mxu0 %v1536_v6  ;;  %v2993_v28 = vld [vmem:[%s3609_s1 + $0x400] sm:$0xff]   ;;  %v1939_v29 = vrot.slane %v1931_v1, %v3195_v53 }
  0x72   : > { %1882 = vmatprep.mubr.bf16.mxu1 %v1751_v13 }
  0x73   : > { %2761 = vmatpush3.bf16.msra.mxu0 %v2951_v30 }
  0x74   : > { %2783 = vmatpush3.bf16.msra.mxu1 %v2953_v31  ;;  %2762 = vmatprep.subr.bf16.mxu0 %v2954_v32 }
  0x75   : > { %2784 = vmatprep.subr.bf16.mxu1 %v2956_v34 }
  0x77   : > { %2763 = vmatpush3.bf16.msra.mxu0 %v2955_v35 }
  0x78   : > { %2785 = vmatpush3.bf16.msra.mxu1 %v2957_v36  ;;  %2764 = vmatprep.subr.bf16.mxu0 %v2958_v37 }
  0x79   : > { %2786 = vmatprep.subr.bf16.mxu1 %v2960_v38 }
  0x7b   : > { %2765 = vmatpush3.bf16.msra.mxu0 %v2959_v33 }
  0x7c   : > { %2787 = vmatpush3.bf16.msra.mxu1 %v2961_v39  ;;  %2766 = vmatprep.subr.bf16.mxu0 %v2962_v41 }
  0x7d   : > { %2788 = vmatprep.subr.bf16.mxu1 %v2964_v42 }
  0x7f   : > { %2767 = vmatpush3.bf16.msra.mxu0 %v2963_v43 }
  0x80   : > { %2789 = vmatpush3.bf16.msra.mxu1 %v2965_v46  ;;  %2768 = vmatprep.subr.bf16.mxu0 %v2966_v47 }
  0x81   : > { %2790 = vmatprep.subr.bf16.mxu1 %v2968_v48 }
  0x83   : > { %2769 = vmatpush3.bf16.msra.mxu0 %v2967_v49 }
  0x84   : > { %2791 = vmatpush3.bf16.msra.mxu1 %v2969_v50  ;;  %2770 = vmatprep.subr.bf16.mxu0 %v2970_v51 }
  0x85   : > { %2792 = vmatprep.subr.bf16.mxu1 %v2972_v52 }
  0x87   : > { %2771 = vmatpush3.bf16.msra.mxu0 %v2971_v54 }
  0x88   : > { %2793 = vmatpush3.bf16.msra.mxu1 %v2973_v56  ;;  %2772 = vmatprep.subr.bf16.mxu0 %v2974_v61 }
  0x89   : > { %2794 = vmatprep.subr.bf16.mxu1 %v2976_v62 }
  0x8b   : > { %2773 = vmatpush3.bf16.msra.mxu0 %v2975_v27 }
  0x8c   : > { %2795 = vmatpush3.bf16.msra.mxu1 %v2977_v4  ;;  %2802 = vmatprep.subr.bf16.mxu0 %v2978_v7 }
  0x8e   : > { %1668 = vmatmul.mubr.bf16.vlgmr.msra.gmra.mxu0 %v1529_v9 }
  0x8f   : > { %2803 = vmatpush3.bf16.msra.mxu0 %v2979_v40  ;;  %1883 = vmatmul.mubr.bf16.vlgmr.msra.gmra.mxu1 %v1744_v11 }
  0x90   : > { %2804 = vmatprep.subr.bf16.mxu0 %v2980_v12  ;;  %2077 = vmatprep.mubr.bf16.mxu0 %v1946_v14  ;;  %v3019_v12 = vmov 1983009808  }
  0x91   : > { %v2097_v13 = vunpack.c.l.s4 %v3019_v12 }
  0x93   : > { %2805 = vmatpush3.bf16.msra.mxu0 %v2981_v15 }
  0x94   : > { %2806 = vmatprep.subr.bf16.mxu0 %v2982_v16 }
  0x97   : > { %2807 = vmatpush3.bf16.msra.mxu0 %v2983_v17 }
  0x98   : > { %2808 = vmatprep.subr.bf16.mxu0 %v2984_v18  ;;  %v2098_v18 = vunpack.c.0.s8 %v2097_v13 }
  0x9b   : > { %2809 = vmatpush3.bf16.msra.mxu0 %v2985_v19  ;;  %v2622_v19 = vld [vmem:[%s3610_s2] ss:$0 sm:$0xff] }
  0x9c   : > { %2810 = vmatprep.subr.bf16.mxu0 %v2986_v20 }
  0x9f   : > { %2811 = vmatpush3.bf16.msra.mxu0 %v2987_v21 }
  0xa0   : > { %2812 = vmatprep.subr.bf16.mxu0 %v2988_v22 }
  0xa3   : > { %2813 = vmatpush3.bf16.msra.mxu0 %v2989_v23 }
  0xa4   : > { %2814 = vmatprep.subr.bf16.mxu0 %v2990_v24  ;;  %v2101_v24 = vsub.s32 %v2098_v18, %v3176_v44 }
  0xa7   : > { %2815 = vmatpush3.bf16.msra.mxu0 %v2991_v25 }
  0xa8   : > { %2816 = vmatprep.subr.bf16.mxu0 %v2992_v26 }
  0xab   : > { %2817 = vmatpush3.bf16.msra.mxu0 %v2993_v28 }
  0xae   : > { %2078 = vmatmul.mubr.bf16.vlgmr.msra.gmra.mxu0 %v1939_v29 }
  0xee   : > { %v2642_v30 = vpop.f32.mrf.mxu0 }
  0xef   : > { %v2664_v31 = vpop.f32.mrf.mxu1 }
  0xf0   : > { %v2643_v32 = vpop.f32.mrf.mxu0 }
  0xf1   : > { %v2665_v34 = vpop.f32.mrf.mxu1  ;;  %v2644_v35 = vadd.f32 %v2643_v32, %v2642_v30 }
  0xf2   : > { %v2666_v36 = vadd.f32 %v2665_v34, %v2664_v31  ;;  %v2645_v37 = vpop.f32.mrf.mxu0 }
  0xf3   : > { %v2667_v38 = vpop.f32.mrf.mxu1 }
  0xf4   : > { %v632_v33 = vadd.f32 %v2666_v36, %v2644_v35  ;;  %v2646_v39 = vpop.f32.mrf.mxu0 }
  0xf5   : > { %v2668_v41 = vpop.f32.mrf.mxu1 }
 0x10e   : > { %v2686_v42 = vpop.f32.mrf.mxu0 }
 0x10f   : > { %v2708_v43 = vpop.f32.mrf.mxu1 }
 0x110   : > { %v2687_v46 = vpop.f32.mrf.mxu0 }
 0x111   : > { %v2709_v47 = vpop.f32.mrf.mxu1  ;;  %v2688_v48 = vadd.f32 %v2687_v46, %v2686_v42 }
 0x112   : > { %v2710_v49 = vadd.f32 %v2709_v47, %v2708_v43  ;;  %v2689_v53 = vpop.f32.mrf.mxu0 }
 0x113   : > { %v2711_v50 = vpop.f32.mrf.mxu1  ;;  %v831_v51 = vadd.f32 %v2688_v48, %v632_v33 }
 0x114   : > { %v2690_v52 = vpop.f32.mrf.mxu0 }
 0x115   : > { %v2712_v54 = vpop.f32.mrf.mxu1  ;;  %v1048_v55 = vadd.f32 %v2710_v49, %v831_v51 }
 0x12e   : > { %v2730_v56 = vpop.f32.mrf.mxu0 }
 0x12f   : > { %v2752_v57 = vpop.f32.mrf.mxu1 }
 0x130   : > { %v2731_v58 = vpop.f32.mrf.mxu0 }
 0x131   : > { %v2753_v59 = vpop.f32.mrf.mxu1  ;;  %v2732_v7 = vadd.f32 %v2731_v58, %v2730_v56 }
 0x132   : > { %v2733_v60 = vpop.f32.mrf.mxu0  ;;  %v2754_v45 = vadd.f32 %v2753_v59, %v2752_v57 }
 0x133   : > { %v2755_v61 = vpop.f32.mrf.mxu1  ;;  %v1263_v8 = vadd.f32 %v2732_v7, %v1048_v55 }
 0x134   : > { %v2734_v62 = vpop.f32.mrf.mxu0 }
 0x135   : > { %v2756_v63 = vpop.f32.mrf.mxu1  ;;  %v1458_v10 = vadd.f32 %v2754_v45, %v1263_v8 }
 0x14e   : > { %v2774_v0 = vpop.f32.mrf.mxu0 }
 0x14f   : > { %v2796_v27 = vpop.f32.mrf.mxu1 }
 0x150   : > { %v2775_v1 = vpop.f32.mrf.mxu0 }
 0x151   : > { %v2797_v3 = vpop.f32.mrf.mxu1  ;;  %v2776_v9 = vadd.f32 %v2775_v1, %v2774_v0 }
 0x152   : > { %v2777_v2 = vpop.f32.mrf.mxu0  ;;  %v2798_v11 = vadd.f32 %v2797_v3, %v2796_v27 }
 0x153   : > { %v2799_v5 = vpop.f32.mrf.mxu1  ;;  %v1675_v40 = vadd.f32 %v2776_v9, %v1458_v10 }
 0x154   : > { %v2778_v4 = vpop.f32.mrf.mxu0 }
 0x155   : > { %v2800_v6 = vpop.f32.mrf.mxu1  ;;  %v1890_v16 = vadd.f32 %v2798_v11, %v1675_v40 }
 0x16e   : > { %v2818_v14 = vpop.f32.mrf.mxu0 }
 0x170   : > { %v2819_v15 = vpop.f32.mrf.mxu0 }
 0x171   : > { %v2820_v17 = vadd.f32 %v2819_v15, %v2818_v14 }
 0x172   : > { %v2821_v20 = vpop.f32.mrf.mxu0 }
 0x173   : > { %v2085_v21 = vadd.f32 %v2820_v17, %v1890_v16 }
 0x174   : > { %v2822_v22 = vpop.f32.mrf.mxu0 }
 0x175   : > { %v2093_v23 = vadd.f32 %v2622_v19, %v2085_v21 }
 0x177   : > { %v2094_v25 = vmax.f32 %v2093_v23, 0.0 }
 0x179   : > { %v2102_v26 = vrot.slane %v2094_v25, %v2101_v24 }
 0x17b   : > { %v2103_v28 = vcombine.high %v2102_v26, %v2102_v26  ;;  %v2106_v29 = vpack.c.bf16 %v2102_v26, %v2102_v26 }
 0x17d   : > { %v2107_v30 = vpack.c.bf16 %v2103_v28, %v2103_v28  ;;  %2108 = vst [vmem:[%s190_s22] sm:$0x1] %v2106_v29 }
 0x17f   : > { %2109 = vst [vmem:[%s190_s22 + $0x1] sm:$0x1] %v2107_v30 }
 0x180 PF: > { %s13_s14 = sadd.s32 1, %s3016_s14   ;;  %s3614_s12 = smov %s3012_s13 }
 0x181   : > { %p10_p5 = scmp.ge.s32.totalorder %s13_s14, 4   ;;  %s3615_s13 = smov %s3617_s15 }
 0x183   :  { %12 = sbr.rel (!%p10_p5) target bundleno = 2 (0x2), region = 73 }

// kernel: deeplab3plus_forward.13
= control target key start
LH: loop header
LB: loop body
LE: loop exit
PB: predicated region body
PF: predicated region fallthrough
CT: control target
= control target key end

     0   :  { %s1299_s12 = smov 0   ;;  %s1301_s13 = smov 0   ;;  %s1412_s0 = inlined_call_operand.vmem [shape: f32[8,2], index: 0, kind: input, shape index: {}, may-alias: {0,1}]   ;;  %s1413_s1 = inlined_call_operand.vmem [shape: f32[8,2], index: 1, kind: input, shape index: {}, may-alias: {0,1}]   ;;  %s1414_s2 = inlined_call_operand.vmem [shape: bf16[2,2,2,8], index: 2, kind: input, shape index: {}]   ;;  %s1415_s3 = inlined_call_operand.vmem [shape: bf16[2,8,8,8], index: 3, kind: output, shape index: {}]  }
   0x1   :  { %s1303_s14 = smov 0  }
   0x2 LB: > { %s32_s15 = sadd.s32 1, %s1267_s13  ;;  %p1131_p0 = scmp.ge.s32.totalorder %s1271_s14, 1  ;;  %s1271_s14 = sphi %s1303_s14, %s13_s14   ;;  %s1267_s13 = sphi %s1301_s13, %s1417_s13   ;;  %s1263_s12 = sphi %s1299_s12, %s1416_s12  }
   0x3   : > { %p34_p1 = scmp.ge.s32.totalorder %s32_s15, 2  ;;  %p173_p2 = scmp.lt.s32.totalorder %s1271_s14, 3 }
   0x5   : > { %s1419_s15 = smov (%p34_p1, %s32_s15), 0  ;;  %p174_p3 = pnand %p1131_p0, %p173_p2 }
   0x6   : > { %p214_p4 = scmp.lt.s32.totalorder (!%p174_p3), %s1263_s12, 1  ;;  %s1277_s20 = smov (!%p174_p3), 8  }
   0x7   : > { %177 = sbr.rel (%p174_p3) target bundleno = 668 (0x29c), region = 32  ;;  %s1278_s23 = smov (!%p174_p3), 120  }
   0xc   : > { %v242_v0 = vlaneseq  ;;  %v1273_v1 = vmov 1934713408   ;;  %v1274_v3 = vmov 0.0   ;;  %s1421_s12 = smov (!%p214_p4, %s1263_s12), 1  ;;  %v1275_v6 = vmov 1983009808  }
   0xd   : > { %v240_v2 = vunpack.c.l.s4 %v1273_v1  ;;  %1174 = vmatprep.subr.mxu0 %v1274_v3  ;;  %1179 = vmatprep.subr.mxu1 %v1274_v3  ;;  %v249_v7 = vunpack.c.l.s4 %v1275_v6  ;;  %s1132_s16 = sshll.u32 %s1421_s12, 1  ;;  %vm1276_vm0 = vmmov 0   ;;  %vm258_vm1 = vcmask 64512   ;;  %v260_v20 = vld [vmem:[%s1412_s0] sm:$0xff]  ;;  %s1155_s26 = sshll.u32 %s1421_s12, 5 }
   0xe   : > { %v243_v5 = vshrl.u32 %v242_v0, 7  ;;  %s220_s19 = scalar_lea.vmem %s1414_s2, %s1132_s16  ;;  %1176 = vmatprep.mubr.msk.f32.mxu0 %vm1276_vm0, %v1274_v3  ;;  %1181 = vmatprep.mubr.msk.f32.mxu1 %vm1276_vm0, %v1274_v3  ;;  %vm265_vm2 = vcmask 1041408   ;;  %vm261_vm3 = vcmask 15360   ;;  %v409_v36 = vld [vmem:[%s1413_s1] sm:$0xff]  ;;  %s1385_s29 = scalar_lea.vmem %s1415_s3, %s1155_s26  ;;  %vm1005_vm4 = vcmask 60416  }
   0xf   : > { %v241_v4 = vunpack.c.0.s8 %v240_v2  ;;  %v234_v8 = vld [vmem:[%s220_s19] sm:$0x1]  ;;  %v235_v9 = vld [vmem:[%s220_s19 + $0x1] sm:$0x1]  ;;  %v250_v13 = vunpack.c.0.s8 %v249_v7 }
  0x10   : > { %v236_v10 = vunpack.c.l.bf16 %v234_v8  ;;  %v237_v11 = vunpack.c.l.bf16 %v235_v9 }
  0x11   : > { %v244_v12 = vsub.s32 %v241_v4, %v243_v5  ;;  %v253_v16 = vsub.s32 %v250_v13, %v243_v5 }
  0x12   : > { %v238_v14 = vcombine.low %v236_v10, %v237_v11 }
  0x14   : > { %v245_v15 = vrot.slane %v238_v14, %v244_v12 }
  0x16   : > { %v246_v17 = vcombine.high %v245_v15, %v1274_v3 }
  0x18   : > { %v254_v18 = vrot.slane %v246_v17, %v253_v16 }
  0x1a   : > { %255 = vrot.lane.b32.xlu0 %v254_v18, %s1277_s20 }
  0x8c   : > { %v256_v19 = vpop.permute.xlu0 %255 }
  0x8d   : > { %v259_v21 = vsel %vm258_vm1, %v245_v15, %v256_v19 }
  0x8e   : > { %1175 = vmatpush3.msk.msra.mxu0 %vm265_vm2, %v259_v21 }
  0x8f   : > { %1177 = vmatmul.mubr.msk.f32.vlgmr.msra.gmra.mxu0 %vm261_vm3, %v260_v20  ;;  %1184 = vmatprep.subr.mxu0 %v1274_v3 }
  0x90   : > { %1186 = vmatprep.mubr.msk.f32.mxu0 %vm1276_vm0, %v1274_v3 }
 0x14f   : > { %v335_v22 = vpop.f32.mrf.mxu0 }
 0x150   : > { %340 = vrot.lane.b32.xlu0 %v335_v22, %s1278_s23  ;;  %v343_v24 = vcombine.high %v335_v22, %v1274_v3  ;;  %v350_v26 = vrot.slane %v335_v22, %v253_v16 }
 0x151   : > { %v1178_v23 = vpop.f32.mrf.mxu0 }
 0x152   : > { %v357_v29 = vrot.slane %v343_v24, %v253_v16 }
 0x1c2   : > { %v341_v25 = vpop.permute.xlu0 %340 }
 0x1c3   : > { %v358_v27 = vcombine.high %v341_v25, %v1274_v3  ;;  %v365_v28 = vrot.slane %v341_v25, %v253_v16 }
 0x1c5   : > { %v372_v30 = vrot.slane %v358_v27, %v253_v16  ;;  %v373_v31 = vcombine.low %v350_v26, %v365_v28  ;;  %v374_v32 = vcombine.high %v350_v26, %v365_v28 }
 0x1c7   : > { %v388_v33 = vrot.slane %v374_v32, %v244_v12  ;;  %v389_v34 = vcombine.low %v357_v29, %v372_v30  ;;  %v381_v35 = vrot.slane %v373_v31, %v244_v12  ;;  %v390_v38 = vcombine.high %v357_v29, %v372_v30 }
 0x1c9   : > { %v405_v37 = vcombine.high %v381_v35, %v1274_v3  ;;  %1180 = vmatpush3.msk.msra.mxu1 %vm265_vm2, %v381_v35  ;;  %v397_v39 = vrot.slane %v389_v34, %v244_v12  ;;  %v406_v40 = vcombine.high %v388_v33, %v1274_v3  ;;  %v404_v41 = vrot.slane %v390_v38, %v244_v12 }
 0x1ca   : > { %1182 = vmatmul.mubr.msk.f32.vlgmr.msra.gmra.mxu1 %vm261_vm3, %v409_v36  ;;  %1189 = vmatprep.subr.mxu1 %v1274_v3 }
 0x1cb   : > { %1185 = vmatpush3.msk.msra.mxu0 %vm265_vm2, %v405_v37  ;;  %1190 = vmatpush3.msk.msra.mxu1 %vm265_vm2, %v388_v33  ;;  %v407_v42 = vcombine.high %v397_v39, %v1274_v3  ;;  %v408_v43 = vcombine.high %v404_v41, %v1274_v3 }
 0x1cc   : > { %1187 = vmatmul.mubr.msk.f32.vlgmr.msra.gmra.mxu0 %vm261_vm3, %v409_v36  ;;  %1194 = vmatprep.subr.mxu0 %v1274_v3 }
 0x1cd   : > { %1191 = vmatprep.mubr.msk.f32.mxu1 %vm1276_vm0, %v1274_v3  ;;  %1195 = vmatpush3.msk.msra.mxu0 %vm265_vm2, %v406_v40 }
 0x1ce   : > { %1199 = vmatprep.subr.mxu1 %v1274_v3  ;;  %1192 = vmatmul.mubr.msk.f32.vlgmr.msra.gmra.mxu1 %vm261_vm3, %v409_v36 }
 0x1cf   : > { %1200 = vmatpush3.msk.msra.mxu1 %vm265_vm2, %v397_v39  ;;  %1196 = vmatprep.mubr.msk.f32.mxu0 %vm1276_vm0, %v1274_v3 }
 0x1d0   : > { %1204 = vmatprep.subr.mxu0 %v1274_v3  ;;  %1197 = vmatmul.mubr.msk.f32.vlgmr.msra.gmra.mxu0 %vm261_vm3, %v409_v36 }
 0x1d1   : > { %1205 = vmatpush3.msk.msra.mxu0 %vm265_vm2, %v407_v42  ;;  %1201 = vmatprep.mubr.msk.f32.mxu1 %vm1276_vm0, %v1274_v3 }
 0x1d2   : > { %1209 = vmatprep.subr.mxu1 %v1274_v3  ;;  %1202 = vmatmul.mubr.msk.f32.vlgmr.msra.gmra.mxu1 %vm261_vm3, %v409_v36 }
 0x1d3   : > { %1210 = vmatpush3.msk.msra.mxu1 %vm265_vm2, %v404_v41  ;;  %1206 = vmatprep.mubr.msk.f32.mxu0 %vm1276_vm0, %v1274_v3 }
 0x1d4   : > { %1214 = vmatprep.subr.mxu0 %v1274_v3  ;;  %1207 = vmatmul.mubr.msk.f32.vlgmr.msra.gmra.mxu0 %vm261_vm3, %v409_v36 }
 0x1d5   : > { %1215 = vmatpush3.msk.msra.mxu0 %vm265_vm2, %v408_v43  ;;  %1211 = vmatprep.mubr.msk.f32.mxu1 %vm1276_vm0, %v1274_v3 }
 0x1d6   : > { %1216 = vmatprep.mubr.msk.f32.mxu0 %vm1276_vm0, %v1274_v3  ;;  %1212 = vmatmul.mubr.msk.f32.vlgmr.msra.gmra.mxu1 %vm261_vm3, %v409_v36 }
 0x1d8   : > { %1217 = vmatmul.mubr.msk.f32.vlgmr.msra.gmra.mxu0 %vm261_vm3, %v409_v36 }
 0x28a   : > { %v482_v44 = vpop.f32.mrf.mxu1 }
 0x28b   : > { %v997_v45 = vpack.c.bf16 %v482_v44, %v482_v44 }
 0x28c   : > { %v555_v46 = vpop.f32.mrf.mxu0  ;;  %v1183_v47 = vpop.f32.mrf.mxu1 }
 0x28d   : > { %1006 = vst.msk [vmem:[%s1385_s29] sm:$0xf] %vm1005_vm4, %v997_v45  ;;  %v998_v48 = vpack.c.bf16 %v555_v46, %v555_v46 }
 0x28e   : > { %v1188_v49 = vpop.f32.mrf.mxu0  ;;  %v628_v50 = vpop.f32.mrf.mxu1 }
 0x28f   : > { %1007 = vst.msk [vmem:[%s1385_s29 + $0x4] sm:$0xf] %vm1005_vm4, %v998_v48  ;;  %v999_v51 = vpack.c.bf16 %v628_v50, %v628_v50 }
 0x290   : > { %v701_v52 = vpop.f32.mrf.mxu0  ;;  %v1193_v53 = vpop.f32.mrf.mxu1 }
 0x291   : > { %1008 = vst.msk [vmem:[%s1385_s29 + $0x8] sm:$0xf] %vm1005_vm4, %v999_v51  ;;  %v1000_v54 = vpack.c.bf16 %v701_v52, %v701_v52 }
 0x292   : > { %v1198_v55 = vpop.f32.mrf.mxu0  ;;  %v774_v56 = vpop.f32.mrf.mxu1 }
 0x293   : > { %1009 = vst.msk [vmem:[%s1385_s29 + $0xc] sm:$0xf] %vm1005_vm4, %v1000_v54  ;;  %v1001_v57 = vpack.c.bf16 %v774_v56, %v774_v56 }
 0x294   : > { %v847_v58 = vpop.f32.mrf.mxu0  ;;  %v1203_v59 = vpop.f32.mrf.mxu1 }
 0x295   : > { %1010 = vst.msk [vmem:[%s1385_s29 + $0x10] sm:$0xf] %vm1005_vm4, %v1001_v57  ;;  %v1002_v60 = vpack.c.bf16 %v847_v58, %v847_v58 }
 0x296   : > { %v1208_v61 = vpop.f32.mrf.mxu0  ;;  %v920_v62 = vpop.f32.mrf.mxu1 }
 0x297   : > { %1011 = vst.msk [vmem:[%s1385_s29 + $0x14] sm:$0xf] %vm1005_vm4, %v1002_v60  ;;  %v1003_v63 = vpack.c.bf16 %v920_v62, %v920_v62 }
 0x298   : > { %v993_v0 = vpop.f32.mrf.mxu0  ;;  %v1213_v1 = vpop.f32.mrf.mxu1 }
 0x299   : > { %1012 = vst.msk [vmem:[%s1385_s29 + $0x18] sm:$0xf] %vm1005_vm4, %v1003_v63  ;;  %v1004_v2 = vpack.c.bf16 %v993_v0, %v993_v0 }
 0x29a   : > { %v1218_v3 = vpop.f32.mrf.mxu0 }
 0x29b   : > { %1013 = vst.msk [vmem:[%s1385_s29 + $0x1c] sm:$0xf] %vm1005_vm4, %v1004_v2 }
 0x29c PF: > { %s13_s14 = sadd.s32 1, %s1271_s14   ;;  %s1416_s12 = smov %s1267_s13 }
 0x29d   : > { %p10_p5 = scmp.ge.s32.totalorder %s13_s14, 4   ;;  %s1417_s13 = smov %s1419_s15 }
 0x29f   :  { %12 = sbr.rel (!%p10_p5) target bundleno = 2 (0x2), region = 65 }

// kernel: deeplab3plus_forward.16
= control target key start
LH: loop header
LB: loop body
LE: loop exit
PB: predicated region body
PF: predicated region fallthrough
CT: control target
= control target key end

     0   :  { %s538_s12 = smov 0   ;;  %s540_s13 = smov 0   ;;  %s580_s0 = inlined_call_operand.vmem [shape: bf16[2,8,8,32], index: 0, kind: input, shape index: {}]   ;;  %s581_s1 = inlined_call_operand.vmem [shape: bf16[1,32,128], index: 1, kind: input, shape index: {}]   ;;  %s582_s2 = inlined_call_operand.vmem [shape: f32[1,128], index: 2, kind: input, shape index: {}]   ;;  %s583_s3 = inlined_call_operand.vmem [shape: f32[2,8,8,128], index: 3, kind: output, shape index: {}]  }
   0x1   :  { %s542_s14 = smov 0  }
   0x2 LB: > { %s25_s15 = sadd.s32 1, %s512_s13  ;;  %p422_p0 = scmp.ge.s32.totalorder %s516_s14, 1  ;;  %s516_s14 = sphi %s542_s14, %s13_s14   ;;  %s512_s13 = sphi %s540_s13, %s585_s13   ;;  %s508_s12 = sphi %s538_s12, %s584_s12  }
   0x3   : > { %p27_p1 = scmp.ge.s32.totalorder %s25_s15, 2  ;;  %p151_p2 = scmp.lt.s32.totalorder %s516_s14, 3 }
   0x5   : > { %s587_s15 = smov (%p27_p1, %s25_s15), 0  ;;  %p152_p3 = pnand %p422_p0, %p151_p2 }
   0x6   : > { %p179_p4 = scmp.lt.s32.totalorder (!%p152_p3), %s508_s12, 1 }
   0x7   : > { %155 = sbr.rel (%p152_p3) target bundleno = 223 (0xdf), region = 32 }
   0xc   : > { %v488_v0 = vld [vmem:[%s581_s1 + $0x8] sm:$0xff]   ;;  %v489_v1 = vld [vmem:[%s581_s1] sm:$0xff]   ;;  %s589_s12 = smov (!%p179_p4, %s508_s12), 1  ;;  %vm249_vm0 = vcmask 261120  }
   0xd   : > { %448 = vmatprep.subr.bf16.mxu0 %v488_v0  ;;  %460 = vmatprep.subr.bf16.mxu1 %v488_v0  ;;  %s440_s20 = sshll.u32 %s589_s12, 5  ;;  %s441_s24 = sshll.u32 %s589_s12, 6  ;;  %v427_v6 = vld [vmem:[%s582_s2] ss:$0 sm:$0xff] }
   0xe   : > { %449 = vmatpush3.bf16.msra.mxu0 %v488_v0  ;;  %462 = vmatpush3.bf16.msra.mxu1 %v488_v0  ;;  %s183_s23 = scalar_lea.vmem %s580_s0, %s440_s20  ;;  %s192_s29 = scalar_lea.vmem %s583_s3, %s441_s24 }
   0xf   : > { %450 = vmatprep.subr.bf16.mxu0 %v489_v1  ;;  %461 = vmatprep.subr.bf16.mxu1 %v489_v1  ;;  %v490_v2 = vld [vmem:[%s183_s23] sm:$0xff]   ;;  %v491_v3 = vld [vmem:[%s183_s23 + $0x10] sm:$0xff]   ;;  %v492_v4 = vld [vmem:[%s183_s23 + $0x8] sm:$0xff]  }
  0x10   : > { %452 = vmatprep.mubr.msk.bf16.mxu0 %vm249_vm0, %v490_v2  ;;  %456 = vmatprep.mubr.msk.bf16.mxu1 %vm249_vm0, %v491_v3  ;;  %v493_v5 = vld [vmem:[%s183_s23 + $0x18] sm:$0xff]  }
  0x12   : > { %451 = vmatpush3.bf16.msra.mxu0 %v489_v1  ;;  %463 = vmatpush3.bf16.msra.mxu1 %v489_v1 }
  0x15   : > { %453 = vmatmul.mubr.msk.bf16.vlgmr.msra.gmra.mxu0 %vm249_vm0, %v492_v4  ;;  %457 = vmatmul.mubr.msk.bf16.vlgmr.msra.gmra.mxu1 %vm249_vm0, %v493_v5 }
  0xd5   : > { %v454_v7 = vpop.f32.mrf.mxu0  ;;  %v458_v9 = vpop.f32.mrf.mxu1 }
  0xd6   : > { %v305_v8 = vadd.f32 %v454_v7, %v427_v6  ;;  %v321_v10 = vadd.f32 %v458_v9, %v427_v6 }
  0xd7   : > { %v296_v11 = vpop.f32.mrf.mxu0  ;;  %v312_v13 = vpop.f32.mrf.mxu1 }
  0xd8   : > { %329 = vst [vmem:[%s192_s29 + $0x10] sm:$0xff] %v305_v8  ;;  %v297_v12 = vadd.f32 %v427_v6, %v296_v11  ;;  %333 = vst [vmem:[%s192_s29 + $0x30] sm:$0xff] %v321_v10  ;;  %v313_v14 = vadd.f32 %v427_v6, %v312_v13 }
  0xd9   : > { %v455_v15 = vpop.f32.mrf.mxu0  ;;  %v459_v17 = vpop.f32.mrf.mxu1 }
  0xda   : > { %327 = vst [vmem:[%s192_s29] sm:$0xff] %v297_v12  ;;  %v308_v16 = vadd.f32 %v455_v15, %v427_v6  ;;  %331 = vst [vmem:[%s192_s29 + $0x20] sm:$0xff] %v313_v14  ;;  %v324_v18 = vadd.f32 %v459_v17, %v427_v6 }
  0xdb   : > { %v299_v19 = vpop.f32.mrf.mxu0  ;;  %v315_v21 = vpop.f32.mrf.mxu1 }
  0xdc   : > { %330 = vst [vmem:[%s192_s29 + $0x18] sm:$0xff] %v308_v16  ;;  %v300_v20 = vadd.f32 %v427_v6, %v299_v19  ;;  %334 = vst [vmem:[%s192_s29 + $0x38] sm:$0xff] %v324_v18  ;;  %v316_v22 = vadd.f32 %v427_v6, %v315_v21 }
  0xde   : > { %328 = vst [vmem:[%s192_s29 + $0x8] sm:$0xff] %v300_v20  ;;  %332 = vst [vmem:[%s192_s29 + $0x28] sm:$0xff] %v316_v22 }
  0xdf PF: > { %s13_s14 = sadd.s32 1, %s516_s14   ;;  %s584_s12 = smov %s512_s13 }
  0xe0   : > { %p10_p5 = scmp.ge.s32.totalorder %s13_s14, 4   ;;  %s585_s13 = smov %s587_s15 }
  0xe2   :  { %12 = sbr.rel (!%p10_p5) target bundleno = 2 (0x2), region = 63 }

// kernel: deeplab3plus_forward.14
= control target key start
LH: loop header
LB: loop body
LE: loop exit
PB: predicated region body
PF: predicated region fallthrough
CT: control target
= control target key end

     0   :  { %s2224_s12 = smov 0   ;;  %s2226_s13 = smov 0   ;;  %s2832_s0 = inlined_call_operand.vmem [shape: bf16[2,10,10,16], index: 0, kind: input, shape index: {}]   ;;  %s2833_s1 = inlined_call_operand.vmem [shape: bf16[9,16,128], index: 1, kind: input, shape index: {}]   ;;  %s2834_s2 = inlined_call_operand.vmem [shape: f32[1,128], index: 2, kind: input, shape index: {}]   ;;  %s2835_s3 = inlined_call_operand.vmem [shape: bf16[2,8,8,128], index: 3, kind: output, shape index: {}]  }
   0x1   :  { %s2228_s14 = smov 0  }
   0x2 LB: > { %s25_s15 = sadd.s32 1, %s2198_s13  ;;  %p1813_p0 = scmp.ge.s32.totalorder %s2202_s14, 1  ;;  %s2202_s14 = sphi %s2228_s14, %s13_s14   ;;  %s2198_s13 = sphi %s2226_s13, %s2841_s13   ;;  %s2194_s12 = sphi %s2224_s12, %s2840_s12  }
   0x3   : > { %p27_p1 = scmp.ge.s32.totalorder %s25_s15, 2  ;;  %p151_p2 = scmp.lt.s32.totalorder %s2202_s14, 3 }
   0x5   : > { %s2843_s15 = smov (%p27_p1, %s25_s15), 0  ;;  %p152_p3 = pnand %p1813_p0, %p151_p2 }
   0x6   : > { %p179_p4 = scmp.lt.s32.totalorder (!%p152_p3), %s2194_s12, 1 }
   0x7   : > { %155 = sbr.rel (%p152_p3) target bundleno = 318 (0x13e), region = 32 }
   0xc   : > { %v2159_v0 = vld [vmem:[%s2833_s1 + $0x8] sm:$0xff]   ;;  %v2248_v1 = vld [vmem:[%s2833_s1] sm:$0xff]   ;;  %s2845_s12 = smov (!%p179_p4, %s2194_s12), 1  ;;  %v2255_v2 = vld [vmem:[%s2833_s1 + $0x10] sm:$0xff]   ;;  %vm217_vm0 = vsmask.f32 3328 }
   0xd   : > { %2132 = vmatprep.subr.bf16.mxu1 %v2159_v0  ;;  %2042 = vmatprep.subr.bf16.mxu0 %v2159_v0  ;;  %s2134_s22 = smul.u32 80, %s2845_s12  ;;  %vm218_vm1 = vsmask.f32 7440  ;;  %vm353_vm2 = vcmask 130048   ;;  %vm542_vm4 = vcmask 1042432   ;;  %vm543_vm5 = vcmask 1046532  }
   0xe   : > { %2133 = vmatpush3.bf16.msra.mxu1 %v2159_v0  ;;  %2043 = vmatpush3.bf16.msra.mxu0 %v2159_v0  ;;  %vm2302_vm3 = vmor %vm217_vm0, %vm218_vm1  ;;  %s1973_s17 = sshll.u32 %s2845_s12, 5 }
   0xf   : > { %2052 = vmatprep.subr.bf16.mxu1 %v2248_v1  ;;  %2062 = vmatprep.subr.bf16.mxu0 %v2255_v2  ;;  %s2263_s25 = scalar_lea.vmem %s2832_s0, %s2134_s22  ;;  %vm2365_vm6 = vmor %vm542_vm4, %vm543_vm5  ;;  %s192_s20 = scalar_lea.vmem %s2835_s3, %s1973_s17 }
  0x10   : > { %v2266_v3 = vld [vmem:[%s2263_s25] sm:$0xf]  ;;  %v2269_v4 = vld [vmem:[%s2263_s25 + $0x4] sm:$0x1]  ;;  %v2272_v5 = vld [vmem:[%s2263_s25 + $0x8] sm:$0xf] }
  0x11   : > { %v2275_v6 = vld [vmem:[%s2263_s25 + $0xc] sm:$0x1]  ;;  %v221_v7 = vshrl.u32 %v2266_v3, 16  ;;  %v224_v8 = vshll.u32 %v2266_v3, 16  ;;  %v230_v9 = vshll.u32 %v2269_v4, 16  ;;  %v235_v10 = vshrl.u32 %v2272_v5, 16 }
  0x12   : > { %v238_v11 = vshll.u32 %v2272_v5, 16  ;;  %v244_v12 = vshll.u32 %v2275_v6, 16  ;;  %v547_v13 = vrot.slane %v2269_v4, 5  ;;  %v551_v14 = vrot.slane %v2275_v6, 5  ;;  %v2286_v15 = vld [vmem:[%s2263_s25 + $0x20] sm:$0xf] }
  0x13   : > { %v223_v16 = vrot.slane %v221_v7, 4  ;;  %v226_v17 = vrot.slane %v224_v8, 5  ;;  %v232_v18 = vrot.slane %v230_v9, 5  ;;  %v237_v19 = vrot.slane %v235_v10, 4  ;;  %v2289_v20 = vld [vmem:[%s2263_s25 + $0x24] sm:$0x1] }
  0x14   : > { %v240_v21 = vrot.slane %v238_v11, 5  ;;  %v246_v22 = vrot.slane %v244_v12, 5  ;;  %v2292_v23 = vld [vmem:[%s2263_s25 + $0x28] sm:$0xf]  ;;  %v2295_v24 = vld [vmem:[%s2263_s25 + $0x2c] sm:$0x1]  ;;  %v1828_v39 = vcombine.low %v2266_v3, %v2272_v5 }
  0x15   : > { %v227_v25 = vor.u32 %v226_v17, %v223_v16  ;;  %v277_v26 = vshrl.u32 %v2286_v15, 16  ;;  %v280_v27 = vshll.u32 %v2286_v15, 16  ;;  %v286_v28 = vshll.u32 %v2289_v20, 16  ;;  %v2310_v34 = vld [vmem:[%s2263_s25 + $0x10] sm:$0xf] }
  0x16   : > { %v241_v30 = vor.u32 %v240_v21, %v237_v19  ;;  %v291_v31 = vshrl.u32 %v2292_v23, 16  ;;  %v294_v32 = vshll.u32 %v2292_v23, 16  ;;  %v300_v33 = vshll.u32 %v2295_v24, 16  ;;  %v2313_v38 = vld [vmem:[%s2263_s25 + $0x14] sm:$0x1] }
  0x17   : > { %v228_v35 = vrot.slane %v227_v25, 4  ;;  %v279_v36 = vrot.slane %v277_v26, 4  ;;  %v282_v37 = vrot.slane %v280_v27, 5  ;;  %v288_v41 = vrot.slane %v286_v28, 5  ;;  %v2318_v44 = vld [vmem:[%s2263_s25 + $0x18] sm:$0xf] }
  0x18   : > { %v242_v40 = vrot.slane %v241_v30, 4  ;;  %v293_v42 = vrot.slane %v291_v31, 4  ;;  %v296_v43 = vrot.slane %v294_v32, 5  ;;  %v302_v47 = vrot.slane %v300_v33, 5  ;;  %v2326_v51 = vld [vmem:[%s2263_s25 + $0x1c] sm:$0x1] }
  0x19   : > { %v233_v45 = vsel %vm2302_vm3, %v228_v35, %v232_v18  ;;  %v283_v46 = vor.u32 %v282_v37, %v279_v36  ;;  %v563_v48 = vrot.slane %v2289_v20, 5  ;;  %v249_v52 = vshrl.u32 %v2310_v34, 16  ;;  %v2334_v62 = vld [vmem:[%s2263_s25 + $0x30] sm:$0xf]  ;;  %v2342_v9 = vld [vmem:[%s2263_s25 + $0x34] sm:$0x1] }
  0x1a   : > { %v247_v49 = vsel %vm2302_vm3, %v242_v40, %v246_v22  ;;  %v297_v50 = vor.u32 %v296_v43, %v293_v42  ;;  %v252_v53 = vshll.u32 %v2310_v34, 16  ;;  %v258_v56 = vshll.u32 %v2313_v38, 16  ;;  %v2347_v17 = vld [vmem:[%s2263_s25 + $0x38] sm:$0xf]  ;;  %v2350_v18 = vld [vmem:[%s2263_s25 + $0x3c] sm:$0x1] }
  0x1b   : > { %v1819_v54 = vcombine.low %v233_v45, %v247_v49  ;;  %v284_v55 = vrot.slane %v283_v46, 4  ;;  %v263_v57 = vshrl.u32 %v2318_v44, 16  ;;  %v251_v59 = vrot.slane %v249_v52, 4  ;;  %v2431_v20 = vld [vmem:[%s2263_s25 + $0x14] sm:$0x1] }
  0x1c   : > { %v298_v58 = vrot.slane %v297_v50, 4  ;;  %v254_v60 = vrot.slane %v252_v53, 5  ;;  %v266_v61 = vshll.u32 %v2318_v44, 16  ;;  %v567_v0 = vrot.slane %v2295_v24, 5 }
  0x1d   : > { %2044 = vmatprep.mubr.msk.bf16.mxu0 %vm353_vm2, %v1819_v54  ;;  %v289_v63 = vsel %vm2302_vm3, %v284_v55, %v288_v41  ;;  %v265_v7 = vrot.slane %v263_v57, 4  ;;  %v272_v8 = vshll.u32 %v2326_v51, 16  ;;  %v260_v12 = vrot.slane %v258_v56, 5  ;;  %v2165_v56 = vld [vmem:[%s2833_s1 + $0x20] sm:$0xff]  }
  0x1e   : > { %v303_v10 = vsel %vm2302_vm3, %v298_v58, %v302_v47  ;;  %v255_v11 = vor.u32 %v254_v60, %v251_v59  ;;  %v268_v16 = vrot.slane %v266_v61, 5  ;;  %v555_v22 = vrot.slane %v2313_v38, 5 }
  0x1f   : > { %v1821_v19 = vcombine.low %v289_v63, %v303_v10  ;;  %v274_v21 = vrot.slane %v272_v8, 5  ;;  %v305_v25 = vshrl.u32 %v2334_v62, 16  ;;  %v308_v28 = vshll.u32 %v2334_v62, 16 }
  0x20   : > { %v256_v26 = vrot.slane %v255_v11, 4  ;;  %v269_v27 = vor.u32 %v268_v16, %v265_v7  ;;  %v314_v30 = vshll.u32 %v2342_v9, 16  ;;  %v319_v32 = vshrl.u32 %v2347_v17, 16  ;;  %v2393_v7 = vld [vmem:[%s2263_s25 + $0x8] sm:$0xf] }
  0x21   : > { %2048 = vmatprep.mubr.msk.bf16.mxu1 %vm353_vm2, %v1821_v19  ;;  %v307_v31 = vrot.slane %v305_v25, 4  ;;  %v322_v33 = vshll.u32 %v2347_v17, 16  ;;  %v328_v35 = vshll.u32 %v2350_v18, 16  ;;  %v559_v38 = vrot.slane %v2326_v51, 5  ;;  %v2404_v11 = vld [vmem:[%s2263_s25 + $0x10] sm:$0xf] }
  0x22   : > { %v261_v36 = vsel %vm2302_vm3, %v256_v26, %v260_v12  ;;  %v270_v37 = vrot.slane %v269_v27, 4  ;;  %v310_v40 = vrot.slane %v308_v28, 5  ;;  %v316_v42 = vrot.slane %v314_v30, 5  ;;  %v2407_v12 = vld [vmem:[%s2263_s25 + $0xc] sm:$0x1] }
  0x23   : > { %v321_v43 = vrot.slane %v319_v32, 4  ;;  %v324_v45 = vrot.slane %v322_v33, 5  ;;  %v1837_v46 = vrot.slane %v2266_v3, 9  ;;  %v330_v50 = vrot.slane %v328_v35, 5  ;;  %v2434_v30 = vld [vmem:[%s2263_s25 + $0x18] sm:$0xf] }
  0x24   : > { %v275_v47 = vsel %vm2302_vm3, %v270_v37, %v274_v21  ;;  %v311_v49 = vor.u32 %v310_v40, %v307_v31  ;;  %v1838_v51 = vrot.slane %v2272_v5, 9  ;;  %v1839_v55 = vrot.slane %v2310_v34, 9 }
  0x25   : > { %v1820_v52 = vcombine.low %v261_v36, %v275_v47  ;;  %v325_v53 = vor.u32 %v324_v45, %v321_v43  ;;  %v548_v54 = vsel %vm2365_vm6, %v1837_v46, %v547_v13  ;;  %v1829_v4 = vcombine.low %v2310_v34, %v2318_v44  ;;  %v2447_v36 = vld [vmem:[%s2263_s25 + $0x20] sm:$0xf]  ;;  %v2464_v43 = vld [vmem:[%s2833_s1 + $0x30] sm:$0xff]   ;;  %v2470_v45 = vld [vmem:[%s2263_s25 + $0x24] sm:$0x1] }
  0x26   : > { %v312_v57 = vrot.slane %v311_v49, 4  ;;  %v552_v58 = vsel %vm2365_vm6, %v1838_v51, %v551_v14  ;;  %v1840_v59 = vrot.slane %v2318_v44, 9  ;;  %v1830_v61 = vcombine.low %v2286_v15, %v2292_v23 }
  0x27   : > { %2045 = vmatmul.mubr.msk.bf16.vlgmr.msra.gmra.mxu0 %vm353_vm2, %v1820_v52  ;;  %v326_v13 = vrot.slane %v325_v53, 4  ;;  %v1847_v60 = vcombine.low %v548_v54, %v552_v58  ;;  %v1841_v63 = vrot.slane %v2286_v15, 9  ;;  %v556_v14 = vsel %vm2365_vm6, %v1839_v55, %v555_v22  ;;  %v2479_v53 = vld [vmem:[%s2833_s1 + $0x28] sm:$0xff]  }
  0x28   : > { %v317_v6 = vsel %vm2302_vm3, %v312_v57, %v316_v42  ;;  %2063 = vmatpush3.bf16.msra.mxu0 %v2255_v2  ;;  %v560_v8 = vsel %vm2365_vm6, %v1840_v59, %v559_v38  ;;  %v1842_v10 = vrot.slane %v2292_v23, 9  ;;  %v2415_v2 = vld [vmem:[%s2833_s1 + $0x18] sm:$0xff]   ;;  %v1831_v21 = vcombine.low %v2334_v62, %v2347_v17 }
  0x29   : > { %v331_v16 = vsel %vm2302_vm3, %v326_v13, %v330_v50  ;;  %2064 = vmatprep.mubr.msk.bf16.mxu0 %vm353_vm2, %v1847_v60  ;;  %2082 = vmatprep.subr.bf16.mxu0 %v2165_v56  ;;  %v564_v19 = vsel %vm2365_vm6, %v1841_v63, %v563_v48  ;;  %v1843_v22 = vrot.slane %v2334_v62, 9  ;;  %v571_v27 = vrot.slane %v2342_v9, 5  ;;  %v2459_v42 = vld [vmem:[%s2263_s25 + $0x1c] sm:$0x1]  ;;  %v2488_v13 = vld [vmem:[%s2263_s25 + $0x28] sm:$0xf] }
  0x2a   : > { %v1822_v25 = vcombine.low %v317_v6, %v331_v16  ;;  %v568_v26 = vsel %vm2365_vm6, %v1842_v10, %v567_v0  ;;  %v1844_v28 = vrot.slane %v2347_v17, 9  ;;  %v1848_v48 = vcombine.low %v556_v14, %v560_v8  ;;  %v2491_v8 = vld [vmem:[%s2263_s25 + $0x30] sm:$0xf]  ;;  %v2562_v17 = vld [vmem:[%s2263_s25 + $0x18] sm:$0xf] }
  0x2b   : > { %v1849_v31 = vcombine.low %v564_v19, %v568_v26  ;;  %v575_v32 = vrot.slane %v2350_v18, 5  ;;  %v818_v33 = vshrl.u32 %v2393_v7, 16  ;;  %v2441_v24 = vsel %vm2365_vm6, %v1843_v22, %v571_v27 }
  0x2c   : > { %2049 = vmatmul.mubr.msk.bf16.vlgmr.msra.gmra.mxu1 %vm353_vm2, %v1822_v25  ;;  %v821_v0 = vshll.u32 %v2393_v7, 16  ;;  %v832_v9 = vshrl.u32 %v2404_v11, 16  ;;  %v835_v35 = vshll.u32 %v2404_v11, 16  ;;  %v827_v38 = vshll.u32 %v2407_v12, 16  ;;  %v2496_v25 = vld [vmem:[%s2263_s25 + $0x2c] sm:$0x1] }
  0x2d   : > { %2053 = vmatpush3.bf16.msra.mxu1 %v2248_v1  ;;  %2054 = vmatprep.mubr.msk.bf16.mxu1 %vm353_vm2, %v1828_v39  ;;  %v576_v18 = vsel %vm2365_vm6, %v1844_v28, %v575_v32  ;;  %v820_v37 = vrot.slane %v818_v33, 4  ;;  %v841_v40 = vshll.u32 %v2431_v20, 16  ;;  %v1874_v1 = vcombine.low %v2393_v7, %v2404_v11 }
  0x2e   : > { %2072 = vmatprep.subr.bf16.mxu1 %v2415_v2  ;;  %v823_v3 = vrot.slane %v821_v0, 5  ;;  %v834_v5 = vrot.slane %v832_v9, 4  ;;  %v837_v39 = vrot.slane %v835_v35, 5  ;;  %v1850_v46 = vcombine.low %v2441_v24, %v576_v18  ;;  %v2521_v9 = vld [vmem:[%s2263_s25 + $0x38] sm:$0xf] }
  0x2f   : > { %2065 = vmatmul.mubr.msk.bf16.vlgmr.msra.gmra.mxu0 %vm353_vm2, %v1848_v48  ;;  %v829_v47 = vrot.slane %v827_v38, 5  ;;  %v843_v49 = vrot.slane %v841_v40, 5  ;;  %v846_v50 = vshrl.u32 %v2434_v30, 16  ;;  %v849_v54 = vshll.u32 %v2434_v30, 16  ;;  %v2526_v18 = vld [vmem:[%s2263_s25 + $0x40] sm:$0xf] }
  0x30   : > { %2083 = vmatpush3.bf16.msra.mxu0 %v2165_v56  ;;  %2068 = vmatprep.mubr.msk.bf16.mxu0 %vm353_vm2, %v1849_v31  ;;  %v824_v51 = vor.u32 %v823_v3, %v820_v37  ;;  %v838_v52 = vor.u32 %v837_v39, %v834_v5  ;;  %v860_v55 = vshrl.u32 %v2447_v36, 16  ;;  %v863_v57 = vshll.u32 %v2447_v36, 16  ;;  %v2508_v31 = vld [vmem:[%s2263_s25 + $0x34] sm:$0x1]  ;;  %v2534_v5 = vld [vmem:[%s2263_s25 + $0x3c] sm:$0x1] }
  0x31   : > { %v848_v58 = vrot.slane %v846_v50, 4  ;;  %v855_v56 = vshll.u32 %v2459_v42, 16  ;;  %v869_v59 = vshll.u32 %v2470_v45, 16  ;;  %2102 = vmatprep.subr.bf16.mxu0 %v2464_v43  ;;  %v851_v6 = vrot.slane %v849_v54, 5  ;;  %v2540_v50 = vld [vmem:[%s2263_s25 + $0x44] sm:$0x1] }
  0x32   : > { %v825_v60 = vrot.slane %v824_v51, 4  ;;  %v839_v63 = vrot.slane %v838_v52, 4  ;;  %v862_v14 = vrot.slane %v860_v55, 4  ;;  %v1875_v10 = vcombine.low %v2434_v30, %v2447_v36 }
  0x33   : > { %v857_v16 = vrot.slane %v855_v56, 5  ;;  %v865_v19 = vrot.slane %v863_v57, 5  ;;  %v871_v22 = vrot.slane %v869_v59, 5  ;;  %v852_v28 = vor.u32 %v851_v6, %v848_v58 }
  0x34   : > { %2055 = vmatmul.mubr.msk.bf16.vlgmr.msra.gmra.mxu1 %vm353_vm2, %v1829_v4  ;;  %v830_v26 = vsel %vm2302_vm3, %v825_v60, %v829_v47  ;;  %v844_v27 = vsel %vm2302_vm3, %v839_v63, %v843_v49  ;;  %v874_v48 = vshrl.u32 %v2488_v13, 16  ;;  %v877_v4 = vshll.u32 %v2488_v13, 16 }
  0x35   : > { %2073 = vmatpush3.bf16.msra.mxu1 %v2415_v2  ;;  %2058 = vmatprep.mubr.msk.bf16.mxu1 %vm353_vm2, %v1830_v61  ;;  %v1885_v34 = vcombine.low %v830_v26, %v844_v27  ;;  %v866_v44 = vor.u32 %v865_v19, %v862_v14  ;;  %v888_v32 = vshrl.u32 %v2491_v8, 16  ;;  %v853_v33 = vrot.slane %v852_v28, 4 }
  0x36   : > { %2092 = vmatprep.subr.bf16.mxu1 %v2479_v53  ;;  %v891_v24 = vshll.u32 %v2491_v8, 16  ;;  %v876_v0 = vrot.slane %v874_v48, 4  ;;  %v883_v2 = vshll.u32 %v2496_v25, 16  ;;  %v879_v23 = vrot.slane %v877_v4, 5 }
  0x37   : > { %2069 = vmatmul.mubr.msk.bf16.gmra.mxu0 %vm353_vm2, %v1850_v46  ;;  %v867_v15 = vrot.slane %v866_v44, 4  ;;  %v890_v61 = vrot.slane %v888_v32, 4  ;;  %v897_v35 = vshll.u32 %v2508_v31, 16  ;;  %v858_v37 = vsel %vm2302_vm3, %v853_v33, %v857_v16  ;;  %v2552_v16 = vld [vmem:[%s2263_s25 + $0x10] sm:$0xf] }
  0x38   : > { %2084 = vmatprep.mubr.msk.bf16.mxu0 %vm353_vm2, %v1885_v34  ;;  %v1876_v38 = vcombine.low %v2488_v13, %v2491_v8  ;;  %v885_v40 = vrot.slane %v883_v2, 5  ;;  %v893_v3 = vrot.slane %v891_v24, 5  ;;  %v880_v46 = vor.u32 %v879_v23, %v876_v0  ;;  %v2585_v0 = vld [vmem:[%s2263_s25 + $0x20] sm:$0xf] }
  0x39   : > { %v872_v39 = vsel %vm2302_vm3, %v867_v15, %v871_v22  ;;  %v899_v47 = vrot.slane %v897_v35, 5  ;;  %v902_v49 = vshrl.u32 %v2521_v9, 16  ;;  %v905_v54 = vshll.u32 %v2521_v9, 16  ;;  %v2595_v15 = vld [vmem:[%s2263_s25 + $0x28] sm:$0xf] }
  0x3a   : > { %v1886_v51 = vcombine.low %v858_v37, %v872_v39  ;;  %v894_v52 = vor.u32 %v893_v3, %v890_v61  ;;  %v916_v55 = vshrl.u32 %v2526_v18, 16  ;;  %v881_v57 = vrot.slane %v880_v46, 4  ;;  %v2606_v37 = vld [vmem:[%s2833_s1 + $0x38] sm:$0xff]  }
  0x3b   : > { %v919_v58 = vshll.u32 %v2526_v18, 16  ;;  %v904_v56 = vrot.slane %v902_v49, 4  ;;  %v911_v59 = vshll.u32 %v2534_v5, 16  ;;  %v907_v63 = vrot.slane %v905_v54, 5 }
  0x3c   : > { %2059 = vmatmul.mubr.msk.bf16.gmra.mxu1 %vm353_vm2, %v1831_v21  ;;  %v895_v60 = vrot.slane %v894_v52, 4  ;;  %v918_v6 = vrot.slane %v916_v55, 4  ;;  %v925_v14 = vshll.u32 %v2540_v50, 16  ;;  %v886_v19 = vsel %vm2302_vm3, %v881_v57, %v885_v40  ;;  %v2567_v21 = vld [vmem:[%s2833_s1 + $0x40] sm:$0xff]   ;;  %v2623_v55 = vld [vmem:[%s2263_s25 + $0x30] sm:$0xf] }
  0x3d   : > { %2074 = vmatprep.mubr.msk.bf16.mxu1 %vm353_vm2, %v1874_v1  ;;  %v913_v22 = vrot.slane %v911_v59, 5  ;;  %v921_v26 = vrot.slane %v919_v58, 5  ;;  %v1894_v62 = vrot.slane %v2393_v7, 9  ;;  %v908_v28 = vor.u32 %v907_v63, %v904_v56 }
  0x3e   : > { %v900_v27 = vsel %vm2302_vm3, %v895_v60, %v899_v47  ;;  %v927_v1 = vrot.slane %v925_v14, 5  ;;  %v1045_v48 = vrot.slane %v2407_v12, 5  ;;  %v1895_v44 = vrot.slane %v2404_v11, 9 }
  0x3f   : > { %2085 = vmatmul.mubr.msk.bf16.vlgmr.msra.gmra.mxu0 %vm353_vm2, %v1886_v51  ;;  %v1887_v34 = vcombine.low %v886_v19, %v900_v27  ;;  %v922_v7 = vor.u32 %v921_v26, %v918_v6  ;;  %v1049_v4 = vrot.slane %v2431_v20, 5  ;;  %v1877_v32 = vcombine.low %v2521_v9, %v2526_v18  ;;  %v2656_v6 = vld [vmem:[%s2263_s25 + $0x40] sm:$0xf]  ;;  %v1914_v27 = vld [vmem:[%s2263_s25 + $0x14] sm:$0x1] }
  0x40   : > { %2103 = vmatpush3.bf16.msra.mxu0 %v2464_v43  ;;  %v909_v33 = vrot.slane %v908_v28, 4  ;;  %v2580_v24 = vsel %vm2365_vm6, %v1894_v62, %v1045_v48  ;;  %v1931_v12 = vcombine.low %v2552_v16, %v2562_v17  ;;  %v1316_v43 = vshrl.u32 %v2552_v16, 16 }
  0x41   : > { %2088 = vmatprep.mubr.msk.bf16.mxu0 %vm353_vm2, %v1887_v34  ;;  %v923_v11 = vrot.slane %v922_v7, 4  ;;  %v2590_v20 = vsel %vm2365_vm6, %v1895_v44, %v1049_v4  ;;  %v1319_v2 = vshll.u32 %v2552_v16, 16  ;;  %2122 = vmatprep.subr.bf16.mxu0 %v2567_v21  ;;  %v1330_v35 = vshrl.u32 %v2562_v17, 16  ;;  %v1916_v7 = vld [vmem:[%s2263_s25 + $0x1c] sm:$0x1] }
  0x42   : > { %v914_v23 = vsel %vm2302_vm3, %v909_v33, %v913_v22  ;;  %v1904_v61 = vcombine.low %v2580_v24, %v2590_v20  ;;  %v1896_v40 = vrot.slane %v2434_v30, 9  ;;  %v1053_v39 = vrot.slane %v2459_v42, 5  ;;  %v2626_v42 = vld [vmem:[%s2263_s25 + $0x38] sm:$0xf] }
  0x43   : > { %v928_v3 = vsel %vm2302_vm3, %v923_v11, %v927_v1  ;;  %v1897_v46 = vrot.slane %v2447_v36, 9  ;;  %v1057_v47 = vrot.slane %v2470_v45, 5  ;;  %v1333_v51 = vshll.u32 %v2562_v17, 16 }
  0x44   : > { %2075 = vmatmul.mubr.msk.bf16.vlgmr.msra.gmra.mxu1 %vm353_vm2, %v1875_v10  ;;  %v1888_v49 = vcombine.low %v914_v23, %v928_v3  ;;  %v1932_v52 = vcombine.low %v2585_v0, %v2595_v15  ;;  %v1344_v54 = vshrl.u32 %v2585_v0, 16  ;;  %v2635_v30 = vsel %vm2365_vm6, %v1896_v40, %v1053_v39  ;;  %v1918_v39 = vld [vmem:[%s2263_s25 + $0x24] sm:$0x1] }
  0x45   : > { %2093 = vmatpush3.bf16.msra.mxu1 %v2479_v53  ;;  %2078 = vmatprep.mubr.msk.bf16.mxu1 %vm353_vm2, %v1876_v38  ;;  %v2639_v36 = vsel %vm2365_vm6, %v1897_v46, %v1057_v47  ;;  %v1347_v45 = vshll.u32 %v2585_v0, 16  ;;  %v1358_v10 = vshrl.u32 %v2595_v15, 16  ;;  %v1361_v53 = vshll.u32 %v2595_v15, 16 }
  0x46   : > { %2112 = vmatprep.subr.bf16.mxu1 %v2606_v37  ;;  %v1898_v57 = vrot.slane %v2488_v13, 9  ;;  %v1061_v38 = vrot.slane %v2496_v25, 5  ;;  %v1899_v58 = vrot.slane %v2491_v8, 9  ;;  %v1905_v56 = vcombine.low %v2635_v30, %v2639_v36  ;;  %v2659_v13 = vld [vmem:[%s2263_s25 + $0x48] sm:$0xf] }
  0x47   : > { %2089 = vmatmul.mubr.msk.bf16.gmra.mxu0 %vm353_vm2, %v1888_v49  ;;  %v1065_v59 = vrot.slane %v2508_v31, 5  ;;  %v1933_v60 = vcombine.low %v2623_v55, %v2626_v42  ;;  %v1372_v63 = vshrl.u32 %v2623_v55, 16  ;;  %v1375_v25 = vshll.u32 %v2623_v55, 16  ;;  %v1924_v36 = vld [vmem:[%s2263_s25 + $0x3c] sm:$0x1] }
  0x48   : > { %2104 = vmatprep.mubr.msk.bf16.mxu0 %vm353_vm2, %v1931_v12  ;;  %v2664_v8 = vsel %vm2365_vm6, %v1898_v57, %v1061_v38  ;;  %v1386_v31 = vshrl.u32 %v2626_v42, 16  ;;  %v1900_v14 = vrot.slane %v2521_v9, 9  ;;  %v1069_v22 = vrot.slane %v2534_v5, 5 }
  0x49   : > { %v1066_v19 = vsel %vm2365_vm6, %v1899_v58, %v1065_v59  ;;  %v1901_v26 = vrot.slane %v2526_v18, 9  ;;  %v1073_v62 = vrot.slane %v2540_v50, 5  ;;  %v1389_v1 = vshll.u32 %v2626_v42, 16 }
  0x4a   : > { %v1906_v28 = vcombine.low %v2664_v8, %v1066_v19  ;;  %v1934_v48 = vcombine.low %v2656_v6, %v2659_v13  ;;  %v1400_v34 = vshrl.u32 %v2656_v6, 16  ;;  %v2683_v44 = vsel %vm2365_vm6, %v1900_v14, %v1069_v22  ;;  %v1922_v22 = vld [vmem:[%s2263_s25 + $0x34] sm:$0x1] }
  0x4b   : > { %v2687_v5 = vsel %vm2365_vm6, %v1901_v26, %v1073_v62  ;;  %v1403_v50 = vshll.u32 %v2656_v6, 16  ;;  %v1414_v4 = vshrl.u32 %v2659_v13, 16  ;;  %v1417_v33 = vshll.u32 %v2659_v13, 16 }
  0x4c   : > { %2079 = vmatmul.mubr.msk.bf16.gmra.mxu1 %vm353_vm2, %v1877_v32  ;;  %v1318_v24 = vrot.slane %v1316_v43, 4  ;;  %v1321_v12 = vrot.slane %v1319_v2, 5  ;;  %v1325_v11 = vshll.u32 %v1914_v27, 16  ;;  %v1332_v20 = vrot.slane %v1330_v35, 4  ;;  %v1920_v35 = vld [vmem:[%s2263_s25 + $0x2c] sm:$0x1] }
  0x4d   : > { %2094 = vmatprep.mubr.msk.bf16.mxu1 %vm353_vm2, %v1904_v61  ;;  %v1335_v23 = vrot.slane %v1333_v51, 5  ;;  %v1339_v40 = vshll.u32 %v1916_v7, 16  ;;  %v1951_v3 = vrot.slane %v2552_v16, 9  ;;  %v1543_v49 = vrot.slane %v1914_v27, 5 }
  0x4e   : > { %v1322_v46 = vor.u32 %v1321_v12, %v1318_v24  ;;  %v1327_v47 = vrot.slane %v1325_v11, 5  ;;  %v1952_v9 = vrot.slane %v2562_v17, 9  ;;  %v1547_v43 = vrot.slane %v1916_v7, 5 }
  0x4f   : > { %2105 = vmatmul.mubr.msk.bf16.vlgmr.msra.gmra.mxu0 %vm353_vm2, %v1932_v52  ;;  %v1336_v18 = vor.u32 %v1335_v23, %v1332_v20  ;;  %v1341_v32 = vrot.slane %v1339_v40, 5  ;;  %v1346_v2 = vrot.slane %v1344_v54, 4  ;;  %v1544_v16 = vsel %vm2365_vm6, %v1951_v3, %v1543_v49 }
  0x50   : > { %2123 = vmatpush3.bf16.msra.mxu0 %v2567_v21  ;;  %2108 = vmatprep.mubr.msk.bf16.mxu0 %vm353_vm2, %v1933_v60  ;;  %v1323_v61 = vrot.slane %v1322_v46, 4  ;;  %v1349_v51 = vrot.slane %v1347_v45, 5  ;;  %v1353_v57 = vshll.u32 %v1918_v39, 16  ;;  %v1548_v17 = vsel %vm2365_vm6, %v1952_v9, %v1547_v43 }
  0x51   : > { %v1337_v38 = vrot.slane %v1336_v18, 4  ;;  %v1360_v52 = vrot.slane %v1358_v10, 4  ;;  %v1363_v58 = vrot.slane %v1361_v53, 5  ;;  %v1907_v54 = vcombine.low %v2683_v44, %v2687_v5 }
  0x52   : > { %v1328_v21 = vsel %vm2302_vm3, %v1323_v61, %v1327_v47  ;;  %v1350_v59 = vor.u32 %v1349_v51, %v1346_v2  ;;  %v2712_v60 = vrot.slane %v1353_v57, 5  ;;  %v1367_v14 = vshll.u32 %v1920_v35, 16 }
  0x53   : > { %v1342_v8 = vsel %vm2302_vm3, %v1337_v38, %v1341_v32  ;;  %v1364_v45 = vor.u32 %v1363_v58, %v1360_v52  ;;  %v1953_v19 = vrot.slane %v2585_v0, 9  ;;  %v1961_v10 = vcombine.low %v1544_v16, %v1548_v17  ;;  %v1928_v32 = vld [vmem:[%s2263_s25 + $0x4c] sm:$0x1] }
  0x54   : > { %2095 = vmatmul.mubr.msk.bf16.vlgmr.msra.gmra.mxu1 %vm353_vm2, %v1905_v56  ;;  %v1351_v53 = vrot.slane %v1350_v59, 4  ;;  %v1551_v26 = vrot.slane %v1918_v39, 5  ;;  %v1954_v62 = vrot.slane %v2595_v15, 9  ;;  %v1369_v7 = vrot.slane %v1367_v14, 5  ;;  %v1926_v39 = vld [vmem:[%s2263_s25 + $0x44] sm:$0x1] }
  0x55   : > { %2113 = vmatpush3.bf16.msra.mxu1 %v2606_v37  ;;  %2098 = vmatprep.mubr.msk.bf16.mxu1 %vm353_vm2, %v1906_v28  ;;  %v1365_v27 = vrot.slane %v1364_v45, 4  ;;  %v1555_v44 = vrot.slane %v1920_v35, 5  ;;  %v1374_v0 = vrot.slane %v1372_v63, 4  ;;  %v1942_v5 = vcombine.low %v1328_v21, %v1342_v8 }
  0x56   : > { %v1552_v30 = vsel %vm2365_vm6, %v1953_v19, %v1551_v26  ;;  %v1377_v56 = vrot.slane %v1375_v25, 5  ;;  %v1381_v15 = vshll.u32 %v1922_v22, 16  ;;  %v1356_v37 = vsel %vm2302_vm3, %v1351_v53, %v2712_v60 }
  0x57   : > { %2109 = vmatmul.mubr.msk.bf16.gmra.mxu0 %vm353_vm2, %v1934_v48  ;;  %v1556_v63 = vsel %vm2365_vm6, %v1954_v62, %v1555_v44  ;;  %v1388_v28 = vrot.slane %v1386_v31, 4  ;;  %v1391_v25 = vrot.slane %v1389_v1, 5  ;;  %v1370_v24 = vsel %vm2302_vm3, %v1365_v27, %v1369_v7 }
  0x58   : > { %2124 = vmatprep.mubr.msk.bf16.mxu0 %vm353_vm2, %v1961_v10  ;;  %v1962_v48 = vcombine.low %v1552_v30, %v1556_v63  ;;  %v1378_v12 = vor.u32 %v1377_v56, %v1374_v0  ;;  %v1383_v11 = vrot.slane %v1381_v15, 5  ;;  %v1395_v23 = vshll.u32 %v1924_v36, 16 }
  0x59   : > { %v1392_v20 = vor.u32 %v1391_v25, %v1388_v28  ;;  %v1955_v40 = vrot.slane %v2623_v55, 9  ;;  %v1559_v3 = vrot.slane %v1922_v22, 5  ;;  %v1956_v31 = vrot.slane %v2626_v42, 9 }
  0x5a   : > { %v1379_v46 = vrot.slane %v1378_v12, 4  ;;  %v1563_v47 = vrot.slane %v1924_v36, 5  ;;  %v1402_v1 = vrot.slane %v1400_v34, 4  ;;  %v1397_v9 = vrot.slane %v1395_v23, 5 }
  0x5b   : > { %v1393_v49 = vrot.slane %v1392_v20, 4  ;;  %v1560_v18 = vsel %vm2365_vm6, %v1955_v40, %v1559_v3  ;;  %v1405_v43 = vrot.slane %v1403_v50, 5  ;;  %v1409_v2 = vshll.u32 %v1926_v39, 16 }
  0x5c   : > { %2099 = vmatmul.mubr.msk.bf16.gmra.mxu1 %vm353_vm2, %v1907_v54  ;;  %v1384_v55 = vsel %vm2302_vm3, %v1379_v46, %v1383_v11  ;;  %v1564_v42 = vsel %vm2365_vm6, %v1956_v31, %v1563_v47  ;;  %v1416_v34 = vrot.slane %v1414_v4, 4  ;;  %v1419_v50 = vrot.slane %v1417_v33, 5 }
  0x5d   : > { %2114 = vmatprep.mubr.msk.bf16.mxu1 %vm353_vm2, %v1942_v5  ;;  %v1398_v61 = vsel %vm2302_vm3, %v1393_v49, %v1397_v9  ;;  %v1963_v16 = vcombine.low %v1560_v18, %v1564_v42  ;;  %v1406_v35 = vor.u32 %v1405_v43, %v1402_v1  ;;  %v1423_v51 = vshll.u32 %v1928_v32, 16 }
  0x5e   : > { %v1957_v57 = vrot.slane %v2656_v6, 9  ;;  %v1420_v38 = vor.u32 %v1419_v50, %v1416_v34  ;;  %v1567_v17 = vrot.slane %v1926_v39, 5  ;;  %v1958_v52 = vrot.slane %v2659_v13, 9 }
  0x5f   : > { %2125 = vmatmul.mubr.msk.bf16.vlgmr.msra.gmra.mxu0 %vm353_vm2, %v1962_v48  ;;  %v1943_v4 = vcombine.low %v1356_v37, %v1370_v24  ;;  %v1944_v58 = vcombine.low %v1384_v55, %v1398_v61  ;;  %v1411_v54 = vrot.slane %v1409_v2, 5  ;;  %v1571_v21 = vrot.slane %v1928_v32, 5 }
  0x60   : > { %2128 = vmatprep.mubr.msk.bf16.mxu0 %vm353_vm2, %v1963_v16  ;;  %v1407_v59 = vrot.slane %v1406_v35, 4  ;;  %v1421_v60 = vrot.slane %v1420_v38, 4  ;;  %v1425_v8 = vrot.slane %v1423_v51, 5  ;;  %v1568_v33 = vsel %vm2365_vm6, %v1957_v57, %v1567_v17 }
  0x61   : > { %v1572_v6 = vsel %vm2365_vm6, %v1958_v52, %v1571_v21 }
  0x62   : > { %v1964_v45 = vcombine.low %v1568_v33, %v1572_v6  ;;  %v1412_v13 = vsel %vm2302_vm3, %v1407_v59, %v1411_v54  ;;  %v1426_v14 = vsel %vm2302_vm3, %v1421_v60, %v1425_v8 }
  0x63   : > { %v1945_v19 = vcombine.low %v1412_v13, %v1426_v14 }
  0x64   : > { %2115 = vmatmul.mubr.msk.bf16.vlgmr.msra.gmra.mxu1 %vm353_vm2, %v1943_v4 }
  0x65   : > { %2118 = vmatprep.mubr.msk.bf16.mxu1 %vm353_vm2, %v1944_v58 }
  0x67   : > { %2129 = vmatmul.mubr.msk.bf16.gmra.mxu0 %vm353_vm2, %v1964_v45 }
  0x6c   : > { %2119 = vmatmul.mubr.msk.bf16.gmra.mxu1 %vm353_vm2, %v1945_v19 }
  0xe7   : > { %v2046_v22 = vpop.f32.mrf.mxu0 }
  0xe9   : > { %v400_v10 = vpop.f32.mrf.mxu0 }
  0xeb   : > { %v2047_v41 = vpop.f32.mrf.mxu0 }
  0xec   : > { %v2050_v53 = vpop.f32.mrf.mxu1 }
  0xed   : > { %v403_v26 = vpop.f32.mrf.mxu0 }
  0xee   : > { %v416_v62 = vpop.f32.mrf.mxu1 }
  0xef   : > { %v2066_v27 = vpop.f32.mrf.mxu0 }
  0xf0   : > { %v2786_v7 = vpop.f32.mrf.mxu1 }
  0xf1   : > { %v644_v44 = vpop.f32.mrf.mxu0 }
  0xf2   : > { %v2788_v0 = vpop.f32.mrf.mxu1 }
  0xf3   : > { %v2067_v5 = vpop.f32.mrf.mxu0 }
  0xf4   : > { %v2056_v29 = vpop.f32.mrf.mxu1 }
  0xf5   : > { %v647_v30 = vpop.f32.mrf.mxu0  ;;  %v512_v61 = vadd.f32 %v2056_v29, %v2046_v22 }
  0xf6   : > { %v503_v36 = vpop.f32.mrf.mxu1 }
  0xf7   : > { %v2070_v56 = vpop.f32.mrf.mxu0  ;;  %v504_v50 = vadd.f32 %v503_v36, %v400_v10  ;;  %v677_v38 = vadd.f32 %v2066_v27, %v512_v61 }
  0xf8   : > { %v2057_v15 = vpop.f32.mrf.mxu1 }
  0xf9   : > { %v660_v37 = vpop.f32.mrf.mxu0  ;;  %v515_v17 = vadd.f32 %v2057_v15, %v2047_v41  ;;  %v675_v58 = vadd.f32 %v644_v44, %v504_v50 }
  0xfa   : > { %v506_v63 = vpop.f32.mrf.mxu1 }
  0xfb   : > { %v2790_v28 = vpop.f32.mrf.mxu0  ;;  %v507_v54 = vadd.f32 %v506_v63, %v403_v26  ;;  %v678_v8 = vadd.f32 %v2067_v5, %v515_v17 }
  0xfc   : > { %v2060_v25 = vpop.f32.mrf.mxu1 }
  0xfd   : > { %v2792_v24 = vpop.f32.mrf.mxu0  ;;  %v528_v33 = vadd.f32 %v2060_v25, %v2050_v53  ;;  %v676_v19 = vadd.f32 %v647_v30, %v507_v54 }
  0xfe   : > { %v519_v48 = vpop.f32.mrf.mxu1 }
  0xff   : > { %v2086_v12 = vpop.f32.mrf.mxu0  ;;  %v520_v13 = vadd.f32 %v519_v48, %v416_v62  ;;  %v681_v29 = vadd.f32 %v2070_v56, %v528_v33 }
 0x100   : > { %v2061_v11 = vpop.f32.mrf.mxu1 }
 0x101   : > { %v996_v20 = vpop.f32.mrf.mxu0  ;;  %v679_v63 = vadd.f32 %v660_v37, %v520_v13  ;;  %v531_v5 = vadd.f32 %v2061_v11, %v2786_v7 }
 0x102   : > { %v522_v23 = vpop.f32.mrf.mxu1 }
 0x103   : > { %v2087_v40 = vpop.f32.mrf.mxu0  ;;  %v523_v53 = vadd.f32 %v522_v23, %v2788_v0 }
 0x104   : > { %v2076_v3 = vpop.f32.mrf.mxu1 }
 0x105   : > { %v999_v39 = vpop.f32.mrf.mxu0  ;;  %v811_v21 = vadd.f32 %v2076_v3, %v677_v38 }
 0x106   : > { %v778_v46 = vpop.f32.mrf.mxu1 }
 0x107   : > { %v2090_v31 = vpop.f32.mrf.mxu0  ;;  %v809_v6 = vadd.f32 %v778_v46, %v675_v58  ;;  %v1029_v22 = vadd.f32 %v2086_v12, %v811_v21 }
 0x108   : > { %v2077_v47 = vpop.f32.mrf.mxu1 }
 0x109   : > { %v2794_v1 = vpop.f32.mrf.mxu0  ;;  %v812_v10 = vadd.f32 %v2077_v47, %v678_v8  ;;  %v1027_v36 = vadd.f32 %v996_v20, %v809_v6  ;;  %v682_v20 = vadd.f32 %v2790_v28, %v531_v5  ;;  %v1970_v28 = vld [vmem:[%s2834_s2] ss:$0 sm:$0xff] }
 0x10a   : > { %v781_v49 = vpop.f32.mrf.mxu1 }
 0x10b   : > { %v2796_v9 = vpop.f32.mrf.mxu0  ;;  %v810_v44 = vadd.f32 %v781_v49, %v676_v19  ;;  %v1030_v3 = vadd.f32 %v2087_v40, %v812_v10  ;;  %v680_v49 = vadd.f32 %v2792_v24, %v523_v53 }
 0x10c   : > { %v2080_v18 = vpop.f32.mrf.mxu1 }
 0x10d   : > { %v2798_v32 = vpop.f32.mrf.mxu0  ;;  %v815_v62 = vadd.f32 %v2080_v18, %v681_v29  ;;  %v1028_v47 = vadd.f32 %v999_v39, %v810_v44 }
 0x10e   : > { %v794_v43 = vpop.f32.mrf.mxu1 }
 0x10f   : > { %v2106_v55 = vpop.f32.mrf.mxu0  ;;  %v813_v12 = vadd.f32 %v794_v43, %v679_v63 }
 0x110   : > { %v2081_v42 = vpop.f32.mrf.mxu1 }
 0x111   : > { %v1276_v2 = vpop.f32.mrf.mxu0  ;;  %v1031_v40 = vadd.f32 %v2794_v1, %v813_v12  ;;  %v816_v18 = vadd.f32 %v2081_v42, %v682_v20 }
 0x112   : > { %v797_v34 = vpop.f32.mrf.mxu1 }
 0x113   : > { %v2107_v16 = vpop.f32.mrf.mxu0  ;;  %v1034_v1 = vadd.f32 %v2796_v9, %v816_v18 }
 0x114   : > { %v2096_v35 = vpop.f32.mrf.mxu1 }
 0x115   : > { %v1279_v51 = vpop.f32.mrf.mxu0  ;;  %v1175_v26 = vadd.f32 %v2096_v35, %v1029_v22  ;;  %v1033_v35 = vadd.f32 %v2090_v31, %v815_v62 }
 0x116   : > { %v1142_v57 = vpop.f32.mrf.mxu1 }
 0x117   : > { %v2800_v52 = vpop.f32.mrf.mxu0  ;;  %v1173_v48 = vadd.f32 %v1142_v57, %v1027_v36  ;;  %v1309_v61 = vadd.f32 %v2106_v55, %v1175_v26  ;;  %v814_v57 = vadd.f32 %v797_v34, %v680_v49 }
 0x118   : > { %v2097_v4 = vpop.f32.mrf.mxu1 }
 0x119   : > { %v1292_v59 = vpop.f32.mrf.mxu0  ;;  %v1176_v50 = vadd.f32 %v2097_v4, %v1030_v3  ;;  %v1307_v7 = vadd.f32 %v1276_v2, %v1173_v48  ;;  %v1032_v42 = vadd.f32 %v2798_v32, %v814_v57 }
 0x11a   : > { %v1145_v60 = vpop.f32.mrf.mxu1 }
 0x11b   : > { %v2802_v45 = vpop.f32.mrf.mxu0  ;;  %v1174_v11 = vadd.f32 %v1145_v60, %v1028_v47  ;;  %v1310_v38 = vadd.f32 %v2107_v16, %v1176_v50 }
 0x11c   : > { %v2100_v14 = vpop.f32.mrf.mxu1 }
 0x11d   : > { %v2804_v27 = vpop.f32.mrf.mxu0  ;;  %v1179_v39 = vadd.f32 %v2100_v14, %v1033_v35  ;;  %v1308_v2 = vadd.f32 %v1279_v51, %v1174_v11 }
 0x11e   : > { %v1158_v41 = vpop.f32.mrf.mxu1 }
 0x11f   : > { %v2126_v15 = vpop.f32.mrf.mxu0  ;;  %v1177_v4 = vadd.f32 %v1158_v41, %v1031_v40  ;;  %v1313_v16 = vadd.f32 %v2800_v52, %v1179_v39 }
 0x120   : > { %v2101_v25 = vpop.f32.mrf.mxu1 }
 0x121   : > { %v1640_v30 = vpop.f32.mrf.mxu0  ;;  %v1311_v33 = vadd.f32 %v1292_v59, %v1177_v4  ;;  %v1180_v6 = vadd.f32 %v2101_v25, %v1034_v1 }
 0x122   : > { %v1161_v46 = vpop.f32.mrf.mxu1 }
 0x123   : > { %v2127_v56 = vpop.f32.mrf.mxu0  ;;  %v1178_v13 = vadd.f32 %v1161_v46, %v1032_v42  ;;  %v1314_v52 = vadd.f32 %v2802_v45, %v1180_v6 }
 0x124   : > { %v2116_v37 = vpop.f32.mrf.mxu1 }
 0x125   : > { %v1527_v0 = vadd.f32 %v2116_v37, %v1309_v61  ;;  %v1643_v23 = vpop.f32.mrf.mxu0  ;;  %v1312_v26 = vadd.f32 %v2804_v27, %v1178_v13 }
 0x126   : > { %v1494_v43 = vpop.f32.mrf.mxu1 }
 0x127   : > { %v1673_v55 = vadd.f32 %v2126_v15, %v1527_v0  ;;  %v1525_v17 = vadd.f32 %v1494_v43, %v1307_v7  ;;  %v2130_v31 = vpop.f32.mrf.mxu0 }
 0x128   : > { %v2117_v24 = vpop.f32.mrf.mxu1 }
 0x129   : > { %v1671_v58 = vadd.f32 %v1640_v30, %v1525_v17  ;;  %v1528_v54 = vadd.f32 %v2117_v24, %v1310_v38  ;;  %v1688_v21 = vadd.f32 %v1970_v28, %v1673_v55  ;;  %v1656_v19 = vpop.f32.mrf.mxu0 }
 0x12a   : > { %v1497_v34 = vpop.f32.mrf.mxu1 }
 0x12b   : > { %v1674_v60 = vadd.f32 %v2127_v56, %v1528_v54  ;;  %v1526_v8 = vadd.f32 %v1497_v34, %v1308_v2  ;;  %v1686_v22 = vadd.f32 %v1970_v28, %v1671_v58  ;;  %v1696_v9 = vmax.f32 %v1688_v21, 0.0  ;;  %v2131_v63 = vpop.f32.mrf.mxu0 }
 0x12c   : > { %v2120_v14 = vpop.f32.mrf.mxu1 }
 0x12d   : > { %v1689_v51 = vadd.f32 %v1970_v28, %v1674_v60  ;;  %v1672_v10 = vadd.f32 %v1643_v23, %v1526_v8  ;;  %v1531_v41 = vadd.f32 %v2120_v14, %v1313_v16  ;;  %v1694_v5 = vmax.f32 %v1686_v22, 0.0  ;;  %v1659_v47 = vpop.f32.mrf.mxu0 }
 0x12e   : > { %v1510_v29 = vpop.f32.mrf.mxu1 }
 0x12f   : > { %v1697_v36 = vmax.f32 %v1689_v51, 0.0  ;;  %v1687_v32 = vadd.f32 %v1970_v28, %v1672_v10  ;;  %v1529_v44 = vadd.f32 %v1510_v29, %v1311_v33  ;;  %v1677_v59 = vadd.f32 %v2130_v31, %v1531_v41 }
 0x130   : > { %v2121_v15 = vpop.f32.mrf.mxu1 }
 0x131   : > { %v1982_v53 = vpack.c.bf16 %v1697_v36, %v1696_v9  ;;  %v1695_v25 = vmax.f32 %v1687_v32, 0.0  ;;  %v1675_v3 = vadd.f32 %v1656_v19, %v1529_v44  ;;  %v1532_v62 = vadd.f32 %v2121_v15, %v1314_v52 }
 0x132   : > { %v1513_v48 = vpop.f32.mrf.mxu1  ;;  %v1692_v46 = vadd.f32 %v1970_v28, %v1677_v59 }
 0x133   : > { %1994 = vst [vmem:[%s192_s20 + $0x8] sm:$0xff] %v1982_v53   ;;  %v1977_v30 = vpack.c.bf16 %v1695_v25, %v1694_v5  ;;  %v1530_v12 = vadd.f32 %v1513_v48, %v1312_v26  ;;  %v1678_v45 = vadd.f32 %v2131_v63, %v1532_v62  ;;  %v1690_v27 = vadd.f32 %v1970_v28, %v1675_v3 }
 0x134   : > { %v1700_v20 = vmax.f32 %v1692_v46, 0.0 }
 0x135   : > { %1978 = vst [vmem:[%s192_s20] sm:$0xff] %v1977_v30   ;;  %v1676_v61 = vadd.f32 %v1659_v47, %v1530_v12  ;;  %v1693_v50 = vadd.f32 %v1970_v28, %v1678_v45  ;;  %v1698_v37 = vmax.f32 %v1690_v27, 0.0 }
 0x137   : > { %v1691_v56 = vadd.f32 %v1970_v28, %v1676_v61  ;;  %v1701_v49 = vmax.f32 %v1693_v50, 0.0 }
 0x139   : > { %v1699_v35 = vmax.f32 %v1691_v56, 0.0  ;;  %v1992_v7 = vpack.c.bf16 %v1701_v49, %v1700_v20 }
 0x13b   : > { %v1987_v11 = vpack.c.bf16 %v1699_v35, %v1698_v37  ;;  %1996 = vst [vmem:[%s192_s20 + $0x18] sm:$0xff] %v1992_v7  }
 0x13d   : > { %1995 = vst [vmem:[%s192_s20 + $0x10] sm:$0xff] %v1987_v11  }
 0x13e PF: > { %s13_s14 = sadd.s32 1, %s2202_s14   ;;  %s2840_s12 = smov %s2198_s13 }
 0x13f   : > { %p10_p5 = scmp.ge.s32.totalorder %s13_s14, 4   ;;  %s2841_s13 = smov %s2843_s15 }
 0x141   :  { %12 = sbr.rel (!%p10_p5) target bundleno = 2 (0x2), region = 73 }

// kernel: deeplab3plus_forward.11
= control target key start
LH: loop header
LB: loop body
LE: loop exit
PB: predicated region body
PF: predicated region fallthrough
CT: control target
= control target key end

     0   :  { %s5399_s30 = smov 0   ;;  %s6272_s0 = inlined_call_operand.vmem [shape: bf16[2,2,2,64], index: 0, kind: input, shape index: {}]   ;;  %s6273_s1 = inlined_call_operand.vmem [shape: bf16[64,8], index: 1, kind: input, shape index: {}]   ;;  %s6274_s2 = inlined_call_operand.vmem [shape: f32[1,8], index: 2, kind: input, shape index: {}]   ;;  %s6275_s3 = inlined_call_operand.vmem [shape: bf16[3,9,64,8], index: 3, kind: input, shape index: {}]   ;;  %s6276_s4 = inlined_call_operand.vmem [shape: f32[3,8], index: 4, kind: input, shape index: {}]   ;;  %s6277_s5 = inlined_call_operand.vmem [shape: bf16[64,8], index: 5, kind: input, shape index: {}]   ;;  %s6278_s6 = inlined_call_operand.vmem [shape: f32[1,8], index: 6, kind: input, shape index: {}]   ;;  %s6279_s7 = inlined_call_operand.vmem [shape: bf16[5,8,128], index: 7, kind: input, shape index: {}]   ;;  %s6280_s8 = inlined_call_operand.vmem [shape: f32[1,128], index: 8, kind: input, shape index: {}]   ;;  %s6281_s9 = inlined_call_operand.vmem [shape: bf16[2,2,2,128], index: 9, kind: output, shape index: {}]  }
   0x1 LB: > { %s4239_s10 = sadd.s32 4294967295, %s5341_s30   ;;  %p4243_p0 = scmp.ge.s32.totalorder %s5341_s30, 1  ;;  %s5341_s30 = sphi %s5399_s30, %s19_s30  }
   0x2   : > { %p286_p1 = scmp.lt.s32.totalorder %s5341_s30, 3 }
   0x4   : > { %p287_p2 = pnand %p4243_p0, %p286_p1 }
   0x5   : > { %p320_p3 = scmp.lt.s32.totalorder (!%p287_p2), %s4239_s10, 1 }
   0x6   : > { %290 = sbr.rel (%p287_p2) target bundleno = 1284 (0x504), region = 56 }
   0xb   : > { %v5213_v0 = vld [vmem:[%s6277_s5 + $0x18] sm:$0xff]   ;;  %v5343_v1 = vmov 0.0   ;;  %v5214_v2 = vld [vmem:[%s6277_s5 + $0x10] sm:$0xff]   ;;  %vm5344_vm0 = vmmov 0   ;;  %v536_v3 = vlaneseq  ;;  %s6283_s10 = smov (!%p320_p3, %s4239_s10), 1  ;;  %vm329_vm1 = vcmask 519168  }
   0xc   : > { %4821 = vmatprep.subr.bf16.mxu0 %v5343_v1  ;;  %4833 = vmatprep.subr.bf16.mxu1 %v5343_v1  ;;  %v5345_v4 = vmov 0   ;;  %v5346_v5 = vmov 1935823168   ;;  %v5215_v7 = vld [vmem:[%s6277_s5 + $0x8] sm:$0xff]   ;;  %s4244_s17 = sshll.u32 %s6283_s10, 1  ;;  %vm558_vm2 = vcmask 517121  }
   0xd   : > { %4822 = vmatpush3.bf16.msra.mxu0 %v5213_v0  ;;  %4829 = vmatprep.mubr.msk.bf16.mxu0 %vm5344_vm0, %v5343_v1  ;;  %423 = vst.msk [vmem:[#allocation2 + $0x170] sm:$0xf] %vm329_vm1, %v5345_v4  ;;  %428 = vst.msk [vmem:[#allocation2 + $0x184] sm:$0xf] %vm329_vm1, %v5345_v4  ;;  %v534_v6 = vunpack.c.l.s4 %v5346_v5  ;;  %v5506_v8 = vshrl.u32 %v536_v3, 7  ;;  %s323_s20 = scalar_lea.vmem %s6272_s0, %s4244_s17  ;;  %v5216_v12 = vld [vmem:[%s6277_s5] sm:$0xff]   ;;  %s327_s19 = scalar_lea.vmem %s6281_s9, %s4244_s17 }
   0xe   : > { %4823 = vmatprep.subr.bf16.mxu0 %v5343_v1  ;;  %4835 = vmatprep.mubr.msk.bf16.mxu1 %vm5344_vm0, %v5343_v1  ;;  %330 = vst.msk [vmem:[#allocation2] sm:$0xf] %vm329_vm1, %v5345_v4  ;;  %332 = vst.msk [vmem:[#allocation2 + $0x8] sm:$0xf] %vm329_vm1, %v5345_v4  ;;  %v5347_v9 = vmov 1983009808  }
   0xf   : > { %336 = vst.msk [vmem:[#allocation2 + $0x14] sm:$0xf] %vm329_vm1, %v5345_v4  ;;  %338 = vst.msk [vmem:[#allocation2 + $0x1c] sm:$0xf] %vm329_vm1, %v5345_v4  ;;  %v569_v10 = vunpack.c.l.s4 %v5347_v9  ;;  %v535_v11 = vunpack.c.0.s8 %v534_v6  ;;  %v5517_v14 = vld [vmem:[%s323_s20] sm:$0x1] }
  0x10   : > { %361 = vst.msk [vmem:[#allocation2 + $0x78] sm:$0xf] %vm329_vm1, %v5345_v4  ;;  %363 = vst.msk [vmem:[#allocation2 + $0x80] sm:$0xf] %vm329_vm1, %v5345_v4  ;;  %v5520_v19 = vld [vmem:[%s323_s20 + $0x1] sm:$0x1]  ;;  %v563_v20 = vunpack.c.l.bf16 %v5517_v14 }
  0x11   : > { %364 = vst.msk [vmem:[#allocation2 + $0x84] sm:$0xf] %vm329_vm1, %v5345_v4  ;;  %366 = vst.msk [vmem:[#allocation2 + $0x8c] sm:$0xf] %vm329_vm1, %v5345_v4  ;;  %4824 = vmatpush3.bf16.msra.mxu0 %v5214_v2  ;;  %v570_v15 = vunpack.c.0.s8 %v569_v10  ;;  %v538_v18 = vsub.s32 %v535_v11, %v5506_v8  ;;  %v564_v22 = vunpack.c.l.bf16 %v5520_v19  ;;  %vm619_vm3 = vcmask 523264   ;;  %v5217_v40 = vld [vmem:[%s6275_s3 + $0x38] sm:$0xff]  }
  0x12   : > { %368 = vst.msk [vmem:[#allocation2 + $0x94] sm:$0xf] %vm329_vm1, %v5345_v4  ;;  %369 = vst.msk [vmem:[#allocation2 + $0x98] sm:$0xf] %vm329_vm1, %v5345_v4  ;;  %4825 = vmatprep.subr.bf16.mxu0 %v5343_v1  ;;  %v5348_v37 = vmov 1966171168  }
  0x13   : > { %392 = vst.msk [vmem:[#allocation2 + $0xf4] sm:$0xf] %vm329_vm1, %v5345_v4  ;;  %393 = vst.msk [vmem:[#allocation2 + $0xf8] sm:$0xf] %vm329_vm1, %v5345_v4  ;;  %v5525_v23 = vsub.s32 %v570_v15, %v5506_v8  ;;  %v567_v26 = vcombine.low %v563_v20, %v564_v22  ;;  %v736_v38 = vunpack.c.l.s4 %v5348_v37  ;;  %v4253_v39 = vld [vmem:[%s6279_s7 + $0x10] sm:$0xf] }
  0x14   : > { %394 = vst.msk [vmem:[#allocation2 + $0xfc] sm:$0xf] %vm329_vm1, %v5345_v4  ;;  %397 = vst.msk [vmem:[#allocation2 + $0x108] sm:$0xf] %vm329_vm1, %v5345_v4  ;;  %vm672_vm4 = vcmask 1043456   ;;  %v5219_v43 = vld [vmem:[%s6275_s3 + $0x30] sm:$0xff]  }
  0x15   : > { %398 = vst.msk [vmem:[#allocation2 + $0x10c] sm:$0xf] %vm329_vm1, %v5345_v4  ;;  %399 = vst.msk [vmem:[#allocation2 + $0x110] sm:$0xf] %vm329_vm1, %v5345_v4  ;;  %4826 = vmatpush3.bf16.msra.mxu0 %v5215_v7  ;;  %v574_v27 = vrot.slane %v567_v26, %v5525_v23  ;;  %v674_v41 = vsel %vm672_vm4, %v4253_v39, 0  ;;  %v737_v42 = vunpack.c.0.s8 %v736_v38  ;;  %v5221_v46 = vld [vmem:[%s6275_s3 + $0x28] sm:$0xff]  }
  0x16   : > { %421 = vst.msk [vmem:[#allocation2 + $0x168] sm:$0xf] %vm329_vm1, %v5345_v4  ;;  %422 = vst.msk [vmem:[#allocation2 + $0x16c] sm:$0xf] %vm329_vm1, %v5345_v4  ;;  %4827 = vmatprep.subr.bf16.mxu0 %v5343_v1  ;;  %4834 = vmatpush3.bf16.msra.mxu1 %v674_v41  ;;  %v5223_v52 = vld [vmem:[%s6275_s3 + $0x20] sm:$0xff]   ;;  %v5225_v55 = vld [vmem:[%s6275_s3 + $0x58] sm:$0xff]  }
  0x17   : > { %424 = vst.msk [vmem:[#allocation2 + $0x174] sm:$0xf] %vm329_vm1, %v5345_v4  ;;  %426 = vst.msk [vmem:[#allocation2 + $0x17c] sm:$0xf] %vm329_vm1, %v5345_v4  ;;  %v576_v28 = vsel %vm329_vm1, %v574_v27, 0.0  ;;  %4839 = vmatprep.subr.bf16.mxu1 %v5343_v1  ;;  %v5549_v44 = vsub.s32 %v737_v42, %v5506_v8  ;;  %v5227_v57 = vld [vmem:[%s6275_s3 + $0x50] sm:$0xff]  }
  0x18   : > { %427 = vst.msk [vmem:[#allocation2 + $0x180] sm:$0xf] %vm329_vm1, %v5345_v4  ;;  %429 = vst.msk [vmem:[#allocation2 + $0x188] sm:$0xf] %vm329_vm1, %v5345_v4  ;;  %v577_v29 = vrot.slane %v576_v28, 4  ;;  %v5229_v58 = vld [vmem:[%s6275_s3 + $0x48] sm:$0xff]  }
  0x19   : > { %452 = vst.msk [vmem:[#allocation2 + $0x1e4] sm:$0xf] %vm329_vm1, %v5345_v4  ;;  %453 = vst.msk [vmem:[#allocation2 + $0x1e8] sm:$0xf] %vm329_vm1, %v5345_v4  ;;  %4828 = vmatpush3.bf16.msra.mxu0 %v5216_v12  ;;  %v5231_v59 = vld [vmem:[%s6275_s3 + $0x40] sm:$0xff]   ;;  %v5234_v63 = vld [vmem:[%s6275_s3 + $0x98] sm:$0xff]  }
  0x1a   : > { %454 = vst.msk [vmem:[#allocation2 + $0x1ec] sm:$0xf] %vm329_vm1, %v5345_v4  ;;  %457 = vst.msk [vmem:[#allocation2 + $0x1f8] sm:$0xf] %vm329_vm1, %v5345_v4  ;;  %4851 = vmatprep.subr.bf16.mxu0 %v5343_v1  ;;  %v578_v30 = vadd.f32 %v577_v29, %v576_v28  ;;  %v5236_v0 = vld [vmem:[%s6275_s3 + $0x90] sm:$0xff]   ;;  %v5238_v3 = vld [vmem:[%s6275_s3 + $0x88] sm:$0xff]  }
  0x1b   : > { %458 = vst.msk [vmem:[#allocation2 + $0x1fc] sm:$0xf] %vm329_vm1, %v5345_v4  ;;  %459 = vst.msk [vmem:[#allocation2 + $0x200] sm:$0xf] %vm329_vm1, %v5345_v4  ;;  %v5240_v11 = vld [vmem:[%s6275_s3 + $0x80] sm:$0xff]   ;;  %v5242_v15 = vld [vmem:[%s6275_s3 + $0xd8] sm:$0xff]  }
  0x1c   : > { %481 = vst.msk [vmem:[#allocation2 + $0x258] sm:$0xf] %vm329_vm1, %v5345_v4  ;;  %483 = vst.msk [vmem:[#allocation2 + $0x260] sm:$0xf] %vm329_vm1, %v5345_v4  ;;  %v579_v31 = vrot.slane %v578_v30, 2  ;;  %v5250_v28 = vld [vmem:[%s6275_s3 + $0x118] sm:$0xff]  }
  0x1d   : > { %484 = vst.msk [vmem:[#allocation2 + $0x264] sm:$0xf] %vm329_vm1, %v5345_v4  ;;  %486 = vst.msk [vmem:[#allocation2 + $0x26c] sm:$0xf] %vm329_vm1, %v5345_v4  ;;  %vm668_vm5 = vcmask 64512   ;;  %v5218_v42 = vld [vmem:[%s6273_s1 + $0x18] sm:$0xff]  }
  0x1e   : > { %488 = vst.msk [vmem:[#allocation2 + $0x274] sm:$0xf] %vm329_vm1, %v5345_v4  ;;  %489 = vst.msk [vmem:[#allocation2 + $0x278] sm:$0xf] %vm329_vm1, %v5345_v4  ;;  %v580_v32 = vadd.f32 %v579_v31, %v578_v30  ;;  %v5253_v30 = vld [vmem:[%s6275_s3 + $0x110] sm:$0xff]   ;;  %v5255_v31 = vld [vmem:[%s6275_s3 + $0x108] sm:$0xff]  }
  0x1f   : > { %511 = vst.msk [vmem:[#allocation2 + $0x2d0] sm:$0xf] %vm329_vm1, %v5345_v4  ;;  %513 = vst.msk [vmem:[#allocation2 + $0x2d8] sm:$0xf] %vm329_vm1, %v5345_v4  ;;  %vm334_vm6 = vcmask 518144  }
  0x20   : > { %516 = vst.msk [vmem:[#allocation2 + $0x2e4] sm:$0xf] %vm329_vm1, %v5345_v4  ;;  %518 = vst.msk [vmem:[#allocation2 + $0x2ec] sm:$0xf] %vm329_vm1, %v5345_v4  ;;  %v581_v33 = vrot.slane %v580_v32, 1 }
  0x21   : > { %v4246_v13 = vld.sshfl [vmem:[%s323_s20] sm:$0x1 pattern:$0x73625140]  ;;  %335 = vst.msk [vmem:[#allocation2 + $0x10] sm:$0x7] %vm334_vm6, %v5345_v4 }
  0x22   : > { %v4247_v16 = vld.sshfl [vmem:[%s323_s20 + $0x1] sm:$0x1 pattern:$0x73625140]  ;;  %v532_v17 = vcombine.low %v4246_v13, %v4246_v13  ;;  %v582_v34 = vadd.f32 %v581_v33, %v580_v32  ;;  %340 = vst.msk [vmem:[#allocation2 + $0x24] sm:$0x7] %vm334_vm6, %v5345_v4 }
  0x23   : > { %v547_v21 = vcombine.low %v4247_v16, %v4247_v16  ;;  %v4263_v45 = vld.sshfl [vmem:[#allocation2 + $0xf8] sm:$0x10 pattern:$0x75316420]  ;;  %v5257_v33 = vld [vmem:[%s6275_s3 + $0x100] sm:$0xff]  }
  0x24   : > { %v539_v24 = vrot.slane %v532_v17, %v538_v18  ;;  %v584_v35 = vmul.f32 0.25, %v582_v34  ;;  %v4264_v47 = vld.sshfl [vmem:[#allocation2 + $0x10c] sm:$0x10 pattern:$0x75316420]  ;;  %v873_v48 = vcombine.high %v4263_v45, %v4263_v45  ;;  %v5244_v17 = vld [vmem:[%s6275_s3 + $0xd0] sm:$0xff]  }
  0x25   : > { %v554_v25 = vrot.slane %v547_v21, %v538_v18  ;;  %v888_v49 = vcombine.high %v4264_v47, %v4264_v47  ;;  %v5233_v60 = vld [vmem:[#allocation2 + $0xfc] ss:$20 sps:$4 sm:$0x11]   ;;  %v5246_v18 = vld [vmem:[%s6275_s3 + $0xc8] sm:$0xff]   ;;  %v734_v47 = vcombine.low %v5517_v14, %v5520_v19  ;;  %425 = vst.msk [vmem:[#allocation2 + $0x178] sm:$0x7] %vm334_vm6, %v5345_v4 }
  0x26   : > { %559 = vst.msk [vmem:[#allocation2 + $0x170] sm:$0x2] %vm558_vm2, %v539_v24  ;;  %v585_v36 = vpack.c.bf16 %v584_v35, %v584_v35  ;;  %v880_v50 = vrot.slane %v873_v48, %v5549_v44  ;;  %v1089_v61 = vrot.slane %v5233_v60, %v5549_v44  ;;  %v4341_v20 = vld.sshfl [vmem:[#allocation2 + $0x1e4] sm:$0x2 pattern:$0x75316420] }
  0x27   : > { %560 = vst.msk [vmem:[#allocation2 + $0x184] sm:$0x2] %vm558_vm2, %v554_v25  ;;  %v895_v51 = vrot.slane %v888_v49, %v5549_v44  ;;  %v4342_v21 = vld.sshfl [vmem:[#allocation2 + $0x1f8] sm:$0x2 pattern:$0x75316420]  ;;  %v1531_v22 = vrot.slane %v4341_v20, %v5549_v44  ;;  %v741_v49 = vrot.slane %v734_v47, %v5549_v44 }
  0x28   : > { %4830 = vmatmul.mubr.msk.bf16.vlgmr.msra.gmra.mxu0 %vm619_vm3, %v585_v36  ;;  %v1096_v62 = vrot.slane %v1089_v61, %v5549_v44  ;;  %v1546_v24 = vrot.slane %v4342_v21, %v5549_v44  ;;  %v5248_v25 = vld [vmem:[%s6275_s3 + $0xc0] sm:$0xff]   ;;  %v5222_v48 = vld [vmem:[%s6273_s1 + $0x8] sm:$0xff]   ;;  %v5226_v14 = vld [vmem:[%s6275_s3 + $0x18] sm:$0xff]   ;;  %430 = vst.msk [vmem:[#allocation2 + $0x18c] sm:$0x7] %vm334_vm6, %v5345_v4 }
  0x29   : > { %4859 = vmatprep.mubr.msk.bf16.mxu0 %vm5344_vm0, %v5343_v1  ;;  %4852 = vmatpush3.bf16.msra.mxu0 %v5217_v40  ;;  %v905_v53 = vcombine.low %v880_v50, %v895_v51  ;;  %v5258_v32 = vld [vmem:[#allocation2 + $0x1ec] ss:$20 sps:$4 sm:$0x11]   ;;  %v748_v51 = vrot.slane %v741_v49, %v5549_v44  ;;  %515 = vst.msk [vmem:[#allocation2 + $0x2e0] sm:$0x7] %vm334_vm6, %v5345_v4 }
  0x2a   : > { %4853 = vmatprep.subr.bf16.mxu0 %v5343_v1  ;;  %v4351_v26 = vcombine.high %v1531_v22, %v1546_v24  ;;  %v1786_v34 = vrot.slane %v5258_v32, %v5549_v44  ;;  %v594_v36 = vld [vmem:[%s6278_s6] sm:$0x1]  ;;  %v4262_v19 = vld.sshfl [vmem:[#allocation2 + $0x108] sm:$0x2 pattern:$0x75316420] }
  0x2b   : > { %v912_v54 = vrot.slane %v905_v53, %v5549_v44  ;;  %v5224_v50 = vld [vmem:[%s6273_s1] sm:$0xff]   ;;  %v4297_v61 = vld.sshfl [vmem:[#allocation2 + $0x16c] sm:$0x2 pattern:$0x75316420] }
  0x2c   : > { %v1564_v27 = vrot.slane %v4351_v26, %v5549_v44  ;;  %v1793_v35 = vrot.slane %v1786_v34, %v5549_v44  ;;  %v5249_v20 = vld [vmem:[%s6275_s3 + $0xa0] sm:$0xff]   ;;  %v4358_v21 = vld.sshfl [vmem:[#allocation2 + $0x1fc] sm:$0x10 pattern:$0x75316420] }
  0x2d   : > { %4854 = vmatpush3.bf16.msra.mxu0 %v5219_v43  ;;  %v919_v56 = vrot.slane %v912_v54, %v5549_v44  ;;  %v4313_v2 = vld.sshfl [vmem:[#allocation2 + $0x170] sm:$0x10 pattern:$0x75316420]  ;;  %v852_v54 = vrot.slane %v4262_v19, %v5549_v44  ;;  %v5252_v26 = vld [vmem:[%s6275_s3 + $0xf8] sm:$0xff]  }
  0x2e   : > { %4855 = vmatprep.subr.bf16.mxu0 %v5343_v1  ;;  %v4314_v5 = vld.sshfl [vmem:[#allocation2 + $0x184] sm:$0x10 pattern:$0x75316420]  ;;  %v1302_v6 = vcombine.high %v4313_v2, %v4313_v2  ;;  %v1571_v29 = vrot.slane %v1564_v27, %v5549_v44  ;;  %520 = vst.msk [vmem:[#allocation2 + $0x2f4] sm:$0x7] %vm334_vm6, %v5345_v4 }
  0x2f   : > { %v1317_v7 = vcombine.high %v4314_v5, %v4314_v5  ;;  %v5310_v4 = vld [vmem:[%s6275_s3 + $0x2a8] sm:$0xff]  }
  0x30   : > { %v1309_v9 = vrot.slane %v1302_v6, %v5549_v44  ;;  %v5239_v6 = vld [vmem:[%s6275_s3 + $0x68] sm:$0xff]  }
  0x31   : > { %4856 = vmatpush3.bf16.msra.mxu0 %v5221_v46  ;;  %v1324_v10 = vrot.slane %v1317_v7, %v5549_v44  ;;  %v5220_v46 = vld [vmem:[%s6273_s1 + $0x10] sm:$0xff]  }
  0x32   : > { %4857 = vmatprep.subr.bf16.mxu0 %v5343_v1 }
  0x33   : > { %v1334_v12 = vcombine.low %v1309_v9, %v1324_v10  ;;  %v5241_v9 = vld [vmem:[%s6275_s3 + $0x60] sm:$0xff]  }
  0x35   : > { %4858 = vmatpush3.bf16.msra.mxu0 %v5223_v52  ;;  %v1341_v13 = vrot.slane %v1334_v12, %v5549_v44  ;;  %v4261_v52 = vld.sshfl [vmem:[#allocation2 + $0xf4] sm:$0x2 pattern:$0x75316420] }
  0x36   : > { %4875 = vmatprep.subr.bf16.mxu0 %v5343_v1  ;;  %v837_v53 = vrot.slane %v4261_v52, %v5549_v44  ;;  %v5245_v12 = vld [vmem:[%s6275_s3 + $0xb0] sm:$0xff]   ;;  %v5260_v52 = vld [vmem:[%s6275_s3 + $0x158] sm:$0xff]  }
  0x37   : > { %v5611_v16 = vrot.slane %v1341_v13, %v5549_v44  ;;  %v5251_v13 = vld [vmem:[#allocation2 + $0x174] ss:$20 sps:$4 sm:$0x11]  }
  0x38   : > { %4860 = vmatmul.mubr.msk.bf16.vlgmr.msra.gmra.mxu0 %vm619_vm3, %v919_v56  ;;  %v4278_v56 = vcombine.high %v837_v53, %v852_v54  ;;  %v5261_v53 = vld [vmem:[%s6275_s3 + $0x150] sm:$0xff]  }
  0x39   : > { %4876 = vmatpush3.bf16.msra.mxu0 %v5225_v55  ;;  %4883 = vmatprep.mubr.msk.bf16.mxu0 %vm5344_vm0, %v5343_v1  ;;  %v5228_v55 = vld [vmem:[%s6275_s3 + $0x10] sm:$0xff]  }
  0x3a   : > { %4877 = vmatprep.subr.bf16.mxu0 %v5343_v1 }
  0x3d   : > { %4878 = vmatpush3.bf16.msra.mxu0 %v5227_v57  ;;  %v5230_v57 = vld [vmem:[%s6275_s3 + $0x8] sm:$0xff]  }
  0x3e   : > { %4879 = vmatprep.subr.bf16.mxu0 %v5343_v1 }
  0x41   : > { %4880 = vmatpush3.bf16.msra.mxu0 %v5229_v58  ;;  %v994_v58 = vrot.slane %v4278_v56, %v5549_v44  ;;  %v4399_v56 = vld.sshfl [vmem:[#allocation2 + $0x80] sm:$0x10 pattern:$0x75316420] }
  0x42   : > { %4881 = vmatprep.subr.bf16.mxu0 %v5343_v1 }
  0x43   : > { %v1001_v60 = vrot.slane %v994_v58, %v5549_v44  ;;  %v4400_v58 = vld.sshfl [vmem:[#allocation2 + $0x94] sm:$0x10 pattern:$0x75316420] }
  0x45   : > { %4882 = vmatpush3.bf16.msra.mxu0 %v5231_v59  ;;  %v5232_v59 = vld [vmem:[%s6275_s3] sm:$0xff]  }
  0x46   : > { %4899 = vmatprep.subr.bf16.mxu0 %v5343_v1 }
  0x48   : > { %4884 = vmatmul.mubr.msk.bf16.vlgmr.msra.gmra.mxu0 %vm619_vm3, %v1096_v62  ;;  %v5235_v62 = vld [vmem:[%s6275_s3 + $0x78] sm:$0xff]  }
  0x49   : > { %4900 = vmatpush3.bf16.msra.mxu0 %v5234_v63  ;;  %4907 = vmatprep.mubr.msk.bf16.mxu0 %vm5344_vm0, %v5343_v1  ;;  %v4298_v63 = vld.sshfl [vmem:[#allocation2 + $0x180] sm:$0x2 pattern:$0x75316420] }
  0x4a   : > { %4901 = vmatprep.subr.bf16.mxu0 %v5343_v1  ;;  %v1197_v2 = vrot.slane %v4298_v63, %v5549_v44 }
  0x4d   : > { %4902 = vmatpush3.bf16.msra.mxu0 %v5236_v0  ;;  %v1182_v0 = vrot.slane %v4297_v61, %v5549_v44  ;;  %v2036_v61 = vcombine.high %v4400_v58, %v4400_v58 }
  0x4e   : > { %4903 = vmatprep.subr.bf16.mxu0 %v5343_v1 }
  0x4f   : > { %v4307_v5 = vcombine.high %v1182_v0, %v1197_v2  ;;  %v2043_v0 = vrot.slane %v2036_v61, %v5549_v44  ;;  %v5263_v2 = vld [vmem:[%s6275_s3 + $0x140] sm:$0xff]  }
  0x51   : > { %4904 = vmatpush3.bf16.msra.mxu0 %v5238_v3  ;;  %v5237_v3 = vld [vmem:[%s6275_s3 + $0x70] sm:$0xff]   ;;  %v1215_v7 = vrot.slane %v4307_v5, %v5549_v44 }
  0x52   : > { %4905 = vmatprep.subr.bf16.mxu0 %v5343_v1 }
  0x53   : > { %v1222_v10 = vrot.slane %v1215_v7, %v5549_v44 }
  0x55   : > { %4906 = vmatpush3.bf16.msra.mxu0 %v5240_v11  ;;  %v5243_v11 = vld [vmem:[%s6275_s3 + $0xb8] sm:$0xff]  }
  0x56   : > { %4923 = vmatprep.subr.bf16.mxu0 %v5343_v1 }
  0x58   : > { %4908 = vmatmul.mubr.msk.bf16.vlgmr.msra.gmra.mxu0 %vm619_vm3, %v5611_v16 }
  0x59   : > { %4924 = vmatpush3.bf16.msra.mxu0 %v5242_v15  ;;  %4931 = vmatprep.mubr.msk.bf16.mxu0 %vm5344_vm0, %v5343_v1  ;;  %v5247_v15 = vld [vmem:[%s6275_s3 + $0xa8] sm:$0xff]  }
  0x5a   : > { %4925 = vmatprep.subr.bf16.mxu0 %v5343_v1 }
  0x5d   : > { %4926 = vmatpush3.bf16.msra.mxu0 %v5244_v17  ;;  %v1437_v17 = vrot.slane %v5251_v13, %v5549_v44 }
  0x5e   : > { %4927 = vmatprep.subr.bf16.mxu0 %v5343_v1 }
  0x5f   : > { %v1444_v22 = vrot.slane %v1437_v17, %v5549_v44 }
  0x61   : > { %4928 = vmatpush3.bf16.msra.mxu0 %v5246_v18  ;;  %v4357_v18 = vld.sshfl [vmem:[#allocation2 + $0x1e8] sm:$0x10 pattern:$0x75316420] }
  0x62   : > { %4929 = vmatprep.subr.bf16.mxu0 %v5343_v1  ;;  %v1651_v24 = vcombine.high %v4357_v18, %v4357_v18 }
  0x64   : > { %v1658_v27 = vrot.slane %v1651_v24, %v5549_v44  ;;  %v5272_v24 = vld [vmem:[%s6275_s3 + $0x1b8] sm:$0xff]  }
  0x65   : > { %4930 = vmatpush3.bf16.msra.mxu0 %v5248_v25  ;;  %v1666_v25 = vcombine.high %v4358_v21, %v4358_v21 }
  0x66   : > { %4947 = vmatprep.subr.bf16.mxu0 %v5343_v1 }
  0x68   : > { %4932 = vmatmul.mubr.msk.bf16.vlgmr.msra.gmra.mxu0 %vm619_vm3, %v1571_v29  ;;  %v5254_v29 = vld [vmem:[%s6275_s3 + $0xf0] sm:$0xff]  }
  0x69   : > { %4948 = vmatpush3.bf16.msra.mxu0 %v5250_v28  ;;  %4955 = vmatprep.mubr.msk.bf16.mxu0 %vm5344_vm0, %v5343_v1  ;;  %v1673_v28 = vrot.slane %v1666_v25, %v5549_v44 }
  0x6a   : > { %4949 = vmatprep.subr.bf16.mxu0 %v5343_v1 }
  0x6d   : > { %4950 = vmatpush3.bf16.msra.mxu0 %v5253_v30  ;;  %v1683_v30 = vcombine.low %v1658_v27, %v1673_v28  ;;  %v5276_v27 = vld [vmem:[%s6275_s3 + $0x1a8] sm:$0xff]   ;;  %v5278_v28 = vld [vmem:[%s6275_s3 + $0x1a0] sm:$0xff]  }
  0x6e   : > { %4951 = vmatprep.subr.bf16.mxu0 %v5343_v1 }
  0x6f   : > { %v1690_v32 = vrot.slane %v1683_v30, %v5549_v44 }
  0x71   : > { %4952 = vmatpush3.bf16.msra.mxu0 %v5255_v31  ;;  %v5256_v31 = vld [vmem:[%s6275_s3 + $0xe8] sm:$0xff]   ;;  %v1697_v34 = vrot.slane %v1690_v32, %v5549_v44  ;;  %v5282_v32 = vld [vmem:[%s6275_s3 + $0x1f0] sm:$0xff]  }
  0x72   : > { %4953 = vmatprep.subr.bf16.mxu0 %v5343_v1 }
  0x75   : > { %4954 = vmatpush3.bf16.msra.mxu0 %v5257_v33  ;;  %v5259_v33 = vld [vmem:[%s6275_s3 + $0xe0] sm:$0xff]  }
  0x76   : > { %4971 = vmatprep.subr.bf16.mxu0 %v5343_v1 }
  0x78   : > { %4956 = vmatmul.mubr.msk.bf16.vlgmr.msra.gmra.mxu0 %vm619_vm3, %v1793_v35 }
  0x79   : > { %4979 = vmatprep.mubr.msk.bf16.mxu0 %vm5344_vm0, %v5343_v1  ;;  %4972 = vmatpush3.bf16.msra.mxu0 %v5260_v52 }
  0x7a   : > { %4973 = vmatprep.subr.bf16.mxu0 %v5343_v1 }
  0x7d   : > { %4974 = vmatpush3.bf16.msra.mxu0 %v5261_v53  ;;  %v5290_v53 = vld [vmem:[%s6275_s3 + $0x230] sm:$0xff]  }
  0x7e   : > { %4975 = vmatprep.subr.bf16.mxu0 %v5343_v1 }
  0xe8   : > { %v657_v37 = vpop.f32.mrf.mxu0 }
  0xe9   : > { %v658_v38 = vadd.f32 %v657_v37, %v594_v36 }
  0xea   : > { %v4831_v39 = vpop.f32.mrf.mxu0 }
  0xeb   : > { %v663_v40 = vmax.f32 %v658_v38, 0.0 }
  0xec   : > { %v660_v41 = vpop.f32.mrf.mxu0 }
  0xed   : > { %v665_v43 = vpack.c.bf16 %v663_v40, %v663_v40 }
  0xee   : > { %v4832_v45 = vpop.f32.mrf.mxu0 }
  0xef   : > { %4836 = vmatmul.mubr.msk.bf16.vlgmr.msra.gmra.mxu1 %vm668_vm5, %v665_v43 }
  0xf0   : > { %4840 = vmatpush3.bf16.msra.mxu1 %v5218_v42  ;;  %4847 = vmatprep.mubr.msk.bf16.mxu1 %vm5344_vm0, %v5343_v1 }
  0xf1   : > { %4841 = vmatprep.subr.bf16.mxu1 %v5343_v1 }
  0xf4   : > { %4842 = vmatpush3.bf16.msra.mxu1 %v5220_v46 }
  0xf5   : > { %4843 = vmatprep.subr.bf16.mxu1 %v5343_v1 }
  0xf8   : > { %4844 = vmatpush3.bf16.msra.mxu1 %v5222_v48  ;;  %v5773_v35 = vpop.f32.mrf.mxu0 }
  0xf9   : > { %4845 = vmatprep.subr.bf16.mxu1 %v5343_v1 }
  0xfa   : > { %v4861_v36 = vpop.f32.mrf.mxu0 }
  0xfc   : > { %4846 = vmatpush3.bf16.msra.mxu1 %v5224_v50  ;;  %v984_v37 = vpop.f32.mrf.mxu0 }
  0xfd   : > { %4863 = vmatprep.subr.bf16.mxu1 %v5343_v1  ;;  %v5284_v37 = vld [vmem:[%s6275_s3 + $0x1e8] sm:$0xff]  }
  0xfe   : > { %v4862_v38 = vpop.f32.mrf.mxu0 }
  0xff   : > { %4848 = vmatmul.mubr.msk.bf16.vlgmr.msra.gmra.mxu1 %vm619_vm3, %v748_v51  ;;  %v4482_v38 = vld.sshfl [vmem:[#allocation2 + $0x26c] sm:$0x20 pattern:$0x75316420] }
 0x100   : > { %4864 = vmatpush3.bf16.msra.mxu1 %v5226_v14  ;;  %4871 = vmatprep.mubr.msk.bf16.mxu1 %vm5344_vm0, %v5343_v1 }
 0x101   : > { %4865 = vmatprep.subr.bf16.mxu1 %v5343_v1 }
 0x104   : > { %4866 = vmatpush3.bf16.msra.mxu1 %v5228_v55 }
 0x105   : > { %4867 = vmatprep.subr.bf16.mxu1 %v5343_v1 }
 0x108   : > { %4868 = vmatpush3.bf16.msra.mxu1 %v5230_v57  ;;  %v5779_v39 = vpop.f32.mrf.mxu0  ;;  %v5262_v57 = vld [vmem:[%s6275_s3 + $0x148] sm:$0xff]  }
 0x109   : > { %4869 = vmatprep.subr.bf16.mxu1 %v5343_v1  ;;  %4976 = vmatpush3.bf16.msra.mxu0 %v5262_v57 }
 0x10a   : > { %v4885_v40 = vpop.f32.mrf.mxu0  ;;  %4977 = vmatprep.subr.bf16.mxu0 %v5343_v1 }
 0x10c   : > { %4870 = vmatpush3.bf16.msra.mxu1 %v5232_v59  ;;  %v1161_v41 = vpop.f32.mrf.mxu0  ;;  %v2021_v59 = vcombine.high %v4399_v56, %v4399_v56  ;;  %v4513_v56 = vld.sshfl [vmem:[#allocation2 + $0x278] sm:$0x20 pattern:$0x75316420] }
 0x10d   : > { %4887 = vmatprep.subr.bf16.mxu1 %v5343_v1  ;;  %4978 = vmatpush3.bf16.msra.mxu0 %v5263_v2  ;;  %v2703_v41 = vcombine.high %v4482_v38, %v4482_v38 }
 0x10e   : > { %v4886_v42 = vpop.f32.mrf.mxu0  ;;  %v2028_v63 = vrot.slane %v2021_v59, %v5549_v44  ;;  %4995 = vmatprep.subr.bf16.mxu0 %v5343_v1  ;;  %v5292_v59 = vld [vmem:[%s6275_s3 + $0x228] sm:$0xff]  }
 0x10f   : > { %4872 = vmatmul.mubr.msk.bf16.vlgmr.msra.gmra.mxu1 %vm619_vm3, %v1001_v60  ;;  %v4386_v60 = vld [vmem:[%s6279_s7 + $0x4] sm:$0xf] }
 0x110   : > { %4888 = vmatpush3.bf16.msra.mxu1 %v5235_v62  ;;  %4895 = vmatprep.mubr.msk.bf16.mxu1 %vm5344_vm0, %v5343_v1  ;;  %v1876_v62 = vsel %vm672_vm4, %v4386_v60, 0  ;;  %v2957_v60 = vcombine.high %v4513_v56, %v4513_v56  ;;  %v5271_v56 = vld [vmem:[%s6275_s3 + $0x120] sm:$0xff]  }
 0x111   : > { %4889 = vmatprep.subr.bf16.mxu1 %v5343_v1 }
 0x114   : > { %4890 = vmatpush3.bf16.msra.mxu1 %v5237_v3  ;;  %v2053_v3 = vcombine.low %v2028_v63, %v2043_v0  ;;  %v5294_v63 = vld [vmem:[%s6275_s3 + $0x220] sm:$0xff]  }
 0x115   : > { %4891 = vmatprep.subr.bf16.mxu1 %v5343_v1 }
 0x116   : > { %v2060_v5 = vrot.slane %v2053_v3, %v5549_v44 }
 0x118   : > { %4892 = vmatpush3.bf16.msra.mxu1 %v5239_v6  ;;  %v5781_v43 = vpop.f32.mrf.mxu0  ;;  %v5264_v6 = vld [vmem:[%s6275_s3 + $0x178] sm:$0xff]   ;;  %v2067_v7 = vrot.slane %v2060_v5, %v5549_v44 }
 0x119   : > { %4893 = vmatprep.subr.bf16.mxu1 %v5343_v1 }
 0x11a   : > { %v4909_v45 = vpop.f32.mrf.mxu0  ;;  %4980 = vmatmul.mubr.msk.bf16.vlgmr.msra.gmra.mxu0 %vm619_vm3, %v2067_v7 }
 0x11b   : > { %4996 = vmatpush3.bf16.msra.mxu0 %v5264_v6  ;;  %5003 = vmatprep.mubr.msk.bf16.mxu0 %vm5344_vm0, %v5343_v1  ;;  %v2710_v45 = vrot.slane %v2703_v41, %v5549_v44  ;;  %v4389_v41 = vld.sshfl [vmem:[#allocation2 + $0x78] sm:$0x20 pattern:$0x75316420] }
 0x11c   : > { %4894 = vmatpush3.bf16.msra.mxu1 %v5241_v9  ;;  %v1413_v46 = vpop.f32.mrf.mxu0  ;;  %4997 = vmatprep.subr.bf16.mxu0 %v5343_v1  ;;  %v5266_v9 = vld [vmem:[%s6275_s3 + $0x170] sm:$0xff]  }
 0x11d   : > { %4911 = vmatprep.subr.bf16.mxu1 %v5343_v1  ;;  %v5286_v46 = vld [vmem:[%s6275_s3 + $0x1e0] sm:$0xff]  }
 0x11e   : > { %v4910_v47 = vpop.f32.mrf.mxu0 }
 0x11f   : > { %4896 = vmatmul.mubr.msk.bf16.vlgmr.msra.gmra.mxu1 %vm619_vm3, %v1222_v10  ;;  %4998 = vmatpush3.bf16.msra.mxu0 %v5266_v9  ;;  %v4420_v10 = vld.sshfl [vmem:[#allocation2 + $0x84] sm:$0x20 pattern:$0x75316420] }
 0x120   : > { %4912 = vmatpush3.bf16.msra.mxu1 %v5243_v11  ;;  %4919 = vmatprep.mubr.msk.bf16.mxu1 %vm5344_vm0, %v5343_v1  ;;  %v5268_v11 = vld [vmem:[%s6275_s3 + $0x168] sm:$0xff]   ;;  %v2228_v13 = vcombine.high %v4420_v10, %v4420_v10 }
 0x121   : > { %4913 = vmatprep.subr.bf16.mxu1 %v5343_v1  ;;  %4999 = vmatprep.subr.bf16.mxu0 %v5343_v1 }
 0x122   : > { %v2235_v17 = vrot.slane %v2228_v13, %v5549_v44 }
 0x123   : > { %5000 = vmatpush3.bf16.msra.mxu0 %v5268_v11 }
 0x124   : > { %4914 = vmatpush3.bf16.msra.mxu1 %v5245_v12  ;;  %v4421_v12 = vld.sshfl [vmem:[#allocation2 + $0x98] sm:$0x20 pattern:$0x75316420]  ;;  %5001 = vmatprep.subr.bf16.mxu0 %v5343_v1 }
 0x125   : > { %4915 = vmatprep.subr.bf16.mxu1 %v5343_v1 }
 0x128   : > { %4916 = vmatpush3.bf16.msra.mxu1 %v5247_v15  ;;  %v5783_v48 = vpop.f32.mrf.mxu0  ;;  %v2244_v15 = vcombine.high %v4421_v12, %v4421_v12 }
 0x129   : > { %4917 = vmatprep.subr.bf16.mxu1 %v5343_v1 }
 0x12a   : > { %v4933_v49 = vpop.f32.mrf.mxu0  ;;  %v2251_v18 = vrot.slane %v2244_v15, %v5549_v44 }
 0x12c   : > { %4918 = vmatpush3.bf16.msra.mxu1 %v5249_v20  ;;  %v1636_v50 = vpop.f32.mrf.mxu0  ;;  %v5270_v20 = vld [vmem:[%s6275_s3 + $0x160] sm:$0xff]   ;;  %v4430_v21 = vcombine.high %v2235_v17, %v2251_v18 }
 0x12d   : > { %4935 = vmatprep.subr.bf16.mxu1 %v5343_v1  ;;  %5002 = vmatpush3.bf16.msra.mxu0 %v5270_v20  ;;  %v5288_v50 = vld [vmem:[%s6275_s3 + $0x238] sm:$0xff]  }
 0x12e   : > { %v4934_v51 = vpop.f32.mrf.mxu0  ;;  %5019 = vmatprep.subr.bf16.mxu0 %v5343_v1 }
 0x12f   : > { %4920 = vmatmul.mubr.msk.bf16.vlgmr.msra.gmra.mxu1 %vm619_vm3, %v1444_v22  ;;  %v2269_v22 = vrot.slane %v4430_v21, %v5549_v44 }
 0x130   : > { %4936 = vmatpush3.bf16.msra.mxu1 %v5252_v26  ;;  %4943 = vmatprep.mubr.msk.bf16.mxu1 %vm5344_vm0, %v5343_v1  ;;  %v5274_v26 = vld [vmem:[%s6275_s3 + $0x1b0] sm:$0xff]  }
 0x131   : > { %4937 = vmatprep.subr.bf16.mxu1 %v5343_v1  ;;  %v2276_v25 = vrot.slane %v2269_v22, %v5549_v44 }
 0x133   : > { %5004 = vmatmul.mubr.msk.bf16.vlgmr.msra.gmra.mxu0 %vm619_vm3, %v2276_v25 }
 0x134   : > { %4938 = vmatpush3.bf16.msra.mxu1 %v5254_v29  ;;  %5020 = vmatpush3.bf16.msra.mxu0 %v5272_v24  ;;  %v5280_v29 = vld [vmem:[%s6275_s3 + $0x1f8] sm:$0xff]  }
 0x135   : > { %4939 = vmatprep.subr.bf16.mxu1 %v5343_v1  ;;  %5027 = vmatprep.mubr.msk.bf16.mxu0 %vm5344_vm0, %v5343_v1 }
 0x136   : > { %5021 = vmatprep.subr.bf16.mxu0 %v5343_v1 }
 0x138   : > { %4940 = vmatpush3.bf16.msra.mxu1 %v5256_v31  ;;  %v5789_v14 = vpop.f32.mrf.mxu0  ;;  %5022 = vmatpush3.bf16.msra.mxu0 %v5274_v26 }
 0x139   : > { %4941 = vmatprep.subr.bf16.mxu1 %v5343_v1  ;;  %5023 = vmatprep.subr.bf16.mxu0 %v5343_v1 }
 0x13a   : > { %v4957_v19 = vpop.f32.mrf.mxu0 }
 0x13c   : > { %4942 = vmatpush3.bf16.msra.mxu1 %v5259_v33  ;;  %v1858_v54 = vpop.f32.mrf.mxu0  ;;  %5024 = vmatpush3.bf16.msra.mxu0 %v5276_v27 }
 0x13d   : > { %4959 = vmatprep.subr.bf16.mxu1 %v5343_v1  ;;  %5025 = vmatprep.subr.bf16.mxu0 %v5343_v1 }
 0x13e   : > { %v4958_v55 = vpop.f32.mrf.mxu0 }
 0x13f   : > { %4944 = vmatmul.mubr.msk.bf16.vlgmr.msra.gmra.mxu1 %vm619_vm3, %v1697_v34  ;;  %v4481_v34 = vld.sshfl [vmem:[#allocation2 + $0x258] sm:$0x20 pattern:$0x75316420] }
 0x140   : > { %4961 = vmatprep.mubr.msk.bf16.mxu1 %vm5344_vm0, %v5343_v1  ;;  %4960 = vmatpush3.bf16.msra.mxu1 %v1876_v62  ;;  %v2687_v40 = vcombine.high %v4481_v34, %v4481_v34  ;;  %v4512_v55 = vld.sshfl [vmem:[#allocation2 + $0x264] sm:$0x20 pattern:$0x75316420]  ;;  %v2964_v62 = vrot.slane %v2957_v60, %v5549_v44 }
 0x141   : > { %4965 = vmatprep.subr.bf16.mxu1 %v5343_v1  ;;  %5026 = vmatpush3.bf16.msra.mxu0 %v5278_v28  ;;  %v2941_v57 = vcombine.high %v4512_v55, %v4512_v55  ;;  %v4436_v55 = vld.sshfl [vmem:[#allocation2 + $0x168] sm:$0x20 pattern:$0x75316420] }
 0x142   : > { %5043 = vmatprep.subr.bf16.mxu0 %v5343_v1  ;;  %v2694_v42 = vrot.slane %v2687_v40, %v5549_v44 }
 0x143   : > { %v2948_v61 = vrot.slane %v2941_v57, %v5549_v44  ;;  %v4437_v57 = vld.sshfl [vmem:[#allocation2 + $0x17c] sm:$0x20 pattern:$0x75316420] }
 0x144   : > { %5028 = vmatmul.mubr.msk.bf16.vlgmr.msra.gmra.mxu0 %vm619_vm3, %v5611_v16  ;;  %v4491_v47 = vcombine.high %v2694_v42, %v2710_v45  ;;  %v1976_v45 = vcombine.high %v4389_v41, %v4389_v41  ;;  %v2372_v60 = vcombine.high %v4437_v57, %v4437_v57 }
 0x145   : > { %5044 = vmatpush3.bf16.msra.mxu0 %v5280_v29  ;;  %5051 = vmatprep.mubr.msk.bf16.mxu0 %vm5344_vm0, %v5343_v1  ;;  %v4522_v0 = vcombine.high %v2948_v61, %v2964_v62  ;;  %v5273_v61 = vld [vmem:[%s6275_s3 + $0x198] sm:$0xff]  }
 0x146   : > { %5045 = vmatprep.subr.bf16.mxu0 %v5343_v1  ;;  %v2728_v49 = vrot.slane %v4491_v47, %v5549_v44  ;;  %v5265_v47 = vld [vmem:[%s6275_s3 + $0x138] sm:$0xff]  }
 0x147   : > { %v2982_v2 = vrot.slane %v4522_v0, %v5549_v44  ;;  %v5275_v0 = vld [vmem:[%s6275_s3 + $0x190] sm:$0xff]  }
 0x148   : > { %v2735_v51 = vrot.slane %v2728_v49, %v5549_v44 }
 0x149   : > { %5046 = vmatpush3.bf16.msra.mxu0 %v5282_v32  ;;  %v2989_v3 = vrot.slane %v2982_v2, %v5549_v44 }
 0x14a   : > { %5047 = vmatprep.subr.bf16.mxu0 %v5343_v1 }
 0x14d   : > { %5048 = vmatpush3.bf16.msra.mxu0 %v5284_v37 }
 0x14e   : > { %5049 = vmatprep.subr.bf16.mxu0 %v5343_v1 }
 0x151   : > { %5050 = vmatpush3.bf16.msra.mxu0 %v5286_v46 }
 0x152   : > { %5067 = vmatprep.subr.bf16.mxu0 %v5343_v1 }
 0x154   : > { %5052 = vmatmul.mubr.msk.bf16.vlgmr.msra.gmra.mxu0 %vm619_vm3, %v2735_v51 }
 0x155   : > { %5068 = vmatpush3.bf16.msra.mxu0 %v5288_v50  ;;  %5075 = vmatprep.mubr.msk.bf16.mxu0 %vm5344_vm0, %v5343_v1  ;;  %v1983_v50 = vrot.slane %v1976_v45, %v5549_v44 }
 0x156   : > { %5069 = vmatprep.subr.bf16.mxu0 %v5343_v1 }
 0x159   : > { %5070 = vmatpush3.bf16.msra.mxu0 %v5290_v53  ;;  %v5269_v53 = vld [vmem:[%s6275_s3 + $0x128] sm:$0xff]  }
 0x15a   : > { %5071 = vmatprep.subr.bf16.mxu0 %v5343_v1 }
 0x15d   : > { %5072 = vmatpush3.bf16.msra.mxu0 %v5292_v59  ;;  %v2356_v59 = vcombine.high %v4436_v55, %v4436_v55 }
 0x15e   : > { %5073 = vmatprep.subr.bf16.mxu0 %v5343_v1 }
 0x15f   : > { %v2363_v62 = vrot.slane %v2356_v59, %v5549_v44  ;;  %v4529_v59 = vld [vmem:[%s6279_s7 + $0x8] sm:$0xf] }
 0x161   : > { %5074 = vmatpush3.bf16.msra.mxu0 %v5294_v63  ;;  %v2379_v63 = vrot.slane %v2372_v60, %v5549_v44  ;;  %v3072_v60 = vsel %vm672_vm4, %v4529_v59, 0 }
 0x162   : > { %5097 = vmatprep.subr.bf16.mxu0 %v5343_v1 }
 0x163   : > { %v4446_v2 = vcombine.high %v2363_v62, %v2379_v63  ;;  %v5299_v62 = vld [vmem:[%s6275_s3 + $0x250] sm:$0xff]   ;;  %v5301_v63 = vld [vmem:[%s6275_s3 + $0x248] sm:$0xff]  }
 0x164   : > { %5076 = vmatmul.mubr.msk.bf16.vlgmr.msra.gmra.mxu0 %vm619_vm3, %v2989_v3  ;;  %v5277_v3 = vld [vmem:[%s6275_s3 + $0x188] sm:$0xff]  }
 0x165   : > { %5105 = vmatprep.mubr.msk.bf16.mxu0 %vm5344_vm0, %v5343_v1 }
 0x1af   : > { %v5857_v30 = vpop.f32.mrf.mxu1 }
 0x1b1   : > { %v4837_v31 = vpop.f32.mrf.mxu1 }
 0x1b2   : > { %v4385_v31 = vld [vmem:[%s6276_s4] ss:$0 sm:$0xff] }
 0x1b3   : > { %v713_v33 = vpop.f32.mrf.mxu1 }
 0x1b5   : > { %v4838_v36 = vpop.f32.mrf.mxu1 }
 0x1bf   : > { %v810_v52 = vpop.f32.mrf.mxu1 }
 0x1c1   : > { %v4849_v19 = vpop.f32.mrf.mxu1 }
 0x1c3   : > { %v813_v54 = vpop.f32.mrf.mxu1 }
 0x1c5   : > { %v4850_v58 = vpop.f32.mrf.mxu1 }
 0x1cf   : > { %v1063_v5 = vpop.f32.mrf.mxu1 }
 0x1d0   : > { %v1064_v15 = vadd.f32 %v1063_v5, %v5773_v35  ;;  %v2397_v5 = vrot.slane %v4446_v2, %v5549_v44  ;;  %v5303_v2 = vld [vmem:[%s6275_s3 + $0x240] sm:$0xff]  }
 0x1d1   : > { %v4873_v6 = vpop.f32.mrf.mxu1 }
 0x1d2   : > { %v1164_v20 = vadd.f32 %v5779_v39, %v1064_v15  ;;  %v4255_v39 = vld [vmem:[%s6274_s2] ss:$0 sm:$0xff]  ;;  %v4465_v6 = vld.sshfl [vmem:[#allocation2 + $0x174] sm:$0x20 pattern:$0x75316420] }
 0x1d3   : > { %v1066_v7 = vpop.f32.mrf.mxu1  ;;  %v811_v37 = vadd.f32 %v4255_v39, %v810_v52  ;;  %v5267_v52 = vld [vmem:[%s6275_s3 + $0x130] sm:$0xff]   ;;  %v5293_v39 = vld [vmem:[%s6275_s3 + $0x208] sm:$0xff]  }
 0x1d4   : > { %v5279_v7 = vld [vmem:[%s6275_s3 + $0x180] sm:$0xff]  }
 0x1d5   : > { %v4874_v9 = vpop.f32.mrf.mxu1  ;;  %v816_v42 = vmax.f32 %v811_v37, 0.0 }
 0x1d6   : > { %v4466_v9 = vld.sshfl [vmem:[#allocation2 + $0x188] sm:$0x20 pattern:$0x75316420] }
 0x1d7   : > { %v817_v49 = vpack.c.bf16 %v816_v42, %v816_v42 }
 0x1da   : > { %v6016_v37 = vpop.f32.mrf.mxu0 }
 0x1df   : > { %v1284_v10 = vpop.f32.mrf.mxu1 }
 0x1e0   : > { %v1290_v22 = vadd.f32 %v1284_v10, %v1164_v20  ;;  %v2404_v10 = vrot.slane %v2397_v5, %v5549_v44 }
 0x1e1   : > { %v4897_v11 = vpop.f32.mrf.mxu1 }
 0x1e2   : > { %v1416_v25 = vadd.f32 %v5781_v43, %v1290_v22  ;;  %v818_v43 = vld [vmem:[%s6279_s7] sm:$0xf]  ;;  %v2558_v11 = vcombine.high %v4465_v6, %v4465_v6  ;;  %v5306_v6 = vld [vmem:[%s6275_s3 + $0x2b8] sm:$0xff]  }
 0x1e3   : > { %v1287_v12 = vpop.f32.mrf.mxu1  ;;  %v1922_v40 = vsel %vm672_vm4, %v818_v43, 0  ;;  %v5295_v43 = vld [vmem:[%s6275_s3 + $0x200] sm:$0xff]  }
 0x1e4   : > { %v2574_v12 = vcombine.high %v4466_v9, %v4466_v9  ;;  %v2565_v15 = vrot.slane %v2558_v11, %v5549_v44  ;;  %v5314_v9 = vld [vmem:[#allocation2 + $0x168] ss:$20 sps:$4 sm:$0x11]  }
 0x1e5   : > { %v4898_v13 = vpop.f32.mrf.mxu1  ;;  %v3481_v11 = vrot.slane %v5314_v9, %v5549_v44 }
 0x1e6   : > { %v5281_v13 = vld [vmem:[%s6275_s3 + $0x1d8] sm:$0xff]  }
 0x1ef   : > { %v1506_v17 = vpop.f32.mrf.mxu1 }
 0x1f0   : > { %v1512_v26 = vadd.f32 %v1506_v17, %v1416_v25  ;;  %v2581_v17 = vrot.slane %v2574_v12, %v5549_v44  ;;  %v5287_v25 = vld [vmem:[%s6275_s3 + $0x1c0] sm:$0xff]   ;;  %v3488_v12 = vrot.slane %v3481_v11, %v5549_v44 }
 0x1f1   : > { %v4921_v18 = vpop.f32.mrf.mxu1 }
 0x1f2   : > { %v1639_v27 = vadd.f32 %v5783_v48, %v1512_v26  ;;  %v5283_v18 = vld [vmem:[%s6275_s3 + $0x1d0] sm:$0xff]   ;;  %v4475_v20 = vcombine.high %v2565_v15, %v2581_v17  ;;  %v5319_v17 = vld [vmem:[%s6275_s3 + $0x2e8] sm:$0xff]  }
 0x1f3   : > { %v1509_v21 = vpop.f32.mrf.mxu1  ;;  %v4498_v26 = vld.sshfl [vmem:[#allocation2 + $0x274] sm:$0x10 pattern:$0x75316420] }
 0x1f4   : > { %v5285_v21 = vld [vmem:[%s6275_s3 + $0x1c8] sm:$0xff]   ;;  %v2599_v22 = vrot.slane %v4475_v20, %v5549_v44  ;;  %v5317_v15 = vld [vmem:[%s6275_s3 + $0x2f0] sm:$0xff]  }
 0x1f5   : > { %v4922_v24 = vpop.f32.mrf.mxu1  ;;  %v4602_v20 = vld.sshfl [vmem:[#allocation2 + $0x18c] sm:$0x2 pattern:$0x75316420] }
 0x1f6   : > { %v4497_v24 = vld.sshfl [vmem:[#allocation2 + $0x260] sm:$0x10 pattern:$0x75316420] }
 0x1ff   : > { %v1759_v28 = vpop.f32.mrf.mxu1 }
 0x200   : > { %v1765_v29 = vadd.f32 %v1759_v28, %v1639_v27  ;;  %v2606_v27 = vrot.slane %v2599_v22, %v5549_v44  ;;  %v2815_v28 = vcombine.high %v4497_v24, %v4497_v24  ;;  %v3663_v22 = vrot.slane %v4602_v20, %v5549_v44 }
 0x201   : > { %v4945_v32 = vpop.f32.mrf.mxu1 }
 0x202   : > { %v1861_v35 = vadd.f32 %v5789_v14, %v1765_v29  ;;  %v4390_v14 = vld.sshfl [vmem:[#allocation2 + $0x8c] sm:$0x20 pattern:$0x75316420]  ;;  %v2830_v29 = vcombine.high %v4498_v26, %v4498_v26  ;;  %v2822_v32 = vrot.slane %v2815_v28, %v5549_v44 }
 0x203   : > { %v1762_v33 = vpop.f32.mrf.mxu1  ;;  %v1992_v46 = vcombine.high %v4390_v14, %v4390_v14 }
 0x204   : > { %v1867_v34 = vadd.f32 %v4385_v31, %v1861_v35  ;;  %v5289_v31 = vld [vmem:[%s6275_s3 + $0x218] sm:$0xff]   ;;  %v2837_v35 = vrot.slane %v2830_v29, %v5549_v44  ;;  %v5291_v33 = vld [vmem:[%s6275_s3 + $0x210] sm:$0xff]  }
 0x205   : > { %v4946_v36 = vpop.f32.mrf.mxu1  ;;  %v1999_v51 = vrot.slane %v1992_v46, %v5549_v44 }
 0x206   : > { %v1868_v48 = vmax.f32 %v1867_v34, 0.0  ;;  %v2847_v34 = vcombine.low %v2822_v32, %v2837_v35  ;;  %v5323_v32 = vld [vmem:[%s6275_s3 + $0x338] sm:$0xff]  }
 0x207   : > { %v4414_v19 = vcombine.high %v1983_v50, %v1999_v51 }
 0x208   : > { %v1869_v38 = vpack.c.bf16 %v1868_v48, %v1868_v48  ;;  %v2854_v36 = vrot.slane %v2847_v34, %v5549_v44  ;;  %v5325_v34 = vld [vmem:[%s6275_s3 + $0x330] sm:$0xff]  }
 0x209   : > { %v2142_v54 = vrot.slane %v4414_v19, %v5549_v44 }
 0x20a   : > { %4962 = vmatmul.mubr.msk.bf16.vlgmr.msra.gmra.mxu1 %vm668_vm5, %v1869_v38  ;;  %v2861_v48 = vrot.slane %v2854_v36, %v5549_v44  ;;  %v4981_v38 = vpop.f32.mrf.mxu0 }
 0x20b   : > { %4966 = vmatpush3.bf16.msra.mxu1 %v1922_v40  ;;  %4967 = vmatprep.mubr.msk.bf16.mxu1 %vm5344_vm0, %v5343_v1  ;;  %v2149_v58 = vrot.slane %v2142_v54, %v5549_v44 }
 0x20c   : > { %4983 = vmatprep.subr.bf16.mxu1 %v5343_v1  ;;  %v2132_v40 = vpop.f32.mrf.mxu0 }
 0x20e   : > { %v4982_v41 = vpop.f32.mrf.mxu0 }
 0x20f   : > { %v5327_v41 = vld [vmem:[%s6275_s3 + $0x328] sm:$0xff]  }
 0x210   : > { %v6022_v14 = vpop.f32.mrf.mxu0 }
 0x212   : > { %4968 = vmatmul.mubr.msk.bf16.vlgmr.msra.gmra.mxu1 %vm668_vm5, %v817_v49  ;;  %v5005_v42 = vpop.f32.mrf.mxu0 }
 0x213   : > { %4984 = vmatpush3.bf16.msra.mxu1 %v5265_v47  ;;  %4991 = vmatprep.mubr.msk.bf16.mxu1 %vm5344_vm0, %v5343_v1 }
 0x214   : > { %4985 = vmatprep.subr.bf16.mxu1 %v5343_v1  ;;  %v2341_v45 = vpop.f32.mrf.mxu0 }
 0x216   : > { %v5006_v46 = vpop.f32.mrf.mxu0 }
 0x217   : > { %4986 = vmatpush3.bf16.msra.mxu1 %v5267_v52 }
 0x218   : > { %4987 = vmatprep.subr.bf16.mxu1 %v5343_v1  ;;  %v6024_v47 = vpop.f32.mrf.mxu0 }
 0x21a   : > { %v5029_v49 = vpop.f32.mrf.mxu0 }
 0x21b   : > { %4988 = vmatpush3.bf16.msra.mxu1 %v5269_v53 }
 0x21c   : > { %4989 = vmatprep.subr.bf16.mxu1 %v5343_v1  ;;  %v2543_v50 = vpop.f32.mrf.mxu0 }
 0x21d   : > { %v5329_v50 = vld [vmem:[%s6275_s3 + $0x320] sm:$0xff]  }
 0x21e   : > { %v5030_v51 = vpop.f32.mrf.mxu0 }
 0x21f   : > { %4990 = vmatpush3.bf16.msra.mxu1 %v5271_v56 }
 0x220   : > { %5007 = vmatprep.subr.bf16.mxu1 %v5343_v1  ;;  %v6026_v52 = vpop.f32.mrf.mxu0 }
 0x222   : > { %4992 = vmatmul.mubr.msk.bf16.vlgmr.msra.gmra.mxu1 %vm619_vm3, %v2149_v58  ;;  %v5053_v19 = vpop.f32.mrf.mxu0 }
 0x223   : > { %5008 = vmatpush3.bf16.msra.mxu1 %v5273_v61  ;;  %5015 = vmatprep.mubr.msk.bf16.mxu1 %vm5344_vm0, %v5343_v1  ;;  %v5297_v61 = vld [vmem:[%s6275_s3 + $0x258] sm:$0xff]  }
 0x224   : > { %5009 = vmatprep.subr.bf16.mxu1 %v5343_v1  ;;  %v2800_v53 = vpop.f32.mrf.mxu0  ;;  %5098 = vmatpush3.bf16.msra.mxu0 %v5297_v61 }
 0x225   : > { %5099 = vmatprep.subr.bf16.mxu0 %v5343_v1 }
 0x226   : > { %v5054_v54 = vpop.f32.mrf.mxu0 }
 0x227   : > { %5010 = vmatpush3.bf16.msra.mxu1 %v5275_v0  ;;  %v5304_v0 = vld [vmem:[#allocation2] ss:$20 sps:$4 sm:$0x11]  }
 0x228   : > { %5011 = vmatprep.subr.bf16.mxu1 %v5343_v1  ;;  %v6028_v55 = vpop.f32.mrf.mxu0  ;;  %5100 = vmatpush3.bf16.msra.mxu0 %v5299_v62 }
 0x229   : > { %5101 = vmatprep.subr.bf16.mxu0 %v5343_v1 }
 0x22a   : > { %v5077_v56 = vpop.f32.mrf.mxu0 }
 0x22b   : > { %5012 = vmatpush3.bf16.msra.mxu1 %v5277_v3  ;;  %v3260_v3 = vrot.slane %v5304_v0, %v5549_v44 }
 0x22c   : > { %5013 = vmatprep.subr.bf16.mxu1 %v5343_v1  ;;  %v3054_v57 = vpop.f32.mrf.mxu0  ;;  %5102 = vmatpush3.bf16.msra.mxu0 %v5301_v63 }
 0x22d   : > { %5103 = vmatprep.subr.bf16.mxu0 %v5343_v1  ;;  %v3267_v5 = vrot.slane %v3260_v3, %v5549_v44 }
 0x22e   : > { %v5078_v58 = vpop.f32.mrf.mxu0 }
 0x22f   : > { %5014 = vmatpush3.bf16.msra.mxu1 %v5279_v7  ;;  %v5308_v7 = vld [vmem:[%s6275_s3 + $0x2b0] sm:$0xff]  }
 0x230   : > { %5031 = vmatprep.subr.bf16.mxu1 %v5343_v1  ;;  %5104 = vmatpush3.bf16.msra.mxu0 %v5303_v2 }
 0x231   : > { %5121 = vmatprep.subr.bf16.mxu0 %v5343_v1 }
 0x232   : > { %5016 = vmatmul.mubr.msk.bf16.vlgmr.msra.gmra.mxu1 %vm619_vm3, %v2404_v10  ;;  %v5312_v10 = vld [vmem:[%s6275_s3 + $0x2a0] sm:$0xff]  }
 0x233   : > { %5032 = vmatpush3.bf16.msra.mxu1 %v5281_v13  ;;  %5039 = vmatprep.mubr.msk.bf16.mxu1 %vm5344_vm0, %v5343_v1  ;;  %v5315_v13 = vld [vmem:[%s6275_s3 + $0x2f8] sm:$0xff]  }
 0x234   : > { %5033 = vmatprep.subr.bf16.mxu1 %v5343_v1  ;;  %5106 = vmatmul.mubr.msk.bf16.vlgmr.msra.gmra.mxu0 %vm619_vm3, %v3267_v5 }
 0x235   : > { %5129 = vmatprep.mubr.msk.bf16.mxu0 %vm5344_vm0, %v5343_v1  ;;  %5122 = vmatpush3.bf16.msra.mxu0 %v5306_v6 }
 0x236   : > { %5123 = vmatprep.subr.bf16.mxu0 %v5343_v1 }
 0x237   : > { %5034 = vmatpush3.bf16.msra.mxu1 %v5283_v18  ;;  %v4601_v18 = vld.sshfl [vmem:[#allocation2 + $0x178] sm:$0x2 pattern:$0x75316420] }
 0x238   : > { %5035 = vmatprep.subr.bf16.mxu1 %v5343_v1 }
 0x239   : > { %5124 = vmatpush3.bf16.msra.mxu0 %v5308_v7 }
 0x23a   : > { %5125 = vmatprep.subr.bf16.mxu0 %v5343_v1 }
 0x23b   : > { %5036 = vmatpush3.bf16.msra.mxu1 %v5285_v21  ;;  %v3648_v21 = vrot.slane %v4601_v18, %v5549_v44 }
 0x23c   : > { %5037 = vmatprep.subr.bf16.mxu1 %v5343_v1 }
 0x23d   : > { %5126 = vmatpush3.bf16.msra.mxu0 %v5310_v4  ;;  %v4611_v26 = vcombine.high %v3648_v21, %v3663_v22 }
 0x23e   : > { %5127 = vmatprep.subr.bf16.mxu0 %v5343_v1 }
 0x23f   : > { %5038 = vmatpush3.bf16.msra.mxu1 %v5287_v25  ;;  %v5321_v25 = vld [vmem:[%s6275_s3 + $0x2e0] sm:$0xff]   ;;  %v3681_v28 = vrot.slane %v4611_v26, %v5549_v44 }
 0x240   : > { %5055 = vmatprep.subr.bf16.mxu1 %v5343_v1 }
 0x241   : > { %5128 = vmatpush3.bf16.msra.mxu0 %v5312_v10 }
 0x242   : > { %5040 = vmatmul.mubr.msk.bf16.vlgmr.msra.gmra.mxu1 %vm619_vm3, %v2606_v27  ;;  %5145 = vmatprep.subr.bf16.mxu0 %v5343_v1 }
 0x243   : > { %5056 = vmatpush3.bf16.msra.mxu1 %v5289_v31  ;;  %5063 = vmatprep.mubr.msk.bf16.mxu1 %vm5344_vm0, %v5343_v1  ;;  %v3688_v31 = vrot.slane %v3681_v28, %v5549_v44 }
 0x244   : > { %5057 = vmatprep.subr.bf16.mxu1 %v5343_v1  ;;  %5130 = vmatmul.mubr.msk.bf16.vlgmr.msra.gmra.mxu0 %vm619_vm3, %v3488_v12 }
 0x245   : > { %5146 = vmatpush3.bf16.msra.mxu0 %v5315_v13  ;;  %5153 = vmatprep.mubr.msk.bf16.mxu0 %vm5344_vm0, %v5343_v1  ;;  %v4528_v13 = vld [vmem:[%s6276_s4 + $0x1] ss:$0 sm:$0xff] }
 0x246   : > { %5147 = vmatprep.subr.bf16.mxu0 %v5343_v1 }
 0x247   : > { %5058 = vmatpush3.bf16.msra.mxu1 %v5291_v33 }
 0x248   : > { %5059 = vmatprep.subr.bf16.mxu1 %v5343_v1 }
 0x249   : > { %5148 = vmatpush3.bf16.msra.mxu0 %v5317_v15 }
 0x24a   : > { %5149 = vmatprep.subr.bf16.mxu0 %v5343_v1 }
 0x24b   : > { %5060 = vmatpush3.bf16.msra.mxu1 %v5293_v39 }
 0x24c   : > { %5061 = vmatprep.subr.bf16.mxu1 %v5343_v1 }
 0x24d   : > { %5150 = vmatpush3.bf16.msra.mxu0 %v5319_v17  ;;  %v4539_v17 = vld.sshfl [vmem:[#allocation2 + $0x8] sm:$0x10 pattern:$0x75316420] }
 0x24e   : > { %5151 = vmatprep.subr.bf16.mxu0 %v5343_v1 }
 0x24f   : > { %5062 = vmatpush3.bf16.msra.mxu1 %v5295_v43  ;;  %v4630_v43 = vld.sshfl [vmem:[#allocation2 + $0x2d8] sm:$0x10 pattern:$0x75316420] }
 0x250   : > { %5079 = vmatprep.subr.bf16.mxu1 %v5343_v1  ;;  %v3865_v38 = vcombine.high %v4630_v43, %v4630_v43 }
 0x251   : > { %5152 = vmatpush3.bf16.msra.mxu0 %v5321_v25 }
 0x252   : > { %5064 = vmatmul.mubr.msk.bf16.vlgmr.msra.gmra.mxu1 %vm619_vm3, %v2861_v48  ;;  %5169 = vmatprep.subr.bf16.mxu0 %v5343_v1  ;;  %v4631_v48 = vld.sshfl [vmem:[#allocation2 + $0x2ec] sm:$0x10 pattern:$0x75316420]  ;;  %v3872_v45 = vrot.slane %v3865_v38, %v5549_v44  ;;  %v5307_v38 = vld [vmem:[%s6275_s3 + $0x290] sm:$0xff]  }
 0x253   : > { %5081 = vmatprep.mubr.msk.bf16.mxu1 %vm5344_vm0, %v5343_v1  ;;  %5080 = vmatpush3.bf16.msra.mxu1 %v3072_v60  ;;  %v3880_v42 = vcombine.high %v4631_v48, %v4631_v48 }
 0x254   : > { %5085 = vmatprep.subr.bf16.mxu1 %v5343_v1  ;;  %5154 = vmatmul.mubr.msk.bf16.vlgmr.msra.gmra.mxu0 %vm619_vm3, %v3688_v31 }
 0x255   : > { %5170 = vmatpush3.bf16.msra.mxu0 %v5323_v32  ;;  %5177 = vmatprep.mubr.msk.bf16.mxu0 %vm5344_vm0, %v5343_v1  ;;  %v3887_v49 = vrot.slane %v3880_v42, %v5549_v44  ;;  %v5302_v32 = vld [vmem:[%s6275_s3 + $0x260] sm:$0xff]  }
 0x256   : > { %5171 = vmatprep.subr.bf16.mxu0 %v5343_v1 }
 0x257   : > { %v3897_v51 = vcombine.low %v3872_v45, %v3887_v49  ;;  %v5311_v45 = vld [vmem:[%s6275_s3 + $0x280] sm:$0xff]   ;;  %v5313_v49 = vld [vmem:[%s6275_s3 + $0x2d8] sm:$0xff]  }
 0x259   : > { %5172 = vmatpush3.bf16.msra.mxu0 %v5325_v34  ;;  %v3904_v19 = vrot.slane %v3897_v51, %v5549_v44  ;;  %v5305_v34 = vld [vmem:[%s6275_s3 + $0x298] sm:$0xff]   ;;  %v5318_v51 = vld [vmem:[%s6275_s3 + $0x2c8] sm:$0xff]  }
 0x25a   : > { %5173 = vmatprep.subr.bf16.mxu0 %v5343_v1 }
 0x25b   : > { %v3911_v53 = vrot.slane %v3904_v19, %v5549_v44  ;;  %v5320_v19 = vld [vmem:[%s6275_s3 + $0x2c0] sm:$0xff]  }
 0x25d   : > { %5174 = vmatpush3.bf16.msra.mxu0 %v5327_v41  ;;  %v5309_v41 = vld [vmem:[%s6275_s3 + $0x288] sm:$0xff]  }
 0x25e   : > { %5175 = vmatprep.subr.bf16.mxu0 %v5343_v1 }
 0x261   : > { %5176 = vmatpush3.bf16.msra.mxu0 %v5329_v50  ;;  %v5316_v50 = vld [vmem:[%s6275_s3 + $0x2d0] sm:$0xff]  }
 0x262   : > { %5193 = vmatprep.subr.bf16.mxu0 %v5343_v1 }
 0x264   : > { %5178 = vmatmul.mubr.msk.bf16.vlgmr.msra.gmra.mxu0 %vm619_vm3, %v3911_v53  ;;  %v5322_v53 = vld [vmem:[%s6275_s3 + $0x318] sm:$0xff]  }
 0x265   : > { %5195 = vmatprep.mubr.msk.bf16.mxu0 %vm5344_vm0, %v5343_v1 }
 0x2ca   : > { %v1912_v24 = vpop.f32.mrf.mxu1 }
 0x2cc   : > { %v4963_v27 = vpop.f32.mrf.mxu1 }
 0x2ce   : > { %v1915_v29 = vpop.f32.mrf.mxu1 }
 0x2cf   : > { %v5300_v29 = vld [vmem:[%s6275_s3 + $0x268] sm:$0xff]  }
 0x2d0   : > { %v4964_v35 = vpop.f32.mrf.mxu1 }
 0x2d2   : > { %v1958_v33 = vpop.f32.mrf.mxu1 }
 0x2d3   : > { %v6113_v39 = vadd.f32 %v1958_v33, %v1912_v24  ;;  %v3137_v24 = vcombine.high %v4539_v17, %v4539_v17  ;;  %v4559_v33 = vld.sshfl [vmem:[#allocation2 + $0x10] sm:$0x2 pattern:$0x75316420] }
 0x2d4   : > { %v4969_v36 = vpop.f32.mrf.mxu1  ;;  %v3352_v43 = vrot.slane %v4559_v33, %v5549_v44 }
 0x2d5   : > { %v3144_v26 = vrot.slane %v3137_v24, %v5549_v44  ;;  %v4560_v36 = vld.sshfl [vmem:[#allocation2 + $0x24] sm:$0x2 pattern:$0x75316420] }
 0x2d6   : > { %v1961_v40 = vpop.f32.mrf.mxu1  ;;  %v3367_v48 = vrot.slane %v4560_v36, %v5549_v44 }
 0x2d8   : > { %v4970_v46 = vpop.f32.mrf.mxu1  ;;  %v4569_v40 = vcombine.high %v3352_v43, %v3367_v48 }
 0x2da   : > { %v3385_v42 = vrot.slane %v4569_v40, %v5549_v44 }
 0x2dc   : > { %v3392_v46 = vrot.slane %v3385_v42, %v5549_v44 }
 0x2e2   : > { %v2211_v54 = vpop.f32.mrf.mxu1 }
 0x2e3   : > { %v2212_v63 = vadd.f32 %v2211_v54, %v6016_v37  ;;  %v5324_v54 = vld [vmem:[%s6275_s3 + $0x310] sm:$0xff]  }
 0x2e4   : > { %v4993_v56 = vpop.f32.mrf.mxu1 }
 0x2e5   : > { %v2344_v3 = vadd.f32 %v6022_v14, %v2212_v63  ;;  %v4540_v14 = vld.sshfl [vmem:[#allocation2 + $0x1c] sm:$0x10 pattern:$0x75316420] }
 0x2e6   : > { %v2214_v57 = vpop.f32.mrf.mxu1  ;;  %v5330_v56 = vld [vmem:[#allocation2 + $0x2d0] ss:$20 sps:$4 sm:$0x11]  }
 0x2e7   : > { %v5326_v57 = vld [vmem:[%s6275_s3 + $0x308] sm:$0xff]  }
 0x2e8   : > { %v4994_v58 = vpop.f32.mrf.mxu1 }
 0x2e9   : > { %v5328_v58 = vld [vmem:[%s6275_s3 + $0x300] sm:$0xff]  }
 0x2f2   : > { %v2466_v59 = vpop.f32.mrf.mxu1 }
 0x2f3   : > { %v2472_v6 = vadd.f32 %v2466_v59, %v2344_v3 }
 0x2f4   : > { %v5017_v60 = vpop.f32.mrf.mxu1 }
 0x2f5   : > { %v2546_v4 = vadd.f32 %v6024_v47, %v2472_v6  ;;  %v3152_v47 = vcombine.high %v4540_v14, %v4540_v14  ;;  %v4645_v60 = vld.sshfl [vmem:[#allocation2 + $0x2e0] sm:$0x2 pattern:$0x75316420] }
 0x2f6   : > { %v2469_v61 = vpop.f32.mrf.mxu1  ;;  %v3997_v63 = vrot.slane %v4645_v60, %v5549_v44 }
 0x2f7   : > { %v3159_v27 = vrot.slane %v3152_v47, %v5549_v44  ;;  %v5331_v61 = vld [vmem:[%s6275_s3 + $0x358] sm:$0xff]  }
 0x2f8   : > { %v5018_v62 = vpop.f32.mrf.mxu1 }
 0x2f9   : > { %v3169_v28 = vcombine.low %v3144_v26, %v3159_v27  ;;  %v4646_v62 = vld.sshfl [vmem:[#allocation2 + $0x2f4] sm:$0x2 pattern:$0x75316420] }
 0x2fb   : > { %v3176_v31 = vrot.slane %v3169_v28, %v5549_v44 }
 0x2fd   : > { %v3183_v35 = vrot.slane %v3176_v31, %v5549_v44 }
 0x302   : > { %v2668_v0 = vpop.f32.mrf.mxu1 }
 0x303   : > { %v2674_v9 = vadd.f32 %v2668_v0, %v2546_v4  ;;  %v4012_v0 = vrot.slane %v4646_v62, %v5549_v44 }
 0x304   : > { %v5041_v2 = vpop.f32.mrf.mxu1 }
 0x305   : > { %v2803_v10 = vadd.f32 %v6026_v52, %v2674_v9  ;;  %v5296_v52 = vld [vmem:[%s6275_s3 + $0x278] sm:$0xff]   ;;  %v5332_v2 = vld [vmem:[%s6275_s3 + $0x350] sm:$0xff]   ;;  %v4655_v3 = vcombine.high %v3997_v63, %v4012_v0  ;;  %v3329_v9 = vpop.f32.mrf.mxu0 }
 0x306   : > { %v2671_v5 = vpop.f32.mrf.mxu1 }
 0x307   : > { %v5333_v5 = vld [vmem:[%s6275_s3 + $0x348] sm:$0xff]   ;;  %v4030_v6 = vrot.slane %v4655_v3, %v5549_v44 }
 0x308   : > { %v5042_v7 = vpop.f32.mrf.mxu1 }
 0x309   : > { %v5334_v7 = vld [vmem:[%s6275_s3 + $0x340] sm:$0xff]   ;;  %v4037_v4 = vrot.slane %v4030_v6, %v5549_v44 }
 0x312   : > { %v2923_v11 = vpop.f32.mrf.mxu1 }
 0x313   : > { %v2929_v12 = vadd.f32 %v2923_v11, %v2803_v10  ;;  %v5107_v10 = vpop.f32.mrf.mxu0 }
 0x314   : > { %v5065_v15 = vpop.f32.mrf.mxu1 }
 0x315   : > { %v3057_v37 = vadd.f32 %v6028_v55, %v2929_v12  ;;  %v5298_v55 = vld [vmem:[%s6275_s3 + $0x270] sm:$0xff]   ;;  %v3332_v11 = vpop.f32.mrf.mxu0 }
 0x316   : > { %v2926_v18 = vpop.f32.mrf.mxu1 }
 0x317   : > { %v3063_v20 = vadd.f32 %v4528_v13, %v3057_v37  ;;  %v5108_v12 = vpop.f32.mrf.mxu0 }
 0x318   : > { %v5066_v21 = vpop.f32.mrf.mxu1 }
 0x319   : > { %v3064_v22 = vmax.f32 %v3063_v20, 0.0  ;;  %v3550_v13 = vpop.f32.mrf.mxu0 }
 0x31b   : > { %v3065_v25 = vpack.c.bf16 %v3064_v22, %v3064_v22  ;;  %v5131_v15 = vpop.f32.mrf.mxu0 }
 0x31d   : > { %5082 = vmatmul.mubr.msk.bf16.vlgmr.msra.gmra.mxu1 %vm668_vm5, %v3065_v25  ;;  %v3553_v37 = vpop.f32.mrf.mxu0 }
 0x31e   : > { %5086 = vmatpush3.bf16.msra.mxu1 %v5296_v52  ;;  %5093 = vmatprep.mubr.msk.bf16.mxu1 %vm5344_vm0, %v5343_v1 }
 0x31f   : > { %5087 = vmatprep.subr.bf16.mxu1 %v5343_v1  ;;  %v5132_v17 = vpop.f32.mrf.mxu0 }
 0x321   : > { %v3750_v18 = vpop.f32.mrf.mxu0 }
 0x322   : > { %5088 = vmatpush3.bf16.msra.mxu1 %v5298_v55 }
 0x323   : > { %5089 = vmatprep.subr.bf16.mxu1 %v5343_v1  ;;  %v5155_v14 = vpop.f32.mrf.mxu0 }
 0x325   : > { %v3753_v20 = vpop.f32.mrf.mxu0 }
 0x326   : > { %5090 = vmatpush3.bf16.msra.mxu1 %v5300_v29 }
 0x327   : > { %5091 = vmatprep.subr.bf16.mxu1 %v5343_v1  ;;  %v5156_v21 = vpop.f32.mrf.mxu0 }
 0x329   : > { %v3973_v22 = vpop.f32.mrf.mxu0 }
 0x32a   : > { %5092 = vmatpush3.bf16.msra.mxu1 %v5302_v32 }
 0x32b   : > { %5109 = vmatprep.subr.bf16.mxu1 %v5343_v1  ;;  %v5179_v24 = vpop.f32.mrf.mxu0 }
 0x32d   : > { %5094 = vmatmul.mubr.msk.bf16.vlgmr.msra.gmra.mxu1 %vm619_vm3, %v3183_v35 }
 0x32e   : > { %5110 = vmatpush3.bf16.msra.mxu1 %v5305_v34  ;;  %5117 = vmatprep.mubr.msk.bf16.mxu1 %vm5344_vm0, %v5343_v1 }
 0x32f   : > { %5111 = vmatprep.subr.bf16.mxu1 %v5343_v1 }
 0x332   : > { %5112 = vmatpush3.bf16.msra.mxu1 %v5307_v38 }
 0x333   : > { %5113 = vmatprep.subr.bf16.mxu1 %v5343_v1 }
 0x336   : > { %5114 = vmatpush3.bf16.msra.mxu1 %v5309_v41 }
 0x337   : > { %5115 = vmatprep.subr.bf16.mxu1 %v5343_v1 }
 0x33a   : > { %5116 = vmatpush3.bf16.msra.mxu1 %v5311_v45 }
 0x33b   : > { %5133 = vmatprep.subr.bf16.mxu1 %v5343_v1 }
 0x33d   : > { %5118 = vmatmul.mubr.msk.bf16.vlgmr.msra.gmra.mxu1 %vm619_vm3, %v3392_v46 }
 0x33e   : > { %5134 = vmatpush3.bf16.msra.mxu1 %v5313_v49  ;;  %5141 = vmatprep.mubr.msk.bf16.mxu1 %vm5344_vm0, %v5343_v1 }
 0x33f   : > { %5135 = vmatprep.subr.bf16.mxu1 %v5343_v1 }
 0x342   : > { %5136 = vmatpush3.bf16.msra.mxu1 %v5316_v50 }
 0x343   : > { %5137 = vmatprep.subr.bf16.mxu1 %v5343_v1 }
 0x346   : > { %5138 = vmatpush3.bf16.msra.mxu1 %v5318_v51 }
 0x347   : > { %5139 = vmatprep.subr.bf16.mxu1 %v5343_v1 }
 0x34a   : > { %5140 = vmatpush3.bf16.msra.mxu1 %v5320_v19 }
 0x34b   : > { %5157 = vmatprep.subr.bf16.mxu1 %v5343_v1 }
 0x34d   : > { %5142 = vmatmul.mubr.msk.bf16.vlgmr.msra.gmra.mxu1 %vm619_vm3, %v5611_v16  ;;  %v3778_v16 = vrot.slane %v5330_v56, %v5549_v44 }
 0x34e   : > { %5158 = vmatpush3.bf16.msra.mxu1 %v5322_v53  ;;  %5165 = vmatprep.mubr.msk.bf16.mxu1 %vm5344_vm0, %v5343_v1 }
 0x34f   : > { %5159 = vmatprep.subr.bf16.mxu1 %v5343_v1  ;;  %v3785_v59 = vrot.slane %v3778_v16, %v5549_v44  ;;  %v4662_v44 = vld [vmem:[%s6279_s7 + $0xc] sm:$0xf]  ;;  %v4661_v16 = vld [vmem:[%s6276_s4 + $0x2] ss:$0 sm:$0xff] }
 0x350   : > { %v4120_v52 = vsel %vm672_vm4, %v4662_v44, 0 }
 0x351   : > { %5194 = vmatpush3.bf16.msra.mxu0 %v4120_v52 }
 0x352   : > { %5160 = vmatpush3.bf16.msra.mxu1 %v5324_v54 }
 0x353   : > { %5161 = vmatprep.subr.bf16.mxu1 %v5343_v1 }
 0x356   : > { %5162 = vmatpush3.bf16.msra.mxu1 %v5326_v57 }
 0x357   : > { %5163 = vmatprep.subr.bf16.mxu1 %v5343_v1 }
 0x35a   : > { %5164 = vmatpush3.bf16.msra.mxu1 %v5328_v58 }
 0x35b   : > { %5181 = vmatprep.subr.bf16.mxu1 %v5343_v1 }
 0x35d   : > { %5166 = vmatmul.mubr.msk.bf16.vlgmr.msra.gmra.mxu1 %vm619_vm3, %v3785_v59 }
 0x35e   : > { %5182 = vmatpush3.bf16.msra.mxu1 %v5331_v61  ;;  %5189 = vmatprep.mubr.msk.bf16.mxu1 %vm5344_vm0, %v5343_v1 }
 0x35f   : > { %5183 = vmatprep.subr.bf16.mxu1 %v5343_v1 }
 0x362   : > { %5184 = vmatpush3.bf16.msra.mxu1 %v5332_v2  ;;  %v664_v2 = vld [vmem:[%s6280_s8] sm:$0x1] }
 0x363   : > { %5185 = vmatprep.subr.bf16.mxu1 %v5343_v1  ;;  %v716_v3 = vadd.f32 %v5857_v30, %v664_v2 }
 0x366   : > { %5186 = vmatpush3.bf16.msra.mxu1 %v5333_v5  ;;  %v4166_v5 = vsub.s32 0, %v5506_v8 }
 0x367   : > { %5187 = vmatprep.subr.bf16.mxu1 %v5343_v1  ;;  %v3976_v1 = vpop.f32.mrf.mxu0 }
 0x369   : > { %v5180_v47 = vpop.f32.mrf.mxu0 }
 0x36a   : > { %5188 = vmatpush3.bf16.msra.mxu1 %v5334_v7  ;;  %v4167_v7 = vrot.slane %v716_v3, %v4166_v5 }
 0x36d   : > { %5190 = vmatmul.mubr.msk.bf16.vlgmr.msra.gmra.mxu1 %vm619_vm3, %v4037_v4 }
 0x3dd   : > { %v3108_v25 = vpop.f32.mrf.mxu1 }
 0x3de   : > { %v3114_v26 = vadd.f32 %v3108_v25, %v6113_v39 }
 0x3df   : > { %v5083_v27 = vpop.f32.mrf.mxu1 }
 0x3e1   : > { %v3111_v55 = vpop.f32.mrf.mxu1 }
 0x3e3   : > { %v5084_v28 = vpop.f32.mrf.mxu1 }
 0x3ed   : > { %v3245_v29 = vpop.f32.mrf.mxu1 }
 0x3ee   : > { %v3330_v42 = vadd.f32 %v3329_v9, %v3245_v29 }
 0x3ef   : > { %v5095_v31 = vpop.f32.mrf.mxu1 }
 0x3f1   : > { %v3248_v32 = vpop.f32.mrf.mxu1 }
 0x3f3   : > { %v5096_v35 = vpop.f32.mrf.mxu1 }
 0x3fd   : > { %v3454_v33 = vpop.f32.mrf.mxu1 }
 0x3fe   : > { %v3460_v45 = vadd.f32 %v3454_v33, %v3330_v42 }
 0x3ff   : > { %v5119_v34 = vpop.f32.mrf.mxu1 }
 0x400   : > { %v3556_v39 = vadd.f32 %v3550_v13, %v3460_v45 }
 0x401   : > { %v3457_v36 = vpop.f32.mrf.mxu1 }
 0x403   : > { %v5120_v43 = vpop.f32.mrf.mxu1 }
 0x40d   : > { %v3624_v48 = vpop.f32.mrf.mxu1 }
 0x40e   : > { %v3630_v51 = vadd.f32 %v3624_v48, %v3556_v39 }
 0x40f   : > { %v5143_v38 = vpop.f32.mrf.mxu1 }
 0x410   : > { %v3756_v53 = vadd.f32 %v3750_v18, %v3630_v51 }
 0x411   : > { %v3627_v40 = vpop.f32.mrf.mxu1 }
 0x413   : > { %v5144_v41 = vpop.f32.mrf.mxu1 }
 0x41d   : > { %v3847_v46 = vpop.f32.mrf.mxu1 }
 0x41e   : > { %v3853_v54 = vadd.f32 %v3847_v46, %v3756_v53 }
 0x41f   : > { %v5167_v49 = vpop.f32.mrf.mxu1 }
 0x420   : > { %v3979_v56 = vadd.f32 %v3973_v22, %v3853_v54 }
 0x421   : > { %v3850_v50 = vpop.f32.mrf.mxu1 }
 0x423   : > { %v5168_v19 = vpop.f32.mrf.mxu1 }
 0x42d   : > { %v4099_v57 = vpop.f32.mrf.mxu1 }
 0x42e   : > { %v4105_v58 = vadd.f32 %v4099_v57, %v3979_v56 }
 0x42f   : > { %v5191_v59 = vpop.f32.mrf.mxu1 }
 0x430   : > { %v4111_v60 = vadd.f32 %v4661_v16, %v4105_v58 }
 0x431   : > { %v4102_v61 = vpop.f32.mrf.mxu1 }
 0x432   : > { %v4112_v62 = vmax.f32 %v4111_v60, 0.0 }
 0x433   : > { %v5192_v63 = vpop.f32.mrf.mxu1 }
 0x434   : > { %v4113_v0 = vpack.c.bf16 %v4112_v62, %v4112_v62 }
 0x436   : > { %5196 = vmatmul.mubr.msk.bf16.vlgmr.msra.gmra.mxu0 %vm668_vm5, %v4113_v0 }
 0x4f6   : > { %v4156_v6 = vpop.f32.mrf.mxu0 }
 0x4f7   : > { %v4162_v4 = vadd.f32 %v4156_v6, %v3114_v26 }
 0x4f8   : > { %v5197_v9 = vpop.f32.mrf.mxu0 }
 0x4f9   : > { %v4169_v10 = vadd.f32 %v4167_v7, %v4162_v4 }
 0x4fa   : > { %v4159_v11 = vpop.f32.mrf.mxu0 }
 0x4fb   : > { %v4170_v12 = vmax.f32 %v4169_v10, 0.0 }
 0x4fc   : > { %v5198_v13 = vpop.f32.mrf.mxu0 }
 0x4fd   : > { %v4178_v15 = vrot.slane %v4170_v12, %v5525_v23 }
 0x4ff   : > { %v4179_v37 = vcombine.high %v4178_v15, %v4178_v15  ;;  %v4182_v17 = vpack.c.bf16 %v4178_v15, %v4178_v15 }
 0x501   : > { %v4183_v30 = vpack.c.bf16 %v4179_v37, %v4179_v37  ;;  %4184 = vst [vmem:[%s327_s19] sm:$0x1] %v4182_v17 }
 0x503   : > { %4185 = vst [vmem:[%s327_s19 + $0x1] sm:$0x1] %v4183_v30 }
 0x504 PF: > { %s19_s30 = sadd.s32 1, %s5341_s30  }
 0x505   : > { %p16_p4 = scmp.ge.s32.totalorder %s19_s30, 4  }
 0x507   :  { %18 = sbr.rel (!%p16_p4) target bundleno = 1 (0x1), region = 122 }

// kernel: deeplab3plus_forward.15
= control target key start
LH: loop header
LB: loop body
LE: loop exit
PB: predicated region body
PF: predicated region fallthrough
CT: control target
= control target key end

     0   :  { %s2359_s12 = smov 0   ;;  %s2361_s13 = smov 0   ;;  %s3013_s0 = inlined_call_operand.vmem [shape: bf16[2,10,10,32], index: 0, kind: input, shape index: {}]   ;;  %s3014_s1 = inlined_call_operand.vmem [shape: bf16[9,32,128], index: 1, kind: input, shape index: {}]   ;;  %s3015_s2 = inlined_call_operand.vmem [shape: f32[1,128], index: 2, kind: input, shape index: {}]   ;;  %s3016_s3 = inlined_call_operand.vmem [shape: bf16[2,8,8,128], index: 3, kind: output, shape index: {}]  }
   0x1   :  { %s2363_s14 = smov 0  }
   0x2 LB: > { %s25_s15 = sadd.s32 1, %s2333_s13  ;;  %p1885_p0 = scmp.ge.s32.totalorder %s2337_s14, 1  ;;  %s2337_s14 = sphi %s2363_s14, %s13_s14   ;;  %s2333_s13 = sphi %s2361_s13, %s3022_s13   ;;  %s2329_s12 = sphi %s2359_s12, %s3021_s12  }
   0x3   : > { %p27_p1 = scmp.ge.s32.totalorder %s25_s15, 2  ;;  %p151_p2 = scmp.lt.s32.totalorder %s2337_s14, 3 }
   0x5   : > { %s3024_s15 = smov (%p27_p1, %s25_s15), 0  ;;  %p152_p3 = pnand %p1885_p0, %p151_p2 }
   0x6   : > { %p179_p4 = scmp.lt.s32.totalorder (!%p152_p3), %s2329_s12, 1 }
   0x7   : > { %155 = sbr.rel (%p152_p3) target bundleno = 318 (0x13e), region = 32 }
   0xc   : > { %v2285_v0 = vld [vmem:[%s3014_s1 + $0x18] sm:$0xff]   ;;  %v2286_v1 = vld [vmem:[%s3014_s1 + $0x10] sm:$0xff]   ;;  %s3026_s12 = smov (!%p179_p4, %s2329_s12), 1  ;;  %v2388_v2 = vld [vmem:[%s3014_s1 + $0x8] sm:$0xff]   ;;  %vm219_vm0 = vsmask.f32 3328 }
   0xd   : > { %2256 = vmatprep.subr.bf16.mxu1 %v2285_v0  ;;  %2148 = vmatprep.subr.bf16.mxu0 %v2285_v0  ;;  %s2260_s22 = smul.u32 80, %s3026_s12  ;;  %v2394_v3 = vld [vmem:[%s3014_s1 + $0x28] sm:$0xff]   ;;  %vm220_vm1 = vsmask.f32 7440  ;;  %vm363_vm2 = vcmask 261120   ;;  %vm558_vm4 = vcmask 1042432  }
   0xe   : > { %2258 = vmatpush3.bf16.msra.mxu1 %v2285_v0  ;;  %2149 = vmatpush3.bf16.msra.mxu0 %v2285_v0  ;;  %vm2440_vm3 = vmor %vm219_vm0, %vm220_vm1  ;;  %vm559_vm5 = vcmask 1046532   ;;  %s2070_s8 = sshll.u32 %s3026_s12, 5 }
   0xf   : > { %2257 = vmatprep.subr.bf16.mxu1 %v2286_v1  ;;  %2150 = vmatprep.subr.bf16.mxu0 %v2286_v1  ;;  %s2399_s27 = scalar_lea.vmem %s3013_s0, %s2260_s22  ;;  %vm2503_vm6 = vmor %vm558_vm4, %vm559_vm5  ;;  %s192_s11 = scalar_lea.vmem %s3016_s3, %s2070_s8 }
  0x10   : > { %v2402_v4 = vld [vmem:[%s2399_s27] sm:$0xf]  ;;  %v2405_v5 = vld [vmem:[%s2399_s27 + $0x4] sm:$0x1]  ;;  %v2408_v6 = vld [vmem:[%s2399_s27 + $0x8] sm:$0xf] }
  0x11   : > { %v2411_v7 = vld [vmem:[%s2399_s27 + $0xc] sm:$0x1]  ;;  %v223_v8 = vshrl.u32 %v2402_v4, 16  ;;  %v226_v9 = vshll.u32 %v2402_v4, 16  ;;  %v232_v10 = vshll.u32 %v2405_v5, 16  ;;  %v237_v11 = vshrl.u32 %v2408_v6, 16 }
  0x12   : > { %2259 = vmatpush3.bf16.msra.mxu1 %v2286_v1  ;;  %2151 = vmatpush3.bf16.msra.mxu0 %v2286_v1  ;;  %v240_v12 = vshll.u32 %v2408_v6, 16  ;;  %v246_v13 = vshll.u32 %v2411_v7, 16  ;;  %v563_v14 = vrot.slane %v2405_v5, 5  ;;  %v567_v15 = vrot.slane %v2411_v7, 5  ;;  %v2424_v16 = vld [vmem:[%s2399_s27 + $0x20] sm:$0xf] }
  0x13   : > { %2160 = vmatprep.subr.bf16.mxu1 %v2388_v2  ;;  %2172 = vmatprep.subr.bf16.mxu0 %v2394_v3  ;;  %v225_v17 = vrot.slane %v223_v8, 4  ;;  %v228_v18 = vrot.slane %v226_v9, 5  ;;  %v234_v19 = vrot.slane %v232_v10, 5  ;;  %v239_v20 = vrot.slane %v237_v11, 4  ;;  %v2427_v21 = vld [vmem:[%s2399_s27 + $0x24] sm:$0x1] }
  0x14   : > { %v242_v22 = vrot.slane %v240_v12, 5  ;;  %v248_v23 = vrot.slane %v246_v13, 5  ;;  %v2430_v24 = vld [vmem:[%s2399_s27 + $0x28] sm:$0xf]  ;;  %v2433_v25 = vld [vmem:[%s2399_s27 + $0x2c] sm:$0x1]  ;;  %v1903_v12 = vcombine.low %v2402_v4, %v2408_v6 }
  0x15   : > { %v229_v26 = vor.u32 %v228_v18, %v225_v17  ;;  %v279_v27 = vshrl.u32 %v2424_v16, 16  ;;  %v282_v28 = vshll.u32 %v2424_v16, 16  ;;  %v288_v29 = vshll.u32 %v2427_v21, 16  ;;  %v2448_v35 = vld [vmem:[%s2399_s27 + $0x10] sm:$0xf] }
  0x16   : > { %v243_v31 = vor.u32 %v242_v22, %v239_v20  ;;  %v293_v32 = vshrl.u32 %v2430_v24, 16  ;;  %v296_v33 = vshll.u32 %v2430_v24, 16  ;;  %v302_v34 = vshll.u32 %v2433_v25, 16  ;;  %v2451_v40 = vld [vmem:[%s2399_s27 + $0x14] sm:$0x1] }
  0x17   : > { %v230_v36 = vrot.slane %v229_v26, 4  ;;  %v281_v37 = vrot.slane %v279_v27, 4  ;;  %v284_v38 = vrot.slane %v282_v28, 5  ;;  %v290_v39 = vrot.slane %v288_v29, 5  ;;  %v2454_v45 = vld [vmem:[%s2399_s27 + $0x18] sm:$0xf] }
  0x18   : > { %v244_v41 = vrot.slane %v243_v31, 4  ;;  %v295_v42 = vrot.slane %v293_v32, 4  ;;  %v298_v43 = vrot.slane %v296_v33, 5  ;;  %v304_v44 = vrot.slane %v302_v34, 5  ;;  %v2463_v52 = vld [vmem:[%s2399_s27 + $0x1c] sm:$0x1] }
  0x19   : > { %v235_v46 = vsel %vm2440_vm3, %v230_v36, %v234_v19  ;;  %v285_v47 = vor.u32 %v284_v38, %v281_v37  ;;  %v579_v48 = vrot.slane %v2427_v21, 5  ;;  %v583_v49 = vrot.slane %v2433_v25, 5  ;;  %v2468_v55 = vld [vmem:[%s2399_s27 + $0x30] sm:$0xf]  ;;  %v2473_v60 = vld [vmem:[%s2399_s27 + $0x34] sm:$0x1] }
  0x1a   : > { %v249_v50 = vsel %vm2440_vm3, %v244_v41, %v248_v23  ;;  %v299_v51 = vor.u32 %v298_v43, %v295_v42  ;;  %v251_v53 = vshrl.u32 %v2448_v35, 16  ;;  %v254_v54 = vshll.u32 %v2448_v35, 16  ;;  %v2477_v1 = vld [vmem:[%s2399_s27 + $0x38] sm:$0xf]  ;;  %v2484_v11 = vld [vmem:[%s2399_s27 + $0x3c] sm:$0x1] }
  0x1b   : > { %v1893_v56 = vcombine.low %v235_v46, %v249_v50  ;;  %v286_v57 = vrot.slane %v285_v47, 4  ;;  %v260_v58 = vshll.u32 %v2451_v40, 16  ;;  %v265_v59 = vshrl.u32 %v2454_v45, 16  ;;  %v2531_v7 = vld [vmem:[%s2399_s27 + $0x8] sm:$0xf] }
  0x1c   : > { %v300_v61 = vrot.slane %v299_v51, 4  ;;  %v253_v62 = vrot.slane %v251_v53, 4  ;;  %v256_v63 = vrot.slane %v254_v54, 5  ;;  %v268_v0 = vshll.u32 %v2454_v45, 16 }
  0x1d   : > { %2152 = vmatprep.mubr.msk.bf16.mxu0 %vm363_vm2, %v1893_v56  ;;  %v291_v8 = vsel %vm2440_vm3, %v286_v57, %v290_v39  ;;  %v267_v9 = vrot.slane %v265_v59, 4  ;;  %v274_v10 = vshll.u32 %v2463_v52, 16  ;;  %v262_v18 = vrot.slane %v260_v58, 5  ;;  %v2290_v56 = vld [vmem:[%s3014_s1 + $0x20] sm:$0xff]  }
  0x1e   : > { %v305_v13 = vsel %vm2440_vm3, %v300_v61, %v304_v44  ;;  %v257_v17 = vor.u32 %v256_v63, %v253_v62  ;;  %v270_v19 = vrot.slane %v268_v0, 5  ;;  %v571_v23 = vrot.slane %v2451_v40, 5 }
  0x1f   : > { %v1895_v20 = vcombine.low %v291_v8, %v305_v13  ;;  %v276_v22 = vrot.slane %v274_v10, 5  ;;  %v307_v26 = vshrl.u32 %v2468_v55, 16  ;;  %v310_v29 = vshll.u32 %v2468_v55, 16 }
  0x20   : > { %v258_v27 = vrot.slane %v257_v17, 4  ;;  %v271_v28 = vor.u32 %v270_v19, %v267_v9  ;;  %v316_v31 = vshll.u32 %v2473_v60, 16  ;;  %v321_v33 = vshrl.u32 %v2477_v1, 16  ;;  %v2289_v9 = vld [vmem:[%s3014_s1] sm:$0xff]  }
  0x21   : > { %2156 = vmatprep.mubr.msk.bf16.mxu1 %vm363_vm2, %v1895_v20  ;;  %v309_v32 = vrot.slane %v307_v26, 4  ;;  %v324_v34 = vshll.u32 %v2477_v1, 16  ;;  %v330_v36 = vshll.u32 %v2484_v11, 16  ;;  %v575_v39 = vrot.slane %v2463_v52, 5  ;;  %v2561_v26 = vld [vmem:[%s2399_s27 + $0xc] sm:$0x1] }
  0x22   : > { %v263_v37 = vsel %vm2440_vm3, %v258_v27, %v262_v18  ;;  %v272_v38 = vrot.slane %v271_v28, 4  ;;  %v312_v40 = vrot.slane %v310_v29, 5  ;;  %v318_v42 = vrot.slane %v316_v31, 5  ;;  %v2570_v29 = vld [vmem:[%s2399_s27 + $0x14] sm:$0x1] }
  0x23   : > { %v323_v43 = vrot.slane %v321_v33, 4  ;;  %v326_v44 = vrot.slane %v324_v34, 5  ;;  %v1913_v46 = vrot.slane %v2402_v4, 9  ;;  %v332_v51 = vrot.slane %v330_v36, 5  ;;  %v2573_v31 = vld [vmem:[%s2399_s27 + $0x18] sm:$0xf] }
  0x24   : > { %v277_v47 = vsel %vm2440_vm3, %v272_v38, %v276_v22  ;;  %v313_v50 = vor.u32 %v312_v40, %v309_v32  ;;  %v1914_v52 = vrot.slane %v2408_v6, 9  ;;  %v1915_v58 = vrot.slane %v2448_v35, 9  ;;  %v2586_v38 = vld [vmem:[%s2399_s27 + $0x20] sm:$0xf]  ;;  %v2292_v4 = vld [vmem:[%s3014_s1 + $0x38] sm:$0xff]  }
  0x25   : > { %v1894_v53 = vcombine.low %v263_v37, %v277_v47  ;;  %v327_v54 = vor.u32 %v326_v44, %v323_v43  ;;  %v564_v57 = vsel %vm2503_vm6, %v1913_v46, %v563_v14  ;;  %v1904_v62 = vcombine.low %v2448_v35, %v2454_v45  ;;  %v2611_v47 = vld [vmem:[%s2399_s27 + $0x24] sm:$0x1] }
  0x26   : > { %v314_v59 = vrot.slane %v313_v50, 4  ;;  %v568_v61 = vsel %vm2503_vm6, %v1914_v52, %v567_v15  ;;  %v1916_v63 = vrot.slane %v2454_v45, 9  ;;  %v1905_v14 = vcombine.low %v2424_v16, %v2430_v24 }
  0x27   : > { %2153 = vmatmul.mubr.msk.bf16.vlgmr.msra.gmra.mxu0 %vm363_vm2, %v1894_v53  ;;  %v328_v0 = vrot.slane %v327_v54, 4  ;;  %v1925_v5 = vcombine.low %v564_v57, %v568_v61  ;;  %v1917_v8 = vrot.slane %v2424_v16, 9  ;;  %v572_v10 = vsel %vm2503_vm6, %v1915_v58, %v571_v23  ;;  %v2558_v23 = vld [vmem:[%s2399_s27 + $0x10] sm:$0xf]  ;;  %v2618_v54 = vld [vmem:[%s2399_s27 + $0x28] sm:$0xf] }
  0x28   : > { %v319_v15 = vsel %vm2440_vm3, %v314_v59, %v318_v42  ;;  %2173 = vmatpush3.bf16.msra.mxu0 %v2394_v3  ;;  %v576_v13 = vsel %vm2503_vm6, %v1916_v63, %v575_v39  ;;  %v1918_v17 = vrot.slane %v2430_v24, 9  ;;  %v2294_v3 = vld [vmem:[%s3014_s1 + $0x48] sm:$0xff]   ;;  %v1906_v20 = vcombine.low %v2468_v55, %v2477_v1  ;;  %v2298_v39 = vld [vmem:[%s3014_s1 + $0x40] sm:$0xff]  }
  0x29   : > { %v333_v18 = vsel %vm2440_vm3, %v328_v0, %v332_v51  ;;  %2174 = vmatprep.subr.bf16.mxu0 %v2290_v56  ;;  %2176 = vmatprep.mubr.msk.bf16.mxu0 %vm363_vm2, %v1925_v5  ;;  %v580_v19 = vsel %vm2503_vm6, %v1917_v8, %v579_v48  ;;  %v1919_v22 = vrot.slane %v2468_v55, 9  ;;  %v587_v21 = vrot.slane %v2473_v60, 5  ;;  %v2629_v63 = vld [vmem:[%s3014_s1 + $0x68] sm:$0xff]   ;;  %v2306_v55 = vld [vmem:[%s3014_s1 + $0x60] sm:$0xff]  }
  0x2a   : > { %v1896_v27 = vcombine.low %v319_v15, %v333_v18  ;;  %v584_v28 = vsel %vm2503_vm6, %v1918_v17, %v583_v49  ;;  %v1920_v48 = vrot.slane %v2477_v1, 9  ;;  %v1926_v32 = vcombine.low %v572_v10, %v576_v13  ;;  %v2635_v10 = vld [vmem:[%s2399_s27 + $0x30] sm:$0xf] }
  0x2b   : > { %v1927_v33 = vcombine.low %v580_v19, %v584_v28  ;;  %v591_v34 = vrot.slane %v2484_v11, 5  ;;  %v850_v36 = vshrl.u32 %v2531_v7, 16  ;;  %v2580_v25 = vsel %vm2503_vm6, %v1919_v22, %v587_v21  ;;  %v2638_v19 = vld [vmem:[%s2399_s27 + $0x2c] sm:$0x1] }
  0x2c   : > { %2157 = vmatmul.mubr.msk.bf16.vlgmr.msra.gmra.mxu1 %vm363_vm2, %v1896_v27  ;;  %2175 = vmatpush3.bf16.msra.mxu0 %v2290_v56  ;;  %v853_v49 = vshll.u32 %v2531_v7, 16  ;;  %v864_v60 = vshrl.u32 %v2558_v23, 16  ;;  %v867_v37 = vshll.u32 %v2558_v23, 16  ;;  %v859_v42 = vshll.u32 %v2561_v26, 16  ;;  %v2296_v56 = vld [vmem:[%s3014_s1 + $0x30] sm:$0xff]  }
  0x2d   : > { %2161 = vmatpush3.bf16.msra.mxu1 %v2388_v2  ;;  %2164 = vmatprep.mubr.msk.bf16.mxu1 %vm363_vm2, %v1903_v12  ;;  %v2595_v11 = vsel %vm2503_vm6, %v1920_v48, %v591_v34  ;;  %v852_v40 = vrot.slane %v850_v36, 4  ;;  %v873_v43 = vshll.u32 %v2570_v29, 16  ;;  %v2603_v2 = vld [vmem:[%s2399_s27 + $0x1c] sm:$0x1]  ;;  %v1955_v6 = vcombine.low %v2531_v7, %v2558_v23  ;;  %v2657_v36 = vld [vmem:[%s2399_s27 + $0x34] sm:$0x1] }
  0x2e   : > { %2162 = vmatprep.subr.bf16.mxu1 %v2289_v9  ;;  %2196 = vmatprep.subr.bf16.mxu0 %v2294_v3  ;;  %v855_v12 = vrot.slane %v853_v49, 5  ;;  %v866_v44 = vrot.slane %v864_v60, 4  ;;  %v869_v46 = vrot.slane %v867_v37, 5  ;;  %v1928_v50 = vcombine.low %v2580_v25, %v2595_v11  ;;  %v2666_v49 = vld [vmem:[%s2399_s27 + $0x38] sm:$0xf] }
  0x2f   : > { %2177 = vmatmul.mubr.msk.bf16.vlgmr.msra.gmra.mxu0 %vm363_vm2, %v1926_v32  ;;  %v861_v51 = vrot.slane %v859_v42, 5  ;;  %v875_v52 = vrot.slane %v873_v43, 5  ;;  %v878_v53 = vshrl.u32 %v2573_v31, 16  ;;  %v881_v59 = vshll.u32 %v2573_v31, 16  ;;  %v2653_v32 = vld [vmem:[%s3014_s1 + $0x58] sm:$0xff]  }
  0x30   : > { %2197 = vmatpush3.bf16.msra.mxu0 %v2294_v3  ;;  %2180 = vmatprep.mubr.msk.bf16.mxu0 %vm363_vm2, %v1927_v33  ;;  %v856_v57 = vor.u32 %v855_v12, %v852_v40  ;;  %v870_v58 = vor.u32 %v869_v46, %v866_v44  ;;  %v892_v61 = vshrl.u32 %v2586_v38, 16  ;;  %v895_v0 = vshll.u32 %v2586_v38, 16  ;;  %v2674_v42 = vld [vmem:[%s2399_s27 + $0x40] sm:$0xf]  ;;  %v2682_v46 = vld [vmem:[%s2399_s27 + $0x3c] sm:$0x1] }
  0x31   : > { %2163 = vmatpush3.bf16.msra.mxu1 %v2289_v9  ;;  %2198 = vmatprep.subr.bf16.mxu0 %v2298_v39  ;;  %v880_v5 = vrot.slane %v878_v53, 4  ;;  %v887_v8 = vshll.u32 %v2603_v2, 16  ;;  %v901_v15 = vshll.u32 %v2611_v47, 16  ;;  %v883_v18 = vrot.slane %v881_v59, 5 }
  0x32   : > { %2184 = vmatprep.subr.bf16.mxu1 %v2292_v4  ;;  %v857_v13 = vrot.slane %v856_v57, 4  ;;  %v871_v17 = vrot.slane %v870_v58, 4  ;;  %v894_v3 = vrot.slane %v892_v61, 4  ;;  %v1956_v9 = vcombine.low %v2573_v31, %v2586_v38  ;;  %v2688_v57 = vld [vmem:[%s2399_s27 + $0x44] sm:$0x1] }
  0x33   : > { %v889_v22 = vrot.slane %v887_v8, 5  ;;  %v897_v27 = vrot.slane %v895_v0, 5  ;;  %v903_v28 = vrot.slane %v901_v15, 5  ;;  %v884_v33 = vor.u32 %v883_v18, %v880_v5 }
  0x34   : > { %2165 = vmatmul.mubr.msk.bf16.vlgmr.msra.gmra.mxu1 %vm363_vm2, %v1904_v62  ;;  %2199 = vmatpush3.bf16.msra.mxu0 %v2298_v39  ;;  %v862_v21 = vsel %vm2440_vm3, %v857_v13, %v861_v51  ;;  %v876_v48 = vsel %vm2440_vm3, %v871_v17, %v875_v52  ;;  %v906_v34 = vshrl.u32 %v2618_v54, 16  ;;  %v909_v62 = vshll.u32 %v2618_v54, 16 }
  0x35   : > { %2185 = vmatpush3.bf16.msra.mxu1 %v2292_v4  ;;  %2168 = vmatprep.mubr.msk.bf16.mxu1 %vm363_vm2, %v1905_v14  ;;  %v1969_v35 = vcombine.low %v862_v21, %v876_v48  ;;  %v898_v45 = vor.u32 %v897_v27, %v894_v3  ;;  %v920_v25 = vshrl.u32 %v2635_v10, 16  ;;  %v885_v60 = vrot.slane %v884_v33, 4 }
  0x36   : > { %2186 = vmatprep.subr.bf16.mxu1 %v2296_v56  ;;  %2220 = vmatprep.subr.bf16.mxu0 %v2629_v63  ;;  %v923_v37 = vshll.u32 %v2635_v10, 16  ;;  %v908_v11 = vrot.slane %v906_v34, 4  ;;  %v915_v16 = vshll.u32 %v2638_v19, 16  ;;  %v911_v14 = vrot.slane %v909_v62, 5 }
  0x37   : > { %2181 = vmatmul.mubr.msk.bf16.gmra.mxu0 %vm363_vm2, %v1928_v50  ;;  %v899_v24 = vrot.slane %v898_v45, 4  ;;  %v922_v39 = vrot.slane %v920_v25, 4  ;;  %v929_v40 = vshll.u32 %v2657_v36, 16  ;;  %v890_v43 = vsel %vm2440_vm3, %v885_v60, %v889_v22  ;;  %v2701_v22 = vld [vmem:[%s2399_s27 + $0x10] sm:$0xf] }
  0x38   : > { %2200 = vmatprep.mubr.msk.bf16.mxu0 %vm363_vm2, %v1969_v35  ;;  %v1957_v4 = vcombine.low %v2618_v54, %v2635_v10  ;;  %v917_v12 = vrot.slane %v915_v16, 5  ;;  %v925_v44 = vrot.slane %v923_v37, 5  ;;  %v912_v51 = vor.u32 %v911_v14, %v908_v11  ;;  %v2732_v11 = vld [vmem:[%s2399_s27 + $0x20] sm:$0xf]  ;;  %v2304_v14 = vld [vmem:[%s3014_s1 + $0x50] sm:$0xff]  }
  0x39   : > { %2187 = vmatpush3.bf16.msra.mxu1 %v2296_v56  ;;  %v904_v50 = vsel %vm2440_vm3, %v899_v24, %v903_v28  ;;  %v931_v52 = vrot.slane %v929_v40, 5  ;;  %v934_v53 = vshrl.u32 %v2666_v49, 16  ;;  %v937_v61 = vshll.u32 %v2666_v49, 16  ;;  %v2742_v24 = vld [vmem:[%s2399_s27 + $0x28] sm:$0xf] }
  0x3a   : > { %2208 = vmatprep.subr.bf16.mxu1 %v2653_v32  ;;  %v1970_v58 = vcombine.low %v890_v43, %v904_v50  ;;  %v926_v59 = vor.u32 %v925_v44, %v922_v39  ;;  %v948_v0 = vshrl.u32 %v2674_v42, 16  ;;  %v913_v5 = vrot.slane %v912_v51, 4  ;;  %v2756_v44 = vld [vmem:[%s3014_s1 + $0x88] sm:$0xff]  }
  0x3b   : > { %v951_v56 = vshll.u32 %v2674_v42, 16  ;;  %v936_v8 = vrot.slane %v934_v53, 4  ;;  %v943_v15 = vshll.u32 %v2682_v46, 16  ;;  %v939_v17 = vrot.slane %v937_v61, 5 }
  0x3c   : > { %2169 = vmatmul.mubr.msk.bf16.gmra.mxu1 %vm363_vm2, %v1906_v20  ;;  %v927_v13 = vrot.slane %v926_v59, 4  ;;  %v950_v18 = vrot.slane %v948_v0, 4  ;;  %v957_v3 = vshll.u32 %v2688_v57, 16  ;;  %v918_v27 = vsel %vm2440_vm3, %v913_v5, %v917_v12  ;;  %v2714_v20 = vld [vmem:[%s2399_s27 + $0x18] sm:$0xf] }
  0x3d   : > { %2188 = vmatprep.mubr.msk.bf16.mxu1 %vm363_vm2, %v1955_v6  ;;  %v945_v28 = vrot.slane %v943_v15, 5  ;;  %v953_v21 = vrot.slane %v951_v56, 5  ;;  %v1979_v1 = vrot.slane %v2531_v7, 9  ;;  %v940_v33 = vor.u32 %v939_v17, %v936_v8  ;;  %v2772_v5 = vld [vmem:[%s2399_s27 + $0x30] sm:$0xf] }
  0x3e   : > { %v932_v48 = vsel %vm2440_vm3, %v927_v13, %v931_v52  ;;  %v959_v34 = vrot.slane %v957_v3, 5  ;;  %v1085_v6 = vrot.slane %v2561_v26, 5  ;;  %v1980_v62 = vrot.slane %v2558_v23, 9 }
  0x3f   : > { %2201 = vmatmul.mubr.msk.bf16.vlgmr.msra.gmra.mxu0 %vm363_vm2, %v1970_v58  ;;  %v1971_v35 = vcombine.low %v918_v27, %v932_v48  ;;  %v954_v45 = vor.u32 %v953_v21, %v950_v18  ;;  %v1089_v25 = vrot.slane %v2570_v29, 5  ;;  %v1958_v7 = vcombine.low %v2666_v49, %v2674_v42  ;;  %v2810_v27 = vld [vmem:[%s2399_s27 + $0x40] sm:$0xf] }
  0x40   : > { %2221 = vmatpush3.bf16.msra.mxu0 %v2629_v63  ;;  %v941_v60 = vrot.slane %v940_v33, 4  ;;  %v2727_v37 = vsel %vm2503_vm6, %v1979_v1, %v1085_v6  ;;  %v2021_v26 = vcombine.low %v2701_v22, %v2714_v20  ;;  %v1372_v63 = vshrl.u32 %v2701_v22, 16  ;;  %v2002_v33 = vld [vmem:[%s2399_s27 + $0x14] sm:$0x1] }
  0x41   : > { %2204 = vmatprep.mubr.msk.bf16.mxu0 %vm363_vm2, %v1971_v35  ;;  %v955_v23 = vrot.slane %v954_v45, 4  ;;  %2222 = vmatprep.subr.bf16.mxu0 %v2306_v55  ;;  %v2737_v29 = vsel %vm2503_vm6, %v1980_v62, %v1089_v25  ;;  %v1375_v16 = vshll.u32 %v2701_v22, 16  ;;  %v1386_v43 = vshrl.u32 %v2714_v20, 16  ;;  %v2004_v62 = vld [vmem:[%s2399_s27 + $0x1c] sm:$0x1] }
  0x42   : > { %v946_v39 = vsel %vm2440_vm3, %v941_v60, %v945_v28  ;;  %v1991_v40 = vcombine.low %v2727_v37, %v2737_v29  ;;  %v1981_v12 = vrot.slane %v2573_v31, 9  ;;  %v1093_v51 = vrot.slane %v2603_v2, 5  ;;  %v2775_v2 = vld [vmem:[%s2399_s27 + $0x38] sm:$0xf] }
  0x43   : > { %v960_v50 = vsel %vm2440_vm3, %v955_v23, %v959_v34  ;;  %v1982_v52 = vrot.slane %v2586_v38, 9  ;;  %v1097_v53 = vrot.slane %v2611_v47, 5  ;;  %v1389_v59 = vshll.u32 %v2714_v20, 16  ;;  %v2314_v23 = vld [vmem:[%s3014_s1 + $0x80] sm:$0xff]  }
  0x44   : > { %2189 = vmatmul.mubr.msk.bf16.vlgmr.msra.gmra.mxu1 %vm363_vm2, %v1956_v9  ;;  %v1972_v58 = vcombine.low %v946_v39, %v960_v50  ;;  %2223 = vmatpush3.bf16.msra.mxu0 %v2306_v55  ;;  %v2022_v61 = vcombine.low %v2732_v11, %v2742_v24  ;;  %v1400_v0 = vshrl.u32 %v2732_v11, 16  ;;  %v2784_v31 = vsel %vm2503_vm6, %v1981_v12, %v1093_v51  ;;  %v2006_v51 = vld [vmem:[%s2399_s27 + $0x24] sm:$0x1] }
  0x45   : > { %2209 = vmatpush3.bf16.msra.mxu1 %v2653_v32  ;;  %2192 = vmatprep.mubr.msk.bf16.mxu1 %vm363_vm2, %v1957_v4  ;;  %v2788_v38 = vsel %vm2503_vm6, %v1982_v52, %v1097_v53  ;;  %v1403_v47 = vshll.u32 %v2732_v11, 16  ;;  %v1414_v9 = vshrl.u32 %v2742_v24, 16  ;;  %v2795_v32 = vld [vmem:[%s3014_s1 + $0x78] sm:$0xff]   ;;  %v1417_v4 = vshll.u32 %v2742_v24, 16 }
  0x46   : > { %2210 = vmatprep.subr.bf16.mxu1 %v2304_v14  ;;  %2244 = vmatprep.subr.bf16.mxu0 %v2756_v44  ;;  %v1983_v56 = vrot.slane %v2618_v54, 9  ;;  %v1101_v8 = vrot.slane %v2638_v19, 5  ;;  %v1984_v15 = vrot.slane %v2635_v10, 9  ;;  %v1992_v13 = vcombine.low %v2784_v31, %v2788_v38  ;;  %v2813_v54 = vld [vmem:[%s2399_s27 + $0x48] sm:$0xf] }
  0x47   : > { %2205 = vmatmul.mubr.msk.bf16.gmra.mxu0 %vm363_vm2, %v1972_v58  ;;  %v1105_v17 = vrot.slane %v2657_v36, 5  ;;  %v2023_v18 = vcombine.low %v2772_v5, %v2775_v2  ;;  %v1428_v3 = vshrl.u32 %v2772_v5, 16  ;;  %v1431_v19 = vshll.u32 %v2772_v5, 16 }
  0x48   : > { %2224 = vmatprep.mubr.msk.bf16.mxu0 %vm363_vm2, %v2021_v26  ;;  %v2818_v10 = vsel %vm2503_vm6, %v1983_v56, %v1101_v8  ;;  %v1442_v36 = vshrl.u32 %v2775_v2, 16  ;;  %v1985_v28 = vrot.slane %v2666_v49, 9  ;;  %v1109_v55 = vrot.slane %v2682_v46, 5 }
  0x49   : > { %2211 = vmatpush3.bf16.msra.mxu1 %v2304_v14  ;;  %v2825_v21 = vsel %vm2503_vm6, %v1984_v15, %v1105_v17  ;;  %v1986_v1 = vrot.slane %v2674_v42, 9  ;;  %v1113_v48 = vrot.slane %v2688_v57, 5  ;;  %v1445_v6 = vshll.u32 %v2775_v2, 16  ;;  %v2312_v15 = vld [vmem:[%s3014_s1 + $0x70] sm:$0xff]  }
  0x4a   : > { %2232 = vmatprep.subr.bf16.mxu1 %v2795_v32  ;;  %v1993_v34 = vcombine.low %v2818_v10, %v2825_v21  ;;  %v2024_v35 = vcombine.low %v2810_v27, %v2813_v54  ;;  %v1456_v45 = vshrl.u32 %v2810_v27, 16  ;;  %v2841_v46 = vsel %vm2503_vm6, %v1985_v28, %v1109_v55  ;;  %v2010_v55 = vld [vmem:[%s2399_s27 + $0x34] sm:$0x1] }
  0x4b   : > { %v2845_v57 = vsel %vm2503_vm6, %v1986_v1, %v1113_v48  ;;  %v1459_v25 = vshll.u32 %v2810_v27, 16  ;;  %v1470_v60 = vshrl.u32 %v2813_v54, 16  ;;  %v1473_v26 = vshll.u32 %v2813_v54, 16 }
  0x4c   : > { %2193 = vmatmul.mubr.msk.bf16.gmra.mxu1 %vm363_vm2, %v1958_v7  ;;  %v1374_v14 = vrot.slane %v1372_v63, 4  ;;  %v1377_v39 = vrot.slane %v1375_v16, 5  ;;  %v1381_v12 = vshll.u32 %v2002_v33, 16  ;;  %v1388_v49 = vrot.slane %v1386_v43, 4 }
  0x4d   : > { %2212 = vmatprep.mubr.msk.bf16.mxu1 %vm363_vm2, %v1991_v40  ;;  %v1391_v42 = vrot.slane %v1389_v59, 5  ;;  %v1395_v7 = vshll.u32 %v2004_v62, 16  ;;  %v2045_v50 = vrot.slane %v2701_v22, 9  ;;  %v1607_v53 = vrot.slane %v2002_v33, 5  ;;  %v2008_v59 = vld [vmem:[%s2399_s27 + $0x2c] sm:$0x1] }
  0x4e   : > { %v1378_v52 = vor.u32 %v1377_v39, %v1374_v14  ;;  %v1383_v63 = vrot.slane %v1381_v12, 5  ;;  %v2046_v16 = vrot.slane %v2714_v20, 9  ;;  %v1611_v29 = vrot.slane %v2004_v62, 5 }
  0x4f   : > { %2225 = vmatmul.mubr.msk.bf16.vlgmr.msra.gmra.mxu0 %vm363_vm2, %v2022_v61  ;;  %v1392_v58 = vor.u32 %v1391_v42, %v1388_v49  ;;  %v1397_v37 = vrot.slane %v1395_v7, 5  ;;  %v1402_v40 = vrot.slane %v1400_v0, 4  ;;  %v1608_v22 = vsel %vm2503_vm6, %v2045_v50, %v1607_v53 }
  0x50   : > { %2245 = vmatpush3.bf16.msra.mxu0 %v2756_v44  ;;  %2228 = vmatprep.mubr.msk.bf16.mxu0 %vm363_vm2, %v2023_v18  ;;  %v1379_v43 = vrot.slane %v1378_v52, 4  ;;  %v1405_v20 = vrot.slane %v1403_v47, 5  ;;  %v1409_v61 = vshll.u32 %v2006_v51, 16  ;;  %v1612_v8 = vsel %vm2503_vm6, %v2046_v16, %v1611_v29  ;;  %v2014_v52 = vld [vmem:[%s2399_s27 + $0x44] sm:$0x1] }
  0x51   : > { %2246 = vmatprep.subr.bf16.mxu0 %v2314_v23  ;;  %v1393_v56 = vrot.slane %v1392_v58, 4  ;;  %v1416_v44 = vrot.slane %v1414_v9, 4  ;;  %v1419_v0 = vrot.slane %v1417_v4, 5  ;;  %v1994_v47 = vcombine.low %v2841_v46, %v2845_v57  ;;  %v2016_v29 = vld [vmem:[%s2399_s27 + $0x4c] sm:$0x1] }
  0x52   : > { %v1384_v17 = vsel %vm2440_vm3, %v1379_v43, %v1383_v63  ;;  %v1406_v18 = vor.u32 %v1405_v20, %v1402_v40  ;;  %v2893_v10 = vrot.slane %v1409_v61, 5  ;;  %v1423_v21 = vshll.u32 %v2008_v59, 16 }
  0x53   : > { %v1398_v28 = vsel %vm2440_vm3, %v1393_v56, %v1397_v37  ;;  %v1420_v9 = vor.u32 %v1419_v0, %v1416_v44  ;;  %v2047_v4 = vrot.slane %v2732_v11, 9  ;;  %v2057_v1 = vcombine.low %v1608_v22, %v1612_v8 }
  0x54   : > { %2213 = vmatmul.mubr.msk.bf16.vlgmr.msra.gmra.mxu1 %vm363_vm2, %v1992_v13  ;;  %2247 = vmatpush3.bf16.msra.mxu0 %v2314_v23  ;;  %v1407_v48 = vrot.slane %v1406_v18, 4  ;;  %v1615_v33 = vrot.slane %v2006_v51, 5  ;;  %v2048_v62 = vrot.slane %v2742_v24, 9  ;;  %v1425_v57 = vrot.slane %v1423_v21, 5  ;;  %v2012_v13 = vld [vmem:[%s2399_s27 + $0x3c] sm:$0x1] }
  0x55   : > { %2233 = vmatpush3.bf16.msra.mxu1 %v2795_v32  ;;  %2216 = vmatprep.mubr.msk.bf16.mxu1 %vm363_vm2, %v1993_v34  ;;  %v1421_v46 = vrot.slane %v1420_v9, 4  ;;  %v1619_v11 = vrot.slane %v2008_v59, 5  ;;  %v1430_v14 = vrot.slane %v1428_v3, 4  ;;  %v2035_v31 = vcombine.low %v1384_v17, %v1398_v28 }
  0x56   : > { %2234 = vmatprep.subr.bf16.mxu1 %v2312_v15  ;;  %v1616_v38 = vsel %vm2503_vm6, %v2047_v4, %v1615_v33  ;;  %v1433_v23 = vrot.slane %v1431_v19, 5  ;;  %v1437_v24 = vshll.u32 %v2010_v55, 16  ;;  %v1412_v32 = vsel %vm2440_vm3, %v1407_v48, %v2893_v10 }
  0x57   : > { %2229 = vmatmul.mubr.msk.bf16.gmra.mxu0 %vm363_vm2, %v2024_v35  ;;  %v1620_v3 = vsel %vm2503_vm6, %v2048_v62, %v1619_v11  ;;  %v1444_v34 = vrot.slane %v1442_v36, 4  ;;  %v1447_v19 = vrot.slane %v1445_v6, 5  ;;  %v1426_v39 = vsel %vm2440_vm3, %v1421_v46, %v1425_v57 }
  0x58   : > { %2248 = vmatprep.mubr.msk.bf16.mxu0 %vm363_vm2, %v2057_v1  ;;  %v2058_v12 = vcombine.low %v1616_v38, %v1620_v3  ;;  %v1434_v35 = vor.u32 %v1433_v23, %v1430_v14  ;;  %v1439_v49 = vrot.slane %v1437_v24, 5  ;;  %v1451_v7 = vshll.u32 %v2012_v13, 16 }
  0x59   : > { %2235 = vmatpush3.bf16.msra.mxu1 %v2312_v15  ;;  %v1448_v42 = vor.u32 %v1447_v19, %v1444_v34  ;;  %v2049_v50 = vrot.slane %v2772_v5, 9  ;;  %v1623_v51 = vrot.slane %v2010_v55, 5  ;;  %v2050_v63 = vrot.slane %v2775_v2, 9 }
  0x5a   : > { %v1435_v36 = vrot.slane %v1434_v35, 4  ;;  %v1627_v6 = vrot.slane %v2012_v13, 5  ;;  %v1458_v53 = vrot.slane %v1456_v45, 4  ;;  %v1453_v58 = vrot.slane %v1451_v7, 5 }
  0x5b   : > { %v1449_v16 = vrot.slane %v1448_v42, 4  ;;  %v1624_v37 = vsel %vm2503_vm6, %v2049_v50, %v1623_v51  ;;  %v1461_v40 = vrot.slane %v1459_v25, 5  ;;  %v1465_v43 = vshll.u32 %v2014_v52, 16 }
  0x5c   : > { %2217 = vmatmul.mubr.msk.bf16.gmra.mxu1 %vm363_vm2, %v1994_v47  ;;  %v1440_v5 = vsel %vm2440_vm3, %v1435_v36, %v1439_v49  ;;  %v1628_v2 = vsel %vm2503_vm6, %v2050_v63, %v1627_v6  ;;  %v1472_v45 = vrot.slane %v1470_v60, 4  ;;  %v1475_v25 = vrot.slane %v1473_v26, 5 }
  0x5d   : > { %2236 = vmatprep.mubr.msk.bf16.mxu1 %vm363_vm2, %v2035_v31  ;;  %v1454_v22 = vsel %vm2440_vm3, %v1449_v16, %v1453_v58  ;;  %v2059_v59 = vcombine.low %v1624_v37, %v1628_v2  ;;  %v1462_v20 = vor.u32 %v1461_v40, %v1458_v53  ;;  %v1479_v61 = vshll.u32 %v2016_v29, 16 }
  0x5e   : > { %v2051_v56 = vrot.slane %v2810_v27, 9  ;;  %v1476_v8 = vor.u32 %v1475_v25, %v1472_v45  ;;  %v1631_v44 = vrot.slane %v2014_v52, 5  ;;  %v2052_v0 = vrot.slane %v2813_v54, 9 }
  0x5f   : > { %2249 = vmatmul.mubr.msk.bf16.vlgmr.msra.gmra.mxu0 %vm363_vm2, %v2058_v12  ;;  %v2036_v60 = vcombine.low %v1412_v32, %v1426_v39  ;;  %v2037_v15 = vcombine.low %v1440_v5, %v1454_v22  ;;  %v1467_v47 = vrot.slane %v1465_v43, 5  ;;  %v1635_v17 = vrot.slane %v2016_v29, 5 }
  0x60   : > { %2252 = vmatprep.mubr.msk.bf16.mxu0 %vm363_vm2, %v2059_v59  ;;  %v1463_v18 = vrot.slane %v1462_v20, 4  ;;  %v1477_v10 = vrot.slane %v1476_v8, 4  ;;  %v1481_v28 = vrot.slane %v1479_v61, 5  ;;  %v1632_v26 = vsel %vm2503_vm6, %v2051_v56, %v1631_v44 }
  0x61   : > { %v1636_v27 = vsel %vm2503_vm6, %v2052_v0, %v1635_v17 }
  0x62   : > { %v2060_v9 = vcombine.low %v1632_v26, %v1636_v27  ;;  %v1468_v54 = vsel %vm2440_vm3, %v1463_v18, %v1467_v47  ;;  %v1482_v21 = vsel %vm2440_vm3, %v1477_v10, %v1481_v28 }
  0x63   : > { %v2038_v4 = vcombine.low %v1468_v54, %v1482_v21 }
  0x64   : > { %2237 = vmatmul.mubr.msk.bf16.vlgmr.msra.gmra.mxu1 %vm363_vm2, %v2036_v60 }
  0x65   : > { %2240 = vmatprep.mubr.msk.bf16.mxu1 %vm363_vm2, %v2037_v15 }
  0x67   : > { %2253 = vmatmul.mubr.msk.bf16.gmra.mxu0 %vm363_vm2, %v2060_v9 }
  0x6c   : > { %2241 = vmatmul.mubr.msk.bf16.gmra.mxu1 %vm363_vm2, %v2038_v4 }
  0xe7   : > { %v2154_v55 = vpop.f32.mrf.mxu0 }
  0xe9   : > { %v410_v1 = vpop.f32.mrf.mxu0 }
  0xeb   : > { %v2155_v41 = vpop.f32.mrf.mxu0 }
  0xec   : > { %v2158_v48 = vpop.f32.mrf.mxu1 }
  0xed   : > { %v413_v33 = vpop.f32.mrf.mxu0 }
  0xee   : > { %v426_v62 = vpop.f32.mrf.mxu1 }
  0xef   : > { %v2178_v46 = vpop.f32.mrf.mxu0 }
  0xf0   : > { %v2967_v57 = vpop.f32.mrf.mxu1 }
  0xf1   : > { %v668_v11 = vpop.f32.mrf.mxu0 }
  0xf2   : > { %v2969_v14 = vpop.f32.mrf.mxu1 }
  0xf3   : > { %v2179_v31 = vpop.f32.mrf.mxu0 }
  0xf4   : > { %v2166_v30 = vpop.f32.mrf.mxu1 }
  0xf5   : > { %v671_v38 = vpop.f32.mrf.mxu0  ;;  %v528_v22 = vadd.f32 %v2166_v30, %v2154_v55 }
  0xf6   : > { %v519_v13 = vpop.f32.mrf.mxu1 }
  0xf7   : > { %v2182_v23 = vpop.f32.mrf.mxu0  ;;  %v520_v25 = vadd.f32 %v519_v13, %v410_v1  ;;  %v701_v8 = vadd.f32 %v2178_v46, %v528_v22 }
  0xf8   : > { %v2167_v24 = vpop.f32.mrf.mxu1 }
  0xf9   : > { %v684_v32 = vpop.f32.mrf.mxu0  ;;  %v531_v44 = vadd.f32 %v2167_v24, %v2155_v41  ;;  %v699_v15 = vadd.f32 %v668_v11, %v520_v25 }
  0xfa   : > { %v522_v3 = vpop.f32.mrf.mxu1 }
  0xfb   : > { %v2971_v34 = vpop.f32.mrf.mxu0  ;;  %v523_v47 = vadd.f32 %v522_v3, %v413_v33  ;;  %v702_v28 = vadd.f32 %v2179_v31, %v531_v44 }
  0xfc   : > { %v2170_v19 = vpop.f32.mrf.mxu1 }
  0xfd   : > { %v2973_v39 = vpop.f32.mrf.mxu0  ;;  %v544_v26 = vadd.f32 %v2170_v19, %v2158_v48  ;;  %v700_v4 = vadd.f32 %v671_v38, %v523_v47 }
  0xfe   : > { %v535_v12 = vpop.f32.mrf.mxu1 }
  0xff   : > { %v2202_v35 = vpop.f32.mrf.mxu0  ;;  %v536_v54 = vadd.f32 %v535_v12, %v426_v62  ;;  %v705_v30 = vadd.f32 %v2182_v23, %v544_v26 }
 0x100   : > { %v2171_v49 = vpop.f32.mrf.mxu1 }
 0x101   : > { %v1036_v42 = vpop.f32.mrf.mxu0  ;;  %v703_v3 = vadd.f32 %v684_v32, %v536_v54  ;;  %v547_v31 = vadd.f32 %v2171_v49, %v2967_v57 }
 0x102   : > { %v538_v7 = vpop.f32.mrf.mxu1 }
 0x103   : > { %v2203_v50 = vpop.f32.mrf.mxu0  ;;  %v539_v48 = vadd.f32 %v538_v7, %v2969_v14 }
 0x104   : > { %v2190_v51 = vpop.f32.mrf.mxu1 }
 0x105   : > { %v1039_v52 = vpop.f32.mrf.mxu0  ;;  %v843_v17 = vadd.f32 %v2190_v51, %v701_v8 }
 0x106   : > { %v810_v36 = vpop.f32.mrf.mxu1 }
 0x107   : > { %v2206_v63 = vpop.f32.mrf.mxu0  ;;  %v841_v27 = vadd.f32 %v810_v36, %v699_v15  ;;  %v1069_v55 = vadd.f32 %v2202_v35, %v843_v17 }
 0x108   : > { %v2191_v6 = vpop.f32.mrf.mxu1 }
 0x109   : > { %v2975_v53 = vpop.f32.mrf.mxu0  ;;  %v844_v1 = vadd.f32 %v2191_v6, %v702_v28  ;;  %v1067_v13 = vadd.f32 %v1036_v42, %v841_v27  ;;  %v706_v42 = vadd.f32 %v2971_v34, %v547_v31  ;;  %v2067_v34 = vld [vmem:[%s3015_s2] ss:$0 sm:$0xff] }
 0x10a   : > { %v813_v16 = vpop.f32.mrf.mxu1 }
 0x10b   : > { %v2977_v58 = vpop.f32.mrf.mxu0  ;;  %v842_v11 = vadd.f32 %v813_v16, %v700_v4  ;;  %v1070_v51 = vadd.f32 %v2203_v50, %v844_v1  ;;  %v704_v16 = vadd.f32 %v2973_v39, %v539_v48 }
 0x10c   : > { %v2194_v37 = vpop.f32.mrf.mxu1 }
 0x10d   : > { %v2979_v29 = vpop.f32.mrf.mxu0  ;;  %v847_v62 = vadd.f32 %v2194_v37, %v705_v30  ;;  %v1068_v6 = vadd.f32 %v1039_v52, %v842_v11 }
 0x10e   : > { %v826_v40 = vpop.f32.mrf.mxu1 }
 0x10f   : > { %v2226_v5 = vpop.f32.mrf.mxu0  ;;  %v845_v35 = vadd.f32 %v826_v40, %v703_v3 }
 0x110   : > { %v2195_v2 = vpop.f32.mrf.mxu1 }
 0x111   : > { %v1332_v43 = vpop.f32.mrf.mxu0  ;;  %v1071_v50 = vadd.f32 %v2975_v53, %v845_v35  ;;  %v848_v37 = vadd.f32 %v2195_v2, %v706_v42 }
 0x112   : > { %v829_v45 = vpop.f32.mrf.mxu1 }
 0x113   : > { %v2227_v59 = vpop.f32.mrf.mxu0  ;;  %v1074_v53 = vadd.f32 %v2977_v58, %v848_v37 }
 0x114   : > { %v2214_v20 = vpop.f32.mrf.mxu1 }
 0x115   : > { %v1335_v61 = vpop.f32.mrf.mxu0  ;;  %v1223_v33 = vadd.f32 %v2214_v20, %v1069_v55  ;;  %v1073_v20 = vadd.f32 %v2206_v63, %v847_v62 }
 0x116   : > { %v1190_v56 = vpop.f32.mrf.mxu1 }
 0x117   : > { %v2981_v0 = vpop.f32.mrf.mxu0  ;;  %v1221_v12 = vadd.f32 %v1190_v56, %v1067_v13  ;;  %v1365_v22 = vadd.f32 %v2226_v5, %v1223_v33  ;;  %v846_v56 = vadd.f32 %v829_v45, %v704_v16 }
 0x118   : > { %v2215_v60 = vpop.f32.mrf.mxu1 }
 0x119   : > { %v1348_v18 = vpop.f32.mrf.mxu0  ;;  %v1224_v25 = vadd.f32 %v2215_v60, %v1070_v51  ;;  %v1363_v57 = vadd.f32 %v1332_v43, %v1221_v12  ;;  %v1072_v2 = vadd.f32 %v2979_v29, %v846_v56 }
 0x11a   : > { %v1193_v10 = vpop.f32.mrf.mxu1 }
 0x11b   : > { %v2983_v9 = vpop.f32.mrf.mxu0  ;;  %v1222_v49 = vadd.f32 %v1193_v10, %v1068_v6  ;;  %v1366_v8 = vadd.f32 %v2227_v59, %v1224_v25 }
 0x11c   : > { %v2218_v21 = vpop.f32.mrf.mxu1 }
 0x11d   : > { %v2985_v46 = vpop.f32.mrf.mxu0  ;;  %v1227_v52 = vadd.f32 %v2218_v21, %v1073_v20  ;;  %v1364_v43 = vadd.f32 %v1335_v61, %v1222_v49 }
 0x11e   : > { %v1206_v41 = vpop.f32.mrf.mxu1 }
 0x11f   : > { %v2250_v24 = vpop.f32.mrf.mxu0  ;;  %v1225_v60 = vadd.f32 %v1206_v41, %v1071_v50  ;;  %v1369_v59 = vadd.f32 %v2981_v0, %v1227_v52 }
 0x120   : > { %v2219_v19 = vpop.f32.mrf.mxu1 }
 0x121   : > { %v1712_v38 = vpop.f32.mrf.mxu0  ;;  %v1367_v26 = vadd.f32 %v1348_v18, %v1225_v60  ;;  %v1228_v27 = vadd.f32 %v2219_v19, %v1074_v53 }
 0x122   : > { %v1209_v36 = vpop.f32.mrf.mxu1 }
 0x123   : > { %v2251_v23 = vpop.f32.mrf.mxu0  ;;  %v1226_v54 = vadd.f32 %v1209_v36, %v1072_v2  ;;  %v1370_v0 = vadd.f32 %v2983_v9, %v1228_v27 }
 0x124   : > { %v2238_v32 = vpop.f32.mrf.mxu1 }
 0x125   : > { %v1591_v14 = vadd.f32 %v2238_v32, %v1365_v22  ;;  %v1715_v7 = vpop.f32.mrf.mxu0  ;;  %v1368_v33 = vadd.f32 %v2985_v46, %v1226_v54 }
 0x126   : > { %v1558_v40 = vpop.f32.mrf.mxu1 }
 0x127   : > { %v1745_v5 = vadd.f32 %v2250_v24, %v1591_v14  ;;  %v1589_v44 = vadd.f32 %v1558_v40, %v1363_v57  ;;  %v2254_v63 = vpop.f32.mrf.mxu0 }
 0x128   : > { %v2239_v39 = vpop.f32.mrf.mxu1 }
 0x129   : > { %v1743_v15 = vadd.f32 %v1712_v38, %v1589_v44  ;;  %v1592_v47 = vadd.f32 %v2239_v39, %v1366_v8  ;;  %v1760_v17 = vadd.f32 %v2067_v34, %v1745_v5  ;;  %v1728_v4 = vpop.f32.mrf.mxu0 }
 0x12a   : > { %v1561_v45 = vpop.f32.mrf.mxu1 }
 0x12b   : > { %v1746_v10 = vadd.f32 %v2251_v23, %v1592_v47  ;;  %v1590_v28 = vadd.f32 %v1561_v45, %v1364_v43  ;;  %v1758_v55 = vadd.f32 %v2067_v34, %v1743_v15  ;;  %v1768_v58 = vmax.f32 %v1760_v17, 0.0  ;;  %v2255_v3 = vpop.f32.mrf.mxu0 }
 0x12c   : > { %v2242_v21 = vpop.f32.mrf.mxu1 }
 0x12d   : > { %v1761_v61 = vadd.f32 %v2067_v34, %v1746_v10  ;;  %v1744_v1 = vadd.f32 %v1715_v7, %v1590_v28  ;;  %v1595_v41 = vadd.f32 %v2242_v21, %v1369_v59  ;;  %v1766_v31 = vmax.f32 %v1758_v55, 0.0  ;;  %v1731_v6 = vpop.f32.mrf.mxu0 }
 0x12e   : > { %v1574_v30 = vpop.f32.mrf.mxu1 }
 0x12f   : > { %v1769_v13 = vmax.f32 %v1761_v61, 0.0  ;;  %v1759_v29 = vadd.f32 %v2067_v34, %v1744_v1  ;;  %v1593_v11 = vadd.f32 %v1574_v30, %v1367_v26  ;;  %v1749_v18 = vadd.f32 %v2254_v63, %v1595_v41 }
 0x130   : > { %v2243_v24 = vpop.f32.mrf.mxu1 }
 0x131   : > { %v2079_v48 = vpack.c.bf16 %v1769_v13, %v1768_v58  ;;  %v1767_v19 = vmax.f32 %v1759_v29, 0.0  ;;  %v1747_v51 = vadd.f32 %v1728_v4, %v1593_v11  ;;  %v1596_v62 = vadd.f32 %v2243_v24, %v1370_v0 }
 0x132   : > { %v1577_v12 = vpop.f32.mrf.mxu1  ;;  %v1764_v36 = vadd.f32 %v2067_v34, %v1749_v18 }
 0x133   : > { %2091 = vst [vmem:[%s192_s11 + $0x8] sm:$0xff] %v2079_v48   ;;  %v2074_v38 = vpack.c.bf16 %v1767_v19, %v1766_v31  ;;  %v1594_v35 = vadd.f32 %v1577_v12, %v1368_v33  ;;  %v1750_v9 = vadd.f32 %v2255_v3, %v1596_v62  ;;  %v1762_v46 = vadd.f32 %v2067_v34, %v1747_v51 }
 0x134   : > { %v1772_v42 = vmax.f32 %v1764_v36, 0.0 }
 0x135   : > { %2075 = vst [vmem:[%s192_s11] sm:$0xff] %v2074_v38   ;;  %v1748_v22 = vadd.f32 %v1731_v6, %v1594_v35  ;;  %v1765_v25 = vadd.f32 %v2067_v34, %v1750_v9  ;;  %v1770_v32 = vmax.f32 %v1762_v46, 0.0 }
 0x137   : > { %v1763_v23 = vadd.f32 %v2067_v34, %v1748_v22  ;;  %v1773_v16 = vmax.f32 %v1765_v25, 0.0 }
 0x139   : > { %v1771_v20 = vmax.f32 %v1763_v23, 0.0  ;;  %v2089_v57 = vpack.c.bf16 %v1773_v16, %v1772_v42 }
 0x13b   : > { %v2084_v49 = vpack.c.bf16 %v1771_v20, %v1770_v32  ;;  %2093 = vst [vmem:[%s192_s11 + $0x18] sm:$0xff] %v2089_v57  }
 0x13d   : > { %2092 = vst [vmem:[%s192_s11 + $0x10] sm:$0xff] %v2084_v49  }
 0x13e PF: > { %s13_s14 = sadd.s32 1, %s2337_s14   ;;  %s3021_s12 = smov %s2333_s13 }
 0x13f   : > { %p10_p5 = scmp.ge.s32.totalorder %s13_s14, 4   ;;  %s3022_s13 = smov %s3024_s15 }
 0x141   :  { %12 = sbr.rel (!%p10_p5) target bundleno = 2 (0x2), region = 73 }

// kernel: deeplab3plus_forward.17
= control target key start
LH: loop header
LB: loop body
LE: loop exit
PB: predicated region body
PF: predicated region fallthrough
CT: control target
= control target key end

     0   :  { %s4847_s12 = smov 0   ;;  %s4849_s13 = smov 0   ;;  %s5596_s0 = inlined_call_operand.vmem [shape: f32[32,8], index: 0, kind: input, shape index: {}, may-alias: {0,1}]   ;;  %s5597_s1 = inlined_call_operand.vmem [shape: f32[32,8], index: 1, kind: input, shape index: {}, may-alias: {0,1}]   ;;  %s5598_s2 = inlined_call_operand.vmem [shape: f32[2,8,8,128], index: 2, kind: input, shape index: {}]   ;;  %s5599_s3 = inlined_call_operand.vmem [shape: f32[2,32,32,128], index: 3, kind: output, shape index: {}]  }
   0x1   :  { %s4851_s14 = smov 0  }
   0x2 LB: > { %s32_s15 = sadd.s32 1, %s4818_s13  ;;  %p4190_p0 = scmp.ge.s32.totalorder %s4822_s14, 1  ;;  %s4822_s14 = sphi %s4851_s14, %s13_s14   ;;  %s4818_s13 = sphi %s4849_s13, %s5601_s13   ;;  %s4814_s12 = sphi %s4847_s12, %s5600_s12  }
   0x3   : > { %p34_p1 = scmp.ge.s32.totalorder %s32_s15, 2  ;;  %p176_p2 = scmp.lt.s32.totalorder %s4822_s14, 3 }
   0x5   : > { %s5603_s15 = smov (%p34_p1, %s32_s15), 0  ;;  %p177_p3 = pnand %p4190_p0, %p176_p2 }
   0x6   : > { %p222_p4 = scmp.lt.s32.totalorder (!%p177_p3), %s4814_s12, 1 }
   0x7   : > { %180 = sbr.rel (%p177_p3) target bundleno = 566 (0x236), region = 32 }
   0xc   : > { %v4824_v0 = vmov 0.0   ;;  %s5605_s12 = smov (!%p222_p4, %s4814_s12), 1  ;;  %vm287_vm0 = vcmask 64512   ;;  %v283_v6 = vld [vmem:[%s5596_s0] sm:$0xff]  ;;  %v284_v16 = vld [vmem:[%s5596_s0 + $0x8] sm:$0xff]  ;;  %v285_v27 = vld [vmem:[%s5596_s0 + $0x10] sm:$0xff]  ;;  %v661_v34 = vlaneseq }
   0xd   : > { %364 = vmatprep.mubr.f32.mxu0 %v4824_v0  ;;  %453 = vmatprep.mubr.f32.mxu1 %v4824_v0  ;;  %s4355_s16 = sshll.u32 %s5605_s12, 6  ;;  %v286_v28 = vld [vmem:[%s5596_s0 + $0x18] sm:$0xff]  ;;  %v4936_v29 = vld [vmem:[%s5597_s1] sm:$0xff]  ;;  %v4825_v32 = vmov 1983009808   ;;  %s4356_s9 = sshll.u32 %s5605_s12, 10 }
   0xe   : > { %s4873_s19 = scalar_lea.vmem %s5598_s2, %s4355_s16  ;;  %v659_v33 = vunpack.c.l.s4 %v4825_v32  ;;  %v662_v40 = vshrl.u32 %v661_v34, 7  ;;  %v4826_v43 = vmov 1934713408   ;;  %s5457_s16 = scalar_lea.vmem %s5599_s3, %s4356_s9 }
   0xf   : > { %v4195_v1 = vld [vmem:[%s4873_s19 + $0x1] ss:$8 sm:$0xf]  ;;  %v4199_v4 = vld [vmem:[%s4873_s19 + $0x3] ss:$8 sm:$0xf]  ;;  %v723_v44 = vunpack.c.l.s4 %v4826_v43 }
  0x10   : > { %v4196_v2 = vld [vmem:[%s4873_s19 + $0x1] ss:$8 sm:$0xf0]  ;;  %v4200_v5 = vld [vmem:[%s4873_s19 + $0x3] ss:$8 sm:$0xf0]  ;;  %v660_v39 = vunpack.c.0.s8 %v659_v33 }
  0x11   : > { %v250_v3 = vor.u32 %v4196_v2, %v4195_v1  ;;  %v258_v7 = vor.u32 %v4200_v5, %v4199_v4  ;;  %v244_v8 = vld [vmem:[%s4873_s19] ss:$8 sm:$0xf]  ;;  %v4197_v11 = vld [vmem:[%s4873_s19 + $0x2] ss:$8 sm:$0xf]  ;;  %v724_v51 = vunpack.c.0.s8 %v723_v44 }
  0x12   : > { %v245_v9 = vld [vmem:[%s4873_s19] ss:$8 sm:$0xf0]  ;;  %v4198_v12 = vld [vmem:[%s4873_s19 + $0x2] ss:$8 sm:$0xf0]  ;;  %v4958_v47 = vsub.s32 %v660_v39, %v662_v40 }
  0x13   : > { %330 = vmatprep.subr.mxu0 %v250_v3  ;;  %v246_v10 = vor.u32 %v245_v9, %v244_v8  ;;  %419 = vmatprep.subr.mxu1 %v258_v7  ;;  %v254_v13 = vor.u32 %v4198_v12, %v4197_v11  ;;  %v4203_v14 = vld [vmem:[%s4873_s19 + $0x5] ss:$8 sm:$0xf]  ;;  %v4207_v18 = vld [vmem:[%s4873_s19 + $0x7] ss:$8 sm:$0xf]  ;;  %v4970_v61 = vsub.s32 %v724_v51, %v662_v40 }
  0x14   : > { %v4204_v15 = vld [vmem:[%s4873_s19 + $0x5] ss:$8 sm:$0xf0]  ;;  %v4208_v19 = vld [vmem:[%s4873_s19 + $0x7] ss:$8 sm:$0xf0] }
  0x15   : > { %331 = vmatpush1.msra.mxu0 %v246_v10  ;;  %v266_v17 = vor.u32 %v4204_v15, %v4203_v14  ;;  %420 = vmatpush1.msra.mxu1 %v254_v13  ;;  %v274_v20 = vor.u32 %v4208_v19, %v4207_v18  ;;  %v4201_v21 = vld [vmem:[%s4873_s19 + $0x4] ss:$8 sm:$0xf]  ;;  %v4205_v24 = vld [vmem:[%s4873_s19 + $0x6] ss:$8 sm:$0xf] }
  0x16   : > { %4209 = vmatmul.mubr.msk.f32.vlgmr.msra.gmra.mxu0 %vm287_vm0, %v283_v6  ;;  %v4202_v22 = vld [vmem:[%s4873_s19 + $0x4] ss:$8 sm:$0xf0]  ;;  %4213 = vmatmul.mubr.msk.f32.vlgmr.msra.gmra.mxu1 %vm287_vm0, %v283_v6  ;;  %v4206_v25 = vld [vmem:[%s4873_s19 + $0x6] ss:$8 sm:$0xf0] }
  0x17   : > { %370 = vmatprep.mubr.f32.mxu0 %v4824_v0  ;;  %v262_v23 = vor.u32 %v4202_v22, %v4201_v21  ;;  %459 = vmatprep.mubr.f32.mxu1 %v4824_v0  ;;  %v270_v26 = vor.u32 %v4206_v25, %v4205_v24 }
  0x18   : > { %508 = vmatprep.subr.mxu0 %v266_v17  ;;  %597 = vmatprep.subr.mxu1 %v274_v20 }
  0x19   : > { %509 = vmatpush1.msra.mxu0 %v262_v23  ;;  %598 = vmatpush1.msra.mxu1 %v270_v26 }
  0x1a   : > { %4210 = vmatmul.mubr.msk.f32.gmra.mxu0 %vm287_vm0, %v284_v16  ;;  %4214 = vmatmul.mubr.msk.f32.gmra.mxu1 %vm287_vm0, %v284_v16 }
  0x1b   : > { %376 = vmatprep.mubr.f32.mxu0 %v4824_v0  ;;  %465 = vmatprep.mubr.f32.mxu1 %v4824_v0 }
  0x1e   : > { %4211 = vmatmul.mubr.msk.f32.gmra.mxu0 %vm287_vm0, %v285_v27  ;;  %4215 = vmatmul.mubr.msk.f32.gmra.mxu1 %vm287_vm0, %v285_v27 }
  0x1f   : > { %382 = vmatprep.mubr.f32.mxu0 %v4824_v0  ;;  %471 = vmatprep.mubr.f32.mxu1 %v4824_v0 }
  0x22   : > { %4212 = vmatmul.mubr.msk.f32.gmra.mxu0 %vm287_vm0, %v286_v28  ;;  %4216 = vmatmul.mubr.msk.f32.gmra.mxu1 %vm287_vm0, %v286_v28 }
  0x23   : > { %542 = vmatprep.mubr.f32.mxu0 %v4824_v0  ;;  %631 = vmatprep.mubr.f32.mxu1 %v4824_v0 }
  0x26   : > { %4217 = vmatmul.mubr.msk.f32.vlgmr.msra.gmra.mxu0 %vm287_vm0, %v283_v6  ;;  %4221 = vmatmul.mubr.msk.f32.vlgmr.msra.gmra.mxu1 %vm287_vm0, %v283_v6 }
  0x27   : > { %548 = vmatprep.mubr.f32.mxu0 %v4824_v0  ;;  %637 = vmatprep.mubr.f32.mxu1 %v4824_v0 }
  0x2a   : > { %4218 = vmatmul.mubr.msk.f32.gmra.mxu0 %vm287_vm0, %v284_v16  ;;  %4222 = vmatmul.mubr.msk.f32.gmra.mxu1 %vm287_vm0, %v284_v16 }
  0x2b   : > { %554 = vmatprep.mubr.f32.mxu0 %v4824_v0  ;;  %643 = vmatprep.mubr.f32.mxu1 %v4824_v0 }
  0x2e   : > { %4219 = vmatmul.mubr.msk.f32.gmra.mxu0 %vm287_vm0, %v285_v27  ;;  %4223 = vmatmul.mubr.msk.f32.gmra.mxu1 %vm287_vm0, %v285_v27 }
  0x2f   : > { %560 = vmatprep.mubr.f32.mxu0 %v4824_v0  ;;  %649 = vmatprep.mubr.f32.mxu1 %v4824_v0 }
  0x32   : > { %4220 = vmatmul.mubr.msk.f32.gmra.mxu0 %vm287_vm0, %v286_v28  ;;  %4224 = vmatmul.mubr.msk.f32.gmra.mxu1 %vm287_vm0, %v286_v28 }
  0x33   : > { %4519 = vmatprep.mubr.msk.f32.mxu0 %vm287_vm0, %v4936_v29  ;;  %4527 = vmatprep.mubr.msk.f32.mxu1 %vm287_vm0, %v4936_v29 }
  0xd6   : > { %v4942_v30 = vpop.f32.mrf.mxu0  ;;  %v4944_v31 = vpop.f32.mrf.mxu1 }
  0xd7   : > { %v656_v62 = vcombine.low %v4942_v30, %v4944_v31  ;;  %v657_v8 = vcombine.high %v4942_v30, %v4944_v31 }
  0xd8   : > { %v368_v35 = vpop.f32.mrf.mxu0  ;;  %v457_v36 = vpop.f32.mrf.mxu1 }
  0xd9   : > { %v672_v63 = vcombine.low %v368_v35, %v457_v36  ;;  %v673_v9 = vcombine.high %v368_v35, %v457_v36  ;;  %v664_v17 = vrot.slane %v656_v62, %v4958_v47 }
  0xda   : > { %v4946_v37 = vpop.f32.mrf.mxu0  ;;  %v4948_v38 = vpop.f32.mrf.mxu1 }
  0xdb   : > { %v680_v18 = vrot.slane %v672_v63, %v4958_v47  ;;  %v4993_v27 = vrot.slane %v673_v9, %v4958_v47 }
  0xdc   : > { %v4950_v41 = vpop.f32.mrf.mxu0  ;;  %v4952_v42 = vpop.f32.mrf.mxu1 }
  0xdd   : > { %v720_v51 = vcombine.low %v664_v17, %v680_v18 }
  0xde   : > { %v4954_v45 = vpop.f32.mrf.mxu0  ;;  %v4956_v46 = vpop.f32.mrf.mxu1 }
  0xdf   : > { %v929_v48 = vcombine.high %v4954_v45, %v4956_v46 }
  0xe0   : > { %v4962_v49 = vpop.f32.mrf.mxu0  ;;  %v4964_v50 = vpop.f32.mrf.mxu1 }
  0xe1   : > { %v943_v52 = vrot.slane %v929_v48, %v4958_v47  ;;  %v945_v53 = vcombine.high %v4962_v49, %v4964_v50  ;;  %v5019_v48 = vrot.slane %v657_v8, %v4958_v47 }
  0xe2   : > { %v384_v54 = vpop.f32.mrf.mxu0  ;;  %v473_v55 = vpop.f32.mrf.mxu1 }
  0xe3   : > { %v959_v56 = vrot.slane %v945_v53, %v4958_v47  ;;  %v1064_v57 = vcombine.low %v384_v54, %v473_v55  ;;  %v1065_v58 = vcombine.high %v384_v54, %v473_v55 }
  0xe4   : > { %v386_v59 = vpop.f32.mrf.mxu0  ;;  %v475_v60 = vpop.f32.mrf.mxu1 }
  0xe5   : > { %v1008_v0 = vcombine.low %v943_v52, %v959_v56  ;;  %v1009_v1 = vcombine.high %v943_v52, %v959_v56  ;;  %v1072_v3 = vrot.slane %v1064_v57, %v4958_v47  ;;  %v1079_v4 = vrot.slane %v1065_v58, %v4958_v47 }
  0xe6   : > { %v544_v2 = vpop.f32.mrf.mxu0  ;;  %v1080_v5 = vcombine.low %v386_v59, %v475_v60  ;;  %v1081_v6 = vcombine.high %v386_v59, %v475_v60  ;;  %v633_v7 = vpop.f32.mrf.mxu1  ;;  %v721_v56 = vcombine.high %v664_v17, %v680_v18  ;;  %v736_v57 = vcombine.low %v5019_v48, %v4993_v27  ;;  %v5054_v18 = vld [vmem:[%s5597_s1 + $0x8] sm:$0xff] }
  0xe7   : > { %v688_v10 = vcombine.low %v544_v2, %v633_v7  ;;  %v4981_v15 = vrot.slane %v1008_v0, %v4970_v61  ;;  %v4984_v16 = vrot.slane %v1009_v1, %v4970_v61  ;;  %v689_v28 = vcombine.high %v544_v2, %v633_v7 }
  0xe8   : > { %v546_v11 = vpop.f32.mrf.mxu0  ;;  %v1088_v12 = vrot.slane %v1080_v5, %v4958_v47  ;;  %v1095_v13 = vrot.slane %v1081_v6, %v4958_v47  ;;  %v635_v14 = vpop.f32.mrf.mxu1  ;;  %v728_v2 = vrot.slane %v720_v51, %v4970_v61  ;;  %v808_v5 = vcombine.low %v4950_v41, %v4952_v42 }
  0xe9   : > { %v704_v19 = vcombine.low %v546_v11, %v635_v14  ;;  %v705_v20 = vcombine.high %v546_v11, %v635_v14  ;;  %v696_v30 = vrot.slane %v688_v10, %v4958_v47  ;;  %v5024_v54 = vrot.slane %v689_v28, %v4958_v47 }
  0xea   : > { %v4988_v21 = vpop.f32.mrf.mxu0  ;;  %v1128_v22 = vcombine.low %v1072_v3, %v1088_v12  ;;  %v1129_v23 = vcombine.high %v1072_v3, %v1088_v12  ;;  %v1144_v24 = vcombine.low %v1079_v4, %v1095_v13  ;;  %v1145_v25 = vcombine.high %v1079_v4, %v1095_v13  ;;  %v4990_v26 = vpop.f32.mrf.mxu1 }
  0xeb   : > { %v712_v31 = vrot.slane %v704_v19, %v4958_v47  ;;  %v5014_v40 = vrot.slane %v705_v20, %v4958_v47  ;;  %v792_v4 = vcombine.low %v4946_v37, %v4948_v38  ;;  %v735_v11 = vrot.slane %v721_v56, %v4970_v61 }
  0xec   : > { %v4997_v32 = vpop.f32.mrf.mxu0  ;;  %v4999_v33 = vpop.f32.mrf.mxu1  ;;  %v5002_v34 = vrot.slane %v1128_v22, %v4970_v61  ;;  %v5005_v35 = vrot.slane %v1129_v23, %v4970_v61  ;;  %v5008_v36 = vrot.slane %v1144_v24, %v4970_v61  ;;  %v5011_v39 = vrot.slane %v1145_v25, %v4970_v61 }
  0xed   : > { %v752_v43 = vcombine.low %v696_v30, %v712_v31  ;;  %v753_v52 = vcombine.high %v696_v30, %v712_v31  ;;  %v768_v60 = vcombine.low %v5024_v54, %v5014_v40  ;;  %v744_v12 = vrot.slane %v736_v57, %v4970_v61 }
  0xee   : > { %v5016_v44 = vpop.f32.mrf.mxu0  ;;  %v5021_v53 = vpop.f32.mrf.mxu1  ;;  %v824_v13 = vcombine.low %v4988_v21, %v4990_v26  ;;  %v769_v30 = vcombine.high %v5024_v54, %v5014_v40  ;;  %v840_v31 = vcombine.low %v4997_v32, %v4999_v33  ;;  %v737_v51 = vcombine.high %v5019_v48, %v4993_v27  ;;  %v5072_v40 = vld [vmem:[%s5597_s1 + $0x10] sm:$0xff]  ;;  %v5080_v27 = vld [vmem:[%s5597_s1 + $0x18] sm:$0xff] }
  0xef   : > { %v760_v59 = vrot.slane %v752_v43, %v4970_v61  ;;  %v961_v62 = vcombine.high %v5016_v44, %v5021_v53  ;;  %v767_v3 = vrot.slane %v753_v52, %v4970_v61  ;;  %v776_v19 = vrot.slane %v768_v60, %v4970_v61 }
  0xf0   : > { %v5026_v55 = vpop.f32.mrf.mxu0  ;;  %v5030_v58 = vpop.f32.mrf.mxu1  ;;  %v5075_v54 = vrot.slane %v808_v5, %v4958_v47  ;;  %v751_v5 = vrot.slane %v737_v51, %v4970_v61 }
  0xf1   : > { %v977_v63 = vcombine.high %v5026_v55, %v5030_v58  ;;  %v784_v8 = vcombine.low %v728_v2, %v760_v59  ;;  %v785_v9 = vcombine.high %v728_v2, %v760_v59  ;;  %v975_v14 = vrot.slane %v961_v62, %v4958_v47 }
  0xf2   : > { %v562_v0 = vpop.f32.mrf.mxu0  ;;  %v651_v1 = vpop.f32.mrf.mxu1  ;;  %v786_v23 = vcombine.low %v735_v11, %v767_v3  ;;  %v787_v28 = vcombine.high %v735_v11, %v767_v3  ;;  %v788_v52 = vcombine.low %v744_v12, %v776_v19  ;;  %v789_v56 = vcombine.high %v744_v12, %v776_v19 }
  0xf3   : > { %v1096_v6 = vcombine.low %v562_v0, %v651_v1  ;;  %v991_v17 = vrot.slane %v977_v63, %v4958_v47  ;;  %v1097_v20 = vcombine.high %v562_v0, %v651_v1  ;;  %4517 = vmatprep.subr.mxu0 %v784_v8  ;;  %4525 = vmatprep.subr.mxu1 %v785_v9 }
  0xf4   : > { %v564_v7 = vpop.f32.mrf.mxu0  ;;  %v653_v10 = vpop.f32.mrf.mxu1  ;;  %4518 = vmatpush3.msra.mxu0 %v784_v8  ;;  %4526 = vmatpush3.msra.mxu1 %v785_v9  ;;  %v5085_v63 = vrot.slane %v824_v13, %v4958_v47  ;;  %v5088_v0 = vrot.slane %v840_v31, %v4958_v47  ;;  %v783_v1 = vrot.slane %v769_v30, %v4970_v61 }
  0xf5   : > { %v1112_v22 = vcombine.low %v564_v7, %v653_v10  ;;  %v1104_v24 = vrot.slane %v1096_v6, %v4958_v47  ;;  %v1113_v25 = vcombine.high %v564_v7, %v653_v10  ;;  %4520 = vmatmul.mubr.msk.f32.vlgmr.msra.gmra.mxu0 %vm287_vm0, %v5054_v18  ;;  %4528 = vmatmul.mubr.msk.f32.vlgmr.msra.gmra.mxu1 %vm287_vm0, %v5054_v18 }
  0xf6   : > { %4533 = vmatprep.subr.mxu0 %v786_v23  ;;  %4541 = vmatprep.subr.mxu1 %v787_v28  ;;  %v1040_v57 = vcombine.low %v975_v14, %v991_v17  ;;  %v1041_v59 = vcombine.high %v975_v14, %v991_v17  ;;  %v1111_v48 = vrot.slane %v1097_v20, %v4958_v47 }
  0xf7   : > { %v1120_v43 = vrot.slane %v1112_v22, %v4958_v47  ;;  %4534 = vmatpush3.msra.mxu0 %v786_v23  ;;  %4542 = vmatpush3.msra.mxu1 %v787_v28  ;;  %v1127_v60 = vrot.slane %v1113_v25, %v4958_v47  ;;  %v5096_v2 = vrot.slane %v792_v4, %v4958_v47 }
  0xf8   : > { %4549 = vmatprep.subr.mxu0 %v788_v52  ;;  %4557 = vmatprep.subr.mxu1 %v789_v56  ;;  %v1048_v6 = vrot.slane %v1040_v57, %v4970_v61  ;;  %v1055_v8 = vrot.slane %v1041_v59, %v4970_v61  ;;  %v888_v11 = vcombine.low %v5085_v63, %v5088_v0 }
  0xf9   : > { %v1160_v62 = vcombine.low %v1104_v24, %v1120_v43  ;;  %4522 = vmatprep.mubr.msk.f32.mxu0 %vm287_vm0, %v5072_v40  ;;  %4530 = vmatprep.mubr.msk.f32.mxu1 %vm287_vm0, %v5072_v40  ;;  %v1161_v3 = vcombine.high %v1104_v24, %v1120_v43  ;;  %v1176_v7 = vcombine.low %v1111_v48, %v1127_v60 }
  0xfa   : > { %4523 = vmatmul.mubr.msk.f32.gmra.mxu0 %vm287_vm0, %v5080_v27  ;;  %4531 = vmatmul.mubr.msk.f32.gmra.mxu1 %vm287_vm0, %v5080_v27  ;;  %v1177_v4 = vcombine.high %v1111_v48, %v1127_v60  ;;  %v856_v10 = vcombine.low %v5096_v2, %v5075_v54  ;;  %v790_v12 = vcombine.low %v751_v5, %v783_v1 }
  0xfb   : > { %4535 = vmatprep.mubr.msk.f32.mxu0 %vm287_vm0, %v4936_v29  ;;  %4543 = vmatprep.mubr.msk.f32.mxu1 %vm287_vm0, %v4936_v29  ;;  %v1168_v9 = vrot.slane %v1160_v62, %v4970_v61  ;;  %v791_v13 = vcombine.high %v751_v5, %v783_v1  ;;  %v5119_v14 = vcombine.low %v4981_v15, %v1048_v6 }
  0xfc   : > { %v5122_v17 = vcombine.high %v4981_v15, %v1048_v6  ;;  %v5125_v19 = vcombine.low %v4984_v16, %v1055_v8  ;;  %v5128_v20 = vcombine.high %v4984_v16, %v1055_v8  ;;  %v1175_v24 = vrot.slane %v1161_v3, %v4970_v61 }
  0xfd   : > { %v5131_v22 = vcombine.low %v5002_v34, %v1168_v9  ;;  %v5134_v23 = vcombine.high %v5002_v34, %v1168_v9  ;;  %v1184_v15 = vrot.slane %v1176_v7, %v4970_v61  ;;  %v1191_v25 = vrot.slane %v1177_v4, %v4970_v61 }
  0xfe   : > { %4536 = vmatmul.mubr.msk.f32.vlgmr.msra.gmra.mxu0 %vm287_vm0, %v5054_v18  ;;  %4544 = vmatmul.mubr.msk.f32.vlgmr.msra.gmra.mxu1 %vm287_vm0, %v5054_v18  ;;  %v896_v16 = vrot.slane %v888_v11, %v4970_v61  ;;  %v5149_v34 = vcombine.low %v5005_v35, %v1175_v24  ;;  %v5152_v28 = vcombine.high %v5005_v35, %v1175_v24 }
  0xff   : > { %4550 = vmatpush3.msra.mxu0 %v788_v52  ;;  %4558 = vmatpush3.msra.mxu1 %v789_v56  ;;  %v5155_v30 = vcombine.low %v5008_v36, %v1184_v15  ;;  %v5162_v31 = vcombine.high %v5008_v36, %v1184_v15  ;;  %v5165_v43 = vcombine.low %v5011_v39, %v1191_v25 }
 0x100   : > { %4565 = vmatprep.subr.mxu0 %v790_v12  ;;  %4573 = vmatprep.subr.mxu1 %v791_v13  ;;  %v5168_v51 = vcombine.high %v5011_v39, %v1191_v25  ;;  %v864_v35 = vrot.slane %v856_v10, %v4970_v61  ;;  %v825_v52 = vcombine.high %v4988_v21, %v4990_v26 }
 0x101   : > { %4538 = vmatprep.mubr.msk.f32.mxu0 %vm287_vm0, %v5072_v40  ;;  %4546 = vmatprep.mubr.msk.f32.mxu1 %vm287_vm0, %v5072_v40  ;;  %v841_v56 = vcombine.high %v4997_v32, %v4999_v33  ;;  %v889_v57 = vcombine.high %v5085_v63, %v5088_v0  ;;  %v809_v59 = vcombine.high %v4950_v41, %v4952_v42 }
 0x102   : > { %4539 = vmatmul.mubr.msk.f32.gmra.mxu0 %vm287_vm0, %v5080_v27  ;;  %4547 = vmatmul.mubr.msk.f32.gmra.mxu1 %vm287_vm0, %v5080_v27  ;;  %v920_v36 = vcombine.low %v864_v35, %v896_v16  ;;  %v921_v39 = vcombine.high %v864_v35, %v896_v16  ;;  %v857_v21 = vcombine.high %v5096_v2, %v5075_v54 }
 0x103   : > { %4551 = vmatprep.mubr.msk.f32.mxu0 %vm287_vm0, %v4936_v29  ;;  %4559 = vmatprep.mubr.msk.f32.mxu1 %vm287_vm0, %v4936_v29  ;;  %v793_v26 = vcombine.high %v4946_v37, %v4948_v38  ;;  %v839_v32 = vrot.slane %v825_v52, %v4958_v47  ;;  %v855_v33 = vrot.slane %v841_v56, %v4958_v47 }
 0x104   : > { %v903_v41 = vrot.slane %v889_v57, %v4970_v61  ;;  %v823_v37 = vrot.slane %v809_v59, %v4958_v47  ;;  %v871_v38 = vrot.slane %v857_v21, %v4970_v61  ;;  %v960_v1 = vcombine.low %v5016_v44, %v5021_v53 }
 0x105   : > { %v807_v42 = vrot.slane %v793_v26, %v4958_v47  ;;  %v904_v54 = vcombine.low %v839_v32, %v855_v33  ;;  %v976_v2 = vcombine.low %v5026_v55, %v5030_v58  ;;  %v905_v3 = vcombine.high %v839_v32, %v855_v33 }
 0x106   : > { %4552 = vmatmul.mubr.msk.f32.vlgmr.msra.gmra.mxu0 %vm287_vm0, %v5054_v18  ;;  %4560 = vmatmul.mubr.msk.f32.vlgmr.msra.gmra.mxu1 %vm287_vm0, %v5054_v18  ;;  %v922_v48 = vcombine.low %v871_v38, %v903_v41  ;;  %v923_v60 = vcombine.high %v871_v38, %v903_v41  ;;  %v944_v4 = vcombine.low %v4962_v49, %v4964_v50 }
 0x107   : > { %4566 = vmatpush3.msra.mxu0 %v790_v12  ;;  %4574 = vmatpush3.msra.mxu1 %v791_v13  ;;  %v872_v62 = vcombine.low %v807_v42, %v823_v37  ;;  %v912_v63 = vrot.slane %v904_v54, %v4970_v61  ;;  %v873_v7 = vcombine.high %v807_v42, %v823_v37 }
 0x108   : > { %4581 = vmatprep.subr.mxu0 %v920_v36  ;;  %4589 = vmatprep.subr.mxu1 %v921_v39  ;;  %v928_v44 = vcombine.low %v4954_v45, %v4956_v46  ;;  %v968_v53 = vrot.slane %v960_v1, %v4958_v47  ;;  %v984_v55 = vrot.slane %v976_v2, %v4958_v47 }
 0x109   : > { %4554 = vmatprep.mubr.msk.f32.mxu0 %vm287_vm0, %v5072_v40  ;;  %4562 = vmatprep.mubr.msk.f32.mxu1 %vm287_vm0, %v5072_v40  ;;  %v880_v0 = vrot.slane %v872_v62, %v4970_v61  ;;  %v919_v49 = vrot.slane %v905_v3, %v4970_v61  ;;  %v952_v45 = vrot.slane %v944_v4, %v4958_v47 }
 0x10a   : > { %4555 = vmatmul.mubr.msk.f32.gmra.mxu0 %vm287_vm0, %v5080_v27  ;;  %4563 = vmatmul.mubr.msk.f32.gmra.mxu1 %vm287_vm0, %v5080_v27  ;;  %v887_v46 = vrot.slane %v873_v7, %v4970_v61  ;;  %v936_v50 = vrot.slane %v928_v44, %v4958_v47  ;;  %v1024_v58 = vcombine.low %v968_v53, %v984_v55 }
 0x10b   : > { %4567 = vmatprep.mubr.msk.f32.mxu0 %vm287_vm0, %v4936_v29  ;;  %4575 = vmatprep.mubr.msk.f32.mxu1 %vm287_vm0, %v4936_v29  ;;  %v924_v5 = vcombine.low %v880_v0, %v912_v63  ;;  %v925_v6 = vcombine.high %v880_v0, %v912_v63  ;;  %v1025_v12 = vcombine.high %v968_v53, %v984_v55 }
 0x10c   : > { %v926_v8 = vcombine.low %v887_v46, %v919_v49  ;;  %v927_v9 = vcombine.high %v887_v46, %v919_v49  ;;  %v992_v10 = vcombine.low %v936_v50, %v952_v45  ;;  %v1032_v47 = vrot.slane %v1024_v58, %v4970_v61 }
 0x10d   : > { %v993_v15 = vcombine.high %v936_v50, %v952_v45  ;;  %v1039_v25 = vrot.slane %v1025_v12, %v4970_v61 }
 0x10e   : > { %4568 = vmatmul.mubr.msk.f32.vlgmr.msra.gmra.mxu0 %vm287_vm0, %v5054_v18  ;;  %4576 = vmatmul.mubr.msk.f32.vlgmr.msra.gmra.mxu1 %vm287_vm0, %v5054_v18  ;;  %v1000_v11 = vrot.slane %v992_v10, %v4970_v61 }
 0x10f   : > { %4582 = vmatpush3.msra.mxu0 %v920_v36  ;;  %4590 = vmatpush3.msra.mxu1 %v921_v39  ;;  %v1007_v16 = vrot.slane %v993_v15, %v4970_v61 }
 0x110   : > { %4597 = vmatprep.subr.mxu0 %v922_v48  ;;  %4605 = vmatprep.subr.mxu1 %v923_v60  ;;  %v1056_v13 = vcombine.low %v1000_v11, %v1032_v47  ;;  %v1057_v24 = vcombine.high %v1000_v11, %v1032_v47 }
 0x111   : > { %4570 = vmatprep.mubr.msk.f32.mxu0 %vm287_vm0, %v5072_v40  ;;  %4578 = vmatprep.mubr.msk.f32.mxu1 %vm287_vm0, %v5072_v40  ;;  %v1058_v35 = vcombine.low %v1007_v16, %v1039_v25  ;;  %v1059_v52 = vcombine.high %v1007_v16, %v1039_v25 }
 0x112   : > { %4571 = vmatmul.mubr.msk.f32.gmra.mxu0 %vm287_vm0, %v5080_v27  ;;  %4579 = vmatmul.mubr.msk.f32.gmra.mxu1 %vm287_vm0, %v5080_v27 }
 0x113   : > { %4583 = vmatprep.mubr.msk.f32.mxu0 %vm287_vm0, %v4936_v29  ;;  %4591 = vmatprep.mubr.msk.f32.mxu1 %vm287_vm0, %v4936_v29 }
 0x116   : > { %4584 = vmatmul.mubr.msk.f32.vlgmr.msra.gmra.mxu0 %vm287_vm0, %v5054_v18  ;;  %4592 = vmatmul.mubr.msk.f32.vlgmr.msra.gmra.mxu1 %vm287_vm0, %v5054_v18 }
 0x117   : > { %4598 = vmatpush3.msra.mxu0 %v922_v48  ;;  %4606 = vmatpush3.msra.mxu1 %v923_v60 }
 0x118   : > { %4613 = vmatprep.subr.mxu0 %v924_v5  ;;  %4621 = vmatprep.subr.mxu1 %v925_v6 }
 0x119   : > { %4586 = vmatprep.mubr.msk.f32.mxu0 %vm287_vm0, %v5072_v40  ;;  %4594 = vmatprep.mubr.msk.f32.mxu1 %vm287_vm0, %v5072_v40 }
 0x11a   : > { %4587 = vmatmul.mubr.msk.f32.gmra.mxu0 %vm287_vm0, %v5080_v27  ;;  %4595 = vmatmul.mubr.msk.f32.gmra.mxu1 %vm287_vm0, %v5080_v27 }
 0x11b   : > { %4599 = vmatprep.mubr.msk.f32.mxu0 %vm287_vm0, %v4936_v29  ;;  %4607 = vmatprep.mubr.msk.f32.mxu1 %vm287_vm0, %v4936_v29 }
 0x11e   : > { %4600 = vmatmul.mubr.msk.f32.vlgmr.msra.gmra.mxu0 %vm287_vm0, %v5054_v18  ;;  %4608 = vmatmul.mubr.msk.f32.vlgmr.msra.gmra.mxu1 %vm287_vm0, %v5054_v18 }
 0x11f   : > { %4614 = vmatpush3.msra.mxu0 %v924_v5  ;;  %4622 = vmatpush3.msra.mxu1 %v925_v6 }
 0x120   : > { %4629 = vmatprep.subr.mxu0 %v926_v8  ;;  %4637 = vmatprep.subr.mxu1 %v927_v9 }
 0x121   : > { %4602 = vmatprep.mubr.msk.f32.mxu0 %vm287_vm0, %v5072_v40  ;;  %4610 = vmatprep.mubr.msk.f32.mxu1 %vm287_vm0, %v5072_v40 }
 0x122   : > { %4603 = vmatmul.mubr.msk.f32.gmra.mxu0 %vm287_vm0, %v5080_v27  ;;  %4611 = vmatmul.mubr.msk.f32.gmra.mxu1 %vm287_vm0, %v5080_v27 }
 0x123   : > { %4615 = vmatprep.mubr.msk.f32.mxu0 %vm287_vm0, %v4936_v29  ;;  %4623 = vmatprep.mubr.msk.f32.mxu1 %vm287_vm0, %v4936_v29 }
 0x126   : > { %4616 = vmatmul.mubr.msk.f32.vlgmr.msra.gmra.mxu0 %vm287_vm0, %v5054_v18  ;;  %4624 = vmatmul.mubr.msk.f32.vlgmr.msra.gmra.mxu1 %vm287_vm0, %v5054_v18 }
 0x127   : > { %4630 = vmatpush3.msra.mxu0 %v926_v8  ;;  %4638 = vmatpush3.msra.mxu1 %v927_v9 }
 0x128   : > { %4645 = vmatprep.subr.mxu0 %v1056_v13  ;;  %4653 = vmatprep.subr.mxu1 %v1057_v24 }
 0x129   : > { %4618 = vmatprep.mubr.msk.f32.mxu0 %vm287_vm0, %v5072_v40  ;;  %4626 = vmatprep.mubr.msk.f32.mxu1 %vm287_vm0, %v5072_v40 }
 0x12a   : > { %4619 = vmatmul.mubr.msk.f32.gmra.mxu0 %vm287_vm0, %v5080_v27  ;;  %4627 = vmatmul.mubr.msk.f32.gmra.mxu1 %vm287_vm0, %v5080_v27 }
 0x12b   : > { %4631 = vmatprep.mubr.msk.f32.mxu0 %vm287_vm0, %v4936_v29  ;;  %4639 = vmatprep.mubr.msk.f32.mxu1 %vm287_vm0, %v4936_v29 }
 0x12e   : > { %4632 = vmatmul.mubr.msk.f32.vlgmr.msra.gmra.mxu0 %vm287_vm0, %v5054_v18  ;;  %4640 = vmatmul.mubr.msk.f32.vlgmr.msra.gmra.mxu1 %vm287_vm0, %v5054_v18 }
 0x12f   : > { %4646 = vmatpush3.msra.mxu0 %v1056_v13  ;;  %4654 = vmatpush3.msra.mxu1 %v1057_v24 }
 0x130   : > { %4661 = vmatprep.subr.mxu0 %v1058_v35  ;;  %4669 = vmatprep.subr.mxu1 %v1059_v52 }
 0x131   : > { %4634 = vmatprep.mubr.msk.f32.mxu0 %vm287_vm0, %v5072_v40  ;;  %4642 = vmatprep.mubr.msk.f32.mxu1 %vm287_vm0, %v5072_v40 }
 0x132   : > { %4635 = vmatmul.mubr.msk.f32.gmra.mxu0 %vm287_vm0, %v5080_v27  ;;  %4643 = vmatmul.mubr.msk.f32.gmra.mxu1 %vm287_vm0, %v5080_v27 }
 0x133   : > { %4647 = vmatprep.mubr.msk.f32.mxu0 %vm287_vm0, %v4936_v29  ;;  %4655 = vmatprep.mubr.msk.f32.mxu1 %vm287_vm0, %v4936_v29 }
 0x136   : > { %4648 = vmatmul.mubr.msk.f32.vlgmr.msra.gmra.mxu0 %vm287_vm0, %v5054_v18  ;;  %4656 = vmatmul.mubr.msk.f32.vlgmr.msra.gmra.mxu1 %vm287_vm0, %v5054_v18 }
 0x137   : > { %4662 = vmatpush3.msra.mxu0 %v1058_v35  ;;  %4670 = vmatpush3.msra.mxu1 %v1059_v52 }
 0x138   : > { %4677 = vmatprep.subr.mxu0 %v5119_v14  ;;  %4685 = vmatprep.subr.mxu1 %v5122_v17 }
 0x139   : > { %4650 = vmatprep.mubr.msk.f32.mxu0 %vm287_vm0, %v5072_v40  ;;  %4658 = vmatprep.mubr.msk.f32.mxu1 %vm287_vm0, %v5072_v40 }
 0x13a   : > { %4651 = vmatmul.mubr.msk.f32.gmra.mxu0 %vm287_vm0, %v5080_v27  ;;  %4659 = vmatmul.mubr.msk.f32.gmra.mxu1 %vm287_vm0, %v5080_v27 }
 0x13b   : > { %4663 = vmatprep.mubr.msk.f32.mxu0 %vm287_vm0, %v4936_v29  ;;  %4671 = vmatprep.mubr.msk.f32.mxu1 %vm287_vm0, %v4936_v29 }
 0x13e   : > { %4664 = vmatmul.mubr.msk.f32.vlgmr.msra.gmra.mxu0 %vm287_vm0, %v5054_v18  ;;  %4672 = vmatmul.mubr.msk.f32.vlgmr.msra.gmra.mxu1 %vm287_vm0, %v5054_v18 }
 0x13f   : > { %4678 = vmatpush3.msra.mxu0 %v5119_v14  ;;  %4686 = vmatpush3.msra.mxu1 %v5122_v17 }
 0x140   : > { %4693 = vmatprep.subr.mxu0 %v5125_v19  ;;  %4701 = vmatprep.subr.mxu1 %v5128_v20 }
 0x141   : > { %4666 = vmatprep.mubr.msk.f32.mxu0 %vm287_vm0, %v5072_v40  ;;  %4674 = vmatprep.mubr.msk.f32.mxu1 %vm287_vm0, %v5072_v40 }
 0x142   : > { %4667 = vmatmul.mubr.msk.f32.gmra.mxu0 %vm287_vm0, %v5080_v27  ;;  %4675 = vmatmul.mubr.msk.f32.gmra.mxu1 %vm287_vm0, %v5080_v27 }
 0x143   : > { %4679 = vmatprep.mubr.msk.f32.mxu0 %vm287_vm0, %v4936_v29  ;;  %4687 = vmatprep.mubr.msk.f32.mxu1 %vm287_vm0, %v4936_v29 }
 0x146   : > { %4680 = vmatmul.mubr.msk.f32.vlgmr.msra.gmra.mxu0 %vm287_vm0, %v5054_v18  ;;  %4688 = vmatmul.mubr.msk.f32.vlgmr.msra.gmra.mxu1 %vm287_vm0, %v5054_v18 }
 0x147   : > { %4694 = vmatpush3.msra.mxu0 %v5125_v19  ;;  %4702 = vmatpush3.msra.mxu1 %v5128_v20 }
 0x148   : > { %4709 = vmatprep.subr.mxu0 %v5131_v22  ;;  %4717 = vmatprep.subr.mxu1 %v5134_v23 }
 0x149   : > { %4682 = vmatprep.mubr.msk.f32.mxu0 %vm287_vm0, %v5072_v40  ;;  %4690 = vmatprep.mubr.msk.f32.mxu1 %vm287_vm0, %v5072_v40 }
 0x14a   : > { %4683 = vmatmul.mubr.msk.f32.gmra.mxu0 %vm287_vm0, %v5080_v27  ;;  %4691 = vmatmul.mubr.msk.f32.gmra.mxu1 %vm287_vm0, %v5080_v27 }
 0x14b   : > { %4695 = vmatprep.mubr.msk.f32.mxu0 %vm287_vm0, %v4936_v29  ;;  %4703 = vmatprep.mubr.msk.f32.mxu1 %vm287_vm0, %v4936_v29 }
 0x14e   : > { %4696 = vmatmul.mubr.msk.f32.vlgmr.msra.gmra.mxu0 %vm287_vm0, %v5054_v18  ;;  %4704 = vmatmul.mubr.msk.f32.vlgmr.msra.gmra.mxu1 %vm287_vm0, %v5054_v18 }
 0x14f   : > { %4710 = vmatpush3.msra.mxu0 %v5131_v22  ;;  %4718 = vmatpush3.msra.mxu1 %v5134_v23 }
 0x150   : > { %4725 = vmatprep.subr.mxu0 %v5149_v34  ;;  %4733 = vmatprep.subr.mxu1 %v5152_v28 }
 0x151   : > { %4698 = vmatprep.mubr.msk.f32.mxu0 %vm287_vm0, %v5072_v40  ;;  %4706 = vmatprep.mubr.msk.f32.mxu1 %vm287_vm0, %v5072_v40 }
 0x152   : > { %4699 = vmatmul.mubr.msk.f32.gmra.mxu0 %vm287_vm0, %v5080_v27  ;;  %4707 = vmatmul.mubr.msk.f32.gmra.mxu1 %vm287_vm0, %v5080_v27 }
 0x153   : > { %4711 = vmatprep.mubr.msk.f32.mxu0 %vm287_vm0, %v4936_v29  ;;  %4719 = vmatprep.mubr.msk.f32.mxu1 %vm287_vm0, %v4936_v29 }
 0x156   : > { %4712 = vmatmul.mubr.msk.f32.vlgmr.msra.gmra.mxu0 %vm287_vm0, %v5054_v18  ;;  %4720 = vmatmul.mubr.msk.f32.vlgmr.msra.gmra.mxu1 %vm287_vm0, %v5054_v18 }
 0x157   : > { %4726 = vmatpush3.msra.mxu0 %v5149_v34  ;;  %4734 = vmatpush3.msra.mxu1 %v5152_v28 }
 0x158   : > { %4741 = vmatprep.subr.mxu0 %v5155_v30  ;;  %4749 = vmatprep.subr.mxu1 %v5162_v31 }
 0x159   : > { %4714 = vmatprep.mubr.msk.f32.mxu0 %vm287_vm0, %v5072_v40  ;;  %4722 = vmatprep.mubr.msk.f32.mxu1 %vm287_vm0, %v5072_v40 }
 0x15a   : > { %4715 = vmatmul.mubr.msk.f32.gmra.mxu0 %vm287_vm0, %v5080_v27  ;;  %4723 = vmatmul.mubr.msk.f32.gmra.mxu1 %vm287_vm0, %v5080_v27 }
 0x15b   : > { %4727 = vmatprep.mubr.msk.f32.mxu0 %vm287_vm0, %v4936_v29  ;;  %4735 = vmatprep.mubr.msk.f32.mxu1 %vm287_vm0, %v4936_v29 }
 0x15e   : > { %4728 = vmatmul.mubr.msk.f32.vlgmr.msra.gmra.mxu0 %vm287_vm0, %v5054_v18  ;;  %4736 = vmatmul.mubr.msk.f32.vlgmr.msra.gmra.mxu1 %vm287_vm0, %v5054_v18 }
 0x15f   : > { %4742 = vmatpush3.msra.mxu0 %v5155_v30  ;;  %4750 = vmatpush3.msra.mxu1 %v5162_v31 }
 0x160   : > { %4757 = vmatprep.subr.mxu0 %v5165_v43  ;;  %4765 = vmatprep.subr.mxu1 %v5168_v51 }
 0x161   : > { %4730 = vmatprep.mubr.msk.f32.mxu0 %vm287_vm0, %v5072_v40  ;;  %4738 = vmatprep.mubr.msk.f32.mxu1 %vm287_vm0, %v5072_v40 }
 0x162   : > { %4731 = vmatmul.mubr.msk.f32.gmra.mxu0 %vm287_vm0, %v5080_v27  ;;  %4739 = vmatmul.mubr.msk.f32.gmra.mxu1 %vm287_vm0, %v5080_v27 }
 0x163   : > { %4743 = vmatprep.mubr.msk.f32.mxu0 %vm287_vm0, %v4936_v29  ;;  %4751 = vmatprep.mubr.msk.f32.mxu1 %vm287_vm0, %v4936_v29 }
 0x166   : > { %4744 = vmatmul.mubr.msk.f32.vlgmr.msra.gmra.mxu0 %vm287_vm0, %v5054_v18  ;;  %4752 = vmatmul.mubr.msk.f32.vlgmr.msra.gmra.mxu1 %vm287_vm0, %v5054_v18 }
 0x167   : > { %4758 = vmatpush3.msra.mxu0 %v5165_v43  ;;  %4766 = vmatpush3.msra.mxu1 %v5168_v51 }
 0x168   : > { %4746 = vmatprep.mubr.msk.f32.mxu0 %vm287_vm0, %v5072_v40  ;;  %4754 = vmatprep.mubr.msk.f32.mxu1 %vm287_vm0, %v5072_v40 }
 0x16a   : > { %4747 = vmatmul.mubr.msk.f32.gmra.mxu0 %vm287_vm0, %v5080_v27  ;;  %4755 = vmatmul.mubr.msk.f32.gmra.mxu1 %vm287_vm0, %v5080_v27 }
 0x16b   : > { %4759 = vmatprep.mubr.msk.f32.mxu0 %vm287_vm0, %v4936_v29  ;;  %4767 = vmatprep.mubr.msk.f32.mxu1 %vm287_vm0, %v4936_v29 }
 0x16e   : > { %4760 = vmatmul.mubr.msk.f32.vlgmr.msra.gmra.mxu0 %vm287_vm0, %v5054_v18  ;;  %4768 = vmatmul.mubr.msk.f32.vlgmr.msra.gmra.mxu1 %vm287_vm0, %v5054_v18 }
 0x16f   : > { %4762 = vmatprep.mubr.msk.f32.mxu0 %vm287_vm0, %v5072_v40  ;;  %4770 = vmatprep.mubr.msk.f32.mxu1 %vm287_vm0, %v5072_v40 }
 0x172   : > { %4763 = vmatmul.mubr.msk.f32.gmra.mxu0 %vm287_vm0, %v5080_v27  ;;  %4771 = vmatmul.mubr.msk.f32.gmra.mxu1 %vm287_vm0, %v5080_v27 }
 0x1b5   : > { %v4521_v29 = vpop.f32.mrf.mxu0  ;;  %v4529_v61 = vpop.f32.mrf.mxu1 }
 0x1b6   : > { %3937 = vst [vmem:[%s5457_s16 + $0x8] sm:$0xff] %v4521_v29  ;;  %3941 = vst [vmem:[%s5457_s16 + $0x28] sm:$0xff] %v4529_v61 }
 0x1b7   : > { %v1282_v18 = vpop.f32.mrf.mxu0  ;;  %v1367_v40 = vpop.f32.mrf.mxu1 }
 0x1b8   : > { %3936 = vst [vmem:[%s5457_s16] sm:$0xff] %v1282_v18  ;;  %3940 = vst [vmem:[%s5457_s16 + $0x20] sm:$0xff] %v1367_v40 }
 0x1ba   : > { %v4524_v27 = vpop.f32.mrf.mxu0  ;;  %v4532_v14 = vpop.f32.mrf.mxu1 }
 0x1bb   : > { %3939 = vst [vmem:[%s5457_s16 + $0x18] sm:$0xff] %v4524_v27  ;;  %3943 = vst [vmem:[%s5457_s16 + $0x38] sm:$0xff] %v4532_v14 }
 0x1bc   : > { %v1292_v17 = vpop.f32.mrf.mxu0  ;;  %v1377_v19 = vpop.f32.mrf.mxu1 }
 0x1bd   : > { %3938 = vst [vmem:[%s5457_s16 + $0x10] sm:$0xff] %v1292_v17  ;;  %3942 = vst [vmem:[%s5457_s16 + $0x30] sm:$0xff] %v1377_v19 }
 0x1be   : > { %v4537_v20 = vpop.f32.mrf.mxu0  ;;  %v4545_v22 = vpop.f32.mrf.mxu1 }
 0x1bf   : > { %3945 = vst [vmem:[%s5457_s16 + $0x48] sm:$0xff] %v4537_v20  ;;  %3949 = vst [vmem:[%s5457_s16 + $0x68] sm:$0xff] %v4545_v22 }
 0x1c0   : > { %v1452_v23 = vpop.f32.mrf.mxu0  ;;  %v1537_v34 = vpop.f32.mrf.mxu1 }
 0x1c1   : > { %3944 = vst [vmem:[%s5457_s16 + $0x40] sm:$0xff] %v1452_v23  ;;  %3948 = vst [vmem:[%s5457_s16 + $0x60] sm:$0xff] %v1537_v34 }
 0x1c2   : > { %v4540_v28 = vpop.f32.mrf.mxu0  ;;  %v4548_v30 = vpop.f32.mrf.mxu1 }
 0x1c3   : > { %3947 = vst [vmem:[%s5457_s16 + $0x58] sm:$0xff] %v4540_v28  ;;  %3951 = vst [vmem:[%s5457_s16 + $0x78] sm:$0xff] %v4548_v30 }
 0x1c4   : > { %v1462_v31 = vpop.f32.mrf.mxu0  ;;  %v1547_v43 = vpop.f32.mrf.mxu1 }
 0x1c5   : > { %3946 = vst [vmem:[%s5457_s16 + $0x50] sm:$0xff] %v1462_v31  ;;  %3950 = vst [vmem:[%s5457_s16 + $0x70] sm:$0xff] %v1547_v43 }
 0x1c6   : > { %v4553_v51 = vpop.f32.mrf.mxu0  ;;  %v4561_v56 = vpop.f32.mrf.mxu1 }
 0x1c7   : > { %3953 = vst [vmem:[%s5457_s16 + $0x88] sm:$0xff] %v4553_v51  ;;  %3957 = vst [vmem:[%s5457_s16 + $0xa8] sm:$0xff] %v4561_v56 }
 0x1c8   : > { %v1622_v57 = vpop.f32.mrf.mxu0  ;;  %v1707_v36 = vpop.f32.mrf.mxu1 }
 0x1c9   : > { %3952 = vst [vmem:[%s5457_s16 + $0x80] sm:$0xff] %v1622_v57  ;;  %3956 = vst [vmem:[%s5457_s16 + $0xa0] sm:$0xff] %v1707_v36 }
 0x1ca   : > { %v4556_v39 = vpop.f32.mrf.mxu0  ;;  %v4564_v59 = vpop.f32.mrf.mxu1 }
 0x1cb   : > { %3955 = vst [vmem:[%s5457_s16 + $0x98] sm:$0xff] %v4556_v39  ;;  %3959 = vst [vmem:[%s5457_s16 + $0xb8] sm:$0xff] %v4564_v59 }
 0x1cc   : > { %v1632_v21 = vpop.f32.mrf.mxu0  ;;  %v1717_v26 = vpop.f32.mrf.mxu1 }
 0x1cd   : > { %3954 = vst [vmem:[%s5457_s16 + $0x90] sm:$0xff] %v1632_v21  ;;  %3958 = vst [vmem:[%s5457_s16 + $0xb0] sm:$0xff] %v1717_v26 }
 0x1ce   : > { %v4569_v32 = vpop.f32.mrf.mxu0  ;;  %v4577_v33 = vpop.f32.mrf.mxu1 }
 0x1cf   : > { %3961 = vst [vmem:[%s5457_s16 + $0xc8] sm:$0xff] %v4569_v32  ;;  %3965 = vst [vmem:[%s5457_s16 + $0xe8] sm:$0xff] %v4577_v33 }
 0x1d0   : > { %v1792_v41 = vpop.f32.mrf.mxu0  ;;  %v1877_v37 = vpop.f32.mrf.mxu1 }
 0x1d1   : > { %3960 = vst [vmem:[%s5457_s16 + $0xc0] sm:$0xff] %v1792_v41  ;;  %3964 = vst [vmem:[%s5457_s16 + $0xe0] sm:$0xff] %v1877_v37 }
 0x1d2   : > { %v4572_v38 = vpop.f32.mrf.mxu0  ;;  %v4580_v42 = vpop.f32.mrf.mxu1 }
 0x1d3   : > { %3963 = vst [vmem:[%s5457_s16 + $0xd8] sm:$0xff] %v4572_v38  ;;  %3967 = vst [vmem:[%s5457_s16 + $0xf8] sm:$0xff] %v4580_v42 }
 0x1d4   : > { %v1802_v54 = vpop.f32.mrf.mxu0  ;;  %v1887_v48 = vpop.f32.mrf.mxu1 }
 0x1d5   : > { %3962 = vst [vmem:[%s5457_s16 + $0xd0] sm:$0xff] %v1802_v54  ;;  %3966 = vst [vmem:[%s5457_s16 + $0xf0] sm:$0xff] %v1887_v48 }
 0x1d6   : > { %v4585_v60 = vpop.f32.mrf.mxu0  ;;  %v4593_v62 = vpop.f32.mrf.mxu1 }
 0x1d7   : > { %3969 = vst [vmem:[%s5457_s16 + $0x108] sm:$0xff] %v4585_v60  ;;  %3973 = vst [vmem:[%s5457_s16 + $0x128] sm:$0xff] %v4593_v62 }
 0x1d8   : > { %v1962_v63 = vpop.f32.mrf.mxu0  ;;  %v2047_v0 = vpop.f32.mrf.mxu1 }
 0x1d9   : > { %3968 = vst [vmem:[%s5457_s16 + $0x100] sm:$0xff] %v1962_v63  ;;  %3972 = vst [vmem:[%s5457_s16 + $0x120] sm:$0xff] %v2047_v0 }
 0x1da   : > { %v4588_v1 = vpop.f32.mrf.mxu0  ;;  %v4596_v2 = vpop.f32.mrf.mxu1 }
 0x1db   : > { %3971 = vst [vmem:[%s5457_s16 + $0x118] sm:$0xff] %v4588_v1  ;;  %3975 = vst [vmem:[%s5457_s16 + $0x138] sm:$0xff] %v4596_v2 }
 0x1dc   : > { %v1972_v3 = vpop.f32.mrf.mxu0  ;;  %v2057_v5 = vpop.f32.mrf.mxu1 }
 0x1dd   : > { %3970 = vst [vmem:[%s5457_s16 + $0x110] sm:$0xff] %v1972_v3  ;;  %3974 = vst [vmem:[%s5457_s16 + $0x130] sm:$0xff] %v2057_v5 }
 0x1de   : > { %v4601_v6 = vpop.f32.mrf.mxu0  ;;  %v4609_v7 = vpop.f32.mrf.mxu1 }
 0x1df   : > { %3977 = vst [vmem:[%s5457_s16 + $0x148] sm:$0xff] %v4601_v6  ;;  %3981 = vst [vmem:[%s5457_s16 + $0x168] sm:$0xff] %v4609_v7 }
 0x1e0   : > { %v2132_v4 = vpop.f32.mrf.mxu0  ;;  %v2217_v44 = vpop.f32.mrf.mxu1 }
 0x1e1   : > { %3976 = vst [vmem:[%s5457_s16 + $0x140] sm:$0xff] %v2132_v4  ;;  %3980 = vst [vmem:[%s5457_s16 + $0x160] sm:$0xff] %v2217_v44 }
 0x1e2   : > { %v4604_v53 = vpop.f32.mrf.mxu0  ;;  %v4612_v55 = vpop.f32.mrf.mxu1 }
 0x1e3   : > { %3979 = vst [vmem:[%s5457_s16 + $0x158] sm:$0xff] %v4604_v53  ;;  %3983 = vst [vmem:[%s5457_s16 + $0x178] sm:$0xff] %v4612_v55 }
 0x1e4   : > { %v2142_v49 = vpop.f32.mrf.mxu0  ;;  %v2227_v45 = vpop.f32.mrf.mxu1 }
 0x1e5   : > { %3978 = vst [vmem:[%s5457_s16 + $0x150] sm:$0xff] %v2142_v49  ;;  %3982 = vst [vmem:[%s5457_s16 + $0x170] sm:$0xff] %v2227_v45 }
 0x1e6   : > { %v4617_v46 = vpop.f32.mrf.mxu0  ;;  %v4625_v50 = vpop.f32.mrf.mxu1 }
 0x1e7   : > { %3985 = vst [vmem:[%s5457_s16 + $0x188] sm:$0xff] %v4617_v46  ;;  %3989 = vst [vmem:[%s5457_s16 + $0x1a8] sm:$0xff] %v4625_v50 }
 0x1e8   : > { %v2302_v58 = vpop.f32.mrf.mxu0  ;;  %v2387_v8 = vpop.f32.mrf.mxu1 }
 0x1e9   : > { %3984 = vst [vmem:[%s5457_s16 + $0x180] sm:$0xff] %v2302_v58  ;;  %3988 = vst [vmem:[%s5457_s16 + $0x1a0] sm:$0xff] %v2387_v8 }
 0x1ea   : > { %v4620_v9 = vpop.f32.mrf.mxu0  ;;  %v4628_v10 = vpop.f32.mrf.mxu1 }
 0x1eb   : > { %3987 = vst [vmem:[%s5457_s16 + $0x198] sm:$0xff] %v4620_v9  ;;  %3991 = vst [vmem:[%s5457_s16 + $0x1b8] sm:$0xff] %v4628_v10 }
 0x1ec   : > { %v2312_v47 = vpop.f32.mrf.mxu0  ;;  %v2397_v11 = vpop.f32.mrf.mxu1 }
 0x1ed   : > { %3986 = vst [vmem:[%s5457_s16 + $0x190] sm:$0xff] %v2312_v47  ;;  %3990 = vst [vmem:[%s5457_s16 + $0x1b0] sm:$0xff] %v2397_v11 }
 0x1ee   : > { %v4633_v12 = vpop.f32.mrf.mxu0  ;;  %v4641_v13 = vpop.f32.mrf.mxu1 }
 0x1ef   : > { %3993 = vst [vmem:[%s5457_s16 + $0x1c8] sm:$0xff] %v4633_v12  ;;  %3997 = vst [vmem:[%s5457_s16 + $0x1e8] sm:$0xff] %v4641_v13 }
 0x1f0   : > { %v2472_v24 = vpop.f32.mrf.mxu0  ;;  %v2557_v15 = vpop.f32.mrf.mxu1 }
 0x1f1   : > { %3992 = vst [vmem:[%s5457_s16 + $0x1c0] sm:$0xff] %v2472_v24  ;;  %3996 = vst [vmem:[%s5457_s16 + $0x1e0] sm:$0xff] %v2557_v15 }
 0x1f2   : > { %v4636_v25 = vpop.f32.mrf.mxu0  ;;  %v4644_v16 = vpop.f32.mrf.mxu1 }
 0x1f3   : > { %3995 = vst [vmem:[%s5457_s16 + $0x1d8] sm:$0xff] %v4636_v25  ;;  %3999 = vst [vmem:[%s5457_s16 + $0x1f8] sm:$0xff] %v4644_v16 }
 0x1f4   : > { %v2482_v35 = vpop.f32.mrf.mxu0  ;;  %v2567_v52 = vpop.f32.mrf.mxu1 }
 0x1f5   : > { %3994 = vst [vmem:[%s5457_s16 + $0x1d0] sm:$0xff] %v2482_v35  ;;  %3998 = vst [vmem:[%s5457_s16 + $0x1f0] sm:$0xff] %v2567_v52 }
 0x1f6   : > { %v4649_v29 = vpop.f32.mrf.mxu0  ;;  %v4657_v61 = vpop.f32.mrf.mxu1 }
 0x1f7   : > { %4001 = vst [vmem:[%s5457_s16 + $0x208] sm:$0xff] %v4649_v29  ;;  %4005 = vst [vmem:[%s5457_s16 + $0x228] sm:$0xff] %v4657_v61 }
 0x1f8   : > { %v2642_v18 = vpop.f32.mrf.mxu0  ;;  %v2727_v40 = vpop.f32.mrf.mxu1 }
 0x1f9   : > { %4000 = vst [vmem:[%s5457_s16 + $0x200] sm:$0xff] %v2642_v18  ;;  %4004 = vst [vmem:[%s5457_s16 + $0x220] sm:$0xff] %v2727_v40 }
 0x1fa   : > { %v4652_v27 = vpop.f32.mrf.mxu0  ;;  %v4660_v14 = vpop.f32.mrf.mxu1 }
 0x1fb   : > { %4003 = vst [vmem:[%s5457_s16 + $0x218] sm:$0xff] %v4652_v27  ;;  %4007 = vst [vmem:[%s5457_s16 + $0x238] sm:$0xff] %v4660_v14 }
 0x1fc   : > { %v2652_v17 = vpop.f32.mrf.mxu0  ;;  %v2737_v19 = vpop.f32.mrf.mxu1 }
 0x1fd   : > { %4002 = vst [vmem:[%s5457_s16 + $0x210] sm:$0xff] %v2652_v17  ;;  %4006 = vst [vmem:[%s5457_s16 + $0x230] sm:$0xff] %v2737_v19 }
 0x1fe   : > { %v4665_v20 = vpop.f32.mrf.mxu0  ;;  %v4673_v22 = vpop.f32.mrf.mxu1 }
 0x1ff   : > { %4009 = vst [vmem:[%s5457_s16 + $0x248] sm:$0xff] %v4665_v20  ;;  %4013 = vst [vmem:[%s5457_s16 + $0x268] sm:$0xff] %v4673_v22 }
 0x200   : > { %v2812_v23 = vpop.f32.mrf.mxu0  ;;  %v2897_v34 = vpop.f32.mrf.mxu1 }
 0x201   : > { %4008 = vst [vmem:[%s5457_s16 + $0x240] sm:$0xff] %v2812_v23  ;;  %4012 = vst [vmem:[%s5457_s16 + $0x260] sm:$0xff] %v2897_v34 }
 0x202   : > { %v4668_v28 = vpop.f32.mrf.mxu0  ;;  %v4676_v30 = vpop.f32.mrf.mxu1 }
 0x203   : > { %4011 = vst [vmem:[%s5457_s16 + $0x258] sm:$0xff] %v4668_v28  ;;  %4015 = vst [vmem:[%s5457_s16 + $0x278] sm:$0xff] %v4676_v30 }
 0x204   : > { %v2822_v31 = vpop.f32.mrf.mxu0  ;;  %v2907_v43 = vpop.f32.mrf.mxu1 }
 0x205   : > { %4010 = vst [vmem:[%s5457_s16 + $0x250] sm:$0xff] %v2822_v31  ;;  %4014 = vst [vmem:[%s5457_s16 + $0x270] sm:$0xff] %v2907_v43 }
 0x206   : > { %v4681_v51 = vpop.f32.mrf.mxu0  ;;  %v4689_v56 = vpop.f32.mrf.mxu1 }
 0x207   : > { %4017 = vst [vmem:[%s5457_s16 + $0x288] sm:$0xff] %v4681_v51  ;;  %4021 = vst [vmem:[%s5457_s16 + $0x2a8] sm:$0xff] %v4689_v56 }
 0x208   : > { %v2982_v57 = vpop.f32.mrf.mxu0  ;;  %v3067_v36 = vpop.f32.mrf.mxu1 }
 0x209   : > { %4016 = vst [vmem:[%s5457_s16 + $0x280] sm:$0xff] %v2982_v57  ;;  %4020 = vst [vmem:[%s5457_s16 + $0x2a0] sm:$0xff] %v3067_v36 }
 0x20a   : > { %v4684_v39 = vpop.f32.mrf.mxu0  ;;  %v4692_v59 = vpop.f32.mrf.mxu1 }
 0x20b   : > { %4019 = vst [vmem:[%s5457_s16 + $0x298] sm:$0xff] %v4684_v39  ;;  %4023 = vst [vmem:[%s5457_s16 + $0x2b8] sm:$0xff] %v4692_v59 }
 0x20c   : > { %v2992_v21 = vpop.f32.mrf.mxu0  ;;  %v3077_v26 = vpop.f32.mrf.mxu1 }
 0x20d   : > { %4018 = vst [vmem:[%s5457_s16 + $0x290] sm:$0xff] %v2992_v21  ;;  %4022 = vst [vmem:[%s5457_s16 + $0x2b0] sm:$0xff] %v3077_v26 }
 0x20e   : > { %v4697_v32 = vpop.f32.mrf.mxu0  ;;  %v4705_v33 = vpop.f32.mrf.mxu1 }
 0x20f   : > { %4025 = vst [vmem:[%s5457_s16 + $0x2c8] sm:$0xff] %v4697_v32  ;;  %4029 = vst [vmem:[%s5457_s16 + $0x2e8] sm:$0xff] %v4705_v33 }
 0x210   : > { %v3152_v41 = vpop.f32.mrf.mxu0  ;;  %v3237_v37 = vpop.f32.mrf.mxu1 }
 0x211   : > { %4024 = vst [vmem:[%s5457_s16 + $0x2c0] sm:$0xff] %v3152_v41  ;;  %4028 = vst [vmem:[%s5457_s16 + $0x2e0] sm:$0xff] %v3237_v37 }
 0x212   : > { %v4700_v38 = vpop.f32.mrf.mxu0  ;;  %v4708_v42 = vpop.f32.mrf.mxu1 }
 0x213   : > { %4027 = vst [vmem:[%s5457_s16 + $0x2d8] sm:$0xff] %v4700_v38  ;;  %4031 = vst [vmem:[%s5457_s16 + $0x2f8] sm:$0xff] %v4708_v42 }
 0x214   : > { %v3162_v54 = vpop.f32.mrf.mxu0  ;;  %v3247_v48 = vpop.f32.mrf.mxu1 }
 0x215   : > { %4026 = vst [vmem:[%s5457_s16 + $0x2d0] sm:$0xff] %v3162_v54  ;;  %4030 = vst [vmem:[%s5457_s16 + $0x2f0] sm:$0xff] %v3247_v48 }
 0x216   : > { %v4713_v60 = vpop.f32.mrf.mxu0  ;;  %v4721_v62 = vpop.f32.mrf.mxu1 }
 0x217   : > { %4033 = vst [vmem:[%s5457_s16 + $0x308] sm:$0xff] %v4713_v60  ;;  %4037 = vst [vmem:[%s5457_s16 + $0x328] sm:$0xff] %v4721_v62 }
 0x218   : > { %v3322_v63 = vpop.f32.mrf.mxu0  ;;  %v3407_v0 = vpop.f32.mrf.mxu1 }
 0x219   : > { %4032 = vst [vmem:[%s5457_s16 + $0x300] sm:$0xff] %v3322_v63  ;;  %4036 = vst [vmem:[%s5457_s16 + $0x320] sm:$0xff] %v3407_v0 }
 0x21a   : > { %v4716_v1 = vpop.f32.mrf.mxu0  ;;  %v4724_v2 = vpop.f32.mrf.mxu1 }
 0x21b   : > { %4035 = vst [vmem:[%s5457_s16 + $0x318] sm:$0xff] %v4716_v1  ;;  %4039 = vst [vmem:[%s5457_s16 + $0x338] sm:$0xff] %v4724_v2 }
 0x21c   : > { %v3332_v3 = vpop.f32.mrf.mxu0  ;;  %v3417_v5 = vpop.f32.mrf.mxu1 }
 0x21d   : > { %4034 = vst [vmem:[%s5457_s16 + $0x310] sm:$0xff] %v3332_v3  ;;  %4038 = vst [vmem:[%s5457_s16 + $0x330] sm:$0xff] %v3417_v5 }
 0x21e   : > { %v4729_v6 = vpop.f32.mrf.mxu0  ;;  %v4737_v7 = vpop.f32.mrf.mxu1 }
 0x21f   : > { %4041 = vst [vmem:[%s5457_s16 + $0x348] sm:$0xff] %v4729_v6  ;;  %4045 = vst [vmem:[%s5457_s16 + $0x368] sm:$0xff] %v4737_v7 }
 0x220   : > { %v3492_v4 = vpop.f32.mrf.mxu0  ;;  %v3577_v44 = vpop.f32.mrf.mxu1 }
 0x221   : > { %4040 = vst [vmem:[%s5457_s16 + $0x340] sm:$0xff] %v3492_v4  ;;  %4044 = vst [vmem:[%s5457_s16 + $0x360] sm:$0xff] %v3577_v44 }
 0x222   : > { %v4732_v53 = vpop.f32.mrf.mxu0  ;;  %v4740_v55 = vpop.f32.mrf.mxu1 }
 0x223   : > { %4043 = vst [vmem:[%s5457_s16 + $0x358] sm:$0xff] %v4732_v53  ;;  %4047 = vst [vmem:[%s5457_s16 + $0x378] sm:$0xff] %v4740_v55 }
 0x224   : > { %v3502_v49 = vpop.f32.mrf.mxu0  ;;  %v3587_v45 = vpop.f32.mrf.mxu1 }
 0x225   : > { %4042 = vst [vmem:[%s5457_s16 + $0x350] sm:$0xff] %v3502_v49  ;;  %4046 = vst [vmem:[%s5457_s16 + $0x370] sm:$0xff] %v3587_v45 }
 0x226   : > { %v4745_v46 = vpop.f32.mrf.mxu0  ;;  %v4753_v50 = vpop.f32.mrf.mxu1 }
 0x227   : > { %4049 = vst [vmem:[%s5457_s16 + $0x388] sm:$0xff] %v4745_v46  ;;  %4053 = vst [vmem:[%s5457_s16 + $0x3a8] sm:$0xff] %v4753_v50 }
 0x228   : > { %v3662_v58 = vpop.f32.mrf.mxu0  ;;  %v3747_v8 = vpop.f32.mrf.mxu1 }
 0x229   : > { %4048 = vst [vmem:[%s5457_s16 + $0x380] sm:$0xff] %v3662_v58  ;;  %4052 = vst [vmem:[%s5457_s16 + $0x3a0] sm:$0xff] %v3747_v8 }
 0x22a   : > { %v4748_v9 = vpop.f32.mrf.mxu0  ;;  %v4756_v10 = vpop.f32.mrf.mxu1 }
 0x22b   : > { %4051 = vst [vmem:[%s5457_s16 + $0x398] sm:$0xff] %v4748_v9  ;;  %4055 = vst [vmem:[%s5457_s16 + $0x3b8] sm:$0xff] %v4756_v10 }
 0x22c   : > { %v3672_v47 = vpop.f32.mrf.mxu0  ;;  %v3757_v11 = vpop.f32.mrf.mxu1 }
 0x22d   : > { %4050 = vst [vmem:[%s5457_s16 + $0x390] sm:$0xff] %v3672_v47  ;;  %4054 = vst [vmem:[%s5457_s16 + $0x3b0] sm:$0xff] %v3757_v11 }
 0x22e   : > { %v4761_v12 = vpop.f32.mrf.mxu0  ;;  %v4769_v13 = vpop.f32.mrf.mxu1 }
 0x22f   : > { %4057 = vst [vmem:[%s5457_s16 + $0x3c8] sm:$0xff] %v4761_v12  ;;  %4061 = vst [vmem:[%s5457_s16 + $0x3e8] sm:$0xff] %v4769_v13 }
 0x230   : > { %v3832_v24 = vpop.f32.mrf.mxu0  ;;  %v3917_v15 = vpop.f32.mrf.mxu1 }
 0x231   : > { %4056 = vst [vmem:[%s5457_s16 + $0x3c0] sm:$0xff] %v3832_v24  ;;  %4060 = vst [vmem:[%s5457_s16 + $0x3e0] sm:$0xff] %v3917_v15 }
 0x232   : > { %v4764_v25 = vpop.f32.mrf.mxu0  ;;  %v4772_v16 = vpop.f32.mrf.mxu1 }
 0x233   : > { %4059 = vst [vmem:[%s5457_s16 + $0x3d8] sm:$0xff] %v4764_v25  ;;  %4063 = vst [vmem:[%s5457_s16 + $0x3f8] sm:$0xff] %v4772_v16 }
 0x234   : > { %v3842_v35 = vpop.f32.mrf.mxu0  ;;  %v3927_v52 = vpop.f32.mrf.mxu1 }
 0x235   : > { %4058 = vst [vmem:[%s5457_s16 + $0x3d0] sm:$0xff] %v3842_v35  ;;  %4062 = vst [vmem:[%s5457_s16 + $0x3f0] sm:$0xff] %v3927_v52 }
 0x236 PF: > { %s13_s14 = sadd.s32 1, %s4822_s14   ;;  %s5600_s12 = smov %s4818_s13 }
 0x237   : > { %p10_p5 = scmp.ge.s32.totalorder %s13_s14, 4   ;;  %s5601_s13 = smov %s5603_s15 }
 0x239   :  { %12 = sbr.rel (!%p10_p5) target bundleno = 2 (0x2), region = 72 }

</bundles_post_ra>
